<compile_context>
chip_gen: v5e
topology: v5e:2x2
jax: 0.10.0
libtpu: 0.0.40
codegen_flags: <defaults>
</compile_context>

<pallas_src>
import jax
import jax.numpy as jnp
from jax.experimental import pallas as pl
from jax.experimental.pallas import tpu as pltpu

# Layer widths of the autoencoder (encoder then decoder).
DIMS = [784, 512, 256, 128, 64, 32, 16, 32, 64, 128, 256, 512, 784]
N_LAYERS = len(DIMS) - 1  # 12 Linear+ReLU layers

LANE = 128
SUBLANE = 8


def _round_up(x, m):
    return (x + m - 1) // m * m


# Feature dims as seen by the kernel.  Middle dims are zero-padded to whole
# 128-lane vregs (exact: padded rows/cols/bias are zero and ReLU(0)=0).  The
# first/last dims stay at 784 so the kernel reads x and writes the output
# directly without any host-side pad / slice copies.
PDIMS = [DIMS[0]] + [_round_up(d, LANE) for d in DIMS[1:-1]] + [DIMS[-1]]


def _epilogue_dtype():
    """bf16 epilogue / inter-layer activations on chips with a bf16 VPU
    (v6e, v7x); f32 on v5e and older (no bf16 VALU there)."""
    kind = jax.devices()[0].device_kind.lower()
    if any(v in kind for v in ("v2", "v3", "v4", "v5")):
        return jnp.float32
    return jnp.bfloat16


def _make_kernel(ep_dtype, batch_tile):
    half = batch_tile // 2  # batch_tile is a multiple of 16 -> half is sublane aligned

    def kernel(x_ref, *refs):
        """refs = (w0, b0, ..., w11, b11, out_ref).
        w_k: bf16 [in_p, out_p] (pre-transposed, zero-padded)
        b_k: ep_dtype [1, out_p] (f32 for the last layer)."""
        out_ref = refs[-1]
        params = refs[:-1]

        # Two independent row sub-blocks: the bias/ReLU (VPU) epilogue of one
        # overlaps the matmul (MXU) of the other.
        subs = [x_ref[0:half, :], x_ref[half:batch_tile, :]]
        for layer in range(N_LAYERS):
            w = params[2 * layer][...]
            b = params[2 * layer + 1][...]
            last = layer == N_LAYERS - 1
            nxt = []
            for h in subs:
                acc = jnp.dot(h.astype(jnp.bfloat16), w,
                              preferred_element_type=jnp.float32)
                if last:
                    nxt.append(jnp.maximum(acc + b, 0.0))                # f32 epilogue
                else:
                    nxt.append(jnp.maximum(acc.astype(ep_dtype) + b, 0.0))
            subs = nxt

        out_ref[0:half, :] = subs[0].astype(out_ref.dtype)
        out_ref[half:batch_tile, :] = subs[1].astype(out_ref.dtype)

    return kernel


def _pick_batch_tile(B, max_tile=512, min_tiles=2):
    """Near-balanced tiles, >=2 grid steps (v7x megacore), multiple of 16 rows."""
    n_tiles = max(min_tiles, pl.cdiv(B, max_tile))
    tile = _round_up(max(pl.cdiv(B, n_tiles), 1), 16)
    return min(tile, max_tile)


def _build_ae_call(B, batch_tile, param_shapes, ep_dtype):
    grid = (pl.cdiv(B, batch_tile),)

    in_specs = [pl.BlockSpec((batch_tile, DIMS[0]), lambda i: (i, 0))]
    for w_shape, b_shape in param_shapes:
        # Grid-invariant, full-array blocks: Pallas keeps them resident in VMEM
        # and does not re-DMA them across grid steps.
        in_specs.append(pl.BlockSpec(w_shape, lambda i: (0, 0)))
        in_specs.append(pl.BlockSpec(b_shape, lambda i: (0, 0)))
    out_specs = pl.BlockSpec((batch_tile, DIMS[-1]), lambda i: (i, 0))

    flops = 2 * B * sum(PDIMS[l] * PDIMS[l + 1] for l in range(N_LAYERS))
    param_bytes = sum(PDIMS[l] * PDIMS[l + 1] * 2 + PDIMS[l + 1] * 4
                      for l in range(N_LAYERS))
    bytes_accessed = B * DIMS[0] * 4 + B * DIMS[-1] * 4 + param_bytes

    return pl.pallas_call(
        _make_kernel(ep_dtype, batch_tile),
        out_shape=jax.ShapeDtypeStruct((B, DIMS[-1]), jnp.float32),
        grid_spec=pltpu.PrefetchScalarGridSpec(
            num_scalar_prefetch=0,
            grid=grid,
            in_specs=in_specs,
            out_specs=out_specs,
        ),
        compiler_params=pltpu.CompilerParams(
            # Batch tiles are independent -> shards across v7x's 2 TensorCores.
            dimension_semantics=("parallel",),
            # Explicit scoped-VMEM limit: fits v5e/v6e/v7x (peak usage ~18 MiB).
            vmem_limit_bytes=32 * 1024 * 1024,
        ),
        cost_estimate=pl.CostEstimate(
            flops=flops, transcendentals=0, bytes_accessed=bytes_accessed),
    )


def prepare_params(params, ep_dtype):
    """Convert nn.Linear-layout params [(W[out,in] f32, b[out] f32), ...] into
    the kernel layout: W^T zero-padded to [in_p, out_p] bf16; b zero-padded to
    [1, out_p] in the epilogue dtype (f32 for the last layer)."""
    # TODO(synk): optional int8 weights for the two 784<->512 layers on v5e
    # (int MXU path) left out to keep the AE's f32/bf16 numerics everywhere.
    prepped = []
    for layer, (w, b) in enumerate(params):
        fan_in, fan_out = DIMS[layer], DIMS[layer + 1]
        assert w.shape == (fan_out, fan_in) and b.shape == (fan_out,)
        in_p, out_p = PDIMS[layer], PDIMS[layer + 1]
        wt = (jnp.zeros((in_p, out_p), jnp.float32)
              .at[:fan_in, :fan_out].set(w.T).astype(jnp.bfloat16))
        b_dtype = jnp.float32 if layer == N_LAYERS - 1 else ep_dtype
        bp = (jnp.zeros((1, out_p), jnp.float32)
              .at[0, :fan_out].set(b).astype(b_dtype))
        prepped.append((wt, bp))
    return prepped


def ae_forward(x, params, max_batch_tile=512):
    """Forward pass of AE.  x: [B, 784] f32; params: 12 (W[out,in], b[out]) f32 pairs."""
    B, d_in = x.shape
    assert d_in == DIMS[0]

    ep_dtype = _epilogue_dtype()
    prepped = prepare_params(params, ep_dtype)
    flat_params = [a for pair in prepped for a in pair]
    param_shapes = [(w.shape, b.shape) for w, b in prepped]

    batch_tile = _pick_batch_tile(B, max_batch_tile)
    fwd = _build_ae_call(B, batch_tile, param_shapes, ep_dtype)
    return fwd(x, *flat_params)


def init_params(key):
    """Deterministic init mirroring nn.Linear: W[out,in], b[out] ~ U(+-1/sqrt(fan_in))."""
    params = []
    for layer in range(N_LAYERS):
        fan_in, fan_out = DIMS[layer], DIMS[layer + 1]
        key, kw, kb = jax.random.split(key, 3)
        bound = 1.0 / (fan_in ** 0.5)
        w = jax.random.uniform(kw, (fan_out, fan_in), jnp.float32, -bound, bound)
        b = jax.random.uniform(kb, (fan_out,), jnp.float32, -bound, bound)
        params.append((w, b))
    return params


def ae_forward_reference(x, params, ep_dtype):
    """Pure-JAX reference mirroring the kernel numerics (bf16 matmul operands,
    f32 accumulation, ep_dtype bias/ReLU epilogue, f32 final layer)."""
    h = x
    for layer, (w, b) in enumerate(params):
        acc = jnp.dot(h.astype(jnp.bfloat16), w.T.astype(jnp.bfloat16),
                      preferred_element_type=jnp.float32)
        if layer == N_LAYERS - 1:
            h = jnp.maximum(acc + b, 0.0)
        else:
            h = jnp.maximum(acc.astype(ep_dtype) + b.astype(ep_dtype), 0.0)
    return h.astype(jnp.float32)


if __name__ == "__main__":
    key = jax.random.PRNGKey(0)
    key, kx = jax.random.split(key)

    # Ragged batch on purpose: adaptive tiling gives 2 tiles of 64 rows
    # (exercises the >=2-step parallel grid and partial-block batch handling).
    B = 100
    x = jax.random.uniform(kx, (B, DIMS[0]), jnp.float32)
    params = init_params(key)

    out = jax.jit(ae_forward)(x, params)
    out = jax.block_until_ready(out)
    assert out.shape == (B, DIMS[-1])

    ep = _epilogue_dtype()
    ref = ae_forward_reference(x, params, ep)
    max_err = float(jnp.max(jnp.abs(out - ref)))
    assert jnp.allclose(out, ref, atol=1e-3, rtol=1e-2), max_err

    print("KERNEL_OK")
</pallas_src>

<mosaic_0001>
module attributes {stable_mosaic.version = 11 : i64} {
  func.func @kernel(%arg0: i32, %arg1: memref<64x784xf32, #tpu.memory_space<vmem>>, %arg2: memref<784x512xbf16, #tpu.memory_space<vmem>>, %arg3: memref<1x512xbf16, #tpu.memory_space<vmem>>, %arg4: memref<512x256xbf16, #tpu.memory_space<vmem>>, %arg5: memref<1x256xbf16, #tpu.memory_space<vmem>>, %arg6: memref<256x128xbf16, #tpu.memory_space<vmem>>, %arg7: memref<1x128xbf16, #tpu.memory_space<vmem>>, %arg8: memref<128x128xbf16, #tpu.memory_space<vmem>>, %arg9: memref<1x128xbf16, #tpu.memory_space<vmem>>, %arg10: memref<128x128xbf16, #tpu.memory_space<vmem>>, %arg11: memref<1x128xbf16, #tpu.memory_space<vmem>>, %arg12: memref<128x128xbf16, #tpu.memory_space<vmem>>, %arg13: memref<1x128xbf16, #tpu.memory_space<vmem>>, %arg14: memref<128x128xbf16, #tpu.memory_space<vmem>>, %arg15: memref<1x128xbf16, #tpu.memory_space<vmem>>, %arg16: memref<128x128xbf16, #tpu.memory_space<vmem>>, %arg17: memref<1x128xbf16, #tpu.memory_space<vmem>>, %arg18: memref<128x128xbf16, #tpu.memory_space<vmem>>, %arg19: memref<1x128xbf16, #tpu.memory_space<vmem>>, %arg20: memref<128x256xbf16, #tpu.memory_space<vmem>>, %arg21: memref<1x256xbf16, #tpu.memory_space<vmem>>, %arg22: memref<256x512xbf16, #tpu.memory_space<vmem>>, %arg23: memref<1x512xbf16, #tpu.memory_space<vmem>>, %arg24: memref<512x784xbf16, #tpu.memory_space<vmem>>, %arg25: memref<1x784xf32, #tpu.memory_space<vmem>>, %arg26: memref<64x784xf32, #tpu.memory_space<vmem>>) attributes {dimension_semantics = [#tpu.dimension_semantics<parallel>], iteration_bounds = array<i64: 2>, scalar_prefetch = 0 : i64, scratch_operands = 0 : i64, tpu.core_type = #tpu.core_type<tc>, window_params = [{transform_indices = @transform_0, window_bounds = array<i64: 64, 784>}, {pipeline_mode = #tpu.pipeline_mode<synchronous>, transform_indices = @transform_1, window_bounds = array<i64: 784, 512>}, {pipeline_mode = #tpu.pipeline_mode<synchronous>, transform_indices = @transform_2, window_bounds = array<i64: 1, 512>}, {pipeline_mode = #tpu.pipeline_mode<synchronous>, transform_indices = @transform_3, window_bounds = array<i64: 512, 256>}, {pipeline_mode = #tpu.pipeline_mode<synchronous>, transform_indices = @transform_4, window_bounds = array<i64: 1, 256>}, {pipeline_mode = #tpu.pipeline_mode<synchronous>, transform_indices = @transform_5, window_bounds = array<i64: 256, 128>}, {pipeline_mode = #tpu.pipeline_mode<synchronous>, transform_indices = @transform_6, window_bounds = array<i64: 1, 128>}, {pipeline_mode = #tpu.pipeline_mode<synchronous>, transform_indices = @transform_7, window_bounds = array<i64: 128, 128>}, {pipeline_mode = #tpu.pipeline_mode<synchronous>, transform_indices = @transform_8, window_bounds = array<i64: 1, 128>}, {pipeline_mode = #tpu.pipeline_mode<synchronous>, transform_indices = @transform_9, window_bounds = array<i64: 128, 128>}, {pipeline_mode = #tpu.pipeline_mode<synchronous>, transform_indices = @transform_10, window_bounds = array<i64: 1, 128>}, {pipeline_mode = #tpu.pipeline_mode<synchronous>, transform_indices = @transform_11, window_bounds = array<i64: 128, 128>}, {pipeline_mode = #tpu.pipeline_mode<synchronous>, transform_indices = @transform_12, window_bounds = array<i64: 1, 128>}, {pipeline_mode = #tpu.pipeline_mode<synchronous>, transform_indices = @transform_13, window_bounds = array<i64: 128, 128>}, {pipeline_mode = #tpu.pipeline_mode<synchronous>, transform_indices = @transform_14, window_bounds = array<i64: 1, 128>}, {pipeline_mode = #tpu.pipeline_mode<synchronous>, transform_indices = @transform_15, window_bounds = array<i64: 128, 128>}, {pipeline_mode = #tpu.pipeline_mode<synchronous>, transform_indices = @transform_16, window_bounds = array<i64: 1, 128>}, {pipeline_mode = #tpu.pipeline_mode<synchronous>, transform_indices = @transform_17, window_bounds = array<i64: 128, 128>}, {pipeline_mode = #tpu.pipeline_mode<synchronous>, transform_indices = @transform_18, window_bounds = array<i64: 1, 128>}, {pipeline_mode = #tpu.pipeline_mode<synchronous>, transform_indices = @transform_19, window_bounds = array<i64: 128, 256>}, {pipeline_mode = #tpu.pipeline_mode<synchronous>, transform_indices = @transform_20, window_bounds = array<i64: 1, 256>}, {pipeline_mode = #tpu.pipeline_mode<synchronous>, transform_indices = @transform_21, window_bounds = array<i64: 256, 512>}, {pipeline_mode = #tpu.pipeline_mode<synchronous>, transform_indices = @transform_22, window_bounds = array<i64: 1, 512>}, {pipeline_mode = #tpu.pipeline_mode<synchronous>, transform_indices = @transform_23, window_bounds = array<i64: 512, 784>}, {pipeline_mode = #tpu.pipeline_mode<synchronous>, transform_indices = @transform_24, window_bounds = array<i64: 1, 784>}, {transform_indices = @transform_25, window_bounds = array<i64: 64, 784>}]} {
    %c0 = arith.constant 0 : index
    %c0_0 = arith.constant 0 : index
    %0 = vector.load %arg1[%c0, %c0_0] : memref<64x784xf32, #tpu.memory_space<vmem>>, vector<32x784xf32>
    %c32 = arith.constant 32 : index
    %c0_1 = arith.constant 0 : index
    %1 = vector.load %arg1[%c32, %c0_1] : memref<64x784xf32, #tpu.memory_space<vmem>>, vector<32x784xf32>
    %c0_2 = arith.constant 0 : index
    %c0_3 = arith.constant 0 : index
    %2 = vector.load %arg2[%c0_2, %c0_3] : memref<784x512xbf16, #tpu.memory_space<vmem>>, vector<784x512xbf16>
    %c0_4 = arith.constant 0 : index
    %c0_5 = arith.constant 0 : index
    %3 = vector.load %arg3[%c0_4, %c0_5] : memref<1x512xbf16, #tpu.memory_space<vmem>>, vector<1x512xbf16>
    %4 = arith.truncf %0 : vector<32x784xf32> to vector<32x784xbf16>
    %cst = arith.constant dense<0.000000e+00> : vector<32x512xf32>
    %5 = tpu.matmul %4, %2, %cst {dimension_numbers = #tpu.dot_dimension_numbers<[1], [0], [0], [1], [0, 0, 1, 1], [], []>} : vector<32x784xbf16>, vector<784x512xbf16>, vector<32x512xf32> -> vector<32x512xf32>
    %6 = arith.truncf %5 : vector<32x512xf32> to vector<32x512xbf16>
    %7 = vector.broadcast %3 : vector<1x512xbf16> to vector<32x512xbf16>
    %8 = arith.addf %6, %7 : vector<32x512xbf16>
    %cst_6 = arith.constant 0.000000e+00 : bf16
    %9 = vector.broadcast %cst_6 : bf16 to vector<32x512xbf16>
    %10 = arith.maximumf %8, %9 : vector<32x512xbf16>
    %11 = arith.truncf %1 : vector<32x784xf32> to vector<32x784xbf16>
    %cst_7 = arith.constant dense<0.000000e+00> : vector<32x512xf32>
    %12 = tpu.matmul %11, %2, %cst_7 {dimension_numbers = #tpu.dot_dimension_numbers<[1], [0], [0], [1], [0, 0, 1, 1], [], []>} : vector<32x784xbf16>, vector<784x512xbf16>, vector<32x512xf32> -> vector<32x512xf32>
    %13 = arith.truncf %12 : vector<32x512xf32> to vector<32x512xbf16>
    %14 = vector.broadcast %3 : vector<1x512xbf16> to vector<32x512xbf16>
    %15 = arith.addf %13, %14 : vector<32x512xbf16>
    %cst_8 = arith.constant 0.000000e+00 : bf16
    %16 = vector.broadcast %cst_8 : bf16 to vector<32x512xbf16>
    %17 = arith.maximumf %15, %16 : vector<32x512xbf16>
    %c0_9 = arith.constant 0 : index
    %c0_10 = arith.constant 0 : index
    %18 = vector.load %arg4[%c0_9, %c0_10] : memref<512x256xbf16, #tpu.memory_space<vmem>>, vector<512x256xbf16>
    %c0_11 = arith.constant 0 : index
    %c0_12 = arith.constant 0 : index
    %19 = vector.load %arg5[%c0_11, %c0_12] : memref<1x256xbf16, #tpu.memory_space<vmem>>, vector<1x256xbf16>
    %cst_13 = arith.constant dense<0.000000e+00> : vector<32x256xf32>
    %20 = tpu.matmul %10, %18, %cst_13 {dimension_numbers = #tpu.dot_dimension_numbers<[1], [0], [0], [1], [0, 0, 1, 1], [], []>} : vector<32x512xbf16>, vector<512x256xbf16>, vector<32x256xf32> -> vector<32x256xf32>
    %21 = arith.truncf %20 : vector<32x256xf32> to vector<32x256xbf16>
    %22 = vector.broadcast %19 : vector<1x256xbf16> to vector<32x256xbf16>
    %23 = arith.addf %21, %22 : vector<32x256xbf16>
    %cst_14 = arith.constant 0.000000e+00 : bf16
    %24 = vector.broadcast %cst_14 : bf16 to vector<32x256xbf16>
    %25 = arith.maximumf %23, %24 : vector<32x256xbf16>
    %cst_15 = arith.constant dense<0.000000e+00> : vector<32x256xf32>
    %26 = tpu.matmul %17, %18, %cst_15 {dimension_numbers = #tpu.dot_dimension_numbers<[1], [0], [0], [1], [0, 0, 1, 1], [], []>} : vector<32x512xbf16>, vector<512x256xbf16>, vector<32x256xf32> -> vector<32x256xf32>
    %27 = arith.truncf %26 : vector<32x256xf32> to vector<32x256xbf16>
    %28 = vector.broadcast %19 : vector<1x256xbf16> to vector<32x256xbf16>
    %29 = arith.addf %27, %28 : vector<32x256xbf16>
    %cst_16 = arith.constant 0.000000e+00 : bf16
    %30 = vector.broadcast %cst_16 : bf16 to vector<32x256xbf16>
    %31 = arith.maximumf %29, %30 : vector<32x256xbf16>
    %c0_17 = arith.constant 0 : index
    %c0_18 = arith.constant 0 : index
    %32 = vector.load %arg6[%c0_17, %c0_18] : memref<256x128xbf16, #tpu.memory_space<vmem>>, vector<256x128xbf16>
    %c0_19 = arith.constant 0 : index
    %c0_20 = arith.constant 0 : index
    %33 = vector.load %arg7[%c0_19, %c0_20] : memref<1x128xbf16, #tpu.memory_space<vmem>>, vector<1x128xbf16>
    %cst_21 = arith.constant dense<0.000000e+00> : vector<32x128xf32>
    %34 = tpu.matmul %25, %32, %cst_21 {dimension_numbers = #tpu.dot_dimension_numbers<[1], [0], [0], [1], [0, 0, 1, 1], [], []>} : vector<32x256xbf16>, vector<256x128xbf16>, vector<32x128xf32> -> vector<32x128xf32>
    %35 = arith.truncf %34 : vector<32x128xf32> to vector<32x128xbf16>
    %36 = vector.broadcast %33 : vector<1x128xbf16> to vector<32x128xbf16>
    %37 = arith.addf %35, %36 : vector<32x128xbf16>
    %cst_22 = arith.constant 0.000000e+00 : bf16
    %38 = vector.broadcast %cst_22 : bf16 to vector<32x128xbf16>
    %39 = arith.maximumf %37, %38 : vector<32x128xbf16>
    %cst_23 = arith.constant dense<0.000000e+00> : vector<32x128xf32>
    %40 = tpu.matmul %31, %32, %cst_23 {dimension_numbers = #tpu.dot_dimension_numbers<[1], [0], [0], [1], [0, 0, 1, 1], [], []>} : vector<32x256xbf16>, vector<256x128xbf16>, vector<32x128xf32> -> vector<32x128xf32>
    %41 = arith.truncf %40 : vector<32x128xf32> to vector<32x128xbf16>
    %42 = vector.broadcast %33 : vector<1x128xbf16> to vector<32x128xbf16>
    %43 = arith.addf %41, %42 : vector<32x128xbf16>
    %cst_24 = arith.constant 0.000000e+00 : bf16
    %44 = vector.broadcast %cst_24 : bf16 to vector<32x128xbf16>
    %45 = arith.maximumf %43, %44 : vector<32x128xbf16>
    %c0_25 = arith.constant 0 : index
    %c0_26 = arith.constant 0 : index
    %46 = vector.load %arg8[%c0_25, %c0_26] : memref<128x128xbf16, #tpu.memory_space<vmem>>, vector<128x128xbf16>
    %c0_27 = arith.constant 0 : index
    %c0_28 = arith.constant 0 : index
    %47 = vector.load %arg9[%c0_27, %c0_28] : memref<1x128xbf16, #tpu.memory_space<vmem>>, vector<1x128xbf16>
    %cst_29 = arith.constant dense<0.000000e+00> : vector<32x128xf32>
    %48 = tpu.matmul %39, %46, %cst_29 {dimension_numbers = #tpu.dot_dimension_numbers<[1], [0], [0], [1], [0, 0, 1, 1], [], []>} : vector<32x128xbf16>, vector<128x128xbf16>, vector<32x128xf32> -> vector<32x128xf32>
    %49 = arith.truncf %48 : vector<32x128xf32> to vector<32x128xbf16>
    %50 = vector.broadcast %47 : vector<1x128xbf16> to vector<32x128xbf16>
    %51 = arith.addf %49, %50 : vector<32x128xbf16>
    %cst_30 = arith.constant 0.000000e+00 : bf16
    %52 = vector.broadcast %cst_30 : bf16 to vector<32x128xbf16>
    %53 = arith.maximumf %51, %52 : vector<32x128xbf16>
    %cst_31 = arith.constant dense<0.000000e+00> : vector<32x128xf32>
    %54 = tpu.matmul %45, %46, %cst_31 {dimension_numbers = #tpu.dot_dimension_numbers<[1], [0], [0], [1], [0, 0, 1, 1], [], []>} : vector<32x128xbf16>, vector<128x128xbf16>, vector<32x128xf32> -> vector<32x128xf32>
    %55 = arith.truncf %54 : vector<32x128xf32> to vector<32x128xbf16>
    %56 = vector.broadcast %47 : vector<1x128xbf16> to vector<32x128xbf16>
    %57 = arith.addf %55, %56 : vector<32x128xbf16>
    %cst_32 = arith.constant 0.000000e+00 : bf16
    %58 = vector.broadcast %cst_32 : bf16 to vector<32x128xbf16>
    %59 = arith.maximumf %57, %58 : vector<32x128xbf16>
    %c0_33 = arith.constant 0 : index
    %c0_34 = arith.constant 0 : index
    %60 = vector.load %arg10[%c0_33, %c0_34] : memref<128x128xbf16, #tpu.memory_space<vmem>>, vector<128x128xbf16>
    %c0_35 = arith.constant 0 : index
    %c0_36 = arith.constant 0 : index
    %61 = vector.load %arg11[%c0_35, %c0_36] : memref<1x128xbf16, #tpu.memory_space<vmem>>, vector<1x128xbf16>
    %cst_37 = arith.constant dense<0.000000e+00> : vector<32x128xf32>
    %62 = tpu.matmul %53, %60, %cst_37 {dimension_numbers = #tpu.dot_dimension_numbers<[1], [0], [0], [1], [0, 0, 1, 1], [], []>} : vector<32x128xbf16>, vector<128x128xbf16>, vector<32x128xf32> -> vector<32x128xf32>
    %63 = arith.truncf %62 : vector<32x128xf32> to vector<32x128xbf16>
    %64 = vector.broadcast %61 : vector<1x128xbf16> to vector<32x128xbf16>
    %65 = arith.addf %63, %64 : vector<32x128xbf16>
    %cst_38 = arith.constant 0.000000e+00 : bf16
    %66 = vector.broadcast %cst_38 : bf16 to vector<32x128xbf16>
    %67 = arith.maximumf %65, %66 : vector<32x128xbf16>
    %cst_39 = arith.constant dense<0.000000e+00> : vector<32x128xf32>
    %68 = tpu.matmul %59, %60, %cst_39 {dimension_numbers = #tpu.dot_dimension_numbers<[1], [0], [0], [1], [0, 0, 1, 1], [], []>} : vector<32x128xbf16>, vector<128x128xbf16>, vector<32x128xf32> -> vector<32x128xf32>
    %69 = arith.truncf %68 : vector<32x128xf32> to vector<32x128xbf16>
    %70 = vector.broadcast %61 : vector<1x128xbf16> to vector<32x128xbf16>
    %71 = arith.addf %69, %70 : vector<32x128xbf16>
    %cst_40 = arith.constant 0.000000e+00 : bf16
    %72 = vector.broadcast %cst_40 : bf16 to vector<32x128xbf16>
    %73 = arith.maximumf %71, %72 : vector<32x128xbf16>
    %c0_41 = arith.constant 0 : index
    %c0_42 = arith.constant 0 : index
    %74 = vector.load %arg12[%c0_41, %c0_42] : memref<128x128xbf16, #tpu.memory_space<vmem>>, vector<128x128xbf16>
    %c0_43 = arith.constant 0 : index
    %c0_44 = arith.constant 0 : index
    %75 = vector.load %arg13[%c0_43, %c0_44] : memref<1x128xbf16, #tpu.memory_space<vmem>>, vector<1x128xbf16>
    %cst_45 = arith.constant dense<0.000000e+00> : vector<32x128xf32>
    %76 = tpu.matmul %67, %74, %cst_45 {dimension_numbers = #tpu.dot_dimension_numbers<[1], [0], [0], [1], [0, 0, 1, 1], [], []>} : vector<32x128xbf16>, vector<128x128xbf16>, vector<32x128xf32> -> vector<32x128xf32>
    %77 = arith.truncf %76 : vector<32x128xf32> to vector<32x128xbf16>
    %78 = vector.broadcast %75 : vector<1x128xbf16> to vector<32x128xbf16>
    %79 = arith.addf %77, %78 : vector<32x128xbf16>
    %cst_46 = arith.constant 0.000000e+00 : bf16
    %80 = vector.broadcast %cst_46 : bf16 to vector<32x128xbf16>
    %81 = arith.maximumf %79, %80 : vector<32x128xbf16>
    %cst_47 = arith.constant dense<0.000000e+00> : vector<32x128xf32>
    %82 = tpu.matmul %73, %74, %cst_47 {dimension_numbers = #tpu.dot_dimension_numbers<[1], [0], [0], [1], [0, 0, 1, 1], [], []>} : vector<32x128xbf16>, vector<128x128xbf16>, vector<32x128xf32> -> vector<32x128xf32>
    %83 = arith.truncf %82 : vector<32x128xf32> to vector<32x128xbf16>
    %84 = vector.broadcast %75 : vector<1x128xbf16> to vector<32x128xbf16>
    %85 = arith.addf %83, %84 : vector<32x128xbf16>
    %cst_48 = arith.constant 0.000000e+00 : bf16
    %86 = vector.broadcast %cst_48 : bf16 to vector<32x128xbf16>
    %87 = arith.maximumf %85, %86 : vector<32x128xbf16>
    %c0_49 = arith.constant 0 : index
    %c0_50 = arith.constant 0 : index
    %88 = vector.load %arg14[%c0_49, %c0_50] : memref<128x128xbf16, #tpu.memory_space<vmem>>, vector<128x128xbf16>
    %c0_51 = arith.constant 0 : index
    %c0_52 = arith.constant 0 : index
    %89 = vector.load %arg15[%c0_51, %c0_52] : memref<1x128xbf16, #tpu.memory_space<vmem>>, vector<1x128xbf16>
    %cst_53 = arith.constant dense<0.000000e+00> : vector<32x128xf32>
    %90 = tpu.matmul %81, %88, %cst_53 {dimension_numbers = #tpu.dot_dimension_numbers<[1], [0], [0], [1], [0, 0, 1, 1], [], []>} : vector<32x128xbf16>, vector<128x128xbf16>, vector<32x128xf32> -> vector<32x128xf32>
    %91 = arith.truncf %90 : vector<32x128xf32> to vector<32x128xbf16>
    %92 = vector.broadcast %89 : vector<1x128xbf16> to vector<32x128xbf16>
    %93 = arith.addf %91, %92 : vector<32x128xbf16>
    %cst_54 = arith.constant 0.000000e+00 : bf16
    %94 = vector.broadcast %cst_54 : bf16 to vector<32x128xbf16>
    %95 = arith.maximumf %93, %94 : vector<32x128xbf16>
    %cst_55 = arith.constant dense<0.000000e+00> : vector<32x128xf32>
    %96 = tpu.matmul %87, %88, %cst_55 {dimension_numbers = #tpu.dot_dimension_numbers<[1], [0], [0], [1], [0, 0, 1, 1], [], []>} : vector<32x128xbf16>, vector<128x128xbf16>, vector<32x128xf32> -> vector<32x128xf32>
    %97 = arith.truncf %96 : vector<32x128xf32> to vector<32x128xbf16>
    %98 = vector.broadcast %89 : vector<1x128xbf16> to vector<32x128xbf16>
    %99 = arith.addf %97, %98 : vector<32x128xbf16>
    %cst_56 = arith.constant 0.000000e+00 : bf16
    %100 = vector.broadcast %cst_56 : bf16 to vector<32x128xbf16>
    %101 = arith.maximumf %99, %100 : vector<32x128xbf16>
    %c0_57 = arith.constant 0 : index
    %c0_58 = arith.constant 0 : index
    %102 = vector.load %arg16[%c0_57, %c0_58] : memref<128x128xbf16, #tpu.memory_space<vmem>>, vector<128x128xbf16>
    %c0_59 = arith.constant 0 : index
    %c0_60 = arith.constant 0 : index
    %103 = vector.load %arg17[%c0_59, %c0_60] : memref<1x128xbf16, #tpu.memory_space<vmem>>, vector<1x128xbf16>
    %cst_61 = arith.constant dense<0.000000e+00> : vector<32x128xf32>
    %104 = tpu.matmul %95, %102, %cst_61 {dimension_numbers = #tpu.dot_dimension_numbers<[1], [0], [0], [1], [0, 0, 1, 1], [], []>} : vector<32x128xbf16>, vector<128x128xbf16>, vector<32x128xf32> -> vector<32x128xf32>
    %105 = arith.truncf %104 : vector<32x128xf32> to vector<32x128xbf16>
    %106 = vector.broadcast %103 : vector<1x128xbf16> to vector<32x128xbf16>
    %107 = arith.addf %105, %106 : vector<32x128xbf16>
    %cst_62 = arith.constant 0.000000e+00 : bf16
    %108 = vector.broadcast %cst_62 : bf16 to vector<32x128xbf16>
    %109 = arith.maximumf %107, %108 : vector<32x128xbf16>
    %cst_63 = arith.constant dense<0.000000e+00> : vector<32x128xf32>
    %110 = tpu.matmul %101, %102, %cst_63 {dimension_numbers = #tpu.dot_dimension_numbers<[1], [0], [0], [1], [0, 0, 1, 1], [], []>} : vector<32x128xbf16>, vector<128x128xbf16>, vector<32x128xf32> -> vector<32x128xf32>
    %111 = arith.truncf %110 : vector<32x128xf32> to vector<32x128xbf16>
    %112 = vector.broadcast %103 : vector<1x128xbf16> to vector<32x128xbf16>
    %113 = arith.addf %111, %112 : vector<32x128xbf16>
    %cst_64 = arith.constant 0.000000e+00 : bf16
    %114 = vector.broadcast %cst_64 : bf16 to vector<32x128xbf16>
    %115 = arith.maximumf %113, %114 : vector<32x128xbf16>
    %c0_65 = arith.constant 0 : index
    %c0_66 = arith.constant 0 : index
    %116 = vector.load %arg18[%c0_65, %c0_66] : memref<128x128xbf16, #tpu.memory_space<vmem>>, vector<128x128xbf16>
    %c0_67 = arith.constant 0 : index
    %c0_68 = arith.constant 0 : index
    %117 = vector.load %arg19[%c0_67, %c0_68] : memref<1x128xbf16, #tpu.memory_space<vmem>>, vector<1x128xbf16>
    %cst_69 = arith.constant dense<0.000000e+00> : vector<32x128xf32>
    %118 = tpu.matmul %109, %116, %cst_69 {dimension_numbers = #tpu.dot_dimension_numbers<[1], [0], [0], [1], [0, 0, 1, 1], [], []>} : vector<32x128xbf16>, vector<128x128xbf16>, vector<32x128xf32> -> vector<32x128xf32>
    %119 = arith.truncf %118 : vector<32x128xf32> to vector<32x128xbf16>
    %120 = vector.broadcast %117 : vector<1x128xbf16> to vector<32x128xbf16>
    %121 = arith.addf %119, %120 : vector<32x128xbf16>
    %cst_70 = arith.constant 0.000000e+00 : bf16
    %122 = vector.broadcast %cst_70 : bf16 to vector<32x128xbf16>
    %123 = arith.maximumf %121, %122 : vector<32x128xbf16>
    %cst_71 = arith.constant dense<0.000000e+00> : vector<32x128xf32>
    %124 = tpu.matmul %115, %116, %cst_71 {dimension_numbers = #tpu.dot_dimension_numbers<[1], [0], [0], [1], [0, 0, 1, 1], [], []>} : vector<32x128xbf16>, vector<128x128xbf16>, vector<32x128xf32> -> vector<32x128xf32>
    %125 = arith.truncf %124 : vector<32x128xf32> to vector<32x128xbf16>
    %126 = vector.broadcast %117 : vector<1x128xbf16> to vector<32x128xbf16>
    %127 = arith.addf %125, %126 : vector<32x128xbf16>
    %cst_72 = arith.constant 0.000000e+00 : bf16
    %128 = vector.broadcast %cst_72 : bf16 to vector<32x128xbf16>
    %129 = arith.maximumf %127, %128 : vector<32x128xbf16>
    %c0_73 = arith.constant 0 : index
    %c0_74 = arith.constant 0 : index
    %130 = vector.load %arg20[%c0_73, %c0_74] : memref<128x256xbf16, #tpu.memory_space<vmem>>, vector<128x256xbf16>
    %c0_75 = arith.constant 0 : index
    %c0_76 = arith.constant 0 : index
    %131 = vector.load %arg21[%c0_75, %c0_76] : memref<1x256xbf16, #tpu.memory_space<vmem>>, vector<1x256xbf16>
    %cst_77 = arith.constant dense<0.000000e+00> : vector<32x256xf32>
    %132 = tpu.matmul %123, %130, %cst_77 {dimension_numbers = #tpu.dot_dimension_numbers<[1], [0], [0], [1], [0, 0, 1, 1], [], []>} : vector<32x128xbf16>, vector<128x256xbf16>, vector<32x256xf32> -> vector<32x256xf32>
    %133 = arith.truncf %132 : vector<32x256xf32> to vector<32x256xbf16>
    %134 = vector.broadcast %131 : vector<1x256xbf16> to vector<32x256xbf16>
    %135 = arith.addf %133, %134 : vector<32x256xbf16>
    %cst_78 = arith.constant 0.000000e+00 : bf16
    %136 = vector.broadcast %cst_78 : bf16 to vector<32x256xbf16>
    %137 = arith.maximumf %135, %136 : vector<32x256xbf16>
    %cst_79 = arith.constant dense<0.000000e+00> : vector<32x256xf32>
    %138 = tpu.matmul %129, %130, %cst_79 {dimension_numbers = #tpu.dot_dimension_numbers<[1], [0], [0], [1], [0, 0, 1, 1], [], []>} : vector<32x128xbf16>, vector<128x256xbf16>, vector<32x256xf32> -> vector<32x256xf32>
    %139 = arith.truncf %138 : vector<32x256xf32> to vector<32x256xbf16>
    %140 = vector.broadcast %131 : vector<1x256xbf16> to vector<32x256xbf16>
    %141 = arith.addf %139, %140 : vector<32x256xbf16>
    %cst_80 = arith.constant 0.000000e+00 : bf16
    %142 = vector.broadcast %cst_80 : bf16 to vector<32x256xbf16>
    %143 = arith.maximumf %141, %142 : vector<32x256xbf16>
    %c0_81 = arith.constant 0 : index
    %c0_82 = arith.constant 0 : index
    %144 = vector.load %arg22[%c0_81, %c0_82] : memref<256x512xbf16, #tpu.memory_space<vmem>>, vector<256x512xbf16>
    %c0_83 = arith.constant 0 : index
    %c0_84 = arith.constant 0 : index
    %145 = vector.load %arg23[%c0_83, %c0_84] : memref<1x512xbf16, #tpu.memory_space<vmem>>, vector<1x512xbf16>
    %cst_85 = arith.constant dense<0.000000e+00> : vector<32x512xf32>
    %146 = tpu.matmul %137, %144, %cst_85 {dimension_numbers = #tpu.dot_dimension_numbers<[1], [0], [0], [1], [0, 0, 1, 1], [], []>} : vector<32x256xbf16>, vector<256x512xbf16>, vector<32x512xf32> -> vector<32x512xf32>
    %147 = arith.truncf %146 : vector<32x512xf32> to vector<32x512xbf16>
    %148 = vector.broadcast %145 : vector<1x512xbf16> to vector<32x512xbf16>
    %149 = arith.addf %147, %148 : vector<32x512xbf16>
    %cst_86 = arith.constant 0.000000e+00 : bf16
    %150 = vector.broadcast %cst_86 : bf16 to vector<32x512xbf16>
    %151 = arith.maximumf %149, %150 : vector<32x512xbf16>
    %cst_87 = arith.constant dense<0.000000e+00> : vector<32x512xf32>
    %152 = tpu.matmul %143, %144, %cst_87 {dimension_numbers = #tpu.dot_dimension_numbers<[1], [0], [0], [1], [0, 0, 1, 1], [], []>} : vector<32x256xbf16>, vector<256x512xbf16>, vector<32x512xf32> -> vector<32x512xf32>
    %153 = arith.truncf %152 : vector<32x512xf32> to vector<32x512xbf16>
    %154 = vector.broadcast %145 : vector<1x512xbf16> to vector<32x512xbf16>
    %155 = arith.addf %153, %154 : vector<32x512xbf16>
    %cst_88 = arith.constant 0.000000e+00 : bf16
    %156 = vector.broadcast %cst_88 : bf16 to vector<32x512xbf16>
    %157 = arith.maximumf %155, %156 : vector<32x512xbf16>
    %c0_89 = arith.constant 0 : index
    %c0_90 = arith.constant 0 : index
    %158 = vector.load %arg24[%c0_89, %c0_90] : memref<512x784xbf16, #tpu.memory_space<vmem>>, vector<512x784xbf16>
    %c0_91 = arith.constant 0 : index
    %c0_92 = arith.constant 0 : index
    %159 = vector.load %arg25[%c0_91, %c0_92] : memref<1x784xf32, #tpu.memory_space<vmem>>, vector<1x784xf32>
    %cst_93 = arith.constant dense<0.000000e+00> : vector<32x784xf32>
    %160 = tpu.matmul %151, %158, %cst_93 {dimension_numbers = #tpu.dot_dimension_numbers<[1], [0], [0], [1], [0, 0, 1, 1], [], []>} : vector<32x512xbf16>, vector<512x784xbf16>, vector<32x784xf32> -> vector<32x784xf32>
    %161 = vector.broadcast %159 : vector<1x784xf32> to vector<32x784xf32>
    %162 = arith.addf %160, %161 : vector<32x784xf32>
    %cst_94 = arith.constant 0.000000e+00 : f32
    %163 = vector.broadcast %cst_94 : f32 to vector<32x784xf32>
    %164 = arith.maximumf %162, %163 : vector<32x784xf32>
    %cst_95 = arith.constant dense<0.000000e+00> : vector<32x784xf32>
    %165 = tpu.matmul %157, %158, %cst_95 {dimension_numbers = #tpu.dot_dimension_numbers<[1], [0], [0], [1], [0, 0, 1, 1], [], []>} : vector<32x512xbf16>, vector<512x784xbf16>, vector<32x784xf32> -> vector<32x784xf32>
    %166 = vector.broadcast %159 : vector<1x784xf32> to vector<32x784xf32>
    %167 = arith.addf %165, %166 : vector<32x784xf32>
    %cst_96 = arith.constant 0.000000e+00 : f32
    %168 = vector.broadcast %cst_96 : f32 to vector<32x784xf32>
    %169 = arith.maximumf %167, %168 : vector<32x784xf32>
    %c0_97 = arith.constant 0 : index
    %c0_98 = arith.constant 0 : index
    %170 = vector.load %arg26[%c0_97, %c0_98] : memref<64x784xf32, #tpu.memory_space<vmem>>, vector<32x784xf32>
    tpu.vector_store %arg26[%c0_97, %c0_98], %164 {strides = array<i32>} : memref<64x784xf32, #tpu.memory_space<vmem>>, vector<32x784xf32>,
    %c32_99 = arith.constant 32 : index
    %c0_100 = arith.constant 0 : index
    %171 = vector.load %arg26[%c32_99, %c0_100] : memref<64x784xf32, #tpu.memory_space<vmem>>, vector<32x784xf32>
    tpu.vector_store %arg26[%c32_99, %c0_100], %169 {strides = array<i32>} : memref<64x784xf32, #tpu.memory_space<vmem>>, vector<32x784xf32>,
    return
  }
  func.func @transform_0(%arg0: i32) -> (i32, i32) {
    %c0_i32 = arith.constant 0 : i32
    %c0_i32_0 = arith.constant 0 : i32
    return %arg0, %c0_i32 : i32, i32
  }
  func.func @transform_1(%arg0: i32) -> (i32, i32) {
    %c0_i32 = arith.constant 0 : i32
    %c0_i32_0 = arith.constant 0 : i32
    %c0_i32_1 = arith.constant 0 : i32
    return %c0_i32, %c0_i32_0 : i32, i32
  }
  func.func @transform_2(%arg0: i32) -> (i32, i32) {
    %c0_i32 = arith.constant 0 : i32
    %c0_i32_0 = arith.constant 0 : i32
    %c0_i32_1 = arith.constant 0 : i32
    return %c0_i32, %c0_i32_0 : i32, i32
  }
  func.func @transform_3(%arg0: i32) -> (i32, i32) {
    %c0_i32 = arith.constant 0 : i32
    %c0_i32_0 = arith.constant 0 : i32
    %c0_i32_1 = arith.constant 0 : i32
    return %c0_i32, %c0_i32_0 : i32, i32
  }
  func.func @transform_4(%arg0: i32) -> (i32, i32) {
    %c0_i32 = arith.constant 0 : i32
    %c0_i32_0 = arith.constant 0 : i32
    %c0_i32_1 = arith.constant 0 : i32
    return %c0_i32, %c0_i32_0 : i32, i32
  }
  func.func @transform_5(%arg0: i32) -> (i32, i32) {
    %c0_i32 = arith.constant 0 : i32
    %c0_i32_0 = arith.constant 0 : i32
    %c0_i32_1 = arith.constant 0 : i32
    return %c0_i32, %c0_i32_0 : i32, i32
  }
  func.func @transform_6(%arg0: i32) -> (i32, i32) {
    %c0_i32 = arith.constant 0 : i32
    %c0_i32_0 = arith.constant 0 : i32
    %c0_i32_1 = arith.constant 0 : i32
    return %c0_i32, %c0_i32_0 : i32, i32
  }
  func.func @transform_7(%arg0: i32) -> (i32, i32) {
    %c0_i32 = arith.constant 0 : i32
    %c0_i32_0 = arith.constant 0 : i32
    %c0_i32_1 = arith.constant 0 : i32
    return %c0_i32, %c0_i32_0 : i32, i32
  }
  func.func @transform_8(%arg0: i32) -> (i32, i32) {
    %c0_i32 = arith.constant 0 : i32
    %c0_i32_0 = arith.constant 0 : i32
    %c0_i32_1 = arith.constant 0 : i32
    return %c0_i32, %c0_i32_0 : i32, i32
  }
  func.func @transform_9(%arg0: i32) -> (i32, i32) {
    %c0_i32 = arith.constant 0 : i32
    %c0_i32_0 = arith.constant 0 : i32
    %c0_i32_1 = arith.constant 0 : i32
    return %c0_i32, %c0_i32_0 : i32, i32
  }
  func.func @transform_10(%arg0: i32) -> (i32, i32) {
    %c0_i32 = arith.constant 0 : i32
    %c0_i32_0 = arith.constant 0 : i32
    %c0_i32_1 = arith.constant 0 : i32
    return %c0_i32, %c0_i32_0 : i32, i32
  }
  func.func @transform_11(%arg0: i32) -> (i32, i32) {
    %c0_i32 = arith.constant 0 : i32
    %c0_i32_0 = arith.constant 0 : i32
    %c0_i32_1 = arith.constant 0 : i32
    return %c0_i32, %c0_i32_0 : i32, i32
  }
  func.func @transform_12(%arg0: i32) -> (i32, i32) {
    %c0_i32 = arith.constant 0 : i32
    %c0_i32_0 = arith.constant 0 : i32
    %c0_i32_1 = arith.constant 0 : i32
    return %c0_i32, %c0_i32_0 : i32, i32
  }
  func.func @transform_13(%arg0: i32) -> (i32, i32) {
    %c0_i32 = arith.constant 0 : i32
    %c0_i32_0 = arith.constant 0 : i32
    %c0_i32_1 = arith.constant 0 : i32
    return %c0_i32, %c0_i32_0 : i32, i32
  }
  func.func @transform_14(%arg0: i32) -> (i32, i32) {
    %c0_i32 = arith.constant 0 : i32
    %c0_i32_0 = arith.constant 0 : i32
    %c0_i32_1 = arith.constant 0 : i32
    return %c0_i32, %c0_i32_0 : i32, i32
  }
  func.func @transform_15(%arg0: i32) -> (i32, i32) {
    %c0_i32 = arith.constant 0 : i32
    %c0_i32_0 = arith.constant 0 : i32
    %c0_i32_1 = arith.constant 0 : i32
    return %c0_i32, %c0_i32_0 : i32, i32
  }
  func.func @transform_16(%arg0: i32) -> (i32, i32) {
    %c0_i32 = arith.constant 0 : i32
    %c0_i32_0 = arith.constant 0 : i32
    %c0_i32_1 = arith.constant 0 : i32
    return %c0_i32, %c0_i32_0 : i32, i32
  }
  func.func @transform_17(%arg0: i32) -> (i32, i32) {
    %c0_i32 = arith.constant 0 : i32
    %c0_i32_0 = arith.constant 0 : i32
    %c0_i32_1 = arith.constant 0 : i32
    return %c0_i32, %c0_i32_0 : i32, i32
  }
  func.func @transform_18(%arg0: i32) -> (i32, i32) {
    %c0_i32 = arith.constant 0 : i32
    %c0_i32_0 = arith.constant 0 : i32
    %c0_i32_1 = arith.constant 0 : i32
    return %c0_i32, %c0_i32_0 : i32, i32
  }
  func.func @transform_19(%arg0: i32) -> (i32, i32) {
    %c0_i32 = arith.constant 0 : i32
    %c0_i32_0 = arith.constant 0 : i32
    %c0_i32_1 = arith.constant 0 : i32
    return %c0_i32, %c0_i32_0 : i32, i32
  }
  func.func @transform_20(%arg0: i32) -> (i32, i32) {
    %c0_i32 = arith.constant 0 : i32
    %c0_i32_0 = arith.constant 0 : i32
    %c0_i32_1 = arith.constant 0 : i32
    return %c0_i32, %c0_i32_0 : i32, i32
  }
  func.func @transform_21(%arg0: i32) -> (i32, i32) {
    %c0_i32 = arith.constant 0 : i32
    %c0_i32_0 = arith.constant 0 : i32
    %c0_i32_1 = arith.constant 0 : i32
    return %c0_i32, %c0_i32_0 : i32, i32
  }
  func.func @transform_22(%arg0: i32) -> (i32, i32) {
    %c0_i32 = arith.constant 0 : i32
    %c0_i32_0 = arith.constant 0 : i32
    %c0_i32_1 = arith.constant 0 : i32
    return %c0_i32, %c0_i32_0 : i32, i32
  }
  func.func @transform_23(%arg0: i32) -> (i32, i32) {
    %c0_i32 = arith.constant 0 : i32
    %c0_i32_0 = arith.constant 0 : i32
    %c0_i32_1 = arith.constant 0 : i32
    return %c0_i32, %c0_i32_0 : i32, i32
  }
  func.func @transform_24(%arg0: i32) -> (i32, i32) {
    %c0_i32 = arith.constant 0 : i32
    %c0_i32_0 = arith.constant 0 : i32
    %c0_i32_1 = arith.constant 0 : i32
    return %c0_i32, %c0_i32_0 : i32, i32
  }
  func.func @transform_25(%arg0: i32) -> (i32, i32) {
    %c0_i32 = arith.constant 0 : i32
    %c0_i32_0 = arith.constant 0 : i32
    return %arg0, %c0_i32 : i32, i32
  }
}

</mosaic_0001>

<bundles_post_ra>
// kernel: ae_forward.1
= control target key start
LH: loop header
LB: loop body
LE: loop exit
PB: predicated region body
PF: predicated region fallthrough
CT: control target
= control target key end

     0   :  { %s19696_s0 = inlined_call_operand.vmem [shape: f32[100,784], index: 0, kind: input, shape index: {}]   ;;  %s19697_s1 = inlined_call_operand.vmem [shape: bf16[784,512], index: 1, kind: input, shape index: {}]   ;;  %s19698_s2 = inlined_call_operand.vmem [shape: bf16[1,512], index: 2, kind: input, shape index: {}]   ;;  %s19699_s3 = inlined_call_operand.vmem [shape: bf16[512,256], index: 3, kind: input, shape index: {}]   ;;  %s19700_s4 = inlined_call_operand.vmem [shape: bf16[1,256], index: 4, kind: input, shape index: {}]   ;;  %s19701_s5 = inlined_call_operand.vmem [shape: bf16[256,128], index: 5, kind: input, shape index: {}]   ;;  %s19702_s6 = inlined_call_operand.vmem [shape: bf16[1,128], index: 6, kind: input, shape index: {}]   ;;  %s19703_s7 = inlined_call_operand.vmem [shape: bf16[128,128], index: 7, kind: input, shape index: {}]   ;;  %s19704_s8 = inlined_call_operand.vmem [shape: bf16[1,128], index: 8, kind: input, shape index: {}]   ;;  %s19705_s9 = inlined_call_operand.vmem [shape: bf16[128,128], index: 9, kind: input, shape index: {}]   ;;  %s19706_s10 = inlined_call_operand.vmem [shape: bf16[1,128], index: 10, kind: input, shape index: {}]   ;;  %s19707_s11 = inlined_call_operand.vmem [shape: bf16[128,128], index: 11, kind: input, shape index: {}]   ;;  %s19708_s12 = inlined_call_operand.vmem [shape: bf16[1,128], index: 12, kind: input, shape index: {}]   ;;  %s19709_s13 = inlined_call_operand.vmem [shape: bf16[128,128], index: 13, kind: input, shape index: {}]   ;;  %s19710_s14 = inlined_call_operand.vmem [shape: bf16[1,128], index: 14, kind: input, shape index: {}]   ;;  %s19711_s15 = inlined_call_operand.vmem [shape: bf16[128,128], index: 15, kind: input, shape index: {}]   ;;  %s19712_s16 = inlined_call_operand.vmem [shape: bf16[1,128], index: 16, kind: input, shape index: {}]   ;;  %s19713_s17 = inlined_call_operand.vmem [shape: bf16[128,128], index: 17, kind: input, shape index: {}]   ;;  %s19714_s18 = inlined_call_operand.vmem [shape: bf16[1,128], index: 18, kind: input, shape index: {}]   ;;  %s19715_s19 = inlined_call_operand.vmem [shape: bf16[128,256], index: 19, kind: input, shape index: {}]   ;;  %s19716_s20 = inlined_call_operand.vmem [shape: bf16[1,256], index: 20, kind: input, shape index: {}]   ;;  %s19717_s21 = inlined_call_operand.vmem [shape: bf16[256,512], index: 21, kind: input, shape index: {}]   ;;  %s19718_s22 = inlined_call_operand.vmem [shape: bf16[1,512], index: 22, kind: input, shape index: {}]   ;;  %s19719_s23 = inlined_call_operand.vmem [shape: bf16[512,784], index: 23, kind: input, shape index: {}]   ;;  %s19720_s24 = inlined_call_operand.vmem [shape: f32[1,784], index: 24, kind: input, shape index: {}]   ;;  %s19721_s25 = inlined_call_operand.hbm [shape: f32[100,784], index: 25, kind: output, shape index: {}]  }
   0x1   :  { %20137 = sst [smem:[#allocation204_spill]] %s19696_s0 }
   0x2   :  { %20138 = sst [smem:[#allocation205_spill]] %s19697_s1 }
   0x3   :  { %20139 = sst [smem:[#allocation206_spill]] %s19698_s2 }
   0x4   :  { %20140 = sst [smem:[#allocation207_spill]] %s19699_s3 }
   0x5   :  { %20141 = sst [smem:[#allocation208_spill]] %s19700_s4 }
   0x6   :  { %20142 = sst [smem:[#allocation209_spill]] %s19701_s5 }
   0x7   :  { %20143 = sst [smem:[#allocation210_spill]] %s19702_s6 }
   0x8   :  { %20144 = sst [smem:[#allocation211_spill]] %s19703_s7 }
   0x9   :  { %20145 = sst [smem:[#allocation212_spill]] %s19704_s8 }
   0xa   :  { %20146 = sst [smem:[#allocation213_spill]] %s19705_s9 }
   0xb   :  { %20147 = sst [smem:[#allocation214_spill]] %s19706_s10 }
   0xc   :  { %20148 = sst [smem:[#allocation215_spill]] %s19707_s11 }
   0xd   :  { %20149 = sst [smem:[#allocation216_spill]] %s19708_s12 }
   0xe   :  { %20150 = sst [smem:[#allocation217_spill]] %s19709_s13 }
   0xf   :  { %20151 = sst [smem:[#allocation218_spill]] %s19721_s25 }
  0x10   :  { %30 = vsyncpa [#allocation3], 0 }
  0x11   :  { %32 = vsyncpa [#allocation3 + $0x1], 0  ;;  %s12617_s29 = smov 0   ;;  %s12619_s2 = smov 0  }
  0x12   :  { %s12621_s6 = smov 0   ;;  %s12623_s30 = smov 0  }
  0x13 LB: > { %20152 = sst [smem:[#allocation5_spill]] %s12470_s29  ;;  %s12638_s7 = sadd.s32 4294967295, %s12482_s30   ;;  %s12482_s30 = sphi %s12623_s30, %s20975_s30   ;;  %s12478_s6 = sphi %s12621_s6, %s20977_s6   ;;  %s12474_s2 = sphi %s12619_s2, %s20979_s2   ;;  %s12470_s29 = sphi %s12617_s29, %s20978_s29  }
  0x14   : > { %20153 = sst [smem:[#allocation6_spill]] %s12478_s6  ;;  %s9194_s3 = sadd.s32 4294967294, %s12482_s30  }
  0x15   : > { %20154 = sst [smem:[#allocation7_spill]] %s12482_s30  ;;  %s12642_s26 = sadd.s32 1, %s12482_s30  }
  0x16   : > { %20155 = sst [smem:[#allocation8_spill]] %s12638_s7  ;;  %s575_s1 = sadd.s32 1, %s12478_s6 }
  0x17   : > { %20156 = sst [smem:[#allocation9_spill]] %s12642_s26  ;;  %s572_s8 = ssub.s32 %s12482_s30, %s12642_s26 }
  0x18   : > { %p585_p0 = scmp.ne.s32.totalorder %s12478_s6, %s12474_s2  ;;  %p573_p1 = scmp.eq.s32.totalorder %s572_s8, 0 }
  0x19   : > { %p586_p2 = scmp.eq.s32.totalorder %s12638_s7, 1  ;;  %p591_p3 = scmp.ne.s32.totalorder %s12474_s2, %s12470_s29 }
  0x1a   : > { %p592_p4 = scmp.eq.s32.totalorder %s9194_s3, 1  ;;  %p9197_p7 = scmp.ge.s32.totalorder %s12482_s30, 1 }
  0x1b   : > { %s12653_s27 = scalar_select %p573_p1, %s12478_s6, %s575_s1  }
  0x1c   : > { %p12655_p5 = por %p586_p2, %p585_p0  ;;  %p12659_p6 = por %p592_p4, %p591_p3 }
  0x1d   : > { %20157 = sst [smem:[#allocation10_spill]] %s12653_s27  ;;  %p702_p8 = scmp.lt.s32.totalorder %s12482_s30, 3 }
  0x1e   : > { %s20159_s28 = scalar_select %p12659_p6, 1, 0 }
  0x1f   : > { %p703_p9 = pnand %p9197_p7, %p702_p8 }
  0x20   : > { %20160 = sst [smem:[#allocation11_spill]] %s20159_s28 }
  0x21   : > { %706 = sbr.rel (%p703_p9) target bundleno = 2713 (0xa99), region = 120 }
  0x26   : > { %s20161_s0 = sld [smem:[#allocation205_spill]]  ;;  %s12896_s29 = sshll.u32 %s12638_s7, 3  ;;  %vm2047_vm0 = vcmask 130048  }
  0x27   : > { %20162 = sst [smem:[#allocation12_spill]] %s12896_s29  ;;  %p782_p10 = scmp.lt.s32.totalorder %s12896_s29, 12 }
  0x28   : > { %s20167_s9 = sld [smem:[#allocation204_spill]] }
  0x29   : > { %s783_s3 = scalar_select %p782_p10, %s12896_s29, 12 }
  0x2a   : > { %s20323_s25 = sld [smem:[#allocation206_spill]] }
  0x2b   : > { %s12366_s5 = smul.u32 56, %s783_s3  ;;  %s20423_s29 = sld [smem:[#allocation208_spill]] }
  0x2c   : > { %v9314_v0 = vld [vmem:[%s20161_s0 + $0xe0] sm:$0xf]  ;;  %v11767_v1 = vld [vmem:[%s20161_s0 + $0xec] sm:$0xf0]  ;;  %s20486_s1 = sld [smem:[#allocation207_spill]] }
  0x2d   : > { %v9442_v2 = vld [vmem:[%s20161_s0 + $0x1e0] sm:$0xf]  ;;  %v12674_v3 = vor.u32 %v11767_v1, %v9314_v0  ;;  %v11799_v4 = vld [vmem:[%s20161_s0 + $0x1ec] sm:$0xf0]  ;;  %s20549_s26 = sld [smem:[#allocation210_spill]] }
  0x2e   : > { %v9570_v5 = vld [vmem:[%s20161_s0 + $0x2e0] sm:$0xf]  ;;  %v11831_v6 = vld [vmem:[%s20161_s0 + $0x2ec] sm:$0xf0]  ;;  %v12685_v7 = vor.u32 %v11799_v4, %v9442_v2  ;;  %s12969_s27 = scalar_lea.vmem %s20167_s9, %s12366_s5  ;;  %s20547_s5 = sld [smem:[#allocation209_spill]] }
  0x2f   : > { %v12687_v8 = vor.u32 %v11831_v6, %v9570_v5  ;;  %v9698_v9 = vld [vmem:[%s20161_s0 + $0x3e0] sm:$0xf]  ;;  %v11863_v10 = vld [vmem:[%s20161_s0 + $0x3ec] sm:$0xf0]  ;;  %2054 = vmatpush.bf16.msra.mxu0 %v12674_v3  ;;  %s20550_s28 = sld [smem:[#allocation213_spill]] }
  0x30   : > { %v9298_v11 = vld [vmem:[%s20161_s0 + $0xc0] sm:$0xf]  ;;  %v12699_v12 = vor.u32 %v11863_v10, %v9698_v9  ;;  %v11763_v13 = vld [vmem:[%s20161_s0 + $0xcc] sm:$0xf0]  ;;  %2073 = vmatpush.bf16.msra.mxu1 %v12685_v7  ;;  %s20551_s30 = sld [smem:[#allocation212_spill]] }
  0x31   : > { %v9426_v14 = vld [vmem:[%s20161_s0 + $0x1c0] sm:$0xf]  ;;  %v11795_v15 = vld [vmem:[%s20161_s0 + $0x1cc] sm:$0xf0]  ;;  %2092 = vmatpush.bf16.msra.mxu2 %v12687_v8  ;;  %v12712_v16 = vor.u32 %v11763_v13, %v9298_v11  ;;  %s20552_s11 = sld [smem:[#allocation215_spill]] }
  0x32   : > { %v12714_v17 = vor.u32 %v11795_v15, %v9426_v14  ;;  %v9554_v18 = vld [vmem:[%s20161_s0 + $0x2c0] sm:$0xf]  ;;  %v11827_v19 = vld [vmem:[%s20161_s0 + $0x2cc] sm:$0xf0]  ;;  %2111 = vmatpush.bf16.msra.mxu3 %v12699_v12  ;;  %s20553_s10 = sld [smem:[#allocation214_spill]] }
  0x33   : > { %v9682_v20 = vld [vmem:[%s20161_s0 + $0x3c0] sm:$0xf]  ;;  %v12726_v21 = vor.u32 %v11827_v19, %v9554_v18  ;;  %v11859_v22 = vld [vmem:[%s20161_s0 + $0x3cc] sm:$0xf0]  ;;  %2055 = vmatpush.bf16.msra.mxu0 %v12712_v16  ;;  %s20554_s13 = sld [smem:[#allocation217_spill]] }
  0x34   : > { %v9282_v23 = vld [vmem:[%s20161_s0 + $0xa0] sm:$0xf]  ;;  %v11759_v24 = vld [vmem:[%s20161_s0 + $0xac] sm:$0xf0]  ;;  %v12737_v25 = vor.u32 %v11859_v22, %v9682_v20  ;;  %2074 = vmatpush.bf16.msra.mxu1 %v12714_v17  ;;  %s20555_s12 = sld [smem:[#allocation216_spill]] }
  0x35   : > { %v9410_v26 = vld [vmem:[%s20161_s0 + $0x1a0] sm:$0xf]  ;;  %v11791_v27 = vld [vmem:[%s20161_s0 + $0x1ac] sm:$0xf0]  ;;  %v12749_v29 = vor.u32 %v11759_v24, %v9282_v23  ;;  %2093 = vmatpush.bf16.msra.mxu2 %v12726_v21  ;;  %s20968_s8 = sld [smem:[#allocation12_spill]] (%p12655_p5) }
  0x36   : > { %v9538_v28 = vld [vmem:[%s20161_s0 + $0x2a0] sm:$0xf]  ;;  %v11823_v30 = vld [vmem:[%s20161_s0 + $0x2ac] sm:$0xf0]  ;;  %v12762_v33 = vor.u32 %v11791_v27, %v9410_v26  ;;  %2112 = vmatpush.bf16.msra.mxu3 %v12737_v25 }
  0x37   : > { %v9666_v31 = vld [vmem:[%s20161_s0 + $0x3a0] sm:$0xf]  ;;  %v11855_v32 = vld [vmem:[%s20161_s0 + $0x3ac] sm:$0xf0]  ;;  %v12764_v34 = vor.u32 %v11823_v30, %v9538_v28  ;;  %2056 = vmatpush.bf16.msra.mxu0 %v12749_v29 }
  0x38   : > { %v9266_v35 = vld [vmem:[%s20161_s0 + $0x80] sm:$0xf]  ;;  %v11755_v36 = vld [vmem:[%s20161_s0 + $0x8c] sm:$0xf0]  ;;  %v12776_v38 = vor.u32 %v11855_v32, %v9666_v31  ;;  %2075 = vmatpush.bf16.msra.mxu1 %v12762_v33 }
  0x39   : > { %v9394_v37 = vld [vmem:[%s20161_s0 + $0x180] sm:$0xf]  ;;  %v11787_v39 = vld [vmem:[%s20161_s0 + $0x18c] sm:$0xf0]  ;;  %v12794_v44 = vor.u32 %v11755_v36, %v9266_v35  ;;  %2094 = vmatpush.bf16.msra.mxu2 %v12764_v34 }
  0x3a   : > { %v9522_v40 = vld [vmem:[%s20161_s0 + $0x280] sm:$0xf]  ;;  %v11819_v41 = vld [vmem:[%s20161_s0 + $0x28c] sm:$0xf0]  ;;  %v12798_v45 = vor.u32 %v11787_v39, %v9394_v37  ;;  %2113 = vmatpush.bf16.msra.mxu3 %v12776_v38 }
  0x3b   : > { %v9650_v42 = vld [vmem:[%s20161_s0 + $0x380] sm:$0xf]  ;;  %v11851_v43 = vld [vmem:[%s20161_s0 + $0x38c] sm:$0xf0]  ;;  %v12800_v46 = vor.u32 %v11819_v41, %v9522_v40  ;;  %2057 = vmatpush.bf16.msra.mxu0 %v12794_v44 }
  0x3c   : > { %v9250_v47 = vld [vmem:[%s20161_s0 + $0x60] sm:$0xf]  ;;  %v11751_v48 = vld [vmem:[%s20161_s0 + $0x6c] sm:$0xf0]  ;;  %v12812_v50 = vor.u32 %v11851_v43, %v9650_v42  ;;  %2076 = vmatpush.bf16.msra.mxu1 %v12798_v45 }
  0x3d   : > { %v9378_v49 = vld [vmem:[%s20161_s0 + $0x160] sm:$0xf]  ;;  %v11783_v51 = vld [vmem:[%s20161_s0 + $0x16c] sm:$0xf0]  ;;  %v12830_v56 = vor.u32 %v11751_v48, %v9250_v47  ;;  %2095 = vmatpush.bf16.msra.mxu2 %v12800_v46 }
  0x3e   : > { %v9506_v52 = vld [vmem:[%s20161_s0 + $0x260] sm:$0xf]  ;;  %v11815_v53 = vld [vmem:[%s20161_s0 + $0x26c] sm:$0xf0]  ;;  %v12834_v57 = vor.u32 %v11783_v51, %v9378_v49  ;;  %2114 = vmatpush.bf16.msra.mxu3 %v12812_v50 }
  0x3f   : > { %v9634_v54 = vld [vmem:[%s20161_s0 + $0x360] sm:$0xf]  ;;  %v11847_v55 = vld [vmem:[%s20161_s0 + $0x36c] sm:$0xf0]  ;;  %v12836_v58 = vor.u32 %v11815_v53, %v9506_v52  ;;  %2058 = vmatpush.bf16.msra.mxu0 %v12830_v56  ;;  %v11765_v53 = vld [vmem:[%s20161_s0 + $0xe4] sm:$0xf] }
  0x40   : > { %v9234_v59 = vld [vmem:[%s20161_s0 + $0x40] sm:$0xf]  ;;  %v11747_v60 = vld [vmem:[%s20161_s0 + $0x4c] sm:$0xf0]  ;;  %v12848_v62 = vor.u32 %v11847_v55, %v9634_v54  ;;  %2077 = vmatpush.bf16.msra.mxu1 %v12834_v57  ;;  %v9316_v54 = vld [vmem:[%s20161_s0 + $0xf0] sm:$0xf0] }
  0x41   : > { %v9362_v61 = vld [vmem:[%s20161_s0 + $0x140] sm:$0xf]  ;;  %v11779_v63 = vld [vmem:[%s20161_s0 + $0x14c] sm:$0xf0]  ;;  %v12866_v5 = vor.u32 %v11747_v60, %v9234_v59  ;;  %2096 = vmatpush.bf16.msra.mxu2 %v12836_v58  ;;  %v807_v60 = vld [vmem:[%s12969_s27 + $0x38] sm:$0xff] }
  0x42   : > { %v9490_v0 = vld [vmem:[%s20161_s0 + $0x240] sm:$0xf]  ;;  %v11811_v1 = vld [vmem:[%s20161_s0 + $0x24c] sm:$0xf0]  ;;  %v12873_v9 = vor.u32 %v11779_v63, %v9362_v61  ;;  %2115 = vmatpush.bf16.msra.mxu3 %v12848_v62  ;;  %v801_v61 = vld [vmem:[%s12969_s27 + $0x8] sm:$0xff] }
  0x43   : > { %v9618_v2 = vld [vmem:[%s20161_s0 + $0x340] sm:$0xf]  ;;  %v11843_v4 = vld [vmem:[%s20161_s0 + $0x34c] sm:$0xf0]  ;;  %v12875_v10 = vor.u32 %v11811_v1, %v9490_v0  ;;  %2059 = vmatpush.bf16.msra.mxu0 %v12866_v5 }
  0x44   : > { %v9218_v6 = vld [vmem:[%s20161_s0 + $0x20] sm:$0xf]  ;;  %v11743_v11 = vld [vmem:[%s20161_s0 + $0x2c] sm:$0xf0]  ;;  %v12887_v15 = vor.u32 %v11843_v4, %v9618_v2  ;;  %2078 = vmatpush.bf16.msra.mxu1 %v12873_v9 }
  0x45   : > { %v9346_v13 = vld [vmem:[%s20161_s0 + $0x120] sm:$0xf]  ;;  %v11775_v14 = vld [vmem:[%s20161_s0 + $0x12c] sm:$0xf0]  ;;  %v12906_v23 = vor.u32 %v11743_v11, %v9218_v6  ;;  %2097 = vmatpush.bf16.msra.mxu2 %v12875_v10  ;;  %v809_v6 = vld [vmem:[%s12969_s27 + $0x48] sm:$0xff] }
  0x46   : > { %v9474_v18 = vld [vmem:[%s20161_s0 + $0x220] sm:$0xf]  ;;  %v11807_v19 = vld [vmem:[%s20161_s0 + $0x22c] sm:$0xf0]  ;;  %v12919_v28 = vor.u32 %v11775_v14, %v9346_v13  ;;  %2116 = vmatpush.bf16.msra.mxu3 %v12887_v15 }
  0x47   : > { %v9602_v20 = vld [vmem:[%s20161_s0 + $0x320] sm:$0xf]  ;;  %v11839_v22 = vld [vmem:[%s20161_s0 + $0x32c] sm:$0xf0]  ;;  %v12921_v30 = vor.u32 %v11807_v19, %v9474_v18  ;;  %2060 = vmatpush.bf16.msra.mxu0 %v12906_v23  ;;  %v803_v18 = vld [vmem:[%s12969_s27 + $0x18] sm:$0xff] }
  0x48   : > { %v9202_v24 = vld [vmem:[%s20161_s0] sm:$0xf]  ;;  %v11739_v26 = vld [vmem:[%s20161_s0 + $0xc] sm:$0xf0]  ;;  %v12931_v35 = vor.u32 %v11839_v22, %v9602_v20  ;;  %2079 = vmatpush.bf16.msra.mxu1 %v12919_v28 }
  0x49   : > { %v9330_v27 = vld [vmem:[%s20161_s0 + $0x100] sm:$0xf]  ;;  %20163 = vst [vmem:[#allocation13_spill] sm:$0xff] %v12921_v30  ;;  %v11771_v31 = vld [vmem:[%s20161_s0 + $0x10c] sm:$0xf0]  ;;  %v12949_v42 = vor.u32 %v11739_v26, %v9202_v24  ;;  %2098 = vmatpush.bf16.msra.mxu2 %v12921_v30  ;;  %v13016_v26 = vor.u32 %v11765_v53, %v9316_v54  ;;  %v813_v30 = vld [vmem:[%s12969_s27 + $0x68] sm:$0xff] }
  0x4a   : > { %v9458_v32 = vld [vmem:[%s20161_s0 + $0x200] sm:$0xf]  ;;  %v11803_v36 = vld [vmem:[%s20161_s0 + $0x20c] sm:$0xf0]  ;;  %v12962_v49 = vor.u32 %v11771_v31, %v9330_v27  ;;  %2117 = vmatpush.bf16.msra.mxu3 %v12931_v35  ;;  %v11757_v53 = vld [vmem:[%s20161_s0 + $0xa4] sm:$0xf] }
  0x4b   : > { %v9586_v37 = vld [vmem:[%s20161_s0 + $0x300] sm:$0xf]  ;;  %v11835_v39 = vld [vmem:[%s20161_s0 + $0x30c] sm:$0xf0]  ;;  %20164 = vst [vmem:[#allocation14_spill] sm:$0xff] %v12949_v42  ;;  %v12964_v51 = vor.u32 %v11803_v36, %v9458_v32  ;;  %2061 = vmatpush.bf16.msra.mxu0 %v12949_v42 }
  0x4c   : > { %v9970_v40 = vld [vmem:[%s20161_s0 + $0x600] sm:$0xf]  ;;  %v11931_v41 = vld [vmem:[%s20161_s0 + $0x60c] sm:$0xf0]  ;;  %20165 = vst [vmem:[#allocation15_spill] sm:$0xff] %v12962_v49  ;;  %v12981_v55 = vor.u32 %v11835_v39, %v9586_v37  ;;  %2080 = vmatpush.bf16.msra.mxu1 %v12962_v49 }
  0x4d   : > { %v9826_v43 = vld [vmem:[%s20161_s0 + $0x4e0] sm:$0xf]  ;;  %v11927_v48 = vld [vmem:[%s20161_s0 + $0x5ec] sm:$0xf0]  ;;  %20166 = vst [vmem:[#allocation16_spill] sm:$0xff] %v12964_v51  ;;  %v12986_v63 = vor.u32 %v11931_v41, %v9970_v40  ;;  %2099 = vmatpush.bf16.msra.mxu2 %v12964_v51 }
  0x4e   : > { %v9954_v47 = vld [vmem:[%s20161_s0 + $0x5e0] sm:$0xf]  ;;  %v11895_v52 = vld [vmem:[%s20161_s0 + $0x4ec] sm:$0xf0]  ;;  %20168 = vst [vmem:[#allocation17_spill] sm:$0xff] %v12981_v55  ;;  %2118 = vmatpush.bf16.msra.mxu3 %v12981_v55 }
  0x4f   : > { %v800_v59 = vld [vmem:[%s12969_s27] sm:$0xff]  ;;  %20169 = vst [vmem:[#allocation18_spill] sm:$0xff] %v12986_v63  ;;  %v802_v4 = vld [vmem:[%s12969_s27 + $0x10] sm:$0xff]  ;;  %v12996_v11 = vor.u32 %v11927_v48, %v9954_v47  ;;  %v13012_v24 = vor.u32 %v11895_v52, %v9826_v43 }
  0x50   : > { %v9938_v0 = vld [vmem:[%s20161_s0 + $0x5c0] sm:$0xf]  ;;  %v12991_v1 = vpack.c.bf16 %v807_v60, %v800_v59  ;;  %v13001_v14 = vpack.c.bf16 %v809_v6, %v802_v4  ;;  %v810_v19 = vld [vmem:[%s12969_s27 + $0x50] sm:$0xff]  ;;  %20172 = vst [vmem:[#allocation21_spill] sm:$0xff] %v13016_v26  ;;  %v11761_v36 = vld [vmem:[%s20161_s0 + $0xc4] sm:$0xf] }
  0x51   : > { %v808_v2 = vld [vmem:[%s12969_s27 + $0x40] sm:$0xff]  ;;  %20170 = vst [vmem:[#allocation19_spill] sm:$0xff] %v12996_v11  ;;  %v11923_v20 = vld [vmem:[%s20161_s0 + $0x5cc] sm:$0xf0]  ;;  %v13010_v22 = vpack.c.bf16 %v810_v19, %v803_v18  ;;  %2175 = vmatpush.bf16.msrb.mxu2 %v12986_v63  ;;  %2149 = vmatpush.bf16.msrb.mxu1 %v12996_v11  ;;  %v9300_v37 = vld [vmem:[%s20161_s0 + $0xd0] sm:$0xf0] }
  0x52   : > { %v12999_v13 = vpack.c.bf16 %v808_v2, %v801_v61  ;;  %20171 = vst [vmem:[#allocation20_spill] sm:$0xff] %v13012_v24  ;;  %v9810_v27 = vld [vmem:[%s20161_s0 + $0x4c0] sm:$0xf]  ;;  %v11891_v31 = vld [vmem:[%s20161_s0 + $0x4cc] sm:$0xf0]  ;;  %2062 = vmatmul.bf16.vlgmr.msra.gmra.mxu0 %v12991_v1  ;;  %v13026_v32 = vor.u32 %v11923_v20, %v9938_v0  ;;  %2100 = vmatmul.bf16.vlgmr.msra.gmra.mxu2 %v13001_v14 }
  0x53   : > { %v9922_v39 = vld [vmem:[%s20161_s0 + $0x5a0] sm:$0xf]  ;;  %v11919_v40 = vld [vmem:[%s20161_s0 + $0x5ac] sm:$0xf0]  ;;  %2119 = vmatmul.bf16.vlgmr.msra.gmra.mxu3 %v13010_v22  ;;  %2130 = vmatpush.bf16.msrb.mxu0 %v13012_v24  ;;  %v13044_v41 = vor.u32 %v11891_v31, %v9810_v27  ;;  %v13047_v43 = vor.u32 %v11761_v36, %v9300_v37  ;;  %v9284_v54 = vld [vmem:[%s20161_s0 + $0xb0] sm:$0xf0] }
  0x54   : > { %20173 = vst [vmem:[#allocation22_spill] sm:$0xff] %v13026_v32  ;;  %2081 = vmatmul.bf16.vlgmr.msra.gmra.mxu1 %v12999_v13  ;;  %2187 = vmatpush.bf16.msrb.mxu3 %v13016_v26  ;;  %v9794_v47 = vld [vmem:[%s20161_s0 + $0x4a0] sm:$0xf]  ;;  %v11887_v48 = vld [vmem:[%s20161_s0 + $0x4ac] sm:$0xf0]  ;;  %v13056_v52 = vor.u32 %v11919_v40, %v9922_v39  ;;  %v13077_v2 = vor.u32 %v11757_v53, %v9284_v54  ;;  %v821_v27 = vld [vmem:[%s12969_s27 + $0xa8] sm:$0xff] }
  0x55   : > { %20174 = vst [vmem:[#allocation23_spill] sm:$0xff] %v13044_v41  ;;  %2150 = vmatpush.bf16.msrb.mxu1 %v13026_v32  ;;  %v9906_v59 = vld [vmem:[%s20161_s0 + $0x580] sm:$0xf]  ;;  %v11915_v60 = vld [vmem:[%s20161_s0 + $0x58c] sm:$0xf0]  ;;  %v13071_v61 = vor.u32 %v11887_v48, %v9794_v47  ;;  %v815_v31 = vld [vmem:[%s12969_s27 + $0x78] sm:$0xff] }
  0x56   : > { %20175 = vst [vmem:[#allocation24_spill] sm:$0xff] %v13047_v43  ;;  %v9778_v0 = vld [vmem:[%s20161_s0 + $0x480] sm:$0xf]  ;;  %v11883_v4 = vld [vmem:[%s20161_s0 + $0x48c] sm:$0xf0]  ;;  %v13089_v19 = vor.u32 %v11915_v60, %v9906_v59  ;;  %v823_v48 = vld [vmem:[%s12969_s27 + $0xb8] sm:$0xff] }
  0x57   : > { %20176 = vst [vmem:[#allocation25_spill] sm:$0xff] %v13056_v52  ;;  %2131 = vmatpush.bf16.msrb.mxu0 %v13044_v41  ;;  %v11753_v6 = vld [vmem:[%s20161_s0 + $0x84] sm:$0xf]  ;;  %v9268_v18 = vld [vmem:[%s20161_s0 + $0x90] sm:$0xf0]  ;;  %v13102_v40 = vor.u32 %v11883_v4, %v9778_v0  ;;  %v817_v53 = vld [vmem:[%s12969_s27 + $0x88] sm:$0xff] }
  0x58   : > { %20177 = vst [vmem:[#allocation26_spill] sm:$0xff] %v13071_v61  ;;  %2188 = vmatpush.bf16.msrb.mxu3 %v13047_v43  ;;  %v814_v20 = vld [vmem:[%s12969_s27 + $0x70] sm:$0xff]  ;;  %v9890_v37 = vld [vmem:[%s20161_s0 + $0x560] sm:$0xf]  ;;  %v13108_v54 = vor.u32 %v11753_v6, %v9268_v18  ;;  %v11749_v6 = vld [vmem:[%s20161_s0 + $0x64] sm:$0xf] }
  0x59   : > { %20178 = vst [vmem:[#allocation27_spill] sm:$0xff] %v13077_v2  ;;  %2151 = vmatpush.bf16.msrb.mxu1 %v13056_v52  ;;  %v822_v36 = vld [vmem:[%s12969_s27 + $0xb0] sm:$0xff]  ;;  %v816_v47 = vld [vmem:[%s12969_s27 + $0x80] sm:$0xff]  ;;  %v13118_v0 = vpack.c.bf16 %v821_v27, %v814_v20  ;;  %v805_v32 = vld [vmem:[%s12969_s27 + $0x28] sm:$0xff] }
  0x5a   : > { %20179 = vst [vmem:[#allocation28_spill] sm:$0xff] %v13089_v19  ;;  %v11911_v39 = vld [vmem:[%s20161_s0 + $0x56c] sm:$0xf0]  ;;  %v824_v59 = vld [vmem:[%s12969_s27 + $0xc0] sm:$0xff]  ;;  %v9252_v18 = vld [vmem:[%s20161_s0 + $0x70] sm:$0xf0]  ;;  %v13133_v63 = vpack.c.bf16 %v823_v48, %v816_v47 }
  0x5b   : > { %2132 = vmatpush.bf16.msrb.mxu0 %v13071_v61  ;;  %20180 = vst [vmem:[#allocation29_spill] sm:$0xff] %v13102_v40  ;;  %v9762_v60 = vld [vmem:[%s20161_s0 + $0x460] sm:$0xf]  ;;  %v11879_v52 = vld [vmem:[%s20161_s0 + $0x46c] sm:$0xf0]  ;;  %v13120_v4 = vor.u32 %v11911_v39, %v9890_v37  ;;  %v13131_v61 = vpack.c.bf16 %v822_v36, %v815_v31  ;;  %v13145_v39 = vpack.c.bf16 %v824_v59, %v817_v53 }
  0x5c   : > { %2189 = vmatpush.bf16.msrb.mxu3 %v13077_v2  ;;  %20181 = vst [vmem:[#allocation30_spill] sm:$0xff] %v13108_v54  ;;  %v11861_v2 = vld [vmem:[%s20161_s0 + $0x3e4] sm:$0xf]  ;;  %v9874_v20 = vld [vmem:[%s20161_s0 + $0x540] sm:$0xf]  ;;  %v13147_v31 = vor.u32 %v11879_v52, %v9762_v60  ;;  %v13150_v36 = vor.u32 %v11749_v6, %v9252_v18 }
  0x5d   : > { %2152 = vmatpush.bf16.msrb.mxu1 %v13089_v19  ;;  %20182 = vst [vmem:[#allocation31_spill] sm:$0xff] %v13120_v4  ;;  %v11907_v27 = vld [vmem:[%s20161_s0 + $0x54c] sm:$0xf0]  ;;  %v9700_v37 = vld [vmem:[%s20161_s0 + $0x3f0] sm:$0xf0]  ;;  %v812_v41 = vld [vmem:[%s12969_s27 + $0x60] sm:$0xff] }
  0x5e   : > { %20183 = vst [vmem:[#allocation32_spill] sm:$0xff] %v13147_v31  ;;  %v9746_v47 = vld [vmem:[%s20161_s0 + $0x440] sm:$0xf]  ;;  %v11875_v48 = vld [vmem:[%s20161_s0 + $0x44c] sm:$0xf0]  ;;  %v13161_v53 = vor.u32 %v11861_v2, %v9700_v37  ;;  %v13165_v52 = vor.u32 %v11907_v27, %v9874_v20 }
  0x5f   : > { %2133 = vmatpush.bf16.msrb.mxu0 %v13102_v40  ;;  %20184 = vst [vmem:[#allocation33_spill] sm:$0xff] %v13150_v36  ;;  %v11745_v19 = vld [vmem:[%s20161_s0 + $0x44] sm:$0xf]  ;;  %v9236_v59 = vld [vmem:[%s20161_s0 + $0x50] sm:$0xf0]  ;;  %v13186_v20 = vor.u32 %v11875_v48, %v9746_v47 }
  0x60   : > { %2190 = vmatpush.bf16.msrb.mxu3 %v13108_v54  ;;  %20185 = vst [vmem:[#allocation34_spill] sm:$0xff] %v13161_v53  ;;  %v11857_v60 = vld [vmem:[%s20161_s0 + $0x3c4] sm:$0xf]  ;;  %v9684_v6 = vld [vmem:[%s20161_s0 + $0x3d0] sm:$0xf0]  ;;  %v13189_v27 = vor.u32 %v11745_v19, %v9236_v59  ;;  %2244 = vmatpush.bf16.msra.mxu2 %v13161_v53 }
  0x61   : > { %2153 = vmatpush.bf16.msrb.mxu1 %v13120_v4  ;;  %20186 = vst [vmem:[#allocation35_spill] sm:$0xff] %v13165_v52  ;;  %v9858_v2 = vld [vmem:[%s20161_s0 + $0x520] sm:$0xf]  ;;  %v11903_v18 = vld [vmem:[%s20161_s0 + $0x52c] sm:$0xf0]  ;;  %v13201_v47 = vor.u32 %v11857_v60, %v9684_v6 }
  0x62   : > { %2067 = vmatmul.bf16.gmra.mxu0 %v13118_v0  ;;  %2105 = vmatmul.bf16.gmra.mxu2 %v13133_v63  ;;  %20187 = vst [vmem:[#allocation36_spill] sm:$0xff] %v13186_v20  ;;  %v9730_v37 = vld [vmem:[%s20161_s0 + $0x420] sm:$0xf]  ;;  %v11871_v4 = vld [vmem:[%s20161_s0 + $0x42c] sm:$0xf0]  ;;  %v13204_v19 = vor.u32 %v11903_v18, %v9858_v2 }
  0x63   : > { %2124 = vmatmul.bf16.gmra.mxu3 %v13145_v39  ;;  %2134 = vmatpush.bf16.msrb.mxu0 %v13147_v31  ;;  %20188 = vst [vmem:[#allocation37_spill] sm:$0xff] %v13189_v27  ;;  %v11741_v54 = vld [vmem:[%s20161_s0 + $0x24] sm:$0xf]  ;;  %v9220_v48 = vld [vmem:[%s20161_s0 + $0x30] sm:$0xf0]  ;;  %v13222_v2 = vor.u32 %v11871_v4, %v9730_v37 }
  0x64   : > { %2086 = vmatmul.bf16.gmra.mxu1 %v13131_v61  ;;  %2191 = vmatpush.bf16.msrb.mxu3 %v13150_v36  ;;  %20189 = vst [vmem:[#allocation38_spill] sm:$0xff] %v13201_v47  ;;  %v11853_v59 = vld [vmem:[%s20161_s0 + $0x3a4] sm:$0xf]  ;;  %v9668_v36 = vld [vmem:[%s20161_s0 + $0x3b0] sm:$0xf0]  ;;  %v13234_v31 = vor.u32 %v11741_v54, %v9220_v48 }
  0x65   : > { %2154 = vmatpush.bf16.msrb.mxu1 %v13165_v52  ;;  %20190 = vst [vmem:[#allocation39_spill] sm:$0xff] %v13204_v19  ;;  %v9842_v60 = vld [vmem:[%s20161_s0 + $0x500] sm:$0xf]  ;;  %v11899_v6 = vld [vmem:[%s20161_s0 + $0x50c] sm:$0xf0]  ;;  %2245 = vmatpush.bf16.msra.mxu2 %v13201_v47  ;;  %v13246_v40 = vor.u32 %v11853_v59, %v9668_v36 }
  0x66   : > { %20191 = vst [vmem:[#allocation40_spill] sm:$0xff] %v13222_v2  ;;  %v9714_v18 = vld [vmem:[%s20161_s0 + $0x400] sm:$0xf]  ;;  %v11829_v53 = vld [vmem:[%s20161_s0 + $0x2e4] sm:$0xf]  ;;  %v13249_v54 = vor.u32 %v11899_v6, %v9842_v60 }
  0x67   : > { %2135 = vmatpush.bf16.msrb.mxu0 %v13186_v20  ;;  %v9572_v52 = vld [vmem:[%s20161_s0 + $0x2f0] sm:$0xf0]  ;;  %20192 = vst [vmem:[#allocation41_spill] sm:$0xff] %v13234_v31  ;;  %v11867_v4 = vld [vmem:[%s20161_s0 + $0x40c] sm:$0xf0]  ;;  %v804_v48 = vld [vmem:[%s12969_s27 + $0x20] sm:$0xff] }
  0x68   : > { %2192 = vmatpush.bf16.msrb.mxu3 %v13189_v27  ;;  %v11737_v37 = vld [vmem:[%s20161_s0 + $0x4] sm:$0xf]  ;;  %v9204_v20 = vld [vmem:[%s20161_s0 + $0x10] sm:$0xf0]  ;;  %20193 = vst [vmem:[#allocation42_spill] sm:$0xff] %v13246_v40  ;;  %v811_v27 = vld [vmem:[%s12969_s27 + $0x58] sm:$0xff]  ;;  %v13262_v59 = vor.u32 %v11829_v53, %v9572_v52 }
  0x69   : > { %2155 = vmatpush.bf16.msrb.mxu1 %v13204_v19  ;;  %20194 = vst [vmem:[#allocation43_spill] sm:$0xff] %v13249_v54  ;;  %v11797_v51 = vld [vmem:[%s20161_s0 + $0x1e4] sm:$0xf]  ;;  %v9444_v43 = vld [vmem:[%s20161_s0 + $0x1f0] sm:$0xf0]  ;;  %v13274_v19 = vor.u32 %v11867_v4, %v9714_v18  ;;  %v13280_v52 = vor.u32 %v11737_v37, %v9204_v20  ;;  %2246 = vmatpush.bf16.msra.mxu2 %v13246_v40 }
  0x6a   : > { %v11893_v36 = vld [vmem:[%s20161_s0 + $0x4e4] sm:$0xf]  ;;  %20195 = vst [vmem:[#allocation44_spill] sm:$0xff] %v13262_v59  ;;  %v9828_v60 = vld [vmem:[%s20161_s0 + $0x4f0] sm:$0xf0]  ;;  %v13283_v26 = vor.u32 %v11797_v51, %v9444_v43  ;;  %v13306_v37 = vpack.c.bf16 %v811_v27, %v804_v48  ;;  %v13308_v40 = vpack.c.bf16 %v812_v41, %v805_v32 }
  0x6b   : > { %v11849_v6 = vld [vmem:[%s20161_s0 + $0x384] sm:$0xf]  ;;  %v9652_v47 = vld [vmem:[%s20161_s0 + $0x390] sm:$0xf0]  ;;  %2136 = vmatpush.bf16.msrb.mxu0 %v13222_v2  ;;  %20196 = vst [vmem:[#allocation45_spill] sm:$0xff] %v13274_v19  ;;  %v13293_v18 = vor.u32 %v11893_v36, %v9828_v60 }
  0x6c   : > { %v806_v53 = vld [vmem:[%s12969_s27 + $0x30] sm:$0xff]  ;;  %2193 = vmatpush.bf16.msrb.mxu3 %v13234_v31  ;;  %20197 = vst [vmem:[#allocation46_spill] sm:$0xff] %v13280_v52  ;;  %v11793_v11 = vld [vmem:[%s20161_s0 + $0x1c4] sm:$0xf]  ;;  %v13304_v4 = vor.u32 %v11849_v6, %v9652_v47 }
  0x6d   : > { %20198 = vst [vmem:[#allocation47_spill] sm:$0xff] %v13283_v26  ;;  %v9428_v2 = vld [vmem:[%s20161_s0 + $0x1d0] sm:$0xf0]  ;;  %2156 = vmatpush.bf16.msrb.mxu1 %v13249_v54  ;;  %v11825_v20 = vld [vmem:[%s20161_s0 + $0x2c4] sm:$0xf]  ;;  %v13321_v27 = vpack.c.bf16 %v813_v30, %v806_v53 }
  0x6e   : > { %20199 = vst [vmem:[#allocation48_spill] sm:$0xff] %v13293_v18  ;;  %v9556_v51 = vld [vmem:[%s20161_s0 + $0x2d0] sm:$0xf0]  ;;  %v11889_v43 = vld [vmem:[%s20161_s0 + $0x4c4] sm:$0xf]  ;;  %v13325_v32 = vor.u32 %v11793_v11, %v9428_v2  ;;  %2247 = vmatpush.bf16.msra.mxu2 %v13304_v4 }
  0x6f   : > { %20200 = vst [vmem:[#allocation49_spill] sm:$0xff] %v13304_v4  ;;  %v9812_v36 = vld [vmem:[%s20161_s0 + $0x4d0] sm:$0xf0]  ;;  %v11845_v60 = vld [vmem:[%s20161_s0 + $0x364] sm:$0xf]  ;;  %2137 = vmatpush.bf16.msrb.mxu0 %v13274_v19  ;;  %v13327_v41 = vor.u32 %v11825_v20, %v9556_v51 }
  0x70   : > { %v9636_v54 = vld [vmem:[%s20161_s0 + $0x370] sm:$0xf0]  ;;  %2194 = vmatpush.bf16.msrb.mxu3 %v13280_v52  ;;  %20201 = vst [vmem:[#allocation50_spill] sm:$0xff] %v13325_v32  ;;  %v11789_v47 = vld [vmem:[%s20161_s0 + $0x1a4] sm:$0xf]  ;;  %v13336_v30 = vor.u32 %v11889_v43, %v9812_v36 }
  0x71   : > { %2225 = vmatpush.bf16.msra.mxu1 %v13262_v59  ;;  %20202 = vst [vmem:[#allocation51_spill] sm:$0xff] %v13327_v41  ;;  %v9412_v48 = vld [vmem:[%s20161_s0 + $0x1b0] sm:$0xf0]  ;;  %v11821_v6 = vld [vmem:[%s20161_s0 + $0x2a4] sm:$0xf]  ;;  %v13348_v53 = vor.u32 %v11845_v60, %v9636_v54  ;;  %v819_v59 = vld [vmem:[%s12969_s27 + $0x98] sm:$0xff] }
  0x72   : > { %20203 = vst [vmem:[#allocation52_spill] sm:$0xff] %v13336_v30  ;;  %v9540_v11 = vld [vmem:[%s20161_s0 + $0x2b0] sm:$0xf0]  ;;  %v11885_v2 = vld [vmem:[%s20161_s0 + $0x4a4] sm:$0xf]  ;;  %2138 = vmatmul.bf16.vlgmr.msrb.gmra.mxu0 %v13306_v37  ;;  %9984 = vmatmul.msk.bf16.vlgmr.msrb.gmra.mxu2 %vm2047_vm0, %v13321_v27  ;;  %v13366_v54 = vor.u32 %v11789_v47, %v9412_v48 }
  0x73   : > { %2206 = vmatpush.bf16.msra.mxu0 %v13283_v26  ;;  %20204 = vst [vmem:[#allocation53_spill] sm:$0xff] %v13348_v53  ;;  %v9796_v20 = vld [vmem:[%s20161_s0 + $0x4b0] sm:$0xf0]  ;;  %v11841_v51 = vld [vmem:[%s20161_s0 + $0x344] sm:$0xf]  ;;  %2195 = vmatmul.bf16.vlgmr.msrb.gmra.mxu3 %v12991_v1  ;;  %v13368_v36 = vor.u32 %v11821_v6, %v9540_v11 }
  0x74   : > { %2263 = vmatpush.bf16.msra.mxu3 %v13293_v18  ;;  %2157 = vmatmul.bf16.vlgmr.msrb.gmra.mxu1 %v13308_v40  ;;  %v9620_v43 = vld [vmem:[%s20161_s0 + $0x350] sm:$0xf0]  ;;  %20205 = vst [vmem:[#allocation54_spill] sm:$0xff] %v13366_v54  ;;  %v11785_v60 = vld [vmem:[%s20161_s0 + $0x184] sm:$0xf]  ;;  %v13377_v18 = vor.u32 %v11885_v2, %v9796_v20 }
  0x75   : > { %2226 = vmatpush.bf16.msra.mxu1 %v13327_v41  ;;  %20206 = vst [vmem:[#allocation55_spill] sm:$0xff] %v13368_v36  ;;  %v9396_v4 = vld [vmem:[%s20161_s0 + $0x190] sm:$0xf0]  ;;  %v11817_v41 = vld [vmem:[%s20161_s0 + $0x284] sm:$0xf]  ;;  %2248 = vmatpush.bf16.msra.mxu2 %v13348_v53  ;;  %v13389_v6 = vor.u32 %v11841_v51, %v9620_v43 }
  0x76   : > { %20207 = vst [vmem:[#allocation56_spill] sm:$0xff] %v13377_v18  ;;  %v9524_v47 = vld [vmem:[%s20161_s0 + $0x290] sm:$0xf0]  ;;  %v11881_v48 = vld [vmem:[%s20161_s0 + $0x484] sm:$0xf] }
  0x77   : > { %2207 = vmatpush.bf16.msra.mxu0 %v13325_v32  ;;  %20208 = vst [vmem:[#allocation57_spill] sm:$0xff] %v13389_v6  ;;  %v9780_v11 = vld [vmem:[%s20161_s0 + $0x490] sm:$0xf0]  ;;  %v11837_v2 = vld [vmem:[%s20161_s0 + $0x324] sm:$0xf]  ;;  %v13404_v51 = vor.u32 %v11817_v41, %v9524_v47 }
  0x78   : > { %2264 = vmatpush.bf16.msra.mxu3 %v13336_v30  ;;  %v9604_v20 = vld [vmem:[%s20161_s0 + $0x330] sm:$0xf0]  ;;  %v13402_v30 = vor.u32 %v11785_v60, %v9396_v4  ;;  %v11781_v43 = vld [vmem:[%s20161_s0 + $0x164] sm:$0xf]  ;;  %v825_v60 = vld [vmem:[%s12969_s27 + $0xc8] sm:$0xff] }
  0x79   : > { %2227 = vmatpush.bf16.msra.mxu1 %v13368_v36  ;;  %20210 = vst [vmem:[#allocation59_spill] sm:$0xff] %v13404_v51  ;;  %v9380_v53 = vld [vmem:[%s20161_s0 + $0x170] sm:$0xf0]  ;;  %v11813_v41 = vld [vmem:[%s20161_s0 + $0x264] sm:$0xf]  ;;  %2249 = vmatpush.bf16.msra.mxu2 %v13389_v6 }
  0x7a   : > { %20209 = vst [vmem:[#allocation58_spill] sm:$0xff] %v13402_v30  ;;  %v818_v4 = vld [vmem:[%s12969_s27 + $0x90] sm:$0xff]  ;;  %v11877_v36 = vld [vmem:[%s20161_s0 + $0x464] sm:$0xf] }
  0x7b   : > { %2208 = vmatpush.bf16.msra.mxu0 %v13366_v54  ;;  %v13413_v54 = vor.u32 %v11881_v48, %v9780_v11  ;;  %v9508_v47 = vld [vmem:[%s20161_s0 + $0x270] sm:$0xf0]  ;;  %v11833_v11 = vld [vmem:[%s20161_s0 + $0x304] sm:$0xf] }
  0x7c   : > { %2265 = vmatpush.bf16.msra.mxu3 %v13377_v18  ;;  %v13427_v18 = vor.u32 %v11837_v2, %v9604_v20  ;;  %v9764_v48 = vld [vmem:[%s20161_s0 + $0x470] sm:$0xf0]  ;;  %v820_v52 = vld [vmem:[%s12969_s27 + $0xa0] sm:$0xff]  ;;  %v827_v2 = vld [vmem:[%s12969_s27 + $0xd8] sm:$0xff]  ;;  %v13444_v20 = vor.u32 %v11781_v43, %v9380_v53  ;;  %v13446_v6 = vor.u32 %v11813_v41, %v9508_v47  ;;  %v13469_v47 = vpack.c.bf16 %v825_v60, %v818_v4 }
  0x7d   : > { %20211 = vst [vmem:[#allocation60_spill] sm:$0xff] %v13413_v54  ;;  %v9588_v32 = vld [vmem:[%s20161_s0 + $0x310] sm:$0xf0]  ;;  %2228 = vmatpush.bf16.msra.mxu1 %v13404_v51  ;;  %v11777_v19 = vld [vmem:[%s20161_s0 + $0x144] sm:$0xf]  ;;  %v13455_v24 = vor.u32 %v11877_v36, %v9764_v48  ;;  %v13482_v55 = vpack.c.bf16 %v827_v2, %v820_v52 }
  0x7e   : > { %20212 = vst [vmem:[#allocation61_spill] sm:$0xff] %v13427_v18  ;;  %v826_v26 = vld [vmem:[%s12969_s27 + $0xd0] sm:$0xff]  ;;  %v11809_v51 = vld [vmem:[%s20161_s0 + $0x244] sm:$0xf]  ;;  %2250 = vmatpush.bf16.msra.mxu2 %v13427_v18  ;;  %v13467_v41 = vor.u32 %v11833_v11, %v9588_v32  ;;  %v9306_v2 = vld [vmem:[%s20161_s0 + $0xc8] sm:$0xf] }
  0x7f   : > { %2209 = vmatpush.bf16.msra.mxu0 %v13402_v30  ;;  %20213 = vst [vmem:[#allocation62_spill] sm:$0xff] %v13444_v20  ;;  %v9364_v31 = vld [vmem:[%s20161_s0 + $0x150] sm:$0xf0]  ;;  %v11873_v43 = vld [vmem:[%s20161_s0 + $0x444] sm:$0xf]  ;;  %v13471_v36 = vpack.c.bf16 %v826_v26, %v819_v59 }
  0x80   : > { %20214 = vst [vmem:[#allocation63_spill] sm:$0xff] %v13446_v6  ;;  %2266 = vmatpush.bf16.msra.mxu3 %v13413_v54  ;;  %v9492_v53 = vld [vmem:[%s20161_s0 + $0x250] sm:$0xf0]  ;;  %v9322_v54 = vld [vmem:[%s20161_s0 + $0xe8] sm:$0xf]  ;;  %v13486_v26 = vor.u32 %v11777_v19, %v9364_v31 }
  0x81   : > { %20215 = vst [vmem:[#allocation64_spill] sm:$0xff] %v13455_v24  ;;  %v9748_v48 = vld [vmem:[%s20161_s0 + $0x450] sm:$0xf0]  ;;  %v11768_v30 = vld [vmem:[%s20161_s0 + $0xf4] sm:$0xf0]  ;;  %2229 = vmatpush.bf16.msra.mxu1 %v13446_v6  ;;  %v13488_v59 = vor.u32 %v11809_v51, %v9492_v53 }
  0x82   : > { %20216 = vst [vmem:[#allocation65_spill] sm:$0xff] %v13467_v41  ;;  %v11773_v32 = vld [vmem:[%s20161_s0 + $0x124] sm:$0xf]  ;;  %v9348_v4 = vld [vmem:[%s20161_s0 + $0x130] sm:$0xf0]  ;;  %v13497_v52 = vor.u32 %v11873_v43, %v9748_v48  ;;  %2251 = vmatpush.bf16.msra.mxu2 %v13467_v41  ;;  %v13509_v51 = vor.u32 %v11768_v30, %v9322_v54  ;;  %2143 = vmatmul.bf16.gmra.mxu0 %v13469_v47 }
  0x83   : > { %2210 = vmatpush.bf16.msra.mxu0 %v13444_v20  ;;  %20217 = vst [vmem:[#allocation66_spill] sm:$0xff] %v13486_v26  ;;  %v11805_v60 = vld [vmem:[%s20161_s0 + $0x224] sm:$0xf]  ;;  %v9476_v31 = vld [vmem:[%s20161_s0 + $0x230] sm:$0xf0]  ;;  %9985 = vmatmul.msk.bf16.gmra.mxu2 %vm2047_vm0, %v13482_v55  ;;  %v13527_v30 = vor.u32 %v11773_v32, %v9348_v4 }
  0x84   : > { %20218 = vst [vmem:[#allocation67_spill] sm:$0xff] %v13488_v59  ;;  %2267 = vmatpush.bf16.msra.mxu3 %v13455_v24  ;;  %v11869_v19 = vld [vmem:[%s20161_s0 + $0x424] sm:$0xf]  ;;  %2162 = vmatmul.bf16.gmra.mxu1 %v13471_v36  ;;  %v9732_v11 = vld [vmem:[%s20161_s0 + $0x430] sm:$0xf0]  ;;  %v13529_v54 = vor.u32 %v11805_v60, %v9476_v31 }
  0x85   : > { %20219 = vst [vmem:[#allocation68_spill] sm:$0xff] %v13497_v52  ;;  %v11764_v53 = vld [vmem:[%s20161_s0 + $0xd4] sm:$0xf0]  ;;  %2200 = vmatmul.bf16.gmra.mxu3 %v13118_v0  ;;  %2230 = vmatpush.bf16.msra.mxu1 %v13488_v59  ;;  %v11769_v43 = vld [vmem:[%s20161_s0 + $0x104] sm:$0xf]  ;;  %v13541_v18 = vor.u32 %v11869_v19, %v9732_v11 }
  0x86   : > { %20220 = vst [vmem:[#allocation69_spill] sm:$0xff] %v13509_v51  ;;  %v9332_v48 = vld [vmem:[%s20161_s0 + $0x110] sm:$0xf0]  ;;  %v11801_v41 = vld [vmem:[%s20161_s0 + $0x204] sm:$0xf]  ;;  %2320 = vmatpush.bf16.msrb.mxu2 %v13509_v51  ;;  %v13553_v31 = vor.u32 %v11764_v53, %v9306_v2 }
  0x87   : > { %2211 = vmatpush.bf16.msra.mxu0 %v13486_v26  ;;  %20221 = vst [vmem:[#allocation70_spill] sm:$0xff] %v13527_v30  ;;  %v9460_v32 = vld [vmem:[%s20161_s0 + $0x210] sm:$0xf0]  ;;  %v11865_v4 = vld [vmem:[%s20161_s0 + $0x404] sm:$0xf]  ;;  %v13575_v51 = vor.u32 %v11769_v43, %v9332_v48 }
  0x88   : > { %20222 = vst [vmem:[#allocation71_spill] sm:$0xff] %v13529_v54  ;;  %2268 = vmatpush.bf16.msra.mxu3 %v13497_v52  ;;  %v9716_v60 = vld [vmem:[%s20161_s0 + $0x410] sm:$0xf0]  ;;  %v11925_v19 = vld [vmem:[%s20161_s0 + $0x5e4] sm:$0xf]  ;;  %v13577_v26 = vor.u32 %v11801_v41, %v9460_v32 }
  0x89   : > { %20223 = vst [vmem:[#allocation72_spill] sm:$0xff] %v13541_v18  ;;  %v9956_v11 = vld [vmem:[%s20161_s0 + $0x5f0] sm:$0xf0]  ;;  %v9450_v52 = vld [vmem:[%s20161_s0 + $0x1e8] sm:$0xf]  ;;  %2231 = vmatpush.bf16.msra.mxu1 %v13529_v54  ;;  %v13586_v20 = vor.u32 %v11865_v4, %v9716_v60 }
  0x8a   : > { %20224 = vst [vmem:[#allocation73_spill] sm:$0xff] %v13553_v31  ;;  %v11800_v59 = vld [vmem:[%s20161_s0 + $0x1f4] sm:$0xf0]  ;;  %v11929_v2 = vld [vmem:[%s20161_s0 + $0x604] sm:$0xf]  ;;  %v13588_v49 = vor.u32 %v11925_v19, %v9956_v11  ;;  %2321 = vmatpush.bf16.msrb.mxu2 %v13553_v31 }
  0x8b   : > { %v9972_v53 = vld [vmem:[%s20161_s0 + $0x610] sm:$0xf0]  ;;  %2212 = vmatpush.bf16.msra.mxu0 %v13527_v30  ;;  %20225 = vst [vmem:[#allocation74_spill] sm:$0xff] %v13575_v51  ;;  %v9290_v24 = vld [vmem:[%s20161_s0 + $0xa8] sm:$0xf]  ;;  %v13591_v43 = vor.u32 %v11800_v59, %v9450_v52 }
  0x8c   : > { %20226 = vst [vmem:[#allocation75_spill] sm:$0xff] %v13577_v26  ;;  %v11760_v6 = vld [vmem:[%s20161_s0 + $0xb4] sm:$0xf0]  ;;  %2269 = vmatpush.bf16.msra.mxu3 %v13541_v18  ;;  %v13593_v41 = vor.u32 %v11929_v2, %v9972_v53  ;;  %v11921_v48 = vld [vmem:[%s20161_s0 + $0x5c4] sm:$0xf] }
  0x8d   : > { %20227 = vst [vmem:[#allocation76_spill] sm:$0xff] %v13586_v20  ;;  %v9940_v32 = vld [vmem:[%s20161_s0 + $0x5d0] sm:$0xf0]  ;;  %v13601_v54 = vor.u32 %v11760_v6, %v9290_v24  ;;  %2232 = vmatpush.bf16.msra.mxu1 %v13577_v26  ;;  %v9434_v59 = vld [vmem:[%s20161_s0 + $0x1c8] sm:$0xf] }
  0x8e   : > { %20228 = vst [vmem:[#allocation77_spill] sm:$0xff] %v13588_v49  ;;  %v13610_v52 = vor.u32 %v11921_v48, %v9940_v32  ;;  %v11796_v4 = vld [vmem:[%s20161_s0 + $0x1d4] sm:$0xf0]  ;;  %v9274_v24 = vld [vmem:[%s20161_s0 + $0x88] sm:$0xf] }
  0x8f   : > { %20229 = vst [vmem:[#allocation78_spill] sm:$0xff] %v13591_v43  ;;  %2213 = vmatpush.bf16.msra.mxu0 %v13575_v51  ;;  %v11756_v6 = vld [vmem:[%s20161_s0 + $0x94] sm:$0xf0]  ;;  %v11917_v60 = vld [vmem:[%s20161_s0 + $0x5a4] sm:$0xf]  ;;  %2322 = vmatpush.bf16.msrb.mxu2 %v13601_v54  ;;  %v13630_v11 = vor.u32 %v11796_v4, %v9434_v59 }
  0x90   : > { %20230 = vst [vmem:[#allocation79_spill] sm:$0xff] %v13593_v41  ;;  %2270 = vmatpush.bf16.msra.mxu3 %v13586_v20  ;;  %v9924_v19 = vld [vmem:[%s20161_s0 + $0x5b0] sm:$0xf0]  ;;  %v9418_v2 = vld [vmem:[%s20161_s0 + $0x1a8] sm:$0xf]  ;;  %v13638_v48 = vor.u32 %v11756_v6, %v9274_v24 }
  0x91   : > { %20231 = vst [vmem:[#allocation80_spill] sm:$0xff] %v13601_v54  ;;  %2308 = vmatpush.bf16.msrb.mxu1 %v13593_v41  ;;  %v11792_v53 = vld [vmem:[%s20161_s0 + $0x1b4] sm:$0xf0]  ;;  %v13641_v32 = vor.u32 %v11917_v60, %v9924_v19  ;;  %v11913_v54 = vld [vmem:[%s20161_s0 + $0x584] sm:$0xf] }
  0x92   : > { %20232 = vst [vmem:[#allocation81_spill] sm:$0xff] %v13610_v52  ;;  %v9258_v59 = vld [vmem:[%s20161_s0 + $0x68] sm:$0xf]  ;;  %v11752_v4 = vld [vmem:[%s20161_s0 + $0x74] sm:$0xf0]  ;;  %2214 = vmatmul.bf16.vlgmr.msra.gmra.mxu0 %v12999_v13 }
  0x93   : > { %2282 = vmatpush.bf16.msrb.mxu0 %v13588_v49  ;;  %20233 = vst [vmem:[#allocation82_spill] sm:$0xff] %v13630_v11  ;;  %v9908_v24 = vld [vmem:[%s20161_s0 + $0x590] sm:$0xf0]  ;;  %v9706_v6 = vld [vmem:[%s20161_s0 + $0x3e8] sm:$0xf]  ;;  %2252 = vmatmul.bf16.vlgmr.msra.gmra.mxu2 %v13010_v22 }
  0x94   : > { %2339 = vmatpush.bf16.msrb.mxu3 %v13591_v43  ;;  %20234 = vst [vmem:[#allocation83_spill] sm:$0xff] %v13638_v48  ;;  %2233 = vmatmul.bf16.vlgmr.msra.gmra.mxu1 %v13001_v14  ;;  %v11864_v60 = vld [vmem:[%s20161_s0 + $0x3f4] sm:$0xf0]  ;;  %v9402_v31 = vld [vmem:[%s20161_s0 + $0x188] sm:$0xf]  ;;  %v13677_v43 = vor.u32 %v11752_v4, %v9258_v59 }
  0x95   : > { %20235 = vst [vmem:[#allocation84_spill] sm:$0xff] %v13641_v32  ;;  %2271 = vmatmul.bf16.vlgmr.msra.gmra.mxu3 %v13306_v37  ;;  %v13665_v19 = vor.u32 %v11864_v60, %v9706_v6  ;;  %2323 = vmatpush.bf16.msrb.mxu2 %v13638_v48  ;;  %v11788_v41 = vld [vmem:[%s20161_s0 + $0x194] sm:$0xf0]  ;;  %v9242_v6 = vld [vmem:[%s20161_s0 + $0x48] sm:$0xf] }
  0x96   : > { %20238 = vst [vmem:[#allocation87_spill] sm:$0xff] %v13677_v43  ;;  %v9690_v60 = vld [vmem:[%s20161_s0 + $0x3c8] sm:$0xf]  ;;  %v11860_v59 = vld [vmem:[%s20161_s0 + $0x3d4] sm:$0xf0]  ;;  %v13707_v48 = vor.u32 %v11788_v41, %v9402_v31 }
  0x97   : > { %2283 = vmatpush.bf16.msrb.mxu0 %v13610_v52  ;;  %20236 = vst [vmem:[#allocation85_spill] sm:$0xff] %v13665_v19  ;;  %v13668_v52 = vor.u32 %v11792_v53, %v9418_v2  ;;  %v13683_v2 = vor.u32 %v11913_v54, %v9908_v24  ;;  %v11748_v53 = vld [vmem:[%s20161_s0 + $0x54] sm:$0xf0]  ;;  %2377 = vmatpush.bf16.msra.mxu1 %v13665_v19  ;;  %v11909_v4 = vld [vmem:[%s20161_s0 + $0x564] sm:$0xf] }
  0x98   : > { %2340 = vmatpush.bf16.msrb.mxu3 %v13630_v11  ;;  %v9892_v54 = vld [vmem:[%s20161_s0 + $0x570] sm:$0xf0]  ;;  %v13701_v24 = vor.u32 %v11860_v59, %v9690_v60  ;;  %v9674_v19 = vld [vmem:[%s20161_s0 + $0x3a8] sm:$0xf]  ;;  %20241 = vst [vmem:[#allocation90_spill] sm:$0xff] %v13707_v48  ;;  %v13716_v60 = vor.u32 %v11748_v53, %v9242_v6 }
  0x99   : > { %20237 = vst [vmem:[#allocation86_spill] sm:$0xff] %v13668_v52  ;;  %2324 = vmatpush.bf16.msrb.mxu2 %v13677_v43  ;;  %v11784_v11 = vld [vmem:[%s20161_s0 + $0x174] sm:$0xf0]  ;;  %v13722_v31 = vor.u32 %v11909_v4, %v9892_v54  ;;  %v11905_v41 = vld [vmem:[%s20161_s0 + $0x544] sm:$0xf] }
  0x9a   : > { %20239 = vst [vmem:[#allocation88_spill] sm:$0xff] %v13683_v2  ;;  %v11856_v59 = vld [vmem:[%s20161_s0 + $0x3b4] sm:$0xf0]  ;;  %v9226_v43 = vld [vmem:[%s20161_s0 + $0x28] sm:$0xf] }
  0x9b   : > { %2284 = vmatpush.bf16.msrb.mxu0 %v13641_v32  ;;  %20240 = vst [vmem:[#allocation89_spill] sm:$0xff] %v13701_v24  ;;  %v9386_v32 = vld [vmem:[%s20161_s0 + $0x168] sm:$0xf]  ;;  %v11744_v6 = vld [vmem:[%s20161_s0 + $0x34] sm:$0xf0]  ;;  %2378 = vmatpush.bf16.msra.mxu1 %v13701_v24  ;;  %v13734_v53 = vor.u32 %v11856_v59, %v9674_v19 }
  0x9c   : > { %2341 = vmatpush.bf16.msrb.mxu3 %v13668_v52  ;;  %20242 = vst [vmem:[#allocation91_spill] sm:$0xff] %v13716_v60  ;;  %v9876_v4 = vld [vmem:[%s20161_s0 + $0x550] sm:$0xf0]  ;;  %v9658_v54 = vld [vmem:[%s20161_s0 + $0x388] sm:$0xf]  ;;  %v13746_v52 = vor.u32 %v11784_v11, %v9386_v32  ;;  %v13755_v24 = vor.u32 %v11744_v6, %v9226_v43 }
  0x9d   : > { %20243 = vst [vmem:[#allocation92_spill] sm:$0xff] %v13722_v31  ;;  %2325 = vmatpush.bf16.msrb.mxu2 %v13716_v60  ;;  %v9370_v19 = vld [vmem:[%s20161_s0 + $0x148] sm:$0xf]  ;;  %v11780_v59 = vld [vmem:[%s20161_s0 + $0x154] sm:$0xf0]  ;;  %v13758_v49 = vor.u32 %v11905_v41, %v9876_v4 }
  0x9e   : > { %20244 = vst [vmem:[#allocation93_spill] sm:$0xff] %v13734_v53  ;;  %v11901_v11 = vld [vmem:[%s20161_s0 + $0x524] sm:$0xf]  ;;  %v9210_v32 = vld [vmem:[%s20161_s0 + $0x8] sm:$0xf] }
  0x9f   : > { %2285 = vmatpush.bf16.msrb.mxu0 %v13683_v2  ;;  %v11852_v2 = vld [vmem:[%s20161_s0 + $0x394] sm:$0xf0]  ;;  %20245 = vst [vmem:[#allocation94_spill] sm:$0xff] %v13746_v52  ;;  %2379 = vmatpush.bf16.msra.mxu1 %v13734_v53  ;;  %v9860_v41 = vld [vmem:[%s20161_s0 + $0x530] sm:$0xf0] }
  0xa0   : > { %2342 = vmatpush.bf16.msrb.mxu3 %v13707_v48  ;;  %20246 = vst [vmem:[#allocation95_spill] sm:$0xff] %v13755_v24  ;;  %v11740_v60 = vld [vmem:[%s20161_s0 + $0x14] sm:$0xf0]  ;;  %v13770_v43 = vor.u32 %v11852_v2, %v9658_v54  ;;  %v9834_v6 = vld [vmem:[%s20161_s0 + $0x4e8] sm:$0xf]  ;;  %v13794_v48 = vor.u32 %v11901_v11, %v9860_v41 }
  0xa1   : > { %20247 = vst [vmem:[#allocation96_spill] sm:$0xff] %v13758_v49  ;;  %v11896_v4 = vld [vmem:[%s20161_s0 + $0x4f4] sm:$0xf0]  ;;  %2326 = vmatpush.bf16.msrb.mxu2 %v13755_v24  ;;  %v9354_v2 = vld [vmem:[%s20161_s0 + $0x128] sm:$0xf]  ;;  %v13791_v53 = vor.u32 %v11740_v60, %v9210_v32 }
  0xa2   : > { %20248 = vst [vmem:[#allocation97_spill] sm:$0xff] %v13770_v43  ;;  %v11776_v54 = vld [vmem:[%s20161_s0 + $0x134] sm:$0xf0]  ;;  %v13802_v24 = vor.u32 %v11896_v4, %v9834_v6  ;;  %2219 = vmatmul.bf16.gmra.mxu0 %v13131_v61  ;;  %v9642_v11 = vld [vmem:[%s20161_s0 + $0x368] sm:$0xf] }
  0xa3   : > { %2286 = vmatpush.bf16.msrb.mxu0 %v13722_v31  ;;  %v13782_v31 = vor.u32 %v11780_v59, %v9370_v19  ;;  %20250 = vst [vmem:[#allocation99_spill] sm:$0xff] %v13791_v53  ;;  %v11897_v19 = vld [vmem:[%s20161_s0 + $0x504] sm:$0xf]  ;;  %v9844_v59 = vld [vmem:[%s20161_s0 + $0x510] sm:$0xf0]  ;;  %2380 = vmatpush.bf16.msra.mxu1 %v13770_v43  ;;  %v13830_v43 = vor.u32 %v11776_v54, %v9354_v2 }
  0xa4   : > { %2343 = vmatpush.bf16.msrb.mxu3 %v13746_v52  ;;  %20251 = vst [vmem:[#allocation100_spill] sm:$0xff] %v13794_v48  ;;  %v9818_v52 = vld [vmem:[%s20161_s0 + $0x4c8] sm:$0xf]  ;;  %2238 = vmatmul.bf16.gmra.mxu1 %v13133_v63  ;;  %v11892_v60 = vld [vmem:[%s20161_s0 + $0x4d4] sm:$0xf0]  ;;  %v13840_v26 = vor.u32 %v11897_v19, %v9844_v59 }
  0xa5   : > { %20249 = vst [vmem:[#allocation98_spill] sm:$0xff] %v13782_v31  ;;  %v11848_v32 = vld [vmem:[%s20161_s0 + $0x374] sm:$0xf0]  ;;  %2257 = vmatmul.bf16.gmra.mxu2 %v13145_v39  ;;  %2276 = vmatmul.bf16.gmra.mxu3 %v13469_v47  ;;  %v9578_v41 = vld [vmem:[%s20161_s0 + $0x2e8] sm:$0xf]  ;;  %v13846_v54 = vor.u32 %v11892_v60, %v9818_v52 }
  0xa6   : > { %20252 = vst [vmem:[#allocation101_spill] sm:$0xff] %v13802_v24  ;;  %v11832_v6 = vld [vmem:[%s20161_s0 + $0x2f4] sm:$0xf0]  ;;  %v13827_v4 = vor.u32 %v11848_v32, %v9642_v11  ;;  %2327 = vmatpush.bf16.msrb.mxu2 %v13791_v53  ;;  %v9962_v2 = vld [vmem:[%s20161_s0 + $0x5e8] sm:$0xf] }
  0xa7   : > { %2287 = vmatpush.bf16.msrb.mxu0 %v13758_v49  ;;  %20254 = vst [vmem:[#allocation103_spill] sm:$0xff] %v13830_v43  ;;  %v9338_v49 = vld [vmem:[%s20161_s0 + $0x108] sm:$0xf]  ;;  %v11772_v20 = vld [vmem:[%s20161_s0 + $0x114] sm:$0xf0]  ;;  %v13854_v53 = vor.u32 %v11832_v6, %v9578_v41 }
  0xa8   : > { %20253 = vst [vmem:[#allocation102_spill] sm:$0xff] %v13827_v4  ;;  %2344 = vmatpush.bf16.msrb.mxu3 %v13782_v31  ;;  %v9626_v11 = vld [vmem:[%s20161_s0 + $0x348] sm:$0xf]  ;;  %v11844_v32 = vld [vmem:[%s20161_s0 + $0x354] sm:$0xf0]  ;;  %2381 = vmatpush.bf16.msra.mxu1 %v13827_v4 }
  0xa9   : > { %20255 = vst [vmem:[#allocation104_spill] sm:$0xff] %v13840_v26  ;;  %v11928_v19 = vld [vmem:[%s20161_s0 + $0x5f4] sm:$0xf0]  ;;  %v9802_v59 = vld [vmem:[%s20161_s0 + $0x4a8] sm:$0xf]  ;;  %v13866_v60 = vor.u32 %v11844_v32, %v9626_v11 }
  0xaa   : > { %2396 = vmatpush.bf16.msra.mxu2 %v13802_v24  ;;  %20256 = vst [vmem:[#allocation105_spill] sm:$0xff] %v13846_v54  ;;  %v11888_v52 = vld [vmem:[%s20161_s0 + $0x4b4] sm:$0xf0]  ;;  %v9562_v41 = vld [vmem:[%s20161_s0 + $0x2c8] sm:$0xf]  ;;  %v13884_v32 = vor.u32 %v11928_v19, %v9962_v2 }
  0xab   : > { %2288 = vmatpush.bf16.msrb.mxu0 %v13794_v48  ;;  %20257 = vst [vmem:[#allocation106_spill] sm:$0xff] %v13854_v53  ;;  %v11828_v6 = vld [vmem:[%s20161_s0 + $0x2d4] sm:$0xf0]  ;;  %v9610_v24 = vld [vmem:[%s20161_s0 + $0x328] sm:$0xf]  ;;  %v13878_v48 = vor.u32 %v11772_v20, %v9338_v49  ;;  %v13890_v31 = vor.u32 %v11888_v52, %v9802_v59 }
  0xac   : > { %20258 = vst [vmem:[#allocation107_spill] sm:$0xff] %v13866_v60  ;;  %2345 = vmatpush.bf16.msrb.mxu3 %v13830_v43  ;;  %v11840_v11 = vld [vmem:[%s20161_s0 + $0x334] sm:$0xf0]  ;;  %v9946_v4 = vld [vmem:[%s20161_s0 + $0x5c8] sm:$0xf]  ;;  %v13893_v49 = vor.u32 %v11828_v6, %v9562_v41  ;;  %2382 = vmatpush.bf16.msra.mxu1 %v13866_v60 }
  0xad   : > { %20259 = vst [vmem:[#allocation108_spill] sm:$0xff] %v13878_v48  ;;  %v11924_v20 = vld [vmem:[%s20161_s0 + $0x5d4] sm:$0xf0]  ;;  %v9786_v2 = vld [vmem:[%s20161_s0 + $0x488] sm:$0xf]  ;;  %v13905_v59 = vor.u32 %v11840_v11, %v9610_v24 }
  0xae   : > { %20260 = vst [vmem:[#allocation109_spill] sm:$0xff] %v13884_v32  ;;  %2397 = vmatpush.bf16.msra.mxu2 %v13846_v54  ;;  %v11884_v19 = vld [vmem:[%s20161_s0 + $0x494] sm:$0xf0]  ;;  %v9546_v52 = vld [vmem:[%s20161_s0 + $0x2a8] sm:$0xf]  ;;  %v13915_v6 = vor.u32 %v11924_v20, %v9946_v4 }
  0xaf   : > { %2289 = vmatpush.bf16.msrb.mxu0 %v13840_v26  ;;  %20261 = vst [vmem:[#allocation110_spill] sm:$0xff] %v13890_v31  ;;  %v11824_v41 = vld [vmem:[%s20161_s0 + $0x2b4] sm:$0xf0]  ;;  %v9930_v24 = vld [vmem:[%s20161_s0 + $0x5a8] sm:$0xf]  ;;  %v13924_v60 = vor.u32 %v11884_v19, %v9786_v2 }
  0xb0   : > { %20262 = vst [vmem:[#allocation111_spill] sm:$0xff] %v13893_v49  ;;  %2346 = vmatpush.bf16.msrb.mxu3 %v13878_v48  ;;  %v11920_v11 = vld [vmem:[%s20161_s0 + $0x5b4] sm:$0xf0]  ;;  %v9594_v54 = vld [vmem:[%s20161_s0 + $0x308] sm:$0xf]  ;;  %2383 = vmatpush.bf16.msra.mxu1 %v13905_v59  ;;  %v13940_v19 = vor.u32 %v11824_v41, %v9546_v52 }
  0xb1   : > { %20263 = vst [vmem:[#allocation112_spill] sm:$0xff] %v13905_v59  ;;  %v9770_v4 = vld [vmem:[%s20161_s0 + $0x468] sm:$0xf]  ;;  %v11880_v20 = vld [vmem:[%s20161_s0 + $0x474] sm:$0xf0] }
  0xb2   : > { %20264 = vst [vmem:[#allocation113_spill] sm:$0xff] %v13915_v6  ;;  %2398 = vmatpush.bf16.msra.mxu2 %v13890_v31  ;;  %v11836_v2 = vld [vmem:[%s20161_s0 + $0x314] sm:$0xf0]  ;;  %v9530_v31 = vld [vmem:[%s20161_s0 + $0x288] sm:$0xf]  ;;  %v13960_v59 = vor.u32 %v11880_v20, %v9770_v4  ;;  %2290 = vmatmul.bf16.vlgmr.msrb.gmra.mxu0 %v13308_v40 }
  0xb3   : > { %2358 = vmatpush.bf16.msra.mxu0 %v13854_v53  ;;  %20265 = vst [vmem:[#allocation114_spill] sm:$0xff] %v13924_v60  ;;  %v13951_v53 = vor.u32 %v11920_v11, %v9930_v24  ;;  %v9914_v52 = vld [vmem:[%s20161_s0 + $0x588] sm:$0xf]  ;;  %v11916_v41 = vld [vmem:[%s20161_s0 + $0x594] sm:$0xf0] }
  0xb4   : > { %2415 = vmatpush.bf16.msra.mxu3 %v13884_v32  ;;  %20266 = vst [vmem:[#allocation115_spill] sm:$0xff] %v13940_v19  ;;  %v13948_v32 = vor.u32 %v11836_v2, %v9594_v54  ;;  %v11766_v54 = vld [vmem:[%s20161_s0 + $0xec] sm:$0xf]  ;;  %9986 = vmatmul.msk.bf16.vlgmr.msrb.gmra.mxu1 %vm2047_vm0, %v13321_v27  ;;  %v9754_v24 = vld [vmem:[%s20161_s0 + $0x448] sm:$0xf]  ;;  %v13992_v48 = vor.u32 %v11916_v41, %v9914_v52 }
  0xb5   : > { %20268 = vst [vmem:[#allocation117_spill] sm:$0xff] %v13951_v53  ;;  %v11876_v11 = vld [vmem:[%s20161_s0 + $0x454] sm:$0xf0]  ;;  %v9324_v4 = vld [vmem:[%s20161_s0 + $0xf8] sm:$0xf0]  ;;  %2328 = vmatmul.bf16.vlgmr.msrb.gmra.mxu2 %v12991_v1  ;;  %2347 = vmatmul.bf16.vlgmr.msrb.gmra.mxu3 %v12999_v13 }
  0xb6   : > { %20267 = vst [vmem:[#allocation116_spill] sm:$0xff] %v13948_v32  ;;  %2399 = vmatpush.bf16.msra.mxu2 %v13924_v60  ;;  %v13979_v20 = vor.u32 %v11766_v54, %v9324_v4  ;;  %v9514_v60 = vld [vmem:[%s20161_s0 + $0x268] sm:$0xf]  ;;  %2384 = vmatpush.bf16.msra.mxu1 %v13948_v32  ;;  %v14001_v54 = vor.u32 %v11876_v11, %v9754_v24  ;;  %v11762_v4 = vld [vmem:[%s20161_s0 + $0xcc] sm:$0xf] }
  0xb7   : > { %2359 = vmatpush.bf16.msra.mxu0 %v13893_v49  ;;  %v11820_v49 = vld [vmem:[%s20161_s0 + $0x294] sm:$0xf0]  ;;  %20269 = vst [vmem:[#allocation118_spill] sm:$0xff] %v13960_v59  ;;  %v9738_v52 = vld [vmem:[%s20161_s0 + $0x428] sm:$0xf] }
  0xb8   : > { %2416 = vmatpush.bf16.msra.mxu3 %v13915_v6  ;;  %20270 = vst [vmem:[#allocation119_spill] sm:$0xff] %v13979_v20  ;;  %v13982_v2 = vor.u32 %v11820_v49, %v9530_v31  ;;  %v11816_v6 = vld [vmem:[%s20161_s0 + $0x274] sm:$0xf0]  ;;  %v9898_v31 = vld [vmem:[%s20161_s0 + $0x568] sm:$0xf] }
  0xb9   : > { %20272 = vst [vmem:[#allocation121_spill] sm:$0xff] %v13992_v48  ;;  %v11912_v49 = vld [vmem:[%s20161_s0 + $0x574] sm:$0xf0]  ;;  %v9308_v32 = vld [vmem:[%s20161_s0 + $0xd8] sm:$0xf0]  ;;  %v14019_v11 = vor.u32 %v11816_v6, %v9514_v60 }
  0xba   : > { %20271 = vst [vmem:[#allocation120_spill] sm:$0xff] %v13982_v2  ;;  %2400 = vmatpush.bf16.msra.mxu2 %v13960_v59  ;;  %v11872_v41 = vld [vmem:[%s20161_s0 + $0x434] sm:$0xf0]  ;;  %2453 = vmatpush.bf16.msrb.mxu1 %v13979_v20  ;;  %v14016_v24 = vor.u32 %v11762_v4, %v9308_v32  ;;  %v9498_v59 = vld [vmem:[%s20161_s0 + $0x248] sm:$0xf]  ;;  %v14028_v20 = vor.u32 %v11912_v49, %v9898_v31 }
  0xbb   : > { %2360 = vmatpush.bf16.msra.mxu0 %v13940_v19  ;;  %20273 = vst [vmem:[#allocation122_spill] sm:$0xff] %v14001_v54  ;;  %v11812_v32 = vld [vmem:[%s20161_s0 + $0x254] sm:$0xf0]  ;;  %v9882_v60 = vld [vmem:[%s20161_s0 + $0x548] sm:$0xf]  ;;  %v14037_v6 = vor.u32 %v11872_v41, %v9738_v52 }
  0xbc   : > { %2417 = vmatpush.bf16.msra.mxu3 %v13951_v53  ;;  %20274 = vst [vmem:[#allocation123_spill] sm:$0xff] %v14016_v24  ;;  %v11758_v53 = vld [vmem:[%s20161_s0 + $0xac] sm:$0xf]  ;;  %v9292_v4 = vld [vmem:[%s20161_s0 + $0xb8] sm:$0xf0]  ;;  %v14055_v41 = vor.u32 %v11812_v32, %v9498_v59 }
  0xbd   : > { %20275 = vst [vmem:[#allocation124_spill] sm:$0xff] %v14019_v11  ;;  %v11908_v31 = vld [vmem:[%s20161_s0 + $0x554] sm:$0xf0]  ;;  %v9722_v49 = vld [vmem:[%s20161_s0 + $0x408] sm:$0xf]  ;;  %v14052_v52 = vor.u32 %v11758_v53, %v9292_v4 }
  0xbe   : > { %20276 = vst [vmem:[#allocation125_spill] sm:$0xff] %v14028_v20  ;;  %2401 = vmatpush.bf16.msra.mxu2 %v14001_v54  ;;  %v11868_v54 = vld [vmem:[%s20161_s0 + $0x414] sm:$0xf0]  ;;  %2454 = vmatpush.bf16.msrb.mxu1 %v14016_v24  ;;  %v14064_v19 = vor.u32 %v11908_v31, %v9882_v60  ;;  %v9866_v53 = vld [vmem:[%s20161_s0 + $0x528] sm:$0xf] }
  0xbf   : > { %2361 = vmatpush.bf16.msra.mxu0 %v13982_v2  ;;  %20277 = vst [vmem:[#allocation126_spill] sm:$0xff] %v14037_v6  ;;  %v11808_v2 = vld [vmem:[%s20161_s0 + $0x234] sm:$0xf0]  ;;  %v14070_v59 = vor.u32 %v11868_v54, %v9722_v49  ;;  %v11798_v32 = vld [vmem:[%s20161_s0 + $0x1ec] sm:$0xf] }
  0xc0   : > { %2418 = vmatpush.bf16.msra.mxu3 %v13992_v48  ;;  %20278 = vst [vmem:[#allocation127_spill] sm:$0xff] %v14052_v52  ;;  %v9482_v48 = vld [vmem:[%s20161_s0 + $0x228] sm:$0xf]  ;;  %v9452_v4 = vld [vmem:[%s20161_s0 + $0x1f8] sm:$0xf0] }
  0xc1   : > { %20279 = vst [vmem:[#allocation128_spill] sm:$0xff] %v14055_v41  ;;  %v11904_v60 = vld [vmem:[%s20161_s0 + $0x534] sm:$0xf0]  ;;  %v11754_v31 = vld [vmem:[%s20161_s0 + $0x8c] sm:$0xf]  ;;  %v14089_v49 = vor.u32 %v11808_v2, %v9482_v48 }
  0xc2   : > { %20280 = vst [vmem:[#allocation129_spill] sm:$0xff] %v14064_v19  ;;  %2402 = vmatpush.bf16.msra.mxu2 %v14037_v6  ;;  %2455 = vmatpush.bf16.msrb.mxu1 %v14052_v52  ;;  %v9276_v54 = vld [vmem:[%s20161_s0 + $0x98] sm:$0xf0]  ;;  %v9466_v24 = vld [vmem:[%s20161_s0 + $0x208] sm:$0xf] }
  0xc3   : > { %2362 = vmatpush.bf16.msra.mxu0 %v14019_v11  ;;  %20281 = vst [vmem:[#allocation130_spill] sm:$0xff] %v14070_v59  ;;  %v11804_v52 = vld [vmem:[%s20161_s0 + $0x214] sm:$0xf0]  ;;  %v9850_v6 = vld [vmem:[%s20161_s0 + $0x508] sm:$0xf]  ;;  %v14103_v11 = vor.u32 %v11904_v60, %v9866_v53 }
  0xc4   : > { %2419 = vmatpush.bf16.msra.mxu3 %v14028_v20  ;;  %20282 = vst [vmem:[#allocation131_spill] sm:$0xff] %v14089_v49  ;;  %v14100_v20 = vor.u32 %v11798_v32, %v9452_v4  ;;  %v11900_v48 = vld [vmem:[%s20161_s0 + $0x514] sm:$0xf0]  ;;  %v11794_v2 = vld [vmem:[%s20161_s0 + $0x1cc] sm:$0xf]  ;;  %v14115_v32 = vor.u32 %v11754_v31, %v9276_v54  ;;  %2295 = vmatmul.bf16.gmra.mxu0 %v13471_v36 }
  0xc5   : > { %20284 = vst [vmem:[#allocation133_spill] sm:$0xff] %v14103_v11  ;;  %9987 = vmatmul.msk.bf16.gmra.mxu1 %vm2047_vm0, %v13482_v55  ;;  %v11830_v53 = vld [vmem:[%s20161_s0 + $0x2ec] sm:$0xf]  ;;  %v9978_v4 = vld [vmem:[%s20161_s0 + $0x608] sm:$0xf]  ;;  %2333 = vmatmul.bf16.gmra.mxu2 %v13118_v0  ;;  %v14147_v43 = vor.u32 %v11900_v48, %v9850_v6 }
  0xc6   : > { %20283 = vst [vmem:[#allocation132_spill] sm:$0xff] %v14100_v20  ;;  %2403 = vmatpush.bf16.msra.mxu2 %v14070_v59  ;;  %v11932_v60 = vld [vmem:[%s20161_s0 + $0x614] sm:$0xf0]  ;;  %2352 = vmatmul.bf16.gmra.mxu3 %v13131_v61  ;;  %v9580_v31 = vld [vmem:[%s20161_s0 + $0x2f8] sm:$0xf0] }
  0xc7   : > { %2363 = vmatpush.bf16.msra.mxu0 %v14055_v41  ;;  %v9436_v41 = vld [vmem:[%s20161_s0 + $0x1d8] sm:$0xf0]  ;;  %20285 = vst [vmem:[#allocation134_spill] sm:$0xff] %v14115_v32  ;;  %v11750_v54 = vld [vmem:[%s20161_s0 + $0x6c] sm:$0xf]  ;;  %v14149_v51 = vor.u32 %v11932_v60, %v9978_v4  ;;  %2456 = vmatpush.bf16.msrb.mxu1 %v14115_v32 }
  0xc8   : > { %2420 = vmatpush.bf16.msra.mxu3 %v14064_v19  ;;  %v9260_v59 = vld [vmem:[%s20161_s0 + $0x78] sm:$0xf0]  ;;  %v14141_v19 = vor.u32 %v11804_v52, %v9466_v24  ;;  %v14144_v26 = vor.u32 %v11794_v2, %v9436_v41  ;;  %20288 = vst [vmem:[#allocation137_spill] sm:$0xff] %v14147_v43  ;;  %v11790_v18 = vld [vmem:[%s20161_s0 + $0x1ac] sm:$0xf]  ;;  %v14158_v24 = vor.u32 %v11830_v53, %v9580_v31 }
  0xc9   : > { %20289 = vst [vmem:[#allocation138_spill] sm:$0xff] %v14149_v51  ;;  %v11826_v52 = vld [vmem:[%s20161_s0 + $0x2cc] sm:$0xf]  ;;  %v14163_v6 = vor.u32 %v11750_v54, %v9260_v59  ;;  %v9564_v41 = vld [vmem:[%s20161_s0 + $0x2d8] sm:$0xf0] }
  0xca   : > { %20286 = vst [vmem:[#allocation135_spill] sm:$0xff] %v14141_v19  ;;  %2472 = vmatpush.bf16.msrb.mxu2 %v14100_v20  ;;  %v11746_v48 = vld [vmem:[%s20161_s0 + $0x4c] sm:$0xf]  ;;  %v9244_v2 = vld [vmem:[%s20161_s0 + $0x58] sm:$0xf0]  ;;  %v14187_v60 = vor.u32 %v11826_v52, %v9564_v41 }
  0xcb   : > { %2364 = vmatpush.bf16.msra.mxu0 %v14089_v49  ;;  %20287 = vst [vmem:[#allocation136_spill] sm:$0xff] %v14144_v26  ;;  %v9420_v49 = vld [vmem:[%s20161_s0 + $0x1b8] sm:$0xf0]  ;;  %v11786_v59 = vld [vmem:[%s20161_s0 + $0x18c] sm:$0xf]  ;;  %2457 = vmatpush.bf16.msrb.mxu1 %v14163_v6 }
  0xcc   : > { %2421 = vmatpush.bf16.msra.mxu3 %v14103_v11  ;;  %20290 = vst [vmem:[#allocation139_spill] sm:$0xff] %v14158_v24  ;;  %v14176_v53 = vor.u32 %v11790_v18, %v9420_v49  ;;  %v9404_v4 = vld [vmem:[%s20161_s0 + $0x198] sm:$0xf0]  ;;  %v14190_v18 = vor.u32 %v11746_v48, %v9244_v2  ;;  %v11822_v49 = vld [vmem:[%s20161_s0 + $0x2ac] sm:$0xf] }
  0xcd   : > { %20291 = vst [vmem:[#allocation140_spill] sm:$0xff] %v14163_v6  ;;  %v14196_v31 = vor.u32 %v11786_v59, %v9404_v4  ;;  %v9548_v54 = vld [vmem:[%s20161_s0 + $0x2b8] sm:$0xf0]  ;;  %v11782_v52 = vld [vmem:[%s20161_s0 + $0x16c] sm:$0xf] }
  0xce   : > { %2473 = vmatpush.bf16.msrb.mxu2 %v14144_v26  ;;  %20292 = vst [vmem:[#allocation141_spill] sm:$0xff] %v14176_v53  ;;  %v9388_v41 = vld [vmem:[%s20161_s0 + $0x178] sm:$0xf0]  ;;  %v11742_v2 = vld [vmem:[%s20161_s0 + $0x2c] sm:$0xf]  ;;  %v14215_v32 = vor.u32 %v11822_v49, %v9548_v54 }
  0xcf   : > { %2365 = vmatpush.bf16.msra.mxu0 %v14141_v19  ;;  %20293 = vst [vmem:[#allocation142_spill] sm:$0xff] %v14187_v60  ;;  %v2063_v48 = vpop.f32.mrf.mxu0  ;;  %2458 = vmatpush.bf16.msrb.mxu1 %v14190_v18  ;;  %v9228_v59 = vld [vmem:[%s20161_s0 + $0x38] sm:$0xf0]  ;;  %v11778_v26 = vld [vmem:[%s20161_s0 + $0x14c] sm:$0xf] }
  0xd0   : > { %2422 = vmatpush.bf16.msra.mxu3 %v14147_v43  ;;  %20294 = vst [vmem:[#allocation143_spill] sm:$0xff] %v14190_v18  ;;  %v9532_v18 = vld [vmem:[%s20161_s0 + $0x298] sm:$0xf0]  ;;  %v14232_v54 = vor.u32 %v11742_v2, %v9228_v59  ;;  %v11774_v43 = vld [vmem:[%s20161_s0 + $0x12c] sm:$0xf] }
  0xd1   : > { %20295 = vst [vmem:[#allocation144_spill] sm:$0xff] %v14196_v31  ;;  %v2082_v4 = vpop.f32.mrf.mxu1  ;;  %v9372_v49 = vld [vmem:[%s20161_s0 + $0x158] sm:$0xf0] }
  0xd2   : > { %2474 = vmatpush.bf16.msrb.mxu2 %v14176_v53  ;;  %v2083_v6 = vadd.f32 %v2082_v4, %v2063_v48  ;;  %20296 = vst [vmem:[#allocation145_spill] sm:$0xff] %v14215_v32  ;;  %v11818_v53 = vld [vmem:[%s20161_s0 + $0x28c] sm:$0xf]  ;;  %v9708_v2 = vld [vmem:[%s20161_s0 + $0x3f8] sm:$0xf0] }
  0xd3   : > { %2441 = vmatpush.bf16.msrb.mxu0 %v14149_v51  ;;  %20298 = vst [vmem:[#allocation147_spill] sm:$0xff] %v14232_v54  ;;  %v11862_v48 = vld [vmem:[%s20161_s0 + $0x3ec] sm:$0xf]  ;;  %v14259_v51 = vor.u32 %v11818_v53, %v9532_v18  ;;  %v9356_v53 = vld [vmem:[%s20161_s0 + $0x138] sm:$0xf0]  ;;  %2459 = vmatpush.bf16.msrb.mxu1 %v14232_v54 }
  0xd4   : > { %2491 = vmatpush.bf16.msrb.mxu3 %v14158_v24  ;;  %2366 = vmatmul.bf16.vlgmr.msra.gmra.mxu0 %v13001_v14  ;;  %v14250_v59 = vor.u32 %v11862_v48, %v9708_v2  ;;  %v11894_v4 = vld [vmem:[%s20161_s0 + $0x4ec] sm:$0xf]  ;;  %v9516_v48 = vld [vmem:[%s20161_s0 + $0x278] sm:$0xf0]  ;;  %v14268_v2 = vor.u32 %v11778_v26, %v9372_v49 }
  0xd5   : > { %2385 = vmatmul.bf16.vlgmr.msra.gmra.mxu1 %v13010_v22  ;;  %2404 = vmatmul.bf16.vlgmr.msra.gmra.mxu2 %v13306_v37  ;;  %v11814_v24 = vld [vmem:[%s20161_s0 + $0x26c] sm:$0xf]  ;;  %v2101_v20 = vpop.f32.mrf.mxu2  ;;  %v9692_v11 = vld [vmem:[%s20161_s0 + $0x3d8] sm:$0xf0] }
  0xd6   : > { %2475 = vmatpush.bf16.msrb.mxu2 %v14196_v31  ;;  %2423 = vmatmul.bf16.vlgmr.msra.gmra.mxu3 %v13308_v40  ;;  %20299 = vst [vmem:[#allocation148_spill] sm:$0xff] %v14250_v59  ;;  %v9836_v31 = vld [vmem:[%s20161_s0 + $0x4f8] sm:$0xf0]  ;;  %v11858_v26 = vld [vmem:[%s20161_s0 + $0x3cc] sm:$0xf]  ;;  %v2102_v49 = vadd.f32 %v2101_v20, %v2083_v6  ;;  %v14288_v42 = vor.u32 %v11814_v24, %v9516_v48 }
  0xd7   : > { %20300 = vst [vmem:[#allocation149_spill] sm:$0xff] %v14268_v2  ;;  %2510 = vmatpush.bf16.msra.mxu0 %v14250_v59  ;;  %v14283_v19 = vor.u32 %v11894_v4, %v9836_v31  ;;  %v9820_v20 = vld [vmem:[%s20161_s0 + $0x4d8] sm:$0xf0]  ;;  %v14308_v4 = vor.u32 %v11774_v43, %v9356_v53  ;;  %v11926_v43 = vld [vmem:[%s20161_s0 + $0x5ec] sm:$0xf] }
  0xd8   : > { %2492 = vmatpush.bf16.msrb.mxu3 %v14187_v60  ;;  %v14224_v60 = vor.u32 %v11782_v52, %v9388_v41  ;;  %v11738_v52 = vld [vmem:[%s20161_s0 + $0xc] sm:$0xf]  ;;  %v9212_v41 = vld [vmem:[%s20161_s0 + $0x18] sm:$0xf0]  ;;  %20303 = vst [vmem:[#allocation152_spill] sm:$0xff] %v14288_v42 }
  0xd9   : > { %v14277_v18 = vor.u32 %v11738_v52, %v9212_v41  ;;  %20302 = vst [vmem:[#allocation151_spill] sm:$0xff] %v14283_v19  ;;  %v2084_v30 = vpop.f32.mrf.mxu1  ;;  %v14290_v52 = vor.u32 %v11858_v26, %v9692_v11  ;;  %v11890_v41 = vld [vmem:[%s20161_s0 + $0x4cc] sm:$0xf]  ;;  %v9500_v24 = vld [vmem:[%s20161_s0 + $0x258] sm:$0xf0] }
  0xda   : > { %20297 = vst [vmem:[#allocation146_spill] sm:$0xff] %v14224_v60  ;;  %2476 = vmatpush.bf16.msrb.mxu2 %v14224_v60  ;;  %v2120_v60 = vpop.f32.mrf.mxu3  ;;  %v11810_v11 = vld [vmem:[%s20161_s0 + $0x24c] sm:$0xf]  ;;  %v9964_v48 = vld [vmem:[%s20161_s0 + $0x5f8] sm:$0xf0]  ;;  %v14328_v53 = vor.u32 %v11890_v41, %v9820_v20 }
  0xdb   : > { %20301 = vst [vmem:[#allocation150_spill] sm:$0xff] %v14277_v18  ;;  %v14298_v6 = vadd.f32 %v2120_v60, %v2102_v49  ;;  %v11770_v60 = vld [vmem:[%s20161_s0 + $0x10c] sm:$0xf]  ;;  %2460 = vmatpush.bf16.msrb.mxu1 %v14277_v18  ;;  %2511 = vmatpush.bf16.msra.mxu0 %v14290_v52  ;;  %v9676_v26 = vld [vmem:[%s20161_s0 + $0x3b8] sm:$0xf0]  ;;  %v14347_v18 = vor.u32 %v11926_v43, %v9964_v48 }
  0xdc   : > { %2493 = vmatpush.bf16.msrb.mxu3 %v14215_v32  ;;  %v2065_v32 = vpop.f32.mrf.mxu0  ;;  %20304 = vst [vmem:[#allocation153_spill] sm:$0xff] %v14290_v52  ;;  %v14336_v52 = vor.u32 %v11810_v11, %v9500_v24  ;;  %v11806_v59 = vld [vmem:[%s20161_s0 + $0x22c] sm:$0xf]  ;;  %v9484_v41 = vld [vmem:[%s20161_s0 + $0x238] sm:$0xf0] }
  0xdd   : > { %v2085_v31 = vadd.f32 %v2084_v30, %v2065_v32  ;;  %20305 = vst [vmem:[#allocation154_spill] sm:$0xff] %v14308_v4  ;;  %v9340_v30 = vld [vmem:[%s20161_s0 + $0x118] sm:$0xf0]  ;;  %v11854_v32 = vld [vmem:[%s20161_s0 + $0x3ac] sm:$0xf] }
  0xde   : > { %2477 = vmatpush.bf16.msrb.mxu2 %v14268_v2  ;;  %20306 = vst [vmem:[#allocation155_spill] sm:$0xff] %v14328_v53  ;;  %v14333_v49 = vor.u32 %v11854_v32, %v9676_v26  ;;  %v14345_v20 = vor.u32 %v11770_v60, %v9340_v30  ;;  %v11886_v11 = vld [vmem:[%s20161_s0 + $0x4ac] sm:$0xf]  ;;  %v9804_v24 = vld [vmem:[%s20161_s0 + $0x4b8] sm:$0xf0] }
  0xdf   : > { %2529 = vmatpush.bf16.msra.mxu1 %v14283_v19  ;;  %20308 = vst [vmem:[#allocation157_spill] sm:$0xff] %v14336_v52  ;;  %v2103_v19 = vpop.f32.mrf.mxu2  ;;  %v11850_v32 = vld [vmem:[%s20161_s0 + $0x38c] sm:$0xf]  ;;  %v9948_v48 = vld [vmem:[%s20161_s0 + $0x5d8] sm:$0xf0] }
  0xe0   : > { %2494 = vmatpush.bf16.msrb.mxu3 %v14259_v51  ;;  %20307 = vst [vmem:[#allocation156_spill] sm:$0xff] %v14333_v49  ;;  %2512 = vmatpush.bf16.msra.mxu0 %v14333_v49  ;;  %v2104_v26 = vadd.f32 %v2103_v19, %v2085_v31  ;;  %v11922_v43 = vld [vmem:[%s20161_s0 + $0x5cc] sm:$0xf]  ;;  %v9660_v49 = vld [vmem:[%s20161_s0 + $0x398] sm:$0xf0] }
  0xe1   : > { %20309 = vst [vmem:[#allocation158_spill] sm:$0xff] %v14345_v20  ;;  %v2087_v54 = vpop.f32.mrf.mxu1  ;;  %v11802_v19 = vld [vmem:[%s20161_s0 + $0x20c] sm:$0xf]  ;;  %v14374_v31 = vor.u32 %v11850_v32, %v9660_v49  ;;  %v9980_v49 = vld [vmem:[%s20161_s0 + $0x618] sm:$0xf0] }
  0xe2   : > { %2478 = vmatpush.bf16.msrb.mxu2 %v14308_v4  ;;  %20310 = vst [vmem:[#allocation159_spill] sm:$0xff] %v14347_v18  ;;  %v2122_v60 = vpop.f32.mrf.mxu3  ;;  %v14369_v4 = vor.u32 %v11806_v59, %v9484_v41  ;;  %v11930_v59 = vld [vmem:[%s20161_s0 + $0x60c] sm:$0xf]  ;;  %v14389_v41 = vor.u32 %v11886_v11, %v9804_v24  ;;  %v9932_v24 = vld [vmem:[%s20161_s0 + $0x5b8] sm:$0xf0] }
  0xe3   : > { %2530 = vmatpush.bf16.msra.mxu1 %v14328_v53  ;;  %20311 = vst [vmem:[#allocation160_spill] sm:$0xff] %v14374_v31  ;;  %v14376_v2 = vadd.f32 %v2122_v60, %v2104_v26  ;;  %v9468_v53 = vld [vmem:[%s20161_s0 + $0x218] sm:$0xf0]  ;;  %v11882_v32 = vld [vmem:[%s20161_s0 + $0x48c] sm:$0xf] }
  0xe4   : > { %2495 = vmatpush.bf16.msrb.mxu3 %v14288_v42  ;;  %v2068_v30 = vpop.f32.mrf.mxu0  ;;  %20312 = vst [vmem:[#allocation161_spill] sm:$0xff] %v14389_v41  ;;  %2513 = vmatpush.bf16.msra.mxu0 %v14374_v31  ;;  %v9788_v26 = vld [vmem:[%s20161_s0 + $0x498] sm:$0xf0]  ;;  %v11846_v60 = vld [vmem:[%s20161_s0 + $0x36c] sm:$0xf] }
  0xe5   : > { %v2088_v42 = vadd.f32 %v2087_v54, %v2068_v30  ;;  %v14392_v54 = vor.u32 %v11922_v43, %v9948_v48  ;;  %2371 = vmatmul.bf16.gmra.mxu0 %v13133_v63  ;;  %2390 = vmatmul.bf16.gmra.mxu1 %v13145_v39  ;;  %v11918_v11 = vld [vmem:[%s20161_s0 + $0x5ac] sm:$0xf]  ;;  %v9644_v30 = vld [vmem:[%s20161_s0 + $0x378] sm:$0xf0]  ;;  %v14420_v48 = vor.u32 %v11802_v19, %v9468_v53 }
  0xe6   : > { %2479 = vmatpush.bf16.msrb.mxu2 %v14345_v20  ;;  %2428 = vmatmul.bf16.gmra.mxu3 %v13471_v36  ;;  %v14417_v43 = vor.u32 %v11846_v60, %v9644_v30  ;;  %v14423_v31 = vor.u32 %v11882_v32, %v9788_v26  ;;  %v14425_v20 = vor.u32 %v11930_v59, %v9980_v49  ;;  %v11878_v60 = vld [vmem:[%s20161_s0 + $0x46c] sm:$0xf]  ;;  %v9772_v53 = vld [vmem:[%s20161_s0 + $0x478] sm:$0xf0] }
  0xe7   : > { %20313 = vst [vmem:[#allocation162_spill] sm:$0xff] %v14392_v54  ;;  %2409 = vmatmul.bf16.gmra.mxu2 %v13469_v47  ;;  %2531 = vmatpush.bf16.msra.mxu1 %v14389_v41  ;;  %v11842_v19 = vld [vmem:[%s20161_s0 + $0x34c] sm:$0xf] }
  0xe8   : > { %2496 = vmatpush.bf16.msrb.mxu3 %v14336_v52  ;;  %20314 = vst [vmem:[#allocation163_spill] sm:$0xff] %v14417_v43  ;;  %v14428_v52 = vor.u32 %v11918_v11, %v9932_v24  ;;  %2514 = vmatpush.bf16.msra.mxu0 %v14417_v43  ;;  %v11914_v26 = vld [vmem:[%s20161_s0 + $0x58c] sm:$0xf]  ;;  %v9916_v11 = vld [vmem:[%s20161_s0 + $0x598] sm:$0xf0] }
  0xe9   : > { %20315 = vst [vmem:[#allocation164_spill] sm:$0xff] %v14420_v48  ;;  %v9628_v24 = vld [vmem:[%s20161_s0 + $0x358] sm:$0xf0]  ;;  %v2089_v30 = vpop.f32.mrf.mxu1 }
  0xea   : > { %2548 = vmatpush.bf16.msra.mxu2 %v14347_v18  ;;  %20316 = vst [vmem:[#allocation165_spill] sm:$0xff] %v14423_v31  ;;  %v2106_v18 = vpop.f32.mrf.mxu2  ;;  %v2125_v49 = vpop.f32.mrf.mxu3  ;;  %v14449_v43 = vor.u32 %v11842_v19, %v9628_v24  ;;  %v11874_v19 = vld [vmem:[%s20161_s0 + $0x44c] sm:$0xf] }
  0xeb   : > { %20317 = vst [vmem:[#allocation166_spill] sm:$0xff] %v14425_v20  ;;  %v2107_v59 = vadd.f32 %v2106_v18, %v2088_v42  ;;  %2532 = vmatpush.bf16.msra.mxu1 %v14423_v31  ;;  %v14455_v18 = vor.u32 %v11878_v60, %v9772_v53  ;;  %v11910_v60 = vld [vmem:[%s20161_s0 + $0x56c] sm:$0xf]  ;;  %v9900_v53 = vld [vmem:[%s20161_s0 + $0x578] sm:$0xf0] }
  0xec   : > { %2497 = vmatpush.bf16.msrb.mxu3 %v14369_v4  ;;  %20318 = vst [vmem:[#allocation167_spill] sm:$0xff] %v14428_v52  ;;  %v2070_v32 = vpop.f32.mrf.mxu0  ;;  %2515 = vmatpush.bf16.msra.mxu0 %v14449_v43  ;;  %v11870_v31 = vld [vmem:[%s20161_s0 + $0x42c] sm:$0xf] }
  0xed   : > { %20319 = vst [vmem:[#allocation168_spill] sm:$0xff] %v14449_v43  ;;  %v14451_v41 = vadd.f32 %v2125_v49, %v2107_v59  ;;  %v2090_v42 = vadd.f32 %v2089_v30, %v2070_v32  ;;  %v9756_v59 = vld [vmem:[%s20161_s0 + $0x458] sm:$0xf0]  ;;  %v11838_v49 = vld [vmem:[%s20161_s0 + $0x32c] sm:$0xf]  ;;  %v14486_v30 = vor.u32 %v11910_v60, %v9900_v53 }
  0xee   : > { %2549 = vmatpush.bf16.msra.mxu2 %v14392_v54  ;;  %20320 = vst [vmem:[#allocation169_spill] sm:$0xff] %v14455_v18  ;;  %v14459_v54 = vor.u32 %v11914_v26, %v9916_v11  ;;  %v9612_v32 = vld [vmem:[%s20161_s0 + $0x338] sm:$0xf0]  ;;  %v14483_v11 = vor.u32 %v11874_v19, %v9756_v59  ;;  %v11906_v59 = vld [vmem:[%s20161_s0 + $0x54c] sm:$0xf] }
  0xef   : > { %v14480_v26 = vor.u32 %v11838_v49, %v9612_v32  ;;  %2533 = vmatpush.bf16.msra.mxu1 %v14455_v18  ;;  %v9740_v43 = vld [vmem:[%s20161_s0 + $0x438] sm:$0xf0]  ;;  %v11834_v49 = vld [vmem:[%s20161_s0 + $0x30c] sm:$0xf] }
  0xf0   : > { %2498 = vmatpush.bf16.msrb.mxu3 %v14420_v48  ;;  %20321 = vst [vmem:[#allocation170_spill] sm:$0xff] %v14459_v54  ;;  %v9884_v60 = vld [vmem:[%s20161_s0 + $0x558] sm:$0xf0] }
  0xf1   : > { %20322 = vst [vmem:[#allocation171_spill] sm:$0xff] %v14480_v26  ;;  %2516 = vmatpush.bf16.msra.mxu0 %v14480_v26  ;;  %v9596_v53 = vld [vmem:[%s20161_s0 + $0x318] sm:$0xf0]  ;;  %v14516_v48 = vor.u32 %v11906_v59, %v9884_v60  ;;  %v11866_v26 = vld [vmem:[%s20161_s0 + $0x40c] sm:$0xf] }
  0xf2   : > { %2550 = vmatpush.bf16.msra.mxu2 %v14428_v52  ;;  %v2108_v24 = vpop.f32.mrf.mxu2  ;;  %v2127_v19 = vpop.f32.mrf.mxu3 }
  0xf3   : > { %v2109_v32 = vadd.f32 %v2108_v24, %v2090_v42  ;;  %2534 = vmatpush.bf16.msra.mxu1 %v14483_v11  ;;  %v14511_v24 = vor.u32 %v11870_v31, %v9740_v43  ;;  %v9868_v31 = vld [vmem:[%s20161_s0 + $0x538] sm:$0xf0] }
  0xf4   : > { %2574 = vmatpush.bf16.msra.mxu3 %v14425_v20  ;;  %v2139_v18 = vpop.f32.mrf.mxu0  ;;  %v14513_v20 = vor.u32 %v11834_v49, %v9596_v53 }
  0xf5   : > { %v14507_v52 = vadd.f32 %v2127_v19, %v2109_v32  ;;  %v2140_v42 = vadd.f32 %v2139_v18, %v14298_v6  ;;  %v9724_v32 = vld [vmem:[%s20161_s0 + $0x418] sm:$0xf0]  ;;  %9988 = vmatmul.msk.bf16.vlgmr.msrb.gmra.mxu0 %vm2047_vm0, %v13321_v27  ;;  %2461 = vmatmul.bf16.vlgmr.msrb.gmra.mxu1 %v12991_v1  ;;  %v11902_v6 = vld [vmem:[%s20161_s0 + $0x52c] sm:$0xf] }
  0xf6   : > { %2551 = vmatpush.bf16.msra.mxu2 %v14459_v54  ;;  %v2158_v54 = vpop.f32.mrf.mxu1  ;;  %2499 = vmatmul.bf16.vlgmr.msrb.gmra.mxu3 %v13001_v14  ;;  %v14540_v1 = vor.u32 %v11902_v6, %v9868_v31  ;;  %v9852_v14 = vld [vmem:[%s20161_s0 + $0x518] sm:$0xf0]  ;;  %v20333_v6 = vld [vmem:[#allocation24_spill] sm:$0xff] }
  0xf7   : > { %v2159_v19 = vadd.f32 %v2158_v54, %v2140_v42  ;;  %2480 = vmatmul.bf16.vlgmr.msrb.gmra.mxu2 %v12999_v13  ;;  %2535 = vmatpush.bf16.msra.mxu1 %v14511_v24  ;;  %v14537_v54 = vor.u32 %v11866_v26, %v9724_v32  ;;  %v11898_v13 = vld [vmem:[%s20161_s0 + $0x50c] sm:$0xf]  ;;  %v20334_v31 = vld [vmem:[#allocation16_spill] sm:$0xff]  ;;  %s9116_s0 = ssub.s32 (%p12655_p5), 13, %s20968_s8 }
  0xf8   : > { %2517 = vmatpush.bf16.msra.mxu0 %v14513_v20  ;;  %2773 = vmatpush.bf16.msrb.mxu3 %v12699_v12  ;;  %p9117_p11 = scmp.lt.s32.totalorder (%p12655_p5), %s9116_s0, 8 }
  0xfa   : > { %2552 = vmatpush.bf16.msra.mxu2 %v14486_v30  ;;  %v2177_v43 = vpop.f32.mrf.mxu2  ;;  %v2196_v18 = vpop.f32.mrf.mxu3 }
  0xfb   : > { %v14550_v26 = vadd.f32 %v2177_v43, %v2159_v19  ;;  %2536 = vmatpush.bf16.msra.mxu1 %v14537_v54  ;;  %v20335_v43 = vld [vmem:[#allocation18_spill] sm:$0xff] }
  0xfc   : > { %2716 = vmatpush.bf16.msrb.mxu0 %v12674_v3  ;;  %v2141_v49 = vpop.f32.mrf.mxu0  ;;  %v14555_v3 = vor.u32 %v11898_v13, %v9852_v14  ;;  %2774 = vmatpush.bf16.msrb.mxu3 %v12737_v25  ;;  %v20336_v14 = vld [vmem:[#allocation26_spill] sm:$0xff] }
  0xfd   : > { %v2142_v60 = vadd.f32 %v2141_v49, %v14376_v2  ;;  %v20337_v49 = vld [vmem:[#allocation25_spill] sm:$0xff] }
  0xfe   : > { %2553 = vmatpush.bf16.msra.mxu2 %v14516_v48  ;;  %v2160_v59 = vpop.f32.mrf.mxu1 }
  0xff   : > { %2735 = vmatpush.bf16.msrb.mxu1 %v12685_v7  ;;  %v2161_v53 = vadd.f32 %v2160_v59, %v2142_v60 }
 0x100   : > { %2717 = vmatpush.bf16.msrb.mxu0 %v12712_v16  ;;  %2775 = vmatpush.bf16.msrb.mxu3 %v12776_v38 }
 0x102   : > { %2554 = vmatpush.bf16.msra.mxu2 %v14540_v1  ;;  %v2179_v12 = vpop.f32.mrf.mxu2  ;;  %v2198_v42 = vpop.f32.mrf.mxu3 }
 0x103   : > { %2736 = vmatpush.bf16.msrb.mxu1 %v12714_v17  ;;  %v14564_v2 = vadd.f32 %v2179_v12, %v2161_v53  ;;  %v20338_v12 = vld [vmem:[#allocation27_spill] sm:$0xff] }
 0x104   : > { %2718 = vmatpush.bf16.msrb.mxu0 %v12749_v29  ;;  %v2144_v32 = vpop.f32.mrf.mxu0  ;;  %2776 = vmatpush.bf16.msrb.mxu3 %v12812_v50 }
 0x105   : > { %v2145_v7 = vadd.f32 %v2144_v32, %v14451_v41  ;;  %9989 = vmatmul.msk.bf16.gmra.mxu0 %vm2047_vm0, %v13482_v55  ;;  %2466 = vmatmul.bf16.gmra.mxu1 %v13118_v0  ;;  %v20332_v41 = vld [vmem:[#allocation22_spill] sm:$0xff] }
 0x106   : > { %2555 = vmatpush.bf16.msra.mxu2 %v14555_v3  ;;  %v2163_v19 = vpop.f32.mrf.mxu1  ;;  %2504 = vmatmul.bf16.gmra.mxu3 %v13133_v63 }
 0x107   : > { %2737 = vmatpush.bf16.msrb.mxu1 %v12762_v33  ;;  %v2164_v16 = vadd.f32 %v2163_v19, %v2145_v7  ;;  %2485 = vmatmul.bf16.gmra.mxu2 %v13131_v61  ;;  %v20339_v7 = vld [vmem:[#allocation29_spill] sm:$0xff] }
 0x108   : > { %2719 = vmatpush.bf16.msrb.mxu0 %v12794_v44  ;;  %2777 = vmatpush.bf16.msrb.mxu3 %v12848_v62  ;;  %v1052_v44 = vld [vmem:[%s20323_s25] sm:$0xf]  ;;  %s20548_s25 = sld [smem:[#allocation211_spill]] }
 0x109   : > { %2595 = vst [vmem:[#allocation1] ss:$9 sm:$0xff] %v1052_v44  ;;  %v20344_v44 = vld [vmem:[#allocation33_spill] sm:$0xff] }
 0x10a   : > { %2754 = vmatpush.bf16.msrb.mxu2 %v12687_v8  ;;  %v2182_v8 = vpop.f32.mrf.mxu2  ;;  %v2201_v17 = vpop.f32.mrf.mxu3 }
 0x10b   : > { %2738 = vmatpush.bf16.msrb.mxu1 %v12798_v45  ;;  %v14578_v25 = vadd.f32 %v2182_v8, %v2164_v16  ;;  %v20340_v16 = vld [vmem:[#allocation28_spill] sm:$0xff]  ;;  %v20341_v8 = vld [vmem:[#allocation30_spill] sm:$0xff] }
 0x10c   : > { %v2146_v29 = vpop.f32.mrf.mxu0  ;;  %2720 = vmatpush.bf16.msrb.mxu0 %v12830_v56  ;;  %2778 = vmatpush.bf16.msrb.mxu3 %v12887_v15 }
 0x10d   : > { %v2147_v38 = vadd.f32 %v2146_v29, %v14507_v52  ;;  %v20331_v52 = vld [vmem:[#allocation23_spill] sm:$0xff] }
 0x10e   : > { %2755 = vmatpush.bf16.msrb.mxu2 %v12726_v21  ;;  %v2165_v33 = vpop.f32.mrf.mxu1 }
 0x10f   : > { %2739 = vmatpush.bf16.msrb.mxu1 %v12834_v57  ;;  %v2166_v21 = vadd.f32 %v2165_v33, %v2147_v38  ;;  %v20343_v38 = vld [vmem:[#allocation31_spill] sm:$0xff] }
 0x110   : > { %2721 = vmatpush.bf16.msrb.mxu0 %v12866_v5  ;;  %2779 = vmatpush.bf16.msrb.mxu3 %v12931_v35  ;;  %v20324_v5 = vld [vmem:[#allocation14_spill] sm:$0xff]  ;;  %v20328_v35 = vld [vmem:[#allocation19_spill] sm:$0xff] }
 0x112   : > { %2756 = vmatpush.bf16.msrb.mxu2 %v12764_v34  ;;  %v2184_v34 = vpop.f32.mrf.mxu2  ;;  %v2203_v45 = vpop.f32.mrf.mxu3 }
 0x113   : > { %2740 = vmatpush.bf16.msrb.mxu1 %v12873_v9  ;;  %v14592_v50 = vadd.f32 %v2184_v34, %v2166_v21  ;;  %v20326_v9 = vld [vmem:[#allocation17_spill] sm:$0xff] }
 0x114   : > { %v2215_v56 = vpop.f32.mrf.mxu0  ;;  %2722 = vmatpush.bf16.msrb.mxu0 %v12906_v23  ;;  %2780 = vmatpush.bf16.msrb.mxu3 %v20326_v9  ;;  %v831_v9 = vld [vmem:[%s12969_s27 + $0xf8] sm:$0xff] }
 0x115   : > { %v2216_v62 = vadd.f32 %v2215_v56, %v2196_v18  ;;  %2518 = vmatmul.bf16.vlgmr.msra.gmra.mxu0 %v13010_v22  ;;  %2537 = vmatmul.bf16.vlgmr.msra.gmra.mxu1 %v13306_v37  ;;  %v20330_v37 = vld [vmem:[#allocation13_spill] sm:$0xff]  ;;  %v828_v56 = vld [vmem:[%s12969_s27 + $0xe0] sm:$0xff] }
 0x116   : > { %2757 = vmatpush.bf16.msrb.mxu2 %v12800_v46  ;;  %v2234_v57 = vpop.f32.mrf.mxu1  ;;  %9990 = vmatmul.msk.bf16.vlgmr.msra.gmra.mxu3 %vm2047_vm0, %v13321_v27 }
 0x117   : > { %2741 = vmatpush.bf16.msrb.mxu1 %v12919_v28  ;;  %v2235_v46 = vadd.f32 %v2234_v57, %v2216_v62  ;;  %2556 = vmatmul.bf16.vlgmr.msra.gmra.mxu2 %v13308_v40  ;;  %v20327_v28 = vld [vmem:[#allocation20_spill] sm:$0xff]  ;;  %v20329_v40 = vld [vmem:[#allocation21_spill] sm:$0xff]  ;;  %v835_v57 = vld [vmem:[%s12969_s27 + $0x118] sm:$0xff] }
 0x118   : > { %2723 = vmatpush.bf16.msrb.mxu0 %v20324_v5  ;;  %2849 = vmatpush.bf16.msra.mxu3 %v20329_v40  ;;  %v829_v62 = vld [vmem:[%s12969_s27 + $0xe8] sm:$0xff]  ;;  %v830_v5 = vld [vmem:[%s12969_s27 + $0xf0] sm:$0xff] }
 0x11a   : > { %2758 = vmatpush.bf16.msrb.mxu2 %v12836_v58  ;;  %v20325_v58 = vld [vmem:[#allocation15_spill] sm:$0xff]  ;;  %v2253_v15 = vpop.f32.mrf.mxu2  ;;  %v2272_v23 = vpop.f32.mrf.mxu3 }
 0x11b   : > { %2742 = vmatpush.bf16.msrb.mxu1 %v20325_v58  ;;  %v2254_v63 = vadd.f32 %v2253_v15, %v2235_v46  ;;  %v836_v46 = vld [vmem:[%s12969_s27 + $0x120] sm:$0xff]  ;;  %v837_v58 = vld [vmem:[%s12969_s27 + $0x128] sm:$0xff]  ;;  %v838_v15 = vld [vmem:[%s12969_s27 + $0x130] sm:$0xff] }
 0x11c   : > { %2792 = vmatpush.bf16.msra.mxu0 %v20327_v28  ;;  %v2217_v22 = vpop.f32.mrf.mxu0  ;;  %2850 = vmatpush.bf16.msra.mxu3 %v20333_v6  ;;  %v20347_v28 = vld [vmem:[#allocation37_spill] sm:$0xff]  ;;  %v14647_v40 = vpack.c.bf16 %v836_v46, %v829_v62  ;;  %v14651_v6 = vpack.c.bf16 %v838_v15, %v831_v9  ;;  %v842_v46 = vld [vmem:[%s12969_s27 + $0x150] sm:$0xff]  ;;  %v20360_v9 = vld [vmem:[#allocation51_spill] sm:$0xff] }
 0x11d   : > { %v2218_v0 = vadd.f32 %v2217_v22, %v2198_v42  ;;  %v2596_v22 = vld [vmem:[#allocation1] sm:$0xff]  ;;  %v843_v15 = vld [vmem:[%s12969_s27 + $0x158] sm:$0xff] }
 0x11e   : > { %2759 = vmatpush.bf16.msrb.mxu2 %v12875_v10  ;;  %v2236_v61 = vpop.f32.mrf.mxu1  ;;  %v2273_v10 = vadd.f32 %v2272_v23, %v2254_v63  ;;  %v20345_v23 = vld [vmem:[#allocation36_spill] sm:$0xff] }
 0x11f   : > { %2811 = vmatpush.bf16.msra.mxu1 %v20328_v35  ;;  %v2237_v27 = vadd.f32 %v2236_v61, %v2218_v0  ;;  %v14645_v61 = vpack.c.bf16 %v835_v57, %v828_v56 }
 0x120   : > { %2793 = vmatpush.bf16.msra.mxu0 %v20331_v52  ;;  %2851 = vmatpush.bf16.msra.mxu3 %v20338_v12  ;;  %v2597_v52 = vld [vmem:[#allocation1 + $0x9] sm:$0xff]  ;;  %v20352_v12 = vld [vmem:[#allocation43_spill] sm:$0xff] }
 0x122   : > { %2760 = vmatpush.bf16.msrb.mxu2 %v20330_v37  ;;  %v2255_v18 = vpop.f32.mrf.mxu2  ;;  %v2274_v13 = vpop.f32.mrf.mxu3 }
 0x123   : > { %2812 = vmatpush.bf16.msra.mxu1 %v20332_v41  ;;  %v2256_v59 = vadd.f32 %v2255_v18, %v2237_v27  ;;  %v14649_v41 = vpack.c.bf16 %v837_v58, %v830_v5  ;;  %v20349_v18 = vld [vmem:[#allocation39_spill] sm:$0xff]  ;;  %v849_v5 = vld [vmem:[%s12969_s27 + $0x188] sm:$0xff]  ;;  %v20359_v58 = vld [vmem:[#allocation50_spill] sm:$0xff] }
 0x124   : > { %2794 = vmatpush.bf16.msra.mxu0 %v20336_v14  ;;  %v2220_v60 = vpop.f32.mrf.mxu0  ;;  %2852 = vmatpush.bf16.msra.mxu3 %v20341_v8  ;;  %v2600_v14 = vpack.i.b16 %v2596_v22, %v2596_v22  ;;  %v852_v22 = vld [vmem:[%s12969_s27 + $0x1a0] sm:$0xff] }
 0x125   : > { %v2221_v42 = vadd.f32 %v2220_v60, %v2201_v17  ;;  %v14619_v32 = vadd.f32 %v2274_v13, %v2256_v59  ;;  %2523 = vmatmul.bf16.gmra.mxu0 %v13145_v39  ;;  %2542 = vmatmul.bf16.gmra.mxu1 %v13469_v47  ;;  %v2603_v60 = vpack.i.b16 %v2597_v52, %v2597_v52 }
 0x126   : > { %2761 = vmatpush.bf16.msrb.mxu2 %v20334_v31  ;;  %v2239_v53 = vpop.f32.mrf.mxu1  ;;  %9991 = vmatmul.msk.bf16.gmra.mxu3 %vm2047_vm0, %v13482_v55  ;;  %v20342_v55 = vld [vmem:[#allocation32_spill] sm:$0xff] }
 0x127   : > { %2813 = vmatpush.bf16.msra.mxu1 %v20337_v49  ;;  %v2240_v19 = vadd.f32 %v2239_v53, %v2221_v42  ;;  %2561 = vmatmul.bf16.gmra.mxu2 %v13471_v36  ;;  %v20350_v49 = vld [vmem:[#allocation41_spill] sm:$0xff]  ;;  %v2602_v42 = vperm.slane %v2600_v14, 0 }
 0x128   : > { %2795 = vmatpush.bf16.msra.mxu0 %v20339_v7  ;;  %2853 = vmatpush.bf16.msra.mxu3 %v20344_v44  ;;  %v20351_v53 = vld [vmem:[#allocation45_spill] sm:$0xff]  ;;  %v20354_v7 = vld [vmem:[#allocation34_spill] sm:$0xff] }
 0x129   : > { %v14673_v44 = vunpack.c.l.bf16 %v2602_v42 }
 0x12a   : > { %2837 = vmatpush.bf16.msra.mxu2 %v20335_v43  ;;  %v2258_v17 = vpop.f32.mrf.mxu2  ;;  %v2277_v39 = vpop.f32.mrf.mxu3  ;;  %v20348_v43 = vld [vmem:[#allocation40_spill] sm:$0xff] }
 0x12b   : > { %2814 = vmatpush.bf16.msra.mxu1 %v20340_v16  ;;  %v2259_v47 = vadd.f32 %v2258_v17, %v2240_v19  ;;  %v20353_v19 = vld [vmem:[#allocation46_spill] sm:$0xff]  ;;  %v2605_v16 = vperm.slane %v2603_v60, 0 }
 0x12c   : > { %v2222_v36 = vpop.f32.mrf.mxu0  ;;  %2796 = vmatpush.bf16.msra.mxu0 %v20342_v55  ;;  %2854 = vmatpush.bf16.msra.mxu3 %v20347_v28 }
 0x12d   : > { %v2223_v33 = vadd.f32 %v2222_v36, %v2203_v45  ;;  %v14631_v21 = vadd.f32 %v2277_v39, %v2259_v47  ;;  %v20346_v45 = vld [vmem:[#allocation35_spill] sm:$0xff]  ;;  %v20356_v47 = vld [vmem:[#allocation44_spill] sm:$0xff]  ;;  %v14676_v57 = vunpack.c.l.bf16 %v2605_v16 }
 0x12e   : > { %v2241_v29 = vpop.f32.mrf.mxu1  ;;  %v20355_v39 = vld [vmem:[#allocation47_spill] sm:$0xff] }
 0x12f   : > { %2815 = vmatpush.bf16.msra.mxu1 %v20343_v38  ;;  %v2242_v34 = vadd.f32 %v2241_v29, %v2223_v33  ;;  %v20357_v33 = vld [vmem:[#allocation48_spill] sm:$0xff] }
 0x130   : > { %2797 = vmatpush.bf16.msra.mxu0 %v20345_v23  ;;  %2855 = vmatpush.bf16.msra.mxu3 %v20350_v49  ;;  %v844_v23 = vld [vmem:[%s12969_s27 + $0x160] sm:$0xff] }
 0x132   : > { %v2260_v35 = vpop.f32.mrf.mxu2  ;;  %v2279_v63 = vpop.f32.mrf.mxu3 }
 0x133   : > { %2816 = vmatpush.bf16.msra.mxu1 %v20346_v45  ;;  %v2261_v0 = vadd.f32 %v2260_v35, %v2242_v34  ;;  %v20358_v34 = vld [vmem:[#allocation38_spill] sm:$0xff]  ;;  %v20361_v45 = vld [vmem:[#allocation52_spill] sm:$0xff]  ;;  %v851_v35 = vld [vmem:[%s12969_s27 + $0x198] sm:$0xff] }
 0x134   : > { %v2291_v37 = vpop.f32.mrf.mxu0  ;;  %2798 = vmatpush.bf16.msra.mxu0 %v20348_v43  ;;  %2856 = vmatpush.bf16.msra.mxu3 %v20353_v19  ;;  %v20365_v19 = vld [vmem:[#allocation56_spill] sm:$0xff] }
 0x135   : > { %v2292_v31 = vadd.f32 %v2291_v37, %v2273_v10  ;;  %v14655_v13 = vadd.f32 %v2279_v63, %v2261_v0  ;;  %2724 = vmatmul.bf16.vlgmr.msrb.gmra.mxu0 %v14645_v61  ;;  %2743 = vmatmul.bf16.vlgmr.msrb.gmra.mxu1 %v14647_v40  ;;  %v845_v63 = vld [vmem:[%s12969_s27 + $0x168] sm:$0xff]  ;;  %v14691_v37 = vpack.c.bf16 %v849_v5, %v842_v46 }
 0x136   : > { %v2310_v27 = vpop.f32.mrf.mxu1  ;;  %2781 = vmatmul.bf16.vlgmr.msrb.gmra.mxu3 %v14651_v6  ;;  %v14703_v42 = vpack.c.bf16 %v852_v22, %v845_v63  ;;  %v20370_v46 = vld [vmem:[#allocation53_spill] sm:$0xff] }
 0x137   : > { %2817 = vmatpush.bf16.msra.mxu1 %v20349_v18  ;;  %v2311_v59 = vadd.f32 %v2310_v27, %v2292_v31  ;;  %2762 = vmatmul.bf16.vlgmr.msrb.gmra.mxu2 %v14649_v41  ;;  %v20362_v27 = vld [vmem:[#allocation42_spill] sm:$0xff]  ;;  %v20374_v63 = vld [vmem:[#allocation57_spill] sm:$0xff] }
 0x138   : > { %2799 = vmatpush.bf16.msra.mxu0 %v20351_v53  ;;  %2906 = vmatpush.bf16.msrb.mxu2 %v20354_v7 }
 0x139   : > { %v2586_v10 = vpack.c.bf16 %v2311_v59, %v14550_v26  ;;  %2925 = vmatpush.bf16.msrb.mxu3 %v20357_v33  ;;  %v20363_v59 = vld [vmem:[#allocation54_spill] sm:$0xff] }
 0x13a   : > { %v2329_v8 = vpop.f32.mrf.mxu2  ;;  %v2348_v17 = vpop.f32.mrf.mxu3 }
 0x13b   : > { %2818 = vmatpush.bf16.msra.mxu1 %v20352_v12  ;;  %v14669_v26 = vadd.f32 %v2348_v17, %v2329_v8  ;;  %v2612_v38 = vunpack.c.l.bf16 %v2586_v10  ;;  %v2613_v56 = vunpack.c.h.bf16 %v2586_v10  ;;  %v14701_v12 = vpack.c.bf16 %v851_v35, %v844_v23  ;;  %v20371_v23 = vld [vmem:[#allocation62_spill] sm:$0xff]  ;;  %v20373_v35 = vld [vmem:[#allocation64_spill] sm:$0xff] }
 0x13c   : > { %2868 = vmatpush.bf16.msrb.mxu0 %v20355_v39  ;;  %v2293_v36 = vpop.f32.mrf.mxu0  ;;  %2907 = vmatpush.bf16.msrb.mxu2 %v20358_v34  ;;  %v20366_v39 = vld [vmem:[#allocation49_spill] sm:$0xff]  ;;  %v20367_v34 = vld [vmem:[#allocation58_spill] sm:$0xff] }
 0x13d   : > { %v2294_v55 = vadd.f32 %v2293_v36, %v14619_v32  ;;  %v850_v32 = vld [vmem:[%s12969_s27 + $0x190] sm:$0xff]  ;;  %2926 = vmatpush.bf16.msrb.mxu3 %v20361_v45  ;;  %v2632_v0 = vadd.f32 %v14673_v44, %v2612_v38  ;;  %v2633_v52 = vadd.f32 %v14676_v57, %v2613_v56  ;;  %v20368_v56 = vld [vmem:[#allocation59_spill] sm:$0xff] }
 0x13e   : > { %v2312_v29 = vpop.f32.mrf.mxu1  ;;  %v14695_v49 = vpack.c.bf16 %v850_v32, %v843_v15  ;;  %v20372_v45 = vld [vmem:[#allocation63_spill] sm:$0xff] }
 0x13f   : > { %2887 = vmatpush.bf16.msrb.mxu1 %v20356_v47  ;;  %v2313_v62 = vadd.f32 %v2312_v29, %v2294_v55  ;;  %v2672_v17 = vmax.f32 %v2632_v0, 0.0  ;;  %v2673_v47 = vmax.f32 %v2633_v52, 0.0  ;;  %v839_v52 = vld [vmem:[%s12969_s27 + $0x138] sm:$0xff] }
 0x140   : > { %2869 = vmatpush.bf16.msrb.mxu0 %v20359_v58  ;;  %2908 = vmatpush.bf16.msrb.mxu2 %v20362_v27  ;;  %v832_v27 = vld [vmem:[%s12969_s27 + $0x100] sm:$0xff] }
 0x141   : > { %v2588_v28 = vpack.c.bf16 %v2313_v62, %v14564_v2  ;;  %v20364_v2 = vld [vmem:[#allocation55_spill] sm:$0xff]  ;;  %2927 = vmatpush.bf16.msrb.mxu3 %v20365_v19  ;;  %v20369_v62 = vld [vmem:[#allocation60_spill] sm:$0xff]  ;;  %v20378_v19 = vld [vmem:[#allocation61_spill] sm:$0xff] }
 0x142   : > { %v2331_v18 = vpop.f32.mrf.mxu2  ;;  %v2350_v14 = vpop.f32.mrf.mxu3 }
 0x143   : > { %2888 = vmatpush.bf16.msrb.mxu1 %v20360_v9  ;;  %v2616_v31 = vunpack.c.l.bf16 %v2588_v28  ;;  %v2617_v43 = vunpack.c.h.bf16 %v2588_v28  ;;  %v14699_v60 = vadd.f32 %v2350_v14, %v2331_v18  ;;  %v834_v14 = vld [vmem:[%s12969_s27 + $0x110] sm:$0xff] }
 0x144   : > { %2870 = vmatpush.bf16.msrb.mxu0 %v20363_v59  ;;  %v2296_v10 = vpop.f32.mrf.mxu0  ;;  %2909 = vmatpush.bf16.msrb.mxu2 %v20366_v39  ;;  %v841_v59 = vld [vmem:[%s12969_s27 + $0x148] sm:$0xff] }
 0x145   : > { %v2636_v7 = vadd.f32 %v14673_v44, %v2616_v31  ;;  %v2637_v16 = vadd.f32 %v14676_v57, %v2617_v43  ;;  %v2297_v8 = vadd.f32 %v2296_v10, %v14631_v21  ;;  %2729 = vmatmul.bf16.gmra.mxu0 %v14691_v37  ;;  %2748 = vmatmul.bf16.gmra.mxu1 %v14695_v49  ;;  %v833_v31 = vld [vmem:[%s12969_s27 + $0x108] sm:$0xff]  ;;  %v840_v43 = vld [vmem:[%s12969_s27 + $0x140] sm:$0xff] }
 0x146   : > { %v2315_v53 = vpop.f32.mrf.mxu1  ;;  %2786 = vmatmul.bf16.gmra.mxu3 %v14703_v42  ;;  %v14739_v10 = vpack.c.bf16 %v839_v52, %v832_v27  ;;  %v20386_v27 = vld [vmem:[#allocation69_spill] sm:$0xff] }
 0x147   : > { %2889 = vmatpush.bf16.msrb.mxu1 %v20364_v2  ;;  %v2676_v36 = vmax.f32 %v2636_v7, 0.0  ;;  %v2677_v29 = vmax.f32 %v2637_v16, 0.0  ;;  %v2316_v33 = vadd.f32 %v2315_v53, %v2297_v8  ;;  %2767 = vmatmul.bf16.gmra.mxu2 %v14701_v12  ;;  %v20376_v2 = vld [vmem:[#allocation67_spill] sm:$0xff]  ;;  %v20377_v53 = vld [vmem:[#allocation68_spill] sm:$0xff] }
 0x148   : > { %2871 = vmatpush.bf16.msrb.mxu0 %v20367_v34  ;;  %2928 = vmatpush.bf16.msrb.mxu3 %v20369_v62  ;;  %v20380_v62 = vld [vmem:[#allocation71_spill] sm:$0xff] }
 0x149   : > { %v14714_v55 = vpack.c.bf16 %v2676_v36, %v2672_v17  ;;  %v14716_v38 = vpack.c.bf16 %v2677_v29, %v2673_v47  ;;  %v2590_v21 = vpack.c.bf16 %v2316_v33, %v14578_v25  ;;  %2910 = vmatpush.bf16.msrb.mxu2 %v20370_v46  ;;  %v14744_v47 = vpack.c.bf16 %v840_v43, %v833_v31  ;;  %v20387_v43 = vld [vmem:[#allocation77_spill] sm:$0xff] }
 0x14a   : > { %v2334_v5 = vpop.f32.mrf.mxu2  ;;  %v2353_v58 = vpop.f32.mrf.mxu3 }
 0x14b   : > { %2890 = vmatpush.bf16.msrb.mxu1 %v20368_v56  ;;  %v14723_v9 = vadd.f32 %v2353_v58, %v2334_v5  ;;  %v2620_v28 = vunpack.c.l.bf16 %v2590_v21  ;;  %v2621_v22 = vunpack.c.h.bf16 %v2590_v21  ;;  %v14749_v21 = vpack.c.bf16 %v841_v59, %v834_v14  ;;  %v20379_v56 = vld [vmem:[#allocation70_spill] sm:$0xff]  ;;  %v20381_v58 = vld [vmem:[#allocation72_spill] sm:$0xff] }
 0x14c   : > { %v2298_v15 = vpop.f32.mrf.mxu0  ;;  %2872 = vmatpush.bf16.msrb.mxu0 %v20371_v23  ;;  %2929 = vmatpush.bf16.msrb.mxu3 %v20373_v35  ;;  %v20384_v35 = vld [vmem:[#allocation75_spill] sm:$0xff] }
 0x14d   : > { %v2299_v32 = vadd.f32 %v2298_v15, %v14655_v13  ;;  %2911 = vmatpush.bf16.msrb.mxu2 %v20374_v63  ;;  %v20375_v13 = vld [vmem:[#allocation66_spill] sm:$0xff]  ;;  %v2640_v7 = vadd.f32 %v14673_v44, %v2620_v28  ;;  %v20382_v15 = vld [vmem:[#allocation65_spill] sm:$0xff] }
 0x14e   : > { %v2317_v25 = vpop.f32.mrf.mxu1  ;;  %v20383_v28 = vld [vmem:[#allocation74_spill] sm:$0xff] }
 0x14f   : > { %2891 = vmatpush.bf16.msrb.mxu1 %v20372_v45  ;;  %v2318_v0 = vadd.f32 %v2317_v25, %v2299_v32  ;;  %v2680_v25 = vmax.f32 %v2640_v7, 0.0  ;;  %v20390_v7 = vld [vmem:[#allocation73_spill] sm:$0xff] }
 0x150   : > { %2873 = vmatpush.bf16.msrb.mxu0 %v20375_v13  ;;  %2930 = vmatpush.bf16.msrb.mxu3 %v20377_v53 }
 0x151   : > { %v2592_v18 = vpack.c.bf16 %v2318_v0, %v14592_v50  ;;  %2912 = vmatpush.bf16.msrb.mxu2 %v20378_v19  ;;  %v2641_v50 = vadd.f32 %v14676_v57, %v2621_v22  ;;  %v20385_v0 = vld [vmem:[#allocation76_spill] sm:$0xff] }
 0x152   : > { %v2336_v17 = vpop.f32.mrf.mxu2  ;;  %v2355_v39 = vpop.f32.mrf.mxu3 }
 0x153   : > { %2892 = vmatpush.bf16.msrb.mxu1 %v20376_v2  ;;  %v2624_v16 = vunpack.c.l.bf16 %v2592_v18  ;;  %v2625_v8 = vunpack.c.h.bf16 %v2592_v18  ;;  %v14747_v36 = vadd.f32 %v2355_v39, %v2336_v17  ;;  %v20388_v18 = vld [vmem:[#allocation78_spill] sm:$0xff]  ;;  %v20389_v2 = vld [vmem:[#allocation79_spill] sm:$0xff]  ;;  %v20391_v17 = vld [vmem:[#allocation81_spill] sm:$0xff] }
 0x154   : > { %v2367_v29 = vpop.f32.mrf.mxu0  ;;  %2874 = vmatpush.bf16.msrb.mxu0 %v20379_v56  ;;  %2931 = vmatpush.bf16.msrb.mxu3 %v20381_v58  ;;  %v20392_v39 = vld [vmem:[#allocation82_spill] sm:$0xff]  ;;  %v855_v56 = vld [vmem:[%s12969_s27 + $0x1b8] sm:$0xff] }
 0x155   : > { %v2368_v34 = vadd.f32 %v2367_v29, %v14669_v26  ;;  %v2644_v46 = vadd.f32 %v14673_v44, %v2624_v16  ;;  %v2645_v5 = vadd.f32 %v14676_v57, %v2625_v8  ;;  %2913 = vmatpush.bf16.msrb.mxu2 %v20382_v15  ;;  %2800 = vmatmul.bf16.vlgmr.msra.gmra.mxu0 %v14739_v10  ;;  %v2681_v26 = vmax.f32 %v2641_v50, 0.0  ;;  %v846_v8 = vld [vmem:[%s12969_s27 + $0x170] sm:$0xff]  ;;  %v853_v50 = vld [vmem:[%s12969_s27 + $0x1a8] sm:$0xff]  ;;  %v847_v29 = vld [vmem:[%s12969_s27 + $0x178] sm:$0xff] }
 0x156   : > { %v2386_v33 = vpop.f32.mrf.mxu1  ;;  %2819 = vmatmul.bf16.vlgmr.msra.gmra.mxu1 %v14744_v47  ;;  %2857 = vmatmul.bf16.vlgmr.msra.gmra.mxu3 %v14645_v61  ;;  %v14785_v58 = vpack.c.bf16 %v853_v50, %v846_v8  ;;  %v20394_v15 = vld [vmem:[#allocation84_spill] sm:$0xff]  ;;  %v20402_v8 = vld [vmem:[#allocation91_spill] sm:$0xff]  ;;  %v20404_v50 = vld [vmem:[#allocation98_spill] sm:$0xff] }
 0x157   : > { %2893 = vmatpush.bf16.msrb.mxu1 %v20380_v62  ;;  %v2387_v32 = vadd.f32 %v2386_v33, %v2368_v34  ;;  %v2684_v23 = vmax.f32 %v2644_v46, 0.0  ;;  %v2685_v45 = vmax.f32 %v2645_v5, 0.0  ;;  %9992 = vmatmul.msk.bf16.vlgmr.msra.gmra.mxu2 %vm2047_vm0, %v14749_v21  ;;  %v854_v33 = vld [vmem:[%s12969_s27 + $0x1b0] sm:$0xff]  ;;  %v848_v34 = vld [vmem:[%s12969_s27 + $0x180] sm:$0xff] }
 0x158   : > { %2875 = vmatpush.bf16.msrb.mxu0 %v20383_v28  ;;  %2932 = vmatpush.bf16.msrb.mxu3 %v20385_v0  ;;  %v20393_v62 = vld [vmem:[#allocation80_spill] sm:$0xff]  ;;  %v20396_v0 = vld [vmem:[#allocation83_spill] sm:$0xff] }
 0x159   : > { %v14765_v63 = vpack.c.bf16 %v2684_v23, %v2680_v25  ;;  %v14767_v22 = vpack.c.bf16 %v2685_v45, %v2681_v26  ;;  %2982 = vmatpush.bf16.msra.mxu2 %v20386_v27  ;;  %v20395_v25 = vld [vmem:[#allocation86_spill] sm:$0xff]  ;;  %v14791_v45 = vpack.c.bf16 %v855_v56, %v848_v34 }
 0x15a   : > { %v2405_v52 = vpop.f32.mrf.mxu2  ;;  %v2424_v31 = vpop.f32.mrf.mxu3 }
 0x15b   : > { %2894 = vmatpush.bf16.msrb.mxu1 %v20384_v35  ;;  %v2406_v14 = vadd.f32 %v2405_v52, %v2387_v32  ;;  %v20397_v52 = vld [vmem:[#allocation88_spill] sm:$0xff] }
 0x15c   : > { %2944 = vmatpush.bf16.msra.mxu0 %v20387_v43  ;;  %3001 = vmatpush.bf16.msra.mxu3 %v20388_v18  ;;  %v2369_v59 = vpop.f32.mrf.mxu0  ;;  %v20399_v43 = vld [vmem:[#allocation87_spill] sm:$0xff] }
 0x15d   : > { %v2370_v53 = vadd.f32 %v2369_v59, %v14699_v60  ;;  %v2425_v19 = vadd.f32 %v2424_v31, %v2406_v14  ;;  %2983 = vmatpush.bf16.msra.mxu2 %v20390_v7  ;;  %v14787_v60 = vpack.c.bf16 %v854_v33, %v847_v29  ;;  %v20398_v31 = vld [vmem:[#allocation90_spill] sm:$0xff]  ;;  %v20405_v29 = vld [vmem:[#allocation95_spill] sm:$0xff] }
 0x15e   : > { %v2388_v13 = vpop.f32.mrf.mxu1  ;;  %v20401_v7 = vld [vmem:[#allocation94_spill] sm:$0xff] }
 0x15f   : > { %2970 = vmatpush.bf16.msra.mxu1 %v20389_v2  ;;  %v2389_v16 = vadd.f32 %v2388_v13, %v2370_v53  ;;  %v20400_v53 = vld [vmem:[#allocation92_spill] sm:$0xff] }
 0x160   : > { %2945 = vmatpush.bf16.msra.mxu0 %v20391_v17  ;;  %3002 = vmatpush.bf16.msra.mxu3 %v20392_v39  ;;  %v20403_v39 = vld [vmem:[#allocation96_spill] sm:$0xff] }
 0x161   : > { %2984 = vmatpush.bf16.msra.mxu2 %v20393_v62 }
 0x162   : > { %v2407_v46 = vpop.f32.mrf.mxu2  ;;  %v2426_v5 = vpop.f32.mrf.mxu3 }
 0x163   : > { %v2408_v32 = vadd.f32 %v2407_v46, %v2389_v16 }
 0x164   : > { %2946 = vmatpush.bf16.msra.mxu0 %v20394_v15  ;;  %3003 = vmatpush.bf16.msra.mxu3 %v20395_v25  ;;  %v2372_v23 = vpop.f32.mrf.mxu0  ;;  %v20407_v15 = vld [vmem:[#allocation103_spill] sm:$0xff] }
 0x165   : > { %v2373_v28 = vadd.f32 %v2372_v23, %v14723_v9  ;;  %v2427_v35 = vadd.f32 %v2426_v5, %v2408_v32  ;;  %2985 = vmatpush.bf16.msra.mxu2 %v20396_v0  ;;  %2805 = vmatmul.bf16.gmra.mxu0 %v14785_v58  ;;  %v20406_v5 = vld [vmem:[#allocation100_spill] sm:$0xff]  ;;  %v20408_v32 = vld [vmem:[#allocation99_spill] sm:$0xff] }
 0x166   : > { %v2391_v26 = vpop.f32.mrf.mxu1  ;;  %2824 = vmatmul.bf16.gmra.mxu1 %v14787_v60  ;;  %2862 = vmatmul.bf16.gmra.mxu3 %v14691_v37  ;;  %v20409_v23 = vld [vmem:[#allocation104_spill] sm:$0xff] }
 0x167   : > { %v2392_v27 = vadd.f32 %v2391_v26, %v2373_v28  ;;  %9993 = vmatmul.msk.bf16.gmra.mxu2 %vm2047_vm0, %v14791_v45  ;;  %v20410_v26 = vld [vmem:[#allocation108_spill] sm:$0xff]  ;;  %v20412_v28 = vld [vmem:[#allocation106_spill] sm:$0xff] }
 0x168   : > { %2947 = vmatpush.bf16.msra.mxu0 %v20397_v52  ;;  %3004 = vmatpush.bf16.msra.mxu3 %v20398_v31  ;;  %v20413_v52 = vld [vmem:[#allocation85_spill] sm:$0xff] }
 0x169   : > { %2986 = vmatpush.bf16.msra.mxu2 %v20399_v43  ;;  %v20414_v31 = vld [vmem:[#allocation109_spill] sm:$0xff] }
 0x16a   : > { %v2410_v9 = vpop.f32.mrf.mxu2  ;;  %v2429_v18 = vpop.f32.mrf.mxu3 }
 0x16b   : > { %v2411_v14 = vadd.f32 %v2410_v9, %v2392_v27 }
 0x16c   : > { %v2374_v59 = vpop.f32.mrf.mxu0  ;;  %2948 = vmatpush.bf16.msra.mxu0 %v20400_v53  ;;  %3005 = vmatpush.bf16.msra.mxu3 %v20401_v7  ;;  %v20417_v53 = vld [vmem:[#allocation89_spill] sm:$0xff] }
 0x16d   : > { %v2375_v2 = vadd.f32 %v2374_v59, %v14747_v36  ;;  %v2430_v16 = vadd.f32 %v2429_v18, %v2411_v14  ;;  %2987 = vmatpush.bf16.msra.mxu2 %v20402_v8  ;;  %v20418_v7 = vld [vmem:[#allocation113_spill] sm:$0xff]  ;;  %v20419_v8 = vld [vmem:[#allocation110_spill] sm:$0xff] }
 0x16e   : > { %v2393_v13 = vpop.f32.mrf.mxu1 }
 0x16f   : > { %v2394_v17 = vadd.f32 %v2393_v13, %v2375_v2  ;;  %v20415_v13 = vld [vmem:[#allocation105_spill] sm:$0xff]  ;;  %v20416_v2 = vld [vmem:[#allocation111_spill] sm:$0xff] }
 0x170   : > { %2949 = vmatpush.bf16.msra.mxu0 %v20403_v39  ;;  %3006 = vmatpush.bf16.msra.mxu3 %v20404_v50 }
 0x171   : > { %2988 = vmatpush.bf16.msra.mxu2 %v20405_v29  ;;  %v20421_v29 = vld [vmem:[#allocation93_spill] sm:$0xff] }
 0x172   : > { %v2412_v33 = vpop.f32.mrf.mxu2  ;;  %v2431_v34 = vpop.f32.mrf.mxu3 }
 0x173   : > { %v2413_v56 = vadd.f32 %v2412_v33, %v2394_v17  ;;  %v20420_v17 = vld [vmem:[#allocation115_spill] sm:$0xff]  ;;  %v20422_v33 = vld [vmem:[#allocation117_spill] sm:$0xff] }
 0x174   : > { %v2443_v62 = vpop.f32.mrf.mxu0  ;;  %2950 = vmatpush.bf16.msra.mxu0 %v20406_v5  ;;  %3007 = vmatpush.bf16.msra.mxu3 %v20407_v15  ;;  %v14837_v5 = vld [vmem:[#allocation1 + $0x12] sm:$0xff]  ;;  %v14839_v15 = vld [vmem:[#allocation1 + $0x1b] sm:$0xff] }
 0x175   : > { %v14810_v36 = vadd.f32 %v2443_v62, %v2425_v19  ;;  %v2432_v25 = vadd.f32 %v2431_v34, %v2413_v56  ;;  %2989 = vmatpush.bf16.msra.mxu2 %v20408_v32  ;;  %2876 = vmatmul.bf16.vlgmr.msrb.gmra.mxu0 %v14647_v40  ;;  %v20411_v19 = vld [vmem:[#allocation101_spill] sm:$0xff]  ;;  %v3400_v32 = vld [vmem:[%s20423_s29] sm:$0x3] }
 0x176   : > { %v2462_v46 = vpop.f32.mrf.mxu1  ;;  %2895 = vmatmul.bf16.vlgmr.msrb.gmra.mxu1 %v14649_v41  ;;  %2933 = vmatmul.bf16.vlgmr.msrb.gmra.mxu3 %v14739_v10  ;;  %3878 = vst [vmem:[#allocation1] ss:$9 sm:$0xff] %v3400_v32 }
 0x177   : > { %2914 = vmatmul.bf16.vlgmr.msrb.gmra.mxu2 %v14651_v6  ;;  %3039 = vmatpush.bf16.msrb.mxu1 %v20413_v52 }
 0x178   : > { %2951 = vmatpush.bf16.msra.mxu0 %v20409_v23  ;;  %3008 = vmatpush.bf16.msra.mxu3 %v20410_v26  ;;  %v20424_v23 = vld [vmem:[#allocation114_spill] sm:$0xff]  ;;  %v20425_v26 = vld [vmem:[#allocation120_spill] sm:$0xff] }
 0x179   : > { %3058 = vmatpush.bf16.msrb.mxu2 %v20411_v19  ;;  %v20427_v19 = vld [vmem:[#allocation121_spill] sm:$0xff] }
 0x17a   : > { %v2481_v0 = vpop.f32.mrf.mxu2  ;;  %v2500_v27 = vpop.f32.mrf.mxu3 }
 0x17b   : > { %v2482_v43 = vadd.f32 %v2481_v0, %v2462_v46  ;;  %3040 = vmatpush.bf16.msrb.mxu1 %v20417_v53  ;;  %v20429_v0 = vld [vmem:[#allocation124_spill] sm:$0xff] }
 0x17c   : > { %3020 = vmatpush.bf16.msrb.mxu0 %v20412_v28  ;;  %3077 = vmatpush.bf16.msrb.mxu3 %v20414_v31  ;;  %v2445_v9 = vpop.f32.mrf.mxu0  ;;  %v20428_v28 = vld [vmem:[#allocation118_spill] sm:$0xff] }
 0x17d   : > { %v14825_v14 = vadd.f32 %v2445_v9, %v2427_v35  ;;  %v2501_v59 = vadd.f32 %v2500_v27, %v2482_v43  ;;  %3059 = vmatpush.bf16.msrb.mxu2 %v20415_v13  ;;  %v20430_v13 = vld [vmem:[#allocation102_spill] sm:$0xff] }
 0x17e   : > { %v2464_v18 = vpop.f32.mrf.mxu1 }
 0x17f   : > { %3041 = vmatpush.bf16.msrb.mxu1 %v20421_v29  ;;  %v20437_v29 = vld [vmem:[#allocation131_spill] sm:$0xff] }
 0x180   : > { %3021 = vmatpush.bf16.msrb.mxu0 %v20416_v2  ;;  %3078 = vmatpush.bf16.msrb.mxu3 %v20418_v7  ;;  %v20431_v2 = vld [vmem:[#allocation125_spill] sm:$0xff]  ;;  %v20432_v7 = vld [vmem:[#allocation122_spill] sm:$0xff] }
 0x181   : > { %3060 = vmatpush.bf16.msrb.mxu2 %v20419_v8  ;;  %v20433_v8 = vld [vmem:[#allocation128_spill] sm:$0xff] }
 0x182   : > { %v2483_v39 = vpop.f32.mrf.mxu2  ;;  %v2502_v50 = vpop.f32.mrf.mxu3 }
 0x183   : > { %v2484_v35 = vadd.f32 %v2483_v39, %v2464_v18  ;;  %v20435_v39 = vld [vmem:[#allocation129_spill] sm:$0xff] }
 0x184   : > { %3022 = vmatpush.bf16.msrb.mxu0 %v20420_v17  ;;  %3079 = vmatpush.bf16.msrb.mxu3 %v20422_v33  ;;  %v2448_v34 = vpop.f32.mrf.mxu0  ;;  %v20434_v17 = vld [vmem:[#allocation107_spill] sm:$0xff] }
 0x185   : > { %v14835_v62 = vadd.f32 %v2448_v34, %v2430_v16  ;;  %v2503_v46 = vadd.f32 %v2502_v50, %v2484_v35  ;;  %3061 = vmatpush.bf16.msrb.mxu2 %v20424_v23  ;;  %2881 = vmatmul.bf16.gmra.mxu0 %v14695_v49  ;;  %v20426_v16 = vld [vmem:[#allocation97_spill] sm:$0xff]  ;;  %v20436_v50 = vld [vmem:[#allocation126_spill] sm:$0xff]  ;;  %v20438_v23 = vld [vmem:[#allocation112_spill] sm:$0xff] }
 0x186   : > { %v2467_v56 = vpop.f32.mrf.mxu1  ;;  %2900 = vmatmul.bf16.gmra.mxu1 %v14701_v12  ;;  %2938 = vmatmul.bf16.gmra.mxu3 %v14785_v58 }
 0x187   : > { %2919 = vmatmul.bf16.gmra.mxu2 %v14703_v42  ;;  %3042 = vmatpush.bf16.msrb.mxu1 %v20426_v16 }
 0x188   : > { %3023 = vmatpush.bf16.msrb.mxu0 %v20425_v26  ;;  %3080 = vmatpush.bf16.msrb.mxu3 %v20427_v19  ;;  %v20439_v26 = vld [vmem:[#allocation133_spill] sm:$0xff]  ;;  %v20440_v19 = vld [vmem:[#allocation130_spill] sm:$0xff] }
 0x189   : > { %3062 = vmatpush.bf16.msrb.mxu2 %v20428_v28  ;;  %v20441_v28 = vld [vmem:[#allocation135_spill] sm:$0xff] }
 0x18a   : > { %v2486_v27 = vpop.f32.mrf.mxu2  ;;  %v2505_v52 = vpop.f32.mrf.mxu3 }
 0x18b   : > { %v2487_v31 = vadd.f32 %v2486_v27, %v2467_v56  ;;  %3043 = vmatpush.bf16.msrb.mxu1 %v20430_v13  ;;  %v20443_v27 = vld [vmem:[#allocation137_spill] sm:$0xff]  ;;  %v20446_v13 = vld [vmem:[#allocation139_spill] sm:$0xff] }
 0x18c   : > { %3024 = vmatpush.bf16.msrb.mxu0 %v20429_v0  ;;  %v2450_v43 = vpop.f32.mrf.mxu0  ;;  %3081 = vmatpush.bf16.msrb.mxu3 %v20431_v2  ;;  %v20447_v2 = vld [vmem:[#allocation138_spill] sm:$0xff] }
 0x18d   : > { %v14854_v18 = vadd.f32 %v2450_v43, %v2432_v25  ;;  %v2506_v53 = vadd.f32 %v2505_v52, %v2487_v31  ;;  %3063 = vmatpush.bf16.msrb.mxu2 %v20432_v7  ;;  %v20444_v52 = vld [vmem:[#allocation132_spill] sm:$0xff]  ;;  %v20445_v31 = vld [vmem:[#allocation119_spill] sm:$0xff] }
 0x18e   : > { %v2469_v9 = vpop.f32.mrf.mxu1 }
 0x18f   : > { %3044 = vmatpush.bf16.msrb.mxu1 %v20434_v17 }
 0x190   : > { %3025 = vmatpush.bf16.msrb.mxu0 %v20433_v8  ;;  %3082 = vmatpush.bf16.msrb.mxu3 %v20435_v39  ;;  %v2606_v39 = vpack.i.b16 %v14837_v5, %v14837_v5 }
 0x191   : > { %3064 = vmatpush.bf16.msrb.mxu2 %v20436_v50 }
 0x192   : > { %v2488_v33 = vpop.f32.mrf.mxu2  ;;  %v2507_v25 = vpop.f32.mrf.mxu3 }
 0x193   : > { %v2489_v35 = vadd.f32 %v2488_v33, %v2469_v9  ;;  %3045 = vmatpush.bf16.msrb.mxu1 %v20438_v23  ;;  %v2609_v33 = vpack.i.b16 %v14839_v15, %v14839_v15  ;;  %v2608_v23 = vperm.slane %v2606_v39, 0 }
 0x194   : > { %3026 = vmatpush.bf16.msrb.mxu0 %v20437_v29  ;;  %v2519_v34 = vpop.f32.mrf.mxu0  ;;  %3083 = vmatpush.bf16.msrb.mxu3 %v20439_v26 }
 0x195   : > { %v2520_v32 = vadd.f32 %v2519_v34, %v2501_v59  ;;  %v14866_v16 = vadd.f32 %v2507_v25, %v2489_v35  ;;  %3065 = vmatpush.bf16.msrb.mxu2 %v20440_v19  ;;  %2952 = vmatmul.bf16.vlgmr.msra.gmra.mxu0 %v14744_v47  ;;  %v20442_v59 = vld [vmem:[#allocation116_spill] sm:$0xff]  ;;  %v20449_v35 = vld [vmem:[#allocation123_spill] sm:$0xff]  ;;  %v2611_v26 = vperm.slane %v2609_v33, 0  ;;  %v20451_v19 = vld [vmem:[#allocation141_spill] sm:$0xff] }
 0x196   : > { %v2538_v56 = vpop.f32.mrf.mxu1  ;;  %9994 = vmatmul.msk.bf16.vlgmr.msra.gmra.mxu1 %vm2047_vm0, %v14749_v21  ;;  %3009 = vmatmul.bf16.vlgmr.msra.gmra.mxu3 %v14647_v40  ;;  %v20448_v25 = vld [vmem:[#allocation136_spill] sm:$0xff]  ;;  %v20458_v33 = vld [vmem:[#allocation146_spill] sm:$0xff] }
 0x197   : > { %v2539_v0 = vadd.f32 %v2538_v56, %v2520_v32  ;;  %2990 = vmatmul.bf16.vlgmr.msra.gmra.mxu2 %v14645_v61  ;;  %3046 = vmatpush.bf16.msrb.mxu1 %v20442_v59  ;;  %v20450_v56 = vld [vmem:[#allocation142_spill] sm:$0xff] }
 0x198   : > { %3027 = vmatpush.bf16.msrb.mxu0 %v20441_v28  ;;  %3084 = vmatpush.bf16.msrb.mxu3 %v20443_v27  ;;  %v20452_v28 = vld [vmem:[#allocation127_spill] sm:$0xff] }
 0x199   : > { %3134 = vmatpush.bf16.msra.mxu2 %v20444_v52 }
 0x19a   : > { %v2557_v43 = vpop.f32.mrf.mxu2  ;;  %v2576_v9 = vpop.f32.mrf.mxu3 }
 0x19b   : > { %3115 = vmatpush.bf16.msra.mxu1 %v20445_v31  ;;  %v2558_v7 = vadd.f32 %v2557_v43, %v2539_v0  ;;  %v20453_v0 = vld [vmem:[#allocation145_spill] sm:$0xff]  ;;  %v14892_v31 = vunpack.c.l.bf16 %v2608_v23 }
 0x19c   : > { %3153 = vmatpush.bf16.msra.mxu3 %v20446_v13  ;;  %3103 = vmatpush.bf16.msra.mxu0 %v20447_v2  ;;  %v2521_v8 = vpop.f32.mrf.mxu0  ;;  %v14894_v13 = vunpack.c.l.bf16 %v2611_v26  ;;  %v20456_v2 = vld [vmem:[#allocation144_spill] sm:$0xff] }
 0x19d   : > { %v2522_v50 = vadd.f32 %v2521_v8, %v2503_v46  ;;  %v2577_v29 = vadd.f32 %v2576_v9, %v2558_v7  ;;  %3135 = vmatpush.bf16.msra.mxu2 %v20448_v25  ;;  %20454 = vst [vmem:[#allocation14_spill] sm:$0xff] %v14892_v31  ;;  %v20457_v7 = vld [vmem:[#allocation134_spill] sm:$0xff]  ;;  %v20459_v25 = vld [vmem:[#allocation140_spill] sm:$0xff] }
 0x19e   : > { %v2540_v17 = vpop.f32.mrf.mxu1  ;;  %20455 = vst [vmem:[#allocation15_spill] sm:$0xff] %v14894_v13 }
 0x19f   : > { %3116 = vmatpush.bf16.msra.mxu1 %v20449_v35  ;;  %v2541_v34 = vadd.f32 %v2540_v17, %v2522_v50  ;;  %v2587_v32 = vpack.c.bf16 %v2577_v29, %v14810_v36 }
 0x1a0   : > { %3154 = vmatpush.bf16.msra.mxu3 %v20450_v56 }
 0x1a1   : > { %3136 = vmatpush.bf16.msra.mxu2 %v20451_v19  ;;  %v2614_v52 = vunpack.c.l.bf16 %v2587_v32  ;;  %v2615_v9 = vunpack.c.h.bf16 %v2587_v32 }
 0x1a2   : > { %v2559_v46 = vpop.f32.mrf.mxu2  ;;  %v2578_v5 = vpop.f32.mrf.mxu3 }
 0x1a3   : > { %3117 = vmatpush.bf16.msra.mxu1 %v20452_v28  ;;  %v2560_v15 = vadd.f32 %v2559_v46, %v2541_v34  ;;  %v2635_v39 = vadd.f32 %v14894_v13, %v2615_v9  ;;  %v20460_v28 = vld [vmem:[#allocation152_spill] sm:$0xff] }
 0x1a4   : > { %3155 = vmatpush.bf16.msra.mxu3 %v20453_v0  ;;  %v2524_v59 = vpop.f32.mrf.mxu0 }
 0x1a5   : > { %v2525_v43 = vadd.f32 %v2524_v59, %v2506_v53  ;;  %v2579_v36 = vadd.f32 %v2578_v5, %v2560_v15  ;;  %3137 = vmatpush.bf16.msra.mxu2 %v20456_v2  ;;  %2957 = vmatmul.bf16.gmra.mxu0 %v14787_v60  ;;  %v2634_v53 = vadd.f32 %v14892_v31, %v2614_v52  ;;  %v2675_v46 = vmax.f32 %v2635_v39, 0.0  ;;  %v20461_v59 = vld [vmem:[#allocation149_spill] sm:$0xff] }
 0x1a6   : > { %v2543_v27 = vpop.f32.mrf.mxu1  ;;  %9995 = vmatmul.msk.bf16.gmra.mxu1 %vm2047_vm0, %v14791_v45  ;;  %3014 = vmatmul.bf16.gmra.mxu3 %v14695_v49  ;;  %v20463_v2 = vld [vmem:[#allocation157_spill] sm:$0xff] }
 0x1a7   : > { %3118 = vmatpush.bf16.msra.mxu1 %v20457_v7  ;;  %v2544_v8 = vadd.f32 %v2543_v27, %v2525_v43  ;;  %v2589_v17 = vpack.c.bf16 %v2579_v36, %v14825_v14  ;;  %2995 = vmatmul.bf16.gmra.mxu2 %v14691_v37  ;;  %v2674_v19 = vmax.f32 %v2634_v53, 0.0  ;;  %v20462_v27 = vld [vmem:[#allocation143_spill] sm:$0xff] }
 0x1a8   : > { %3156 = vmatpush.bf16.msra.mxu3 %v14259_v51  ;;  %v20465_v7 = vld [vmem:[#allocation147_spill] sm:$0xff] }
 0x1a9   : > { %v2618_v50 = vunpack.c.l.bf16 %v2589_v17  ;;  %v2619_v29 = vunpack.c.h.bf16 %v2589_v17  ;;  %3138 = vmatpush.bf16.msra.mxu2 %v20458_v33 }
 0x1aa   : > { %v2562_v35 = vpop.f32.mrf.mxu2  ;;  %v2581_v34 = vpop.f32.mrf.mxu3 }
 0x1ab   : > { %3119 = vmatpush.bf16.msra.mxu1 %v20459_v25  ;;  %v2638_v14 = vadd.f32 %v14892_v31, %v2618_v50  ;;  %v2639_v56 = vadd.f32 %v14894_v13, %v2619_v29  ;;  %v2563_v32 = vadd.f32 %v2562_v35, %v2544_v8 }
 0x1ac   : > { %v2526_v23 = vpop.f32.mrf.mxu0  ;;  %3157 = vmatpush.bf16.msra.mxu3 %v20460_v28 }
 0x1ad   : > { %v2527_v51 = vadd.f32 %v2526_v23, %v14866_v16  ;;  %v2678_v5 = vmax.f32 %v2638_v14, 0.0  ;;  %v2679_v0 = vmax.f32 %v2639_v56, 0.0  ;;  %v2582_v15 = vadd.f32 %v2581_v34, %v2563_v32  ;;  %3139 = vmatpush.bf16.msra.mxu2 %v20461_v59  ;;  %v20464_v16 = vld [vmem:[#allocation154_spill] sm:$0xff]  ;;  %v20468_v56 = vld [vmem:[#allocation164_spill] sm:$0xff]  ;;  %v20469_v32 = vld [vmem:[#allocation159_spill] sm:$0xff] }
 0x1ae   : > { %v2545_v26 = vpop.f32.mrf.mxu1  ;;  %v20466_v34 = vld [vmem:[#allocation158_spill] sm:$0xff] }
 0x1af   : > { %3120 = vmatpush.bf16.msra.mxu1 %v20462_v27  ;;  %v2546_v52 = vadd.f32 %v2545_v26, %v2527_v51  ;;  %v14915_v43 = vpack.c.bf16 %v2678_v5, %v2674_v19  ;;  %v14917_v9 = vpack.c.bf16 %v2679_v0, %v2675_v46  ;;  %v2591_v36 = vpack.c.bf16 %v2582_v15, %v14835_v62  ;;  %v20467_v62 = vld [vmem:[#allocation150_spill] sm:$0xff]  ;;  %v20470_v19 = vld [vmem:[#allocation148_spill] sm:$0xff]  ;;  %v20471_v51 = vld [vmem:[#allocation151_spill] sm:$0xff] }
 0x1b0   : > { %3158 = vmatpush.bf16.msra.mxu3 %v20463_v2  ;;  %v20472_v5 = vld [vmem:[#allocation166_spill] sm:$0xff] }
 0x1b1   : > { %3140 = vmatpush.bf16.msra.mxu2 %v20464_v16  ;;  %v2622_v29 = vunpack.c.l.bf16 %v2591_v36  ;;  %v2623_v25 = vunpack.c.h.bf16 %v2591_v36  ;;  %v20473_v2 = vld [vmem:[#allocation162_spill] sm:$0xff] }
 0x1b2   : > { %v2564_v8 = vpop.f32.mrf.mxu2  ;;  %v2583_v17 = vpop.f32.mrf.mxu3 }
 0x1b3   : > { %3121 = vmatpush.bf16.msra.mxu1 %v20465_v7  ;;  %v2565_v53 = vadd.f32 %v2564_v8, %v2546_v52  ;;  %v2643_v28 = vadd.f32 %v14894_v13, %v2623_v25  ;;  %v20474_v8 = vld [vmem:[#allocation153_spill] sm:$0xff]  ;;  %v20476_v25 = vld [vmem:[#allocation167_spill] sm:$0xff] }
 0x1b4   : > { %v2725_v39 = vpop.f32.mrf.mxu0  ;;  %3159 = vmatpush.bf16.msra.mxu3 %v14369_v4  ;;  %v2642_v4 = vadd.f32 %v14892_v31, %v2622_v29 }
 0x1b5   : > { %v2584_v35 = vadd.f32 %v2583_v17, %v2565_v53  ;;  %3141 = vmatpush.bf16.msra.mxu2 %v20466_v34  ;;  %3028 = vmatmul.bf16.vlgmr.msrb.gmra.mxu0 %v14649_v41  ;;  %v20475_v17 = vld [vmem:[#allocation155_spill] sm:$0xff]  ;;  %v20478_v34 = vld [vmem:[#allocation161_spill] sm:$0xff] }
 0x1b6   : > { %v2744_v50 = vpop.f32.mrf.mxu1  ;;  %3047 = vmatmul.bf16.vlgmr.msrb.gmra.mxu1 %v14651_v6  ;;  %3085 = vmatmul.bf16.vlgmr.msrb.gmra.mxu3 %v14744_v47  ;;  %v2682_v16 = vmax.f32 %v2642_v4, 0.0 }
 0x1b7   : > { %v2745_v33 = vadd.f32 %v2744_v50, %v2725_v39  ;;  %3122 = vmatpush.bf16.msra.mxu1 %v20467_v62  ;;  %v2593_v14 = vpack.c.bf16 %v2584_v35, %v14854_v18  ;;  %3066 = vmatmul.bf16.vlgmr.msrb.gmra.mxu2 %v14739_v10  ;;  %v2683_v39 = vmax.f32 %v2643_v28, 0.0  ;;  %v20477_v35 = vld [vmem:[#allocation156_spill] sm:$0xff]  ;;  %v20481_v28 = vld [vmem:[#allocation165_spill] sm:$0xff] }
 0x1b8   : > { %3160 = vmatpush.bf16.msra.mxu3 %v20468_v56  ;;  %3172 = vmatpush.bf16.msrb.mxu0 %v20470_v19 }
 0x1b9   : > { %3210 = vmatpush.bf16.msrb.mxu2 %v20469_v32  ;;  %v2626_v23 = vunpack.c.l.bf16 %v2593_v14  ;;  %v2627_v26 = vunpack.c.h.bf16 %v2593_v14 }
 0x1ba   : > { %v2763_v46 = vpop.f32.mrf.mxu2  ;;  %v2782_v18 = vpop.f32.mrf.mxu3 }
 0x1bb   : > { %3191 = vmatpush.bf16.msrb.mxu1 %v20471_v51  ;;  %v2764_v0 = vadd.f32 %v2763_v46, %v2745_v33  ;;  %v2646_v27 = vadd.f32 %v14892_v31, %v2626_v23  ;;  %v2647_v52 = vadd.f32 %v14894_v13, %v2627_v26  ;;  %v20479_v26 = vld [vmem:[#allocation170_spill] sm:$0xff]  ;;  %v20480_v51 = vld [vmem:[#allocation160_spill] sm:$0xff]  ;;  %v20482_v46 = vld [vmem:[#allocation163_spill] sm:$0xff] }
 0x1bc   : > { %3236 = vmatpush.bf16.msrb.mxu3 %v20472_v5  ;;  %v2727_v15 = vpop.f32.mrf.mxu0  ;;  %3173 = vmatpush.bf16.msrb.mxu0 %v20474_v8 }
 0x1bd   : > { %3211 = vmatpush.bf16.msrb.mxu2 %v20473_v2  ;;  %v2783_v7 = vadd.f32 %v2782_v18, %v2764_v0  ;;  %v2686_v53 = vmax.f32 %v2646_v27, 0.0  ;;  %v2687_v50 = vmax.f32 %v2647_v52, 0.0  ;;  %v20483_v18 = vld [vmem:[#allocation169_spill] sm:$0xff]  ;;  %v20484_v2 = vld [vmem:[#allocation168_spill] sm:$0xff] }
 0x1be   : > { %v2746_v59 = vpop.f32.mrf.mxu1 }
 0x1bf   : > { %v2747_v36 = vadd.f32 %v2746_v59, %v2727_v15  ;;  %3192 = vmatpush.bf16.msrb.mxu1 %v20475_v17  ;;  %v14943_v29 = vpack.c.bf16 %v2686_v53, %v2682_v16  ;;  %v14945_v33 = vpack.c.bf16 %v2687_v50, %v2683_v39 }
 0x1c0   : > { %3174 = vmatpush.bf16.msrb.mxu0 %v20477_v35 }
 0x1c1   : > { %3212 = vmatpush.bf16.msrb.mxu2 %v20476_v25  ;;  %v11980_v25 = vld [vmem:[%s20486_s1 + $0x174] sm:$0xf0] }
 0x1c2   : > { %v2765_v62 = vpop.f32.mrf.mxu2  ;;  %v2784_v14 = vpop.f32.mrf.mxu3 }
 0x1c3   : > { %3193 = vmatpush.bf16.msrb.mxu1 %v20478_v34  ;;  %v2766_v56 = vadd.f32 %v2765_v62, %v2747_v36  ;;  %v10250_v34 = vld [vmem:[%s20486_s1 + $0x1f0] sm:$0xf]  ;;  %v11996_v62 = vld [vmem:[%s20486_s1 + $0x1f4] sm:$0xf0] }
 0x1c4   : > { %v2730_v32 = vpop.f32.mrf.mxu0  ;;  %3175 = vmatpush.bf16.msrb.mxu0 %v20480_v51  ;;  %v10178_v51 = vld [vmem:[%s20486_s1 + $0x160] sm:$0xf] }
 0x1c5   : > { %3213 = vmatpush.bf16.msrb.mxu2 %v20479_v26  ;;  %v14951_v19 = vadd.f32 %v2784_v14, %v2766_v56  ;;  %3033 = vmatmul.bf16.gmra.mxu0 %v14701_v12  ;;  %v15011_v14 = vor.u32 %v11996_v62, %v10250_v34  ;;  %v10114_v56 = vld [vmem:[%s20486_s1 + $0xe0] sm:$0xf]  ;;  %v11962_v26 = vld [vmem:[%s20486_s1 + $0xe4] sm:$0xf0] }
 0x1c6   : > { %v2749_v4 = vpop.f32.mrf.mxu1  ;;  %3052 = vmatmul.bf16.gmra.mxu1 %v14703_v42  ;;  %3090 = vmatmul.bf16.gmra.mxu3 %v14787_v60  ;;  %v10098_v34 = vld [vmem:[%s20486_s1 + $0xc0] sm:$0xf] }
 0x1c7   : > { %v2750_v23 = vadd.f32 %v2749_v4, %v2730_v32  ;;  %3194 = vmatpush.bf16.msrb.mxu1 %v20481_v28  ;;  %3071 = vmatmul.bf16.gmra.mxu2 %v14785_v58  ;;  %v11978_v28 = vld [vmem:[%s20486_s1 + $0x164] sm:$0xf0] }
 0x1c8   : > { %3176 = vmatpush.bf16.msrb.mxu0 %v20482_v46 }
 0x1c9   : > { %3214 = vmatpush.bf16.msrb.mxu2 %v14486_v30  ;;  %v20485_v30 = vld [vmem:[#allocation171_spill] sm:$0xff] }
 0x1ca   : > { %v2768_v5 = vpop.f32.mrf.mxu2  ;;  %v2787_v0 = vpop.f32.mrf.mxu3 }
 0x1cb   : > { %3195 = vmatpush.bf16.msrb.mxu1 %v20483_v18  ;;  %v2769_v15 = vadd.f32 %v2768_v5, %v2750_v23 }
 0x1cc   : > { %v2732_v59 = vpop.f32.mrf.mxu0  ;;  %3177 = vmatpush.bf16.msrb.mxu0 %v20484_v2 }
 0x1cd   : > { %3215 = vmatpush.bf16.msrb.mxu2 %v14516_v48  ;;  %v14963_v36 = vadd.f32 %v2787_v0, %v2769_v15  ;;  %v15040_v0 = vor.u32 %v11962_v26, %v10114_v56  ;;  %v15042_v15 = vor.u32 %v11978_v28, %v10178_v51  ;;  %v11958_v56 = vld [vmem:[%s20486_s1 + $0xc4] sm:$0xf0] }
 0x1ce   : > { %v2751_v27 = vpop.f32.mrf.mxu1  ;;  %v11974_v26 = vld [vmem:[%s20486_s1 + $0x144] sm:$0xf0] }
 0x1cf   : > { %v2752_v52 = vadd.f32 %v2751_v27, %v2732_v59  ;;  %3196 = vmatpush.bf16.msrb.mxu1 %v14483_v11  ;;  %v10058_v11 = vld [vmem:[%s20486_s1 + $0x70] sm:$0xf]  ;;  %v10242_v59 = vld [vmem:[%s20486_s1 + $0x1e0] sm:$0xf]  ;;  %v11994_v27 = vld [vmem:[%s20486_s1 + $0x1e4] sm:$0xf0] }
 0x1d0   : > { %3178 = vmatpush.bf16.msrb.mxu0 %v20485_v30  ;;  %v15052_v2 = vor.u32 %v11994_v27, %v10242_v59  ;;  %v10042_v30 = vld [vmem:[%s20486_s1 + $0x50] sm:$0xf]  ;;  %v10226_v27 = vld [vmem:[%s20486_s1 + $0x1c0] sm:$0xf] }
 0x1d1   : > { %3216 = vmatpush.bf16.msrb.mxu2 %v14540_v1  ;;  %v10122_v1 = vld [vmem:[%s20486_s1 + $0xf0] sm:$0xf] }
 0x1d2   : > { %v2770_v16 = vpop.f32.mrf.mxu2  ;;  %v2789_v8 = vpop.f32.mrf.mxu3 }
 0x1d3   : > { %3197 = vmatpush.bf16.msrb.mxu1 %v14511_v24  ;;  %v2771_v17 = vadd.f32 %v2770_v16, %v2752_v52  ;;  %v11948_v24 = vld [vmem:[%s20486_s1 + $0x74] sm:$0xf0] }
 0x1d4   : > { %v2801_v53 = vpop.f32.mrf.mxu0  ;;  %3179 = vmatpush.bf16.msrb.mxu0 %v14513_v20  ;;  %v14987_v20 = vor.u32 %v11948_v24, %v10058_v11  ;;  %v11944_v16 = vld [vmem:[%s20486_s1 + $0x54] sm:$0xf0] }
 0x1d5   : > { %v2802_v50 = vadd.f32 %v2801_v53, %v2783_v7  ;;  %3217 = vmatpush.bf16.msrb.mxu2 %v14555_v3  ;;  %v14971_v48 = vadd.f32 %v2789_v8, %v2771_v17  ;;  %9996 = vmatmul.msk.bf16.vlgmr.msra.gmra.mxu0 %vm2047_vm0, %v14749_v21  ;;  %v10186_v3 = vld [vmem:[%s20486_s1 + $0x170] sm:$0xf]  ;;  %v15066_v17 = vor.u32 %v11944_v16, %v10042_v30  ;;  %v11960_v53 = vld [vmem:[%s20486_s1 + $0xd4] sm:$0xf0] }
 0x1d6   : > { %v2820_v39 = vpop.f32.mrf.mxu1  ;;  %3123 = vmatmul.bf16.vlgmr.msra.gmra.mxu1 %v14645_v61  ;;  %3161 = vmatmul.bf16.vlgmr.msra.gmra.mxu3 %v14649_v41  ;;  %v15002_v61 = vor.u32 %v11980_v25, %v10186_v3  ;;  %v11946_v41 = vld [vmem:[%s20486_s1 + $0x64] sm:$0xf0]  ;;  %v10034_v3 = vld [vmem:[%s20486_s1 + $0x40] sm:$0xf] }
 0x1d7   : > { %3198 = vmatpush.bf16.msrb.mxu1 %v14537_v54  ;;  %v2821_v7 = vadd.f32 %v2820_v39, %v2802_v50  ;;  %v11964_v54 = vld [vmem:[%s20486_s1 + $0xf4] sm:$0xf0]  ;;  %3142 = vmatmul.bf16.vlgmr.msra.gmra.mxu2 %v14647_v40  ;;  %v10050_v40 = vld [vmem:[%s20486_s1 + $0x60] sm:$0xf]  ;;  %v10170_v39 = vld [vmem:[%s20486_s1 + $0x150] sm:$0xf] }
 0x1d8   : > { %v15000_v35 = vor.u32 %v11964_v54, %v10122_v1  ;;  %3721 = vmatpush.bf16.msra.mxu0 %v14987_v20  ;;  %3778 = vmatpush.bf16.msra.mxu3 %v15011_v14  ;;  %v15027_v23 = vor.u32 %v11946_v41, %v10050_v40  ;;  %v11976_v50 = vld [vmem:[%s20486_s1 + $0x154] sm:$0xf0]  ;;  %v10234_v1 = vld [vmem:[%s20486_s1 + $0x1d0] sm:$0xf]  ;;  %v11942_v25 = vld [vmem:[%s20486_s1 + $0x44] sm:$0xf0] }
 0x1d9   : > { %3759 = vmatpush.bf16.msra.mxu2 %v15002_v61  ;;  %v15079_v24 = vor.u32 %v11976_v50, %v10170_v39  ;;  %v15104_v41 = vor.u32 %v11942_v25, %v10034_v3  ;;  %v11956_v50 = vld [vmem:[%s20486_s1 + $0xb4] sm:$0xf0]  ;;  %v10218_v25 = vld [vmem:[%s20486_s1 + $0x1b0] sm:$0xf] }
 0x1da   : > { %v2839_v32 = vpop.f32.mrf.mxu2  ;;  %v15024_v4 = vpop.f32.mrf.mxu3 }
 0x1db   : > { %3740 = vmatpush.bf16.msra.mxu1 %v15000_v35  ;;  %v15038_v46 = vadd.f32 %v2839_v32, %v2821_v7  ;;  %v11992_v7 = vld [vmem:[%s20486_s1 + $0x1d4] sm:$0xf0]  ;;  %v10162_v32 = vld [vmem:[%s20486_s1 + $0x140] sm:$0xf] }
 0x1dc   : > { %v2803_v18 = vpop.f32.mrf.mxu0  ;;  %3722 = vmatpush.bf16.msra.mxu0 %v15027_v23  ;;  %3779 = vmatpush.bf16.msra.mxu3 %v15052_v2  ;;  %v15088_v54 = vor.u32 %v11992_v7, %v10234_v1  ;;  %v15119_v59 = vor.u32 %v11974_v26, %v10162_v32  ;;  %v10154_v1 = vld [vmem:[%s20486_s1 + $0x130] sm:$0xf]  ;;  %v11972_v7 = vld [vmem:[%s20486_s1 + $0x134] sm:$0xf0] }
 0x1dd   : > { %v2804_v52 = vadd.f32 %v2803_v18, %v14951_v19  ;;  %3760 = vmatpush.bf16.msra.mxu2 %v15042_v15  ;;  %v10106_v19 = vld [vmem:[%s20486_s1 + $0xd0] sm:$0xf] }
 0x1de   : > { %v2822_v5 = vpop.f32.mrf.mxu1  ;;  %v15077_v11 = vor.u32 %v11960_v53, %v10106_v19  ;;  %v10026_v19 = vld [vmem:[%s20486_s1 + $0x30] sm:$0xf] }
 0x1df   : > { %3741 = vmatpush.bf16.msra.mxu1 %v15040_v0  ;;  %v2823_v8 = vadd.f32 %v2822_v5, %v2804_v52  ;;  %v15117_v5 = vor.u32 %v11958_v56, %v10098_v34  ;;  %v11990_v52 = vld [vmem:[%s20486_s1 + $0x1c4] sm:$0xf0]  ;;  %v11988_v34 = vld [vmem:[%s20486_s1 + $0x1b4] sm:$0xf0]  ;;  %v10082_v56 = vld [vmem:[%s20486_s1 + $0xa0] sm:$0xf] }
 0x1e0   : > { %3723 = vmatpush.bf16.msra.mxu0 %v15066_v17  ;;  %3780 = vmatpush.bf16.msra.mxu3 %v15088_v54  ;;  %v15129_v16 = vor.u32 %v11990_v52, %v10226_v27  ;;  %v10146_v27 = vld [vmem:[%s20486_s1 + $0x120] sm:$0xf]  ;;  %v11970_v52 = vld [vmem:[%s20486_s1 + $0x124] sm:$0xf0] }
 0x1e1   : > { %3761 = vmatpush.bf16.msra.mxu2 %v15079_v24 }
 0x1e2   : > { %v2841_v62 = vpop.f32.mrf.mxu2  ;;  %v15101_v40 = vpop.f32.mrf.mxu3 }
 0x1e3   : > { %3742 = vmatpush.bf16.msra.mxu1 %v15077_v11  ;;  %v15115_v51 = vadd.f32 %v2841_v62, %v2823_v8  ;;  %v11940_v8 = vld [vmem:[%s20486_s1 + $0x34] sm:$0xf0]  ;;  %v15170_v62 = vor.u32 %v11988_v34, %v10218_v25  ;;  %v10010_v34 = vld [vmem:[%s20486_s1 + $0x10] sm:$0xf] }
 0x1e4   : > { %v2806_v28 = vpop.f32.mrf.mxu0  ;;  %3724 = vmatpush.bf16.msra.mxu0 %v15104_v41  ;;  %v15145_v39 = vor.u32 %v11940_v8, %v10026_v19  ;;  %3781 = vmatpush.bf16.msra.mxu3 %v15129_v16 }
 0x1e5   : > { %v2807_v30 = vadd.f32 %v2806_v28, %v14963_v36  ;;  %3762 = vmatpush.bf16.msra.mxu2 %v15119_v59  ;;  %v10090_v36 = vld [vmem:[%s20486_s1 + $0xb0] sm:$0xf]  ;;  %9997 = vmatmul.msk.bf16.gmra.mxu0 %vm2047_vm0, %v14791_v45 }
 0x1e6   : > { %v2825_v18 = vpop.f32.mrf.mxu1  ;;  %3128 = vmatmul.bf16.gmra.mxu1 %v14691_v37  ;;  %3166 = vmatmul.bf16.gmra.mxu3 %v14701_v12  ;;  %v15158_v3 = vor.u32 %v11956_v50, %v10090_v36  ;;  %v15160_v37 = vor.u32 %v11972_v7, %v10154_v1  ;;  %v11938_v12 = vld [vmem:[%s20486_s1 + $0x24] sm:$0xf0]  ;;  %v15200_v50 = vor.u32 %v11970_v52, %v10146_v27  ;;  %v10210_v1 = vld [vmem:[%s20486_s1 + $0x1a0] sm:$0xf]  ;;  %v11968_v27 = vld [vmem:[%s20486_s1 + $0x114] sm:$0xf0] }
 0x1e7   : > { %3743 = vmatpush.bf16.msra.mxu1 %v15117_v5  ;;  %v2826_v53 = vadd.f32 %v2825_v18, %v2807_v30  ;;  %3147 = vmatmul.bf16.gmra.mxu2 %v14695_v49  ;;  %v10018_v49 = vld [vmem:[%s20486_s1 + $0x20] sm:$0xf]  ;;  %v11954_v18 = vld [vmem:[%s20486_s1 + $0xa4] sm:$0xf0] }
 0x1e8   : > { %3725 = vmatpush.bf16.msra.mxu0 %v15145_v39  ;;  %v15185_v28 = vor.u32 %v11938_v12, %v10018_v49  ;;  %v15198_v36 = vor.u32 %v11954_v18, %v10082_v56  ;;  %v11986_v7 = vld [vmem:[%s20486_s1 + $0x1a4] sm:$0xf0]  ;;  %3782 = vmatpush.bf16.msra.mxu3 %v15170_v62  ;;  %v11936_v49 = vld [vmem:[%s20486_s1 + $0x14] sm:$0xf0]  ;;  %v10138_v18 = vld [vmem:[%s20486_s1 + $0x110] sm:$0xf] }
 0x1e9   : > { %3763 = vmatpush.bf16.msra.mxu2 %v15160_v37  ;;  %v15224_v56 = vor.u32 %v11936_v49, %v10010_v34  ;;  %v11934_v34 = vld [vmem:[%s20486_s1 + $0x4] sm:$0xf0]  ;;  %v10066_v49 = vld [vmem:[%s20486_s1 + $0x80] sm:$0xf] }
 0x1ea   : > { %v2844_v32 = vpop.f32.mrf.mxu2  ;;  %v15183_v26 = vpop.f32.mrf.mxu3 }
 0x1eb   : > { %3744 = vmatpush.bf16.msra.mxu1 %v15158_v3  ;;  %v15196_v30 = vadd.f32 %v2844_v32, %v2826_v53  ;;  %v15211_v53 = vor.u32 %v11986_v7, %v10210_v1  ;;  %20488 = vst [vmem:[#allocation20_spill] sm:$0xff] %v15224_v56  ;;  %v11952_v32 = vld [vmem:[%s20486_s1 + $0x94] sm:$0xf0] }
 0x1ec   : > { %v2808_v19 = vpop.f32.mrf.mxu0  ;;  %3726 = vmatpush.bf16.msra.mxu0 %v15185_v28  ;;  %v11984_v1 = vld [vmem:[%s20486_s1 + $0x194] sm:$0xf0] }
 0x1ed   : > { %v2809_v25 = vadd.f32 %v2808_v19, %v14971_v48  ;;  %20487 = vst [vmem:[#allocation17_spill] sm:$0xff] %v15211_v53  ;;  %3764 = vmatpush.bf16.msra.mxu2 %v15200_v50  ;;  %v10074_v48 = vld [vmem:[%s20486_s1 + $0x90] sm:$0xf]  ;;  %v15237_v19 = vor.u32 %v11968_v27, %v10138_v18  ;;  %3783 = vmatpush.bf16.msra.mxu3 %v15211_v53  ;;  %v11950_v27 = vld [vmem:[%s20486_s1 + $0x84] sm:$0xf0] }
 0x1ee   : > { %v2827_v8 = vpop.f32.mrf.mxu1  ;;  %v15235_v52 = vor.u32 %v11952_v32, %v10074_v48  ;;  %v11982_v53 = vld [vmem:[%s20486_s1 + $0x184] sm:$0xf0] }
 0x1ef   : > { %3745 = vmatpush.bf16.msra.mxu1 %v15198_v36  ;;  %v2828_v12 = vadd.f32 %v2827_v8, %v2809_v25  ;;  %20490 = vst [vmem:[#allocation21_spill] sm:$0xff] %v15237_v19  ;;  %v10202_v8 = vld [vmem:[%s20486_s1 + $0x190] sm:$0xf]  ;;  %v10002_v25 = vld [vmem:[%s20486_s1] sm:$0xf] }
 0x1f0   : > { %20489 = vst [vmem:[#allocation19_spill] sm:$0xff] %v15235_v52  ;;  %3727 = vmatpush.bf16.msra.mxu0 %v15224_v56  ;;  %v15247_v7 = vor.u32 %v11984_v1, %v10202_v8  ;;  %v15262_v18 = vor.u32 %v11934_v34, %v10002_v25  ;;  %v10130_v8 = vld [vmem:[%s20486_s1 + $0x100] sm:$0xf]  ;;  %v11966_v1 = vld [vmem:[%s20486_s1 + $0x104] sm:$0xf0] }
 0x1f1   : > { %3765 = vmatpush.bf16.msra.mxu2 %v15237_v19  ;;  %v15277_v25 = vor.u32 %v11966_v1, %v10130_v8  ;;  %v10194_v34 = vld [vmem:[%s20486_s1 + $0x180] sm:$0xf]  ;;  %v11979_v8 = vld [vmem:[%s20486_s1 + $0x174] sm:$0xf]  ;;  %v10188_v1 = vld [vmem:[%s20486_s1 + $0x178] sm:$0xf0] }
 0x1f2   : > { %v2846_v48 = vpop.f32.mrf.mxu2  ;;  %v15260_v32 = vpop.f32.mrf.mxu3  ;;  %3784 = vmatpush.bf16.msra.mxu3 %v15247_v7 }
 0x1f3   : > { %3746 = vmatpush.bf16.msra.mxu1 %v15235_v52  ;;  %v15273_v13 = vadd.f32 %v2846_v48, %v2828_v12  ;;  %v15275_v52 = vor.u32 %v11950_v27, %v10066_v49  ;;  %20491 = vst [vmem:[#allocation13_spill] sm:$0xff] %v15277_v25  ;;  %v15288_v12 = vor.u32 %v11982_v53, %v10194_v34  ;;  %v11947_v49 = vld [vmem:[%s20486_s1 + $0x74] sm:$0xf]  ;;  %v10060_v48 = vld [vmem:[%s20486_s1 + $0x78] sm:$0xf0] }
 0x1f4   : > { %v2877_v31 = vpop.f32.mrf.mxu0  ;;  %3728 = vmatpush.bf16.msra.mxu0 %v15262_v18  ;;  %v15303_v53 = vor.u32 %v11947_v49, %v10060_v48  ;;  %v10124_v27 = vld [vmem:[%s20486_s1 + $0xf8] sm:$0xf0]  ;;  %v10052_v34 = vld [vmem:[%s20486_s1 + $0x68] sm:$0xf0]  ;;  %v11961_v49 = vld [vmem:[%s20486_s1 + $0xe4] sm:$0xf] }
 0x1f5   : > { %v2878_v56 = vadd.f32 %v2877_v31, %v15024_v4  ;;  %20492 = vst [vmem:[#allocation23_spill] sm:$0xff] %v15288_v12  ;;  %3766 = vmatpush.bf16.msra.mxu2 %v15277_v25  ;;  %v11963_v31 = vld [vmem:[%s20486_s1 + $0xf4] sm:$0xf]  ;;  %3180 = vmatmul.bf16.vlgmr.msrb.gmra.mxu0 %v14651_v6 }
 0x1f6   : > { %v2896_v19 = vpop.f32.mrf.mxu1  ;;  %3199 = vmatmul.bf16.vlgmr.msrb.gmra.mxu1 %v14739_v10  ;;  %20493 = vst [vmem:[#allocation22_spill] sm:$0xff] %v15303_v53  ;;  %9998 = vmatmul.msk.bf16.vlgmr.msrb.gmra.mxu3 %vm2047_vm0, %v14749_v21  ;;  %v15317_v6 = vor.u32 %v11963_v31, %v10124_v27  ;;  %v15319_v10 = vor.u32 %v11979_v8, %v10188_v1  ;;  %v11945_v21 = vld [vmem:[%s20486_s1 + $0x64] sm:$0xf]  ;;  %v10116_v8 = vld [vmem:[%s20486_s1 + $0xe8] sm:$0xf0] }
 0x1f7   : > { %3747 = vmatpush.bf16.msra.mxu1 %v15275_v52  ;;  %v2897_v4 = vadd.f32 %v2896_v19, %v2878_v56  ;;  %3218 = vmatmul.bf16.vlgmr.msrb.gmra.mxu2 %v14744_v47  ;;  %v11995_v56 = vld [vmem:[%s20486_s1 + $0x1f4] sm:$0xf]  ;;  %v10252_v19 = vld [vmem:[%s20486_s1 + $0x1f8] sm:$0xf0]  ;;  %v15343_v27 = vor.u32 %v11945_v21, %v10052_v34  ;;  %v11977_v1 = vld [vmem:[%s20486_s1 + $0x164] sm:$0xf] }
 0x1f8   : > { %20494 = vst [vmem:[#allocation24_spill] sm:$0xff] %v15317_v6  ;;  %3785 = vmatpush.bf16.msra.mxu3 %v15288_v12  ;;  %3797 = vmatpush.bf16.msrb.mxu0 %v15303_v53  ;;  %v15329_v47 = vor.u32 %v11995_v56, %v10252_v19  ;;  %v10180_v56 = vld [vmem:[%s20486_s1 + $0x168] sm:$0xf0]  ;;  %v11993_v21 = vld [vmem:[%s20486_s1 + $0x1e4] sm:$0xf] }
 0x1f9   : > { %20495 = vst [vmem:[#allocation16_spill] sm:$0xff] %v15319_v10  ;;  %3835 = vmatpush.bf16.msrb.mxu2 %v15319_v10  ;;  %v10244_v34 = vld [vmem:[%s20486_s1 + $0x1e8] sm:$0xf0] }
 0x1fa   : > { %20496 = vst [vmem:[#allocation18_spill] sm:$0xff] %v15329_v47  ;;  %v2915_v48 = vpop.f32.mrf.mxu2  ;;  %v2934_v31 = vpop.f32.mrf.mxu3  ;;  %v15366_v25 = vor.u32 %v11993_v21, %v10244_v34 }
 0x1fb   : > { %3816 = vmatpush.bf16.msrb.mxu1 %v15317_v6  ;;  %20497 = vst [vmem:[#allocation26_spill] sm:$0xff] %v15343_v27  ;;  %v2916_v19 = vadd.f32 %v2915_v48, %v2897_v4  ;;  %v15354_v6 = vor.u32 %v11961_v49, %v10116_v8  ;;  %v11943_v49 = vld [vmem:[%s20486_s1 + $0x54] sm:$0xf]  ;;  %v10044_v48 = vld [vmem:[%s20486_s1 + $0x58] sm:$0xf0] }
 0x1fc   : > { %3854 = vmatpush.bf16.msrb.mxu3 %v15329_v47  ;;  %v2879_v10 = vpop.f32.mrf.mxu0  ;;  %v15356_v47 = vor.u32 %v11977_v1, %v10180_v56  ;;  %3798 = vmatpush.bf16.msrb.mxu0 %v15343_v27  ;;  %20500 = vst [vmem:[#allocation29_spill] sm:$0xff] %v15366_v25  ;;  %v10108_v8 = vld [vmem:[%s20486_s1 + $0xd8] sm:$0xf0]  ;;  %v11975_v1 = vld [vmem:[%s20486_s1 + $0x154] sm:$0xf] }
 0x1fd   : > { %20498 = vst [vmem:[#allocation25_spill] sm:$0xff] %v15354_v6  ;;  %v2880_v53 = vadd.f32 %v2879_v10, %v15101_v40  ;;  %v15368_v4 = vadd.f32 %v2934_v31, %v2916_v19  ;;  %v11959_v40 = vld [vmem:[%s20486_s1 + $0xd4] sm:$0xf]  ;;  %v15382_v31 = vor.u32 %v11943_v49, %v10044_v48  ;;  %v10172_v56 = vld [vmem:[%s20486_s1 + $0x158] sm:$0xf0] }
 0x1fe   : > { %v2898_v12 = vpop.f32.mrf.mxu1  ;;  %20499 = vst [vmem:[#allocation27_spill] sm:$0xff] %v15356_v47  ;;  %3836 = vmatpush.bf16.msrb.mxu2 %v15356_v47  ;;  %v15393_v19 = vor.u32 %v11959_v40, %v10108_v8  ;;  %v15395_v21 = vor.u32 %v11975_v1, %v10172_v56  ;;  %v11941_v49 = vld [vmem:[%s20486_s1 + $0x44] sm:$0xf]  ;;  %v10036_v48 = vld [vmem:[%s20486_s1 + $0x48] sm:$0xf0] }
 0x1ff   : > { %3817 = vmatpush.bf16.msrb.mxu1 %v15354_v6  ;;  %v2899_v10 = vadd.f32 %v2898_v12, %v2880_v53  ;;  %20501 = vst [vmem:[#allocation28_spill] sm:$0xff] %v15382_v31  ;;  %v11991_v12 = vld [vmem:[%s20486_s1 + $0x1d4] sm:$0xf]  ;;  %v10236_v53 = vld [vmem:[%s20486_s1 + $0x1d8] sm:$0xf0]  ;;  %v15418_v56 = vor.u32 %v11941_v49, %v10036_v48 }
 0x200   : > { %3855 = vmatpush.bf16.msrb.mxu3 %v15366_v25  ;;  %20502 = vst [vmem:[#allocation30_spill] sm:$0xff] %v15393_v19  ;;  %3799 = vmatpush.bf16.msrb.mxu0 %v15382_v31  ;;  %v15404_v34 = vor.u32 %v11991_v12, %v10236_v53  ;;  %v11957_v40 = vld [vmem:[%s20486_s1 + $0xc4] sm:$0xf]  ;;  %v10100_v12 = vld [vmem:[%s20486_s1 + $0xc8] sm:$0xf0] }
 0x201   : > { %20503 = vst [vmem:[#allocation32_spill] sm:$0xff] %v15395_v21  ;;  %v11973_v53 = vld [vmem:[%s20486_s1 + $0x144] sm:$0xf]  ;;  %v15429_v47 = vor.u32 %v11957_v40, %v10100_v12  ;;  %v10228_v48 = vld [vmem:[%s20486_s1 + $0x1c8] sm:$0xf0] }
 0x202   : > { %20504 = vst [vmem:[#allocation31_spill] sm:$0xff] %v15404_v34  ;;  %3837 = vmatpush.bf16.msrb.mxu2 %v15395_v21  ;;  %v2917_v8 = vpop.f32.mrf.mxu2  ;;  %v2936_v1 = vpop.f32.mrf.mxu3  ;;  %v10164_v21 = vld [vmem:[%s20486_s1 + $0x148] sm:$0xf0]  ;;  %v11989_v49 = vld [vmem:[%s20486_s1 + $0x1c4] sm:$0xf] }
 0x203   : > { %3818 = vmatpush.bf16.msrb.mxu1 %v15393_v19  ;;  %v2918_v19 = vadd.f32 %v2917_v8, %v2899_v10  ;;  %v15441_v27 = vor.u32 %v11989_v49, %v10228_v48  ;;  %v10028_v40 = vld [vmem:[%s20486_s1 + $0x38] sm:$0xf0]  ;;  %v11953_v49 = vld [vmem:[%s20486_s1 + $0xa4] sm:$0xf] }
 0x204   : > { %3856 = vmatpush.bf16.msrb.mxu3 %v15404_v34  ;;  %v2882_v31 = vpop.f32.mrf.mxu0  ;;  %v15431_v34 = vor.u32 %v11973_v53, %v10164_v21  ;;  %3800 = vmatpush.bf16.msrb.mxu0 %v15418_v56  ;;  %v11939_v21 = vld [vmem:[%s20486_s1 + $0x34] sm:$0xf]  ;;  %v10092_v8 = vld [vmem:[%s20486_s1 + $0xb8] sm:$0xf0]  ;;  %v10020_v53 = vld [vmem:[%s20486_s1 + $0x28] sm:$0xf0] }
 0x205   : > { %v2883_v6 = vadd.f32 %v2882_v31, %v15183_v26  ;;  %20505 = vst [vmem:[#allocation33_spill] sm:$0xff] %v15441_v27  ;;  %v15443_v10 = vadd.f32 %v2936_v1, %v2918_v19  ;;  %v11955_v26 = vld [vmem:[%s20486_s1 + $0xb4] sm:$0xf]  ;;  %3185 = vmatmul.bf16.gmra.mxu0 %v14703_v42  ;;  %v15458_v19 = vor.u32 %v11939_v21, %v10028_v40  ;;  %v10156_v12 = vld [vmem:[%s20486_s1 + $0x138] sm:$0xf0] }
 0x206   : > { %v2901_v25 = vpop.f32.mrf.mxu1  ;;  %3838 = vmatpush.bf16.msrb.mxu2 %v15431_v34  ;;  %3204 = vmatmul.bf16.gmra.mxu1 %v14785_v58  ;;  %v11971_v1 = vld [vmem:[%s20486_s1 + $0x134] sm:$0xf]  ;;  %v15472_v42 = vor.u32 %v11955_v26, %v10092_v8  ;;  %v10084_v26 = vld [vmem:[%s20486_s1 + $0xa8] sm:$0xf0]  ;;  %v11969_v8 = vld [vmem:[%s20486_s1 + $0x124] sm:$0xf] }
 0x207   : > { %3819 = vmatpush.bf16.msrb.mxu1 %v15429_v47  ;;  %v2902_v31 = vadd.f32 %v2901_v25, %v2883_v6  ;;  %3223 = vmatmul.bf16.gmra.mxu2 %v14787_v60  ;;  %v15474_v58 = vor.u32 %v11971_v1, %v10156_v12  ;;  %v11987_v25 = vld [vmem:[%s20486_s1 + $0x1b4] sm:$0xf]  ;;  %v10220_v6 = vld [vmem:[%s20486_s1 + $0x1b8] sm:$0xf0]  ;;  %v10148_v1 = vld [vmem:[%s20486_s1 + $0x128] sm:$0xf0] }
 0x208   : > { %9999 = vmatmul.msk.bf16.gmra.mxu3 %vm2047_vm0, %v14791_v45  ;;  %20506 = vst [vmem:[#allocation36_spill] sm:$0xff] %v15472_v42  ;;  %3801 = vmatpush.bf16.msrb.mxu0 %v15458_v19  ;;  %v15484_v60 = vor.u32 %v11987_v25, %v10220_v6  ;;  %v11937_v45 = vld [vmem:[%s20486_s1 + $0x24] sm:$0xf] }
 0x209   : > { %20507 = vst [vmem:[#allocation35_spill] sm:$0xff] %v15474_v58  ;;  %3857 = vmatpush.bf16.msrb.mxu3 %v15441_v27  ;;  %v15497_v40 = vor.u32 %v11937_v45, %v10020_v53  ;;  %v15510_v27 = vor.u32 %v11969_v8, %v10148_v1  ;;  %v11985_v45 = vld [vmem:[%s20486_s1 + $0x1a4] sm:$0xf]  ;;  %v10212_v53 = vld [vmem:[%s20486_s1 + $0x1a8] sm:$0xf0] }
 0x20a   : > { %20508 = vst [vmem:[#allocation37_spill] sm:$0xff] %v15484_v60  ;;  %3839 = vmatpush.bf16.msrb.mxu2 %v15474_v58  ;;  %v2920_v48 = vpop.f32.mrf.mxu2  ;;  %v2939_v21 = vpop.f32.mrf.mxu3  ;;  %v15508_v58 = vor.u32 %v11953_v49, %v10084_v26  ;;  %v11951_v26 = vld [vmem:[%s20486_s1 + $0x94] sm:$0xf] }
 0x20b   : > { %3820 = vmatpush.bf16.msrb.mxu1 %v15472_v42  ;;  %20509 = vst [vmem:[#allocation40_spill] sm:$0xff] %v15497_v40  ;;  %v2921_v12 = vadd.f32 %v2920_v48, %v2902_v31  ;;  %v15521_v31 = vor.u32 %v11985_v45, %v10212_v53  ;;  %v11935_v48 = vld [vmem:[%s20486_s1 + $0x14] sm:$0xf] }
 0x20c   : > { %v2884_v25 = vpop.f32.mrf.mxu0  ;;  %20510 = vst [vmem:[#allocation39_spill] sm:$0xff] %v15508_v58  ;;  %3802 = vmatpush.bf16.msrb.mxu0 %v15497_v40 }
 0x20d   : > { %20511 = vst [vmem:[#allocation41_spill] sm:$0xff] %v15510_v27  ;;  %v2885_v42 = vadd.f32 %v2884_v25, %v15260_v32  ;;  %3858 = vmatpush.bf16.msrb.mxu3 %v15484_v60  ;;  %v15523_v49 = vadd.f32 %v2939_v21, %v2921_v12  ;;  %v10012_v32 = vld [vmem:[%s20486_s1 + $0x18] sm:$0xf0]  ;;  %v11967_v12 = vld [vmem:[%s20486_s1 + $0x114] sm:$0xf] }
 0x20e   : > { %v2903_v6 = vpop.f32.mrf.mxu1  ;;  %20512 = vst [vmem:[#allocation45_spill] sm:$0xff] %v15521_v31  ;;  %3840 = vmatpush.bf16.msrb.mxu2 %v15510_v27  ;;  %v15536_v1 = vor.u32 %v11935_v48, %v10012_v32  ;;  %v10076_v21 = vld [vmem:[%s20486_s1 + $0x98] sm:$0xf0]  ;;  %v11933_v32 = vld [vmem:[%s20486_s1 + $0x4] sm:$0xf] }
 0x20f   : > { %3821 = vmatpush.bf16.msrb.mxu1 %v15508_v58  ;;  %v2904_v8 = vadd.f32 %v2903_v6, %v2885_v42  ;;  %v10140_v25 = vld [vmem:[%s20486_s1 + $0x118] sm:$0xf0]  ;;  %v15547_v45 = vor.u32 %v11951_v26, %v10076_v21  ;;  %v11983_v42 = vld [vmem:[%s20486_s1 + $0x194] sm:$0xf]  ;;  %v10004_v26 = vld [vmem:[%s20486_s1 + $0x8] sm:$0xf0] }
 0x210   : > { %20513 = vst [vmem:[#allocation43_spill] sm:$0xff] %v15536_v1  ;;  %v15549_v53 = vor.u32 %v11967_v12, %v10140_v25  ;;  %v10204_v6 = vld [vmem:[%s20486_s1 + $0x198] sm:$0xf0]  ;;  %3803 = vmatpush.bf16.msrb.mxu0 %v15536_v1  ;;  %v11949_v21 = vld [vmem:[%s20486_s1 + $0x84] sm:$0xf] }
 0x211   : > { %20514 = vst [vmem:[#allocation46_spill] sm:$0xff] %v15547_v45  ;;  %3859 = vmatpush.bf16.msrb.mxu3 %v15521_v31  ;;  %v15559_v48 = vor.u32 %v11983_v42, %v10204_v6  ;;  %v15572_v42 = vor.u32 %v11933_v32, %v10004_v26  ;;  %v10068_v6 = vld [vmem:[%s20486_s1 + $0x88] sm:$0xf0]  ;;  %v11981_v32 = vld [vmem:[%s20486_s1 + $0x184] sm:$0xf] }
 0x212   : > { %20515 = vst [vmem:[#allocation34_spill] sm:$0xff] %v15549_v53  ;;  %3841 = vmatpush.bf16.msrb.mxu2 %v15549_v53  ;;  %v2922_v12 = vpop.f32.mrf.mxu2  ;;  %v2941_v25 = vpop.f32.mrf.mxu3  ;;  %v11965_v53 = vld [vmem:[%s20486_s1 + $0x104] sm:$0xf]  ;;  %v10132_v31 = vld [vmem:[%s20486_s1 + $0x108] sm:$0xf0]  ;;  %v15583_v60 = vor.u32 %v11949_v21, %v10068_v6 }
 0x213   : > { %3822 = vmatpush.bf16.msrb.mxu1 %v15547_v45  ;;  %v2923_v45 = vadd.f32 %v2922_v12, %v2904_v8  ;;  %v15585_v58 = vor.u32 %v11965_v53, %v10132_v31  ;;  %v10196_v26 = vld [vmem:[%s20486_s1 + $0x188] sm:$0xf0] }
 0x214   : > { %v2953_v1 = vpop.f32.mrf.mxu0  ;;  %3804 = vmatpush.bf16.msrb.mxu0 %v15572_v42  ;;  %v15596_v8 = vor.u32 %v11981_v32, %v10196_v26 }
 0x215   : > { %v2954_v40 = vadd.f32 %v2953_v1, %v15368_v4  ;;  %3860 = vmatpush.bf16.msrb.mxu3 %v15559_v48  ;;  %v15598_v21 = vadd.f32 %v2941_v25, %v2923_v45  ;;  %3729 = vmatmul.bf16.vlgmr.msra.gmra.mxu0 %v14714_v55 }
 0x216   : > { %v2972_v27 = vpop.f32.mrf.mxu1  ;;  %3842 = vmatpush.bf16.msrb.mxu2 %v15585_v58  ;;  %3748 = vmatmul.bf16.vlgmr.msra.gmra.mxu1 %v14716_v38 }
 0x217   : > { %3823 = vmatpush.bf16.msrb.mxu1 %v15583_v60  ;;  %v2973_v31 = vadd.f32 %v2972_v27, %v2954_v40  ;;  %3767 = vmatmul.bf16.vlgmr.msra.gmra.mxu2 %v14915_v43 }
 0x218   : > { %3786 = vmatmul.bf16.vlgmr.msra.gmra.mxu3 %v14917_v9  ;;  %3929 = vmatpush.bf16.msra.mxu0 %v14987_v20 }
 0x219   : > { %v3248_v4 = vpack.c.bf16 %v2973_v31, %v15038_v46  ;;  %3861 = vmatpush.bf16.msrb.mxu3 %v15596_v8 }
 0x21a   : > { %3967 = vmatpush.bf16.msra.mxu2 %v15002_v61  ;;  %v2991_v1 = vpop.f32.mrf.mxu2  ;;  %v3010_v27 = vpop.f32.mrf.mxu3 }
 0x21b   : > { %3948 = vmatpush.bf16.msra.mxu1 %v15000_v35  ;;  %v15612_v40 = vadd.f32 %v3010_v27, %v2991_v1  ;;  %v3256_v46 = vunpack.c.l.bf16 %v3248_v4  ;;  %v3257_v20 = vunpack.c.h.bf16 %v3248_v4 }
 0x21c   : > { %v2955_v45 = vpop.f32.mrf.mxu0  ;;  %3930 = vmatpush.bf16.msra.mxu0 %v15027_v23 }
 0x21d   : > { %3986 = vmatpush.bf16.msra.mxu3 %v15011_v14  ;;  %v2956_v12 = vadd.f32 %v2955_v45, %v15443_v10  ;;  %v3272_v14 = vadd.f32 %v3256_v46, %v14673_v44  ;;  %v3273_v23 = vadd.f32 %v3257_v20, %v14676_v57  ;;  %v20518_v46 = vld [vmem:[#allocation19_spill] sm:$0xff] }
 0x21e   : > { %v2974_v53 = vpop.f32.mrf.mxu1  ;;  %3968 = vmatpush.bf16.msra.mxu2 %v15042_v15 }
 0x21f   : > { %3949 = vmatpush.bf16.msra.mxu1 %v15040_v0  ;;  %v2975_v35 = vadd.f32 %v2974_v53, %v2956_v12  ;;  %v3313_v32 = vmax.f32 %v3273_v23, 0.0  ;;  %v20517_v12 = vld [vmem:[#allocation17_spill] sm:$0xff] }
 0x220   : > { %3931 = vmatpush.bf16.msra.mxu0 %v15066_v17 }
 0x221   : > { %3987 = vmatpush.bf16.msra.mxu3 %v15052_v2  ;;  %v3250_v61 = vpack.c.bf16 %v2975_v35, %v15115_v51 }
 0x222   : > { %3969 = vmatpush.bf16.msra.mxu2 %v15079_v24  ;;  %v15625_v25 = vpop.f32.mrf.mxu2  ;;  %v15627_v15 = vpop.f32.mrf.mxu3  ;;  %v3312_v24 = vmax.f32 %v3272_v14, 0.0 }
 0x223   : > { %3950 = vmatpush.bf16.msra.mxu1 %v15077_v11  ;;  %v3260_v10 = vunpack.c.l.bf16 %v3250_v61  ;;  %v3261_v0 = vunpack.c.h.bf16 %v3250_v61 }
 0x224   : > { %v2958_v2 = vpop.f32.mrf.mxu0  ;;  %3932 = vmatpush.bf16.msra.mxu0 %v15104_v41 }
 0x225   : > { %3988 = vmatpush.bf16.msra.mxu3 %v15088_v54  ;;  %v3276_v17 = vadd.f32 %v3260_v10, %v14673_v44  ;;  %v3277_v6 = vadd.f32 %v3261_v0, %v14676_v57  ;;  %v2959_v11 = vadd.f32 %v2958_v2, %v15523_v49  ;;  %3734 = vmatmul.bf16.gmra.mxu0 %v14765_v63  ;;  %v20520_v2 = vld [vmem:[#allocation13_spill] sm:$0xff] }
 0x226   : > { %v2977_v51 = vpop.f32.mrf.mxu1  ;;  %3970 = vmatpush.bf16.msra.mxu2 %v15119_v59  ;;  %3753 = vmatmul.bf16.gmra.mxu1 %v14767_v22 }
 0x227   : > { %3951 = vmatpush.bf16.msra.mxu1 %v15117_v5  ;;  %v3316_v26 = vmax.f32 %v3276_v17, 0.0  ;;  %v3317_v31 = vmax.f32 %v3277_v6, 0.0  ;;  %v2978_v4 = vadd.f32 %v2977_v51, %v2959_v11  ;;  %3772 = vmatmul.bf16.gmra.mxu2 %v14943_v29 }
 0x228   : > { %3791 = vmatmul.bf16.gmra.mxu3 %v14945_v33  ;;  %3933 = vmatpush.bf16.msra.mxu0 %v15145_v39 }
 0x229   : > { %v15640_v54 = vpack.c.bf16 %v3316_v26, %v3312_v24  ;;  %v15642_v41 = vpack.c.bf16 %v3317_v31, %v3313_v32  ;;  %v3252_v5 = vpack.c.bf16 %v2978_v4, %v15196_v30  ;;  %3989 = vmatpush.bf16.msra.mxu3 %v15129_v16  ;;  %v20525_v24 = vld [vmem:[#allocation18_spill] sm:$0xff]  ;;  %v20527_v31 = vld [vmem:[#allocation25_spill] sm:$0xff] }
 0x22a   : > { %3971 = vmatpush.bf16.msra.mxu2 %v15160_v37  ;;  %v2996_v59 = vpop.f32.mrf.mxu2  ;;  %v3015_v49 = vpop.f32.mrf.mxu3  ;;  %v20516_v37 = vld [vmem:[#allocation20_spill] sm:$0xff]  ;;  %v20526_v26 = vld [vmem:[#allocation26_spill] sm:$0xff] }
 0x22b   : > { %3952 = vmatpush.bf16.msra.mxu1 %v15158_v3  ;;  %v15649_v1 = vadd.f32 %v3015_v49, %v2996_v59  ;;  %v3264_v30 = vunpack.c.l.bf16 %v3252_v5  ;;  %v3265_v16 = vunpack.c.h.bf16 %v3252_v5  ;;  %v20528_v5 = vld [vmem:[#allocation27_spill] sm:$0xff]  ;;  %v20529_v59 = vld [vmem:[#allocation29_spill] sm:$0xff]  ;;  %v20530_v49 = vld [vmem:[#allocation28_spill] sm:$0xff] }
 0x22c   : > { %v2960_v27 = vpop.f32.mrf.mxu0  ;;  %3934 = vmatpush.bf16.msra.mxu0 %v15185_v28  ;;  %v20519_v28 = vld [vmem:[#allocation21_spill] sm:$0xff] }
 0x22d   : > { %v2961_v53 = vadd.f32 %v2960_v27, %v15598_v21  ;;  %3990 = vmatpush.bf16.msra.mxu3 %v15170_v62  ;;  %v3280_v21 = vadd.f32 %v3264_v30, %v14673_v44  ;;  %v20531_v27 = vld [vmem:[#allocation30_spill] sm:$0xff] }
 0x22e   : > { %v2979_v45 = vpop.f32.mrf.mxu1  ;;  %3972 = vmatpush.bf16.msra.mxu2 %v15200_v50  ;;  %v3281_v50 = vadd.f32 %v3265_v16, %v14676_v57  ;;  %v20533_v16 = vld [vmem:[#allocation31_spill] sm:$0xff] }
 0x22f   : > { %3953 = vmatpush.bf16.msra.mxu1 %v15198_v36  ;;  %v2980_v39 = vadd.f32 %v2979_v45, %v2961_v53  ;;  %v3320_v0 = vmax.f32 %v3280_v21, 0.0  ;;  %v20532_v45 = vld [vmem:[#allocation32_spill] sm:$0xff] }
 0x230   : > { %3935 = vmatpush.bf16.msra.mxu0 %v20516_v37 }
 0x231   : > { %v3254_v3 = vpack.c.bf16 %v2980_v39, %v15273_v13  ;;  %3991 = vmatpush.bf16.msra.mxu3 %v20517_v12 }
 0x232   : > { %3973 = vmatpush.bf16.msra.mxu2 %v20519_v28  ;;  %v15662_v35 = vpop.f32.mrf.mxu2  ;;  %v15664_v36 = vpop.f32.mrf.mxu3 }
 0x233   : > { %3954 = vmatpush.bf16.msra.mxu1 %v20518_v46  ;;  %v3268_v62 = vunpack.c.l.bf16 %v3254_v3  ;;  %v3269_v20 = vunpack.c.h.bf16 %v3254_v3  ;;  %v20534_v46 = vld [vmem:[#allocation36_spill] sm:$0xff] }
 0x234   : > { %v3029_v61 = vpop.f32.mrf.mxu0  ;;  %3936 = vmatpush.bf16.msra.mxu0 %v15262_v18  ;;  %v20523_v18 = vld [vmem:[#allocation23_spill] sm:$0xff] }
 0x235   : > { %v3030_v14 = vadd.f32 %v3029_v61, %v15612_v40  ;;  %v3284_v23 = vadd.f32 %v3268_v62, %v14673_v44  ;;  %v3285_v10 = vadd.f32 %v3269_v20, %v14676_v57  ;;  %3992 = vmatpush.bf16.msra.mxu3 %v15247_v7  ;;  %3805 = vmatmul.bf16.vlgmr.msrb.gmra.mxu0 %v14714_v55  ;;  %v3321_v40 = vmax.f32 %v3281_v50, 0.0  ;;  %v20521_v44 = vld [vmem:[#allocation22_spill] sm:$0xff]  ;;  %v20522_v57 = vld [vmem:[#allocation24_spill] sm:$0xff]  ;;  %v20540_v62 = vld [vmem:[#allocation41_spill] sm:$0xff] }
 0x236   : > { %v3048_v13 = vpop.f32.mrf.mxu1  ;;  %3974 = vmatpush.bf16.msra.mxu2 %v20520_v2  ;;  %3824 = vmatmul.bf16.vlgmr.msrb.gmra.mxu1 %v14716_v38  ;;  %v20524_v55 = vld [vmem:[#allocation16_spill] sm:$0xff]  ;;  %v20541_v20 = vld [vmem:[#allocation43_spill] sm:$0xff]  ;;  %v20542_v50 = vld [vmem:[#allocation46_spill] sm:$0xff] }
 0x237   : > { %3955 = vmatpush.bf16.msra.mxu1 %v15275_v52  ;;  %v3049_v51 = vadd.f32 %v3048_v13, %v3030_v14  ;;  %v3324_v17 = vmax.f32 %v3284_v23, 0.0  ;;  %v3325_v6 = vmax.f32 %v3285_v10, 0.0  ;;  %3843 = vmatmul.bf16.vlgmr.msrb.gmra.mxu2 %v14915_v43  ;;  %v20543_v61 = vld [vmem:[#allocation45_spill] sm:$0xff]  ;;  %v20544_v13 = vld [vmem:[#allocation34_spill] sm:$0xff] }
 0x238   : > { %3862 = vmatmul.bf16.vlgmr.msrb.gmra.mxu3 %v14917_v9  ;;  %4005 = vmatpush.bf16.msrb.mxu0 %v20521_v44 }
 0x239   : > { %v15680_v52 = vpack.c.bf16 %v3324_v17, %v3320_v0  ;;  %v15682_v7 = vpack.c.bf16 %v3325_v6, %v3321_v40  ;;  %3993 = vmatpush.bf16.msra.mxu3 %v20523_v18 }
 0x23a   : > { %4043 = vmatpush.bf16.msrb.mxu2 %v20524_v55  ;;  %v3067_v38 = vpop.f32.mrf.mxu2  ;;  %v3086_v11 = vpop.f32.mrf.mxu3 }
 0x23b   : > { %4024 = vmatpush.bf16.msrb.mxu1 %v20522_v57  ;;  %v3068_v32 = vadd.f32 %v3067_v38, %v3049_v51 }
 0x23c   : > { %v15687_v43 = vpop.f32.mrf.mxu0  ;;  %4006 = vmatpush.bf16.msrb.mxu0 %v20526_v26 }
 0x23d   : > { %4062 = vmatpush.bf16.msrb.mxu3 %v20525_v24  ;;  %v15693_v4 = vadd.f32 %v3086_v11, %v3068_v32 }
 0x23e   : > { %v15689_v9 = vpop.f32.mrf.mxu1  ;;  %4044 = vmatpush.bf16.msrb.mxu2 %v20528_v5 }
 0x23f   : > { %4025 = vmatpush.bf16.msrb.mxu1 %v20527_v31  ;;  %v3013_v31 = vadd.f32 %v15627_v15, %v15625_v25 }
 0x240   : > { %4007 = vmatpush.bf16.msrb.mxu0 %v20530_v49 }
 0x241   : > { %4063 = vmatpush.bf16.msrb.mxu3 %v20529_v59  ;;  %v3032_v59 = vadd.f32 %v15687_v43, %v3013_v31 }
 0x242   : > { %4045 = vmatpush.bf16.msrb.mxu2 %v20532_v45  ;;  %v15700_v53 = vpop.f32.mrf.mxu2  ;;  %v15702_v30 = vpop.f32.mrf.mxu3 }
 0x243   : > { %4026 = vmatpush.bf16.msrb.mxu1 %v20531_v27 }
 0x244   : > { %v3034_v39 = vpop.f32.mrf.mxu0  ;;  %4008 = vmatpush.bf16.msrb.mxu0 %v15418_v56  ;;  %v20536_v56 = vld [vmem:[#allocation35_spill] sm:$0xff] }
 0x245   : > { %4064 = vmatpush.bf16.msrb.mxu3 %v20533_v16  ;;  %v3035_v37 = vadd.f32 %v3034_v39, %v15649_v1  ;;  %3810 = vmatmul.bf16.gmra.mxu0 %v14765_v63  ;;  %v20535_v1 = vld [vmem:[#allocation33_spill] sm:$0xff] }
 0x246   : > { %v3053_v3 = vpop.f32.mrf.mxu1  ;;  %4046 = vmatpush.bf16.msrb.mxu2 %v15431_v34  ;;  %3829 = vmatmul.bf16.gmra.mxu1 %v14767_v22  ;;  %v20537_v22 = vld [vmem:[#allocation40_spill] sm:$0xff] }
 0x247   : > { %4027 = vmatpush.bf16.msrb.mxu1 %v15429_v47  ;;  %v3054_v12 = vadd.f32 %v3053_v3, %v3035_v37  ;;  %3848 = vmatmul.bf16.gmra.mxu2 %v14943_v29  ;;  %v20538_v29 = vld [vmem:[#allocation39_spill] sm:$0xff] }
 0x248   : > { %3867 = vmatmul.bf16.gmra.mxu3 %v14945_v33  ;;  %4009 = vmatpush.bf16.msrb.mxu0 %v15458_v19  ;;  %v20539_v19 = vld [vmem:[#allocation37_spill] sm:$0xff] }
 0x249   : > { %4065 = vmatpush.bf16.msrb.mxu3 %v20535_v1 }
 0x24a   : > { %4047 = vmatpush.bf16.msrb.mxu2 %v20536_v56  ;;  %v3072_v47 = vpop.f32.mrf.mxu2  ;;  %v3091_v21 = vpop.f32.mrf.mxu3 }
 0x24b   : > { %4028 = vmatpush.bf16.msrb.mxu1 %v20534_v46  ;;  %v3073_v34 = vadd.f32 %v3072_v47, %v3054_v12  ;;  %v3051_v12 = vadd.f32 %v15689_v9, %v3032_v59  ;;  %v12004_v59 = vld [vmem:[%s20547_s5 + $0x38] sm:$0xff] }
 0x24c   : > { %v15717_v28 = vpop.f32.mrf.mxu0  ;;  %4010 = vmatpush.bf16.msrb.mxu0 %v20537_v22 }
 0x24d   : > { %v15723_v33 = vadd.f32 %v3091_v21, %v3073_v34  ;;  %4066 = vmatpush.bf16.msrb.mxu3 %v20539_v19 }
 0x24e   : > { %v15719_v63 = vpop.f32.mrf.mxu1  ;;  %4048 = vmatpush.bf16.msrb.mxu2 %v20540_v62 }
 0x24f   : > { %4029 = vmatpush.bf16.msrb.mxu1 %v20538_v29 }
 0x250   : > { %4011 = vmatpush.bf16.msrb.mxu0 %v20541_v20 }
 0x251   : > { %4067 = vmatpush.bf16.msrb.mxu3 %v20543_v61 }
 0x252   : > { %4049 = vmatpush.bf16.msrb.mxu2 %v20544_v13  ;;  %v15731_v14 = vpop.f32.mrf.mxu2  ;;  %v15733_v23 = vpop.f32.mrf.mxu3 }
 0x253   : > { %4030 = vmatpush.bf16.msrb.mxu1 %v20542_v50 }
 0x254   : > { %v3105_v10 = vpop.f32.mrf.mxu0  ;;  %4012 = vmatpush.bf16.msrb.mxu0 %v15572_v42 }
 0x255   : > { %4068 = vmatpush.bf16.msrb.mxu3 %v15559_v48  ;;  %3937 = vmatmul.bf16.vlgmr.msra.gmra.mxu0 %v15640_v54 }
 0x256   : > { %v3124_v0 = vpop.f32.mrf.mxu1  ;;  %4050 = vmatpush.bf16.msrb.mxu2 %v15585_v58  ;;  %3956 = vmatmul.bf16.vlgmr.msra.gmra.mxu1 %v15642_v41 }
 0x257   : > { %4031 = vmatpush.bf16.msrb.mxu1 %v15583_v60 }
 0x258   : > { %4254 = vmatpush.bf16.msra.mxu0 %v12004_v59 }
 0x259   : > { %4069 = vmatpush.bf16.msrb.mxu3 %v15596_v8 }
 0x25a   : > { %v3143_v2 = vpop.f32.mrf.mxu2  ;;  %v3162_v51 = vpop.f32.mrf.mxu3 }
 0x25b   : > { %v3144_v55 = vadd.f32 %v3143_v2, %v3124_v0  ;;  %v20546_v2 = vld [vmem:[#allocation15_spill] sm:$0xff] }
 0x25c   : > { %v3107_v17 = vpop.f32.mrf.mxu0 }
 0x25d   : > { %v3163_v11 = vadd.f32 %v3162_v51, %v3144_v55 }
 0x25e   : > { %v3126_v40 = vpop.f32.mrf.mxu1 }
 0x262   : > { %v3145_v6 = vpop.f32.mrf.mxu2  ;;  %v3164_v44 = vpop.f32.mrf.mxu3 }
 0x263   : > { %v3146_v5 = vadd.f32 %v3145_v6, %v3126_v40 }
 0x264   : > { %v15742_v57 = vpop.f32.mrf.mxu0 }
 0x265   : > { %3942 = vmatmul.bf16.gmra.mxu0 %v15680_v52  ;;  %v3165_v16 = vadd.f32 %v3164_v44, %v3146_v5 }
 0x266   : > { %v3129_v42 = vpop.f32.mrf.mxu1  ;;  %3961 = vmatmul.bf16.gmra.mxu1 %v15682_v7 }
 0x26a   : > { %v3148_v58 = vpop.f32.mrf.mxu2  ;;  %v3167_v60 = vpop.f32.mrf.mxu3 }
 0x26b   : > { %v3149_v56 = vadd.f32 %v3148_v58, %v3129_v42 }
 0x26c   : > { %v15746_v48 = vpop.f32.mrf.mxu0 }
 0x26d   : > { %v3168_v34 = vadd.f32 %v3167_v60, %v3149_v56  ;;  %v12010_v56 = vld [vmem:[%s20547_s5 + $0x68] sm:$0xff] }
 0x26e   : > { %v3131_v18 = vpop.f32.mrf.mxu1 }
 0x272   : > { %v3150_v8 = vpop.f32.mrf.mxu2  ;;  %v3169_v38 = vpop.f32.mrf.mxu3 }
 0x274   : > { %v3181_v24 = vpop.f32.mrf.mxu0 }
 0x275   : > { %v3182_v26 = vadd.f32 %v3181_v24, %v3163_v11  ;;  %4013 = vmatmul.bf16.vlgmr.msrb.gmra.mxu0 %v15640_v54  ;;  %v3106_v54 = vadd.f32 %v3105_v10, %v15693_v4  ;;  %v3018_v4 = vadd.f32 %v15664_v36, %v15662_v35  ;;  %v20545_v10 = vld [vmem:[#allocation14_spill] sm:$0xff] }
 0x276   : > { %v3200_v32 = vpop.f32.mrf.mxu1  ;;  %4032 = vmatmul.bf16.vlgmr.msrb.gmra.mxu1 %v15642_v41  ;;  %v3070_v41 = vadd.f32 %v15700_v53, %v3051_v12  ;;  %v3151_v53 = vadd.f32 %v3150_v8, %v3131_v18 }
 0x277   : > { %v3201_v49 = vadd.f32 %v3200_v32, %v3182_v26 }
 0x278   : > { %v3089_v21 = vadd.f32 %v15702_v30, %v3070_v41  ;;  %v3037_v30 = vadd.f32 %v15717_v28, %v3018_v4  ;;  %v3170_v58 = vadd.f32 %v3169_v38, %v3151_v53  ;;  %v3111_v38 = vadd.f32 %v15742_v57, %v15723_v33  ;;  %v12002_v41 = vld [vmem:[%s20547_s5 + $0x28] sm:$0xff]  ;;  %v12009_v4 = vld [vmem:[%s20547_s5 + $0x60] sm:$0xff] }
 0x27a   : > { %v3219_v27 = vpop.f32.mrf.mxu2  ;;  %v3238_v45 = vpop.f32.mrf.mxu3  ;;  %v3108_v9 = vadd.f32 %v3107_v17, %v3089_v21  ;;  %v3056_v18 = vadd.f32 %v15719_v63, %v3037_v30  ;;  %v12012_v63 = vld [vmem:[%s20547_s5 + $0x78] sm:$0xff] }
 0x27b   : > { %v3220_v39 = vadd.f32 %v3219_v27, %v3201_v49  ;;  %4273 = vmatpush.bf16.msra.mxu1 %v12012_v63  ;;  %v12000_v30 = vld [vmem:[%s20547_s5 + $0x18] sm:$0xff] }
 0x27c   : > { %v3183_v3 = vpop.f32.mrf.mxu0  ;;  %v3075_v26 = vadd.f32 %v15731_v14, %v3056_v18 }
 0x27d   : > { %v3239_v46 = vadd.f32 %v3238_v45, %v3220_v39  ;;  %v3184_v1 = vadd.f32 %v3183_v3, %v3165_v16  ;;  %v12003_v3 = vld [vmem:[%s20547_s5 + $0x30] sm:$0xff] }
 0x27e   : > { %v3202_v37 = vpop.f32.mrf.mxu1  ;;  %v3094_v57 = vadd.f32 %v15733_v23, %v3075_v26  ;;  %4255 = vmatpush.bf16.msra.mxu0 %v12003_v3 }
 0x27f   : > { %v3249_v25 = vpack.c.bf16 %v3239_v46, %v3106_v54  ;;  %v3203_v15 = vadd.f32 %v3202_v37, %v3184_v1  ;;  %v12011_v37 = vld [vmem:[%s20547_s5 + $0x70] sm:$0xff] }
 0x280   : > { %v3113_v12 = vadd.f32 %v15746_v48, %v3094_v57  ;;  %4274 = vmatpush.bf16.msra.mxu1 %v12011_v37 }
 0x281   : > { %v3258_v62 = vunpack.c.l.bf16 %v3249_v25  ;;  %v3259_v20 = vunpack.c.h.bf16 %v3249_v25 }
 0x282   : > { %v3221_v47 = vpop.f32.mrf.mxu2  ;;  %v3240_v43 = vpop.f32.mrf.mxu3  ;;  %4256 = vmatpush.bf16.msra.mxu0 %v12002_v41 }
 0x283   : > { %v3222_v22 = vadd.f32 %v3221_v47, %v3203_v15  ;;  %v3274_v0 = vadd.f32 %v3258_v62, %v20545_v10  ;;  %v3275_v51 = vadd.f32 %v3259_v20, %v20546_v2  ;;  %v12001_v62 = vld [vmem:[%s20547_s5 + $0x20] sm:$0xff] }
 0x284   : > { %v3186_v29 = vpop.f32.mrf.mxu0  ;;  %4275 = vmatpush.bf16.msra.mxu1 %v12010_v56 }
 0x285   : > { %v3241_v50 = vadd.f32 %v3240_v43, %v3222_v22  ;;  %v3187_v61 = vadd.f32 %v3186_v29, %v3168_v34  ;;  %4018 = vmatmul.bf16.gmra.mxu0 %v15680_v52  ;;  %v3314_v28 = vmax.f32 %v3274_v0, 0.0  ;;  %v3315_v55 = vmax.f32 %v3275_v51, 0.0 }
 0x286   : > { %v3205_v19 = vpop.f32.mrf.mxu1  ;;  %4037 = vmatmul.bf16.gmra.mxu1 %v15682_v7  ;;  %4257 = vmatpush.bf16.msra.mxu0 %v12001_v62 }
 0x287   : > { %v3251_v13 = vpack.c.bf16 %v3241_v50, %v3108_v9  ;;  %v3206_v17 = vadd.f32 %v3205_v19, %v3187_v61 }
 0x288   : > { %4276 = vmatpush.bf16.msra.mxu1 %v12009_v4 }
 0x289   : > { %v3262_v40 = vunpack.c.l.bf16 %v3251_v13  ;;  %v3263_v6 = vunpack.c.h.bf16 %v3251_v13 }
 0x28a   : > { %v3224_v44 = vpop.f32.mrf.mxu2  ;;  %4258 = vmatpush.bf16.msra.mxu0 %v12000_v30 }
 0x28b   : > { %v3243_v42 = vpop.f32.mrf.mxu3  ;;  %v3278_v35 = vadd.f32 %v3262_v40, %v20545_v10  ;;  %v3279_v36 = vadd.f32 %v3263_v6, %v20546_v2  ;;  %v3225_v52 = vadd.f32 %v3224_v44, %v3206_v17  ;;  %v11999_v6 = vld [vmem:[%s20547_s5 + $0x10] sm:$0xff]  ;;  %v3879_v44 = vld [vmem:[#allocation1] sm:$0xff] }
 0x28c   : > { %v3188_v7 = vpop.f32.mrf.mxu0  ;;  %v12007_v17 = vld [vmem:[%s20547_s5 + $0x50] sm:$0xff]  ;;  %v3881_v57 = vpack.i.b16 %v3879_v44, %v3879_v44 }
 0x28d   : > { %v3318_v8 = vmax.f32 %v3278_v35, 0.0  ;;  %v3319_v11 = vmax.f32 %v3279_v36, 0.0  ;;  %v3244_v24 = vadd.f32 %v3243_v42, %v3225_v52  ;;  %v3189_v32 = vadd.f32 %v3188_v7, %v3170_v58  ;;  %v3880_v42 = vld [vmem:[#allocation1 + $0x9] sm:$0xff]  ;;  %v5363_v58 = vld [vmem:[%s19716_s20] sm:$0x3] }
 0x28e   : > { %v3207_v60 = vpop.f32.mrf.mxu1  ;;  %5487 = vst [vmem:[#allocation1] ss:$9 sm:$0xff] %v5363_v58  ;;  %4259 = vmatpush.bf16.msra.mxu0 %v11999_v6  ;;  %v11998_v35 = vld [vmem:[%s20547_s5 + $0x8] sm:$0xff] }
 0x28f   : > { %v15770_v31 = vpack.c.bf16 %v3318_v8, %v3314_v28  ;;  %v15772_v5 = vpack.c.bf16 %v3319_v11, %v3315_v55  ;;  %v3253_v49 = vpack.c.bf16 %v3244_v24, %v3111_v38  ;;  %v3208_v27 = vadd.f32 %v3207_v60, %v3189_v32  ;;  %v12006_v36 = vld [vmem:[%s20547_s5 + $0x48] sm:$0xff]  ;;  %v11997_v28 = vld [vmem:[%s20547_s5] sm:$0xff] }
 0x290   : > { %v12005_v55 = vld [vmem:[%s20547_s5 + $0x40] sm:$0xff] }
 0x291   : > { %3975 = vmatmul.bf16.vlgmr.msra.gmra.mxu2 %v15770_v31  ;;  %3994 = vmatmul.bf16.vlgmr.msra.gmra.mxu3 %v15772_v5  ;;  %v3266_v46 = vunpack.c.l.bf16 %v3253_v49  ;;  %v3267_v1 = vunpack.c.h.bf16 %v3253_v49 }
 0x292   : > { %v3226_v14 = vpop.f32.mrf.mxu2  ;;  %4323 = vmatpush.bf16.msra.mxu2 %v12004_v59  ;;  %4342 = vmatpush.bf16.msra.mxu3 %v12012_v63 }
 0x293   : > { %v3245_v33 = vpop.f32.mrf.mxu3  ;;  %v3227_v45 = vadd.f32 %v3226_v14, %v3208_v27  ;;  %v3282_v48 = vadd.f32 %v3266_v46, %v20545_v10  ;;  %v3283_v47 = vadd.f32 %v3267_v1, %v20546_v2  ;;  %4260 = vmatpush.bf16.msra.mxu0 %v11998_v35 }
 0x294   : > { %v15783_v16 = vpop.f32.mrf.mxu0 }
 0x295   : > { %v3246_v23 = vadd.f32 %v3245_v33, %v3227_v45  ;;  %v3322_v20 = vmax.f32 %v3282_v48, 0.0  ;;  %v3323_v50 = vmax.f32 %v3283_v47, 0.0  ;;  %v3884_v45 = vpack.i.b16 %v3880_v42, %v3880_v42 }
 0x296   : > { %v15785_v39 = vpop.f32.mrf.mxu1  ;;  %4324 = vmatpush.bf16.msra.mxu2 %v12003_v3  ;;  %4343 = vmatpush.bf16.msra.mxu3 %v12011_v37 }
 0x297   : > { %v3255_v54 = vpack.c.bf16 %v3246_v23, %v3113_v12  ;;  %4261 = vmatpush.bf16.msra.mxu0 %v11997_v28  ;;  %v3750_v26 = vadd.f32 %v15785_v39, %v15783_v16  ;;  %v3883_v12 = vperm.slane %v3881_v57, 0  ;;  %v3886_v16 = vperm.slane %v3884_v45, 0 }
 0x299   : > { %v3270_v25 = vunpack.c.l.bf16 %v3255_v54  ;;  %v3271_v15 = vunpack.c.h.bf16 %v3255_v54 }
 0x29a   : > { %v15802_v43 = vpop.f32.mrf.mxu2  ;;  %4325 = vmatpush.bf16.msra.mxu2 %v12002_v41  ;;  %4344 = vmatpush.bf16.msra.mxu3 %v12010_v56  ;;  %v15875_v56 = vunpack.c.l.bf16 %v3883_v12 }
 0x29b   : > { %v15804_v21 = vpop.f32.mrf.mxu3  ;;  %v3286_v29 = vadd.f32 %v3270_v25, %v20545_v10  ;;  %v3287_v19 = vadd.f32 %v3271_v15, %v20546_v2  ;;  %v12008_v10 = vld [vmem:[%s20547_s5 + $0x58] sm:$0xff]  ;;  %v3769_v59 = vadd.f32 %v15802_v43, %v3750_v26  ;;  %v15878_v43 = vunpack.c.l.bf16 %v3886_v16 }
 0x29c   : > { %v15806_v34 = vpop.f32.mrf.mxu0  ;;  %4277 = vmatpush.bf16.msra.mxu1 %v12008_v10 }
 0x29d   : > { %v3326_v9 = vmax.f32 %v3286_v29, 0.0  ;;  %v3327_v61 = vmax.f32 %v3287_v19, 0.0 }
 0x29e   : > { %v15808_v22 = vpop.f32.mrf.mxu1  ;;  %4326 = vmatpush.bf16.msra.mxu2 %v12001_v62  ;;  %4345 = vmatpush.bf16.msra.mxu3 %v12009_v4 }
 0x29f   : > { %v15818_v53 = vpack.c.bf16 %v3326_v9, %v3322_v20  ;;  %v15820_v13 = vpack.c.bf16 %v3327_v61, %v3323_v50  ;;  %v3752_v3 = vadd.f32 %v15808_v22, %v15806_v34 }
 0x2a0   : > { %4278 = vmatpush.bf16.msra.mxu1 %v12007_v17 }
 0x2a1   : > { %3980 = vmatmul.bf16.gmra.mxu2 %v15818_v53  ;;  %3999 = vmatmul.bf16.gmra.mxu3 %v15820_v13 }
 0x2a2   : > { %v3770_v0 = vpop.f32.mrf.mxu2  ;;  %4327 = vmatpush.bf16.msra.mxu2 %v12000_v30  ;;  %4346 = vmatpush.bf16.msra.mxu3 %v12008_v10 }
 0x2a3   : > { %v15830_v2 = vpop.f32.mrf.mxu3  ;;  %v3771_v46 = vadd.f32 %v3770_v0, %v3752_v3 }
 0x2a4   : > { %v15832_v51 = vpop.f32.mrf.mxu0  ;;  %4279 = vmatpush.bf16.msra.mxu1 %v12006_v36 }
 0x2a5   : > { %v3790_v48 = vadd.f32 %v15830_v2, %v3771_v46 }
 0x2a6   : > { %v15834_v40 = vpop.f32.mrf.mxu1  ;;  %4328 = vmatpush.bf16.msra.mxu2 %v11999_v6  ;;  %4347 = vmatpush.bf16.msra.mxu3 %v12007_v17 }
 0x2a7   : > { %v3755_v22 = vadd.f32 %v15834_v40, %v15832_v51 }
 0x2a8   : > { %4280 = vmatpush.bf16.msra.mxu1 %v12005_v55 }
 0x2aa   : > { %v3773_v52 = vpop.f32.mrf.mxu2  ;;  %4329 = vmatpush.bf16.msra.mxu2 %v11998_v35  ;;  %4348 = vmatpush.bf16.msra.mxu3 %v12006_v36 }
 0x2ab   : > { %v15851_v7 = vpop.f32.mrf.mxu3  ;;  %v3774_v4 = vadd.f32 %v3773_v52, %v3755_v22 }
 0x2ac   : > { %v15853_v60 = vpop.f32.mrf.mxu0 }
 0x2ad   : > { %v3793_v44 = vadd.f32 %v15851_v7, %v3774_v4 }
 0x2ae   : > { %v15855_v18 = vpop.f32.mrf.mxu1  ;;  %4330 = vmatpush.bf16.msra.mxu2 %v11997_v28  ;;  %4349 = vmatpush.bf16.msra.mxu3 %v12005_v55 }
 0x2af   : > { %v3757_v42 = vadd.f32 %v15855_v18, %v15853_v60 }
 0x2b1   : > { %4051 = vmatmul.bf16.vlgmr.msrb.gmra.mxu2 %v15770_v31  ;;  %4070 = vmatmul.bf16.vlgmr.msrb.gmra.mxu3 %v15772_v5  ;;  %v3788_v5 = vadd.f32 %v15804_v21, %v3769_v59 }
 0x2b2   : > { %v3775_v8 = vpop.f32.mrf.mxu2 }
 0x2b3   : > { %v15865_v11 = vpop.f32.mrf.mxu3  ;;  %v3776_v36 = vadd.f32 %v3775_v8, %v3757_v42  ;;  %v12014_v42 = vld [vmem:[%s20548_s25 + $0x8] sm:$0xff] }
 0x2b4   : > { %v3806_v24 = vpop.f32.mrf.mxu0 }
 0x2b5   : > { %v3795_v26 = vadd.f32 %v15865_v11, %v3776_v36 }
 0x2b6   : > { %v3825_v32 = vpop.f32.mrf.mxu1 }
 0x2b7   : > { %v3826_v38 = vadd.f32 %v3825_v32, %v3806_v24 }
 0x2ba   : > { %v3844_v63 = vpop.f32.mrf.mxu2 }
 0x2bb   : > { %v3863_v49 = vpop.f32.mrf.mxu3  ;;  %v3845_v27 = vadd.f32 %v3844_v63, %v3826_v38 }
 0x2bc   : > { %v3808_v14 = vpop.f32.mrf.mxu0 }
 0x2bd   : > { %v3864_v31 = vadd.f32 %v3863_v49, %v3845_v27 }
 0x2be   : > { %v3827_v33 = vpop.f32.mrf.mxu1 }
 0x2bf   : > { %v3873_v37 = vpack.c.bf16 %v3864_v31, %v3788_v5  ;;  %v3828_v39 = vadd.f32 %v3827_v33, %v3808_v14 }
 0x2c1   : > { %4056 = vmatmul.bf16.gmra.mxu2 %v15818_v53  ;;  %4075 = vmatmul.bf16.gmra.mxu3 %v15820_v13  ;;  %v3887_v41 = vunpack.c.l.bf16 %v3873_v37  ;;  %v3888_v47 = vunpack.c.h.bf16 %v3873_v37 }
 0x2c2   : > { %v3846_v1 = vpop.f32.mrf.mxu2 }
 0x2c3   : > { %v3865_v23 = vpop.f32.mrf.mxu3  ;;  %v3847_v54 = vadd.f32 %v3846_v1, %v3828_v39  ;;  %v3897_v29 = vadd.f32 %v15875_v56, %v3887_v41  ;;  %v3898_v19 = vadd.f32 %v15878_v43, %v3888_v47 }
 0x2c4   : > { %v3811_v25 = vpop.f32.mrf.mxu0 }
 0x2c5   : > { %v3866_v21 = vadd.f32 %v3865_v23, %v3847_v54  ;;  %v3917_v10 = vmax.f32 %v3897_v29, 0.0  ;;  %v3918_v0 = vmax.f32 %v3898_v19, 0.0  ;;  %v12018_v19 = vld [vmem:[%s20548_s25 + $0x28] sm:$0xff] }
 0x2c6   : > { %v3830_v15 = vpop.f32.mrf.mxu1 }
 0x2c7   : > { %v3874_v34 = vpack.c.bf16 %v3866_v21, %v3790_v48  ;;  %v3831_v9 = vadd.f32 %v3830_v15, %v3811_v25  ;;  %v12020_v48 = vld [vmem:[%s20548_s25 + $0x38] sm:$0xff] }
 0x2c8   : > { %4452 = vmatpush.bf16.msrb.mxu0 %v12020_v48  ;;  %4502 = vmatpush.bf16.msrb.mxu1 %v12020_v48 }
 0x2c9   : > { %v3889_v62 = vunpack.c.l.bf16 %v3874_v34  ;;  %v3890_v20 = vunpack.c.h.bf16 %v3874_v34  ;;  %v12019_v34 = vld [vmem:[%s20548_s25 + $0x30] sm:$0xff] }
 0x2ca   : > { %v3849_v50 = vpop.f32.mrf.mxu2 }
 0x2cb   : > { %v3868_v61 = vpop.f32.mrf.mxu3  ;;  %v3899_v53 = vadd.f32 %v15875_v56, %v3889_v62  ;;  %v3900_v13 = vadd.f32 %v15878_v43, %v3890_v20  ;;  %v3850_v30 = vadd.f32 %v3849_v50, %v3831_v9  ;;  %v12017_v9 = vld [vmem:[%s20548_s25 + $0x20] sm:$0xff] }
 0x2cc   : > { %v3813_v40 = vpop.f32.mrf.mxu0  ;;  %4453 = vmatpush.bf16.msrb.mxu0 %v12019_v34  ;;  %4503 = vmatpush.bf16.msrb.mxu1 %v12019_v34 }
 0x2cd   : > { %v3919_v2 = vmax.f32 %v3899_v53, 0.0  ;;  %v3920_v6 = vmax.f32 %v3900_v13, 0.0  ;;  %v3869_v51 = vadd.f32 %v3868_v61, %v3850_v30  ;;  %v12016_v53 = vld [vmem:[%s20548_s25 + $0x18] sm:$0xff] }
 0x2ce   : > { %v3832_v17 = vpop.f32.mrf.mxu1 }
 0x2cf   : > { %v3925_v58 = vpack.c.bf16 %v3919_v2, %v3917_v10  ;;  %v3926_v35 = vpack.c.bf16 %v3920_v6, %v3918_v0  ;;  %v3875_v52 = vpack.c.bf16 %v3869_v51, %v3793_v44  ;;  %v3833_v28 = vadd.f32 %v3832_v17, %v3813_v40  ;;  %v12015_v6 = vld [vmem:[%s20548_s25 + $0x10] sm:$0xff] }
 0x2d0   : > { %4454 = vmatpush.bf16.msrb.mxu0 %v12018_v19  ;;  %4504 = vmatpush.bf16.msrb.mxu1 %v12018_v19 }
 0x2d1   : > { %4262 = vmatmul.bf16.vlgmr.msra.gmra.mxu0 %v3925_v58  ;;  %4281 = vmatmul.bf16.vlgmr.msra.gmra.mxu1 %v3926_v35  ;;  %v3891_v38 = vunpack.c.l.bf16 %v3875_v52  ;;  %v3892_v59 = vunpack.c.h.bf16 %v3875_v52 }
 0x2d2   : > { %v3851_v55 = vpop.f32.mrf.mxu2 }
 0x2d3   : > { %v3852_v24 = vadd.f32 %v3851_v55, %v3833_v28  ;;  %v3870_v32 = vpop.f32.mrf.mxu3  ;;  %v3901_v60 = vadd.f32 %v15875_v56, %v3891_v38  ;;  %v3902_v18 = vadd.f32 %v15878_v43, %v3892_v59 }
 0x2d4   : > { %v3938_v3 = vpop.f32.mrf.mxu0  ;;  %4455 = vmatpush.bf16.msrb.mxu0 %v12017_v9  ;;  %4505 = vmatpush.bf16.msrb.mxu1 %v12017_v9 }
 0x2d5   : > { %v3871_v63 = vadd.f32 %v3870_v32, %v3852_v24  ;;  %v3921_v33 = vmax.f32 %v3901_v60, 0.0  ;;  %v3922_v31 = vmax.f32 %v3902_v18, 0.0 }
 0x2d6   : > { %v3957_v37 = vpop.f32.mrf.mxu1 }
 0x2d7   : > { %v3876_v49 = vpack.c.bf16 %v3871_v63, %v3795_v26  ;;  %v3958_v4 = vadd.f32 %v3957_v37, %v3938_v3  ;;  %v12013_v26 = vld [vmem:[%s20548_s25] sm:$0xff] }
 0x2d8   : > { %4456 = vmatpush.bf16.msrb.mxu0 %v12016_v53  ;;  %4506 = vmatpush.bf16.msrb.mxu1 %v12016_v53 }
 0x2d9   : > { %v3893_v7 = vunpack.c.l.bf16 %v3876_v49  ;;  %v3894_v27 = vunpack.c.h.bf16 %v3876_v49 }
 0x2db   : > { %v3903_v8 = vadd.f32 %v15875_v56, %v3893_v7  ;;  %v3904_v14 = vadd.f32 %v15878_v43, %v3894_v27 }
 0x2dc   : > { %v3940_v12 = vpop.f32.mrf.mxu0  ;;  %4457 = vmatpush.bf16.msrb.mxu0 %v12015_v6  ;;  %4507 = vmatpush.bf16.msrb.mxu1 %v12015_v6 }
 0x2dd   : > { %v3923_v57 = vmax.f32 %v3903_v8, 0.0  ;;  %v3924_v45 = vmax.f32 %v3904_v14, 0.0 }
 0x2de   : > { %v3959_v46 = vpop.f32.mrf.mxu1 }
 0x2df   : > { %v3927_v5 = vpack.c.bf16 %v3923_v57, %v3921_v33  ;;  %v3928_v11 = vpack.c.bf16 %v3924_v45, %v3922_v31  ;;  %v3960_v17 = vadd.f32 %v3959_v46, %v3940_v12 }
 0x2e0   : > { %4458 = vmatpush.bf16.msrb.mxu0 %v12014_v42  ;;  %4508 = vmatpush.bf16.msrb.mxu1 %v12014_v42 }
 0x2e1   : > { %4267 = vmatmul.bf16.gmra.mxu0 %v3927_v5  ;;  %4286 = vmatmul.bf16.gmra.mxu1 %v3928_v11 }
 0x2e4   : > { %v3943_v16 = vpop.f32.mrf.mxu0  ;;  %4459 = vmatpush.bf16.msrb.mxu0 %v12013_v26  ;;  %4509 = vmatpush.bf16.msrb.mxu1 %v12013_v26 }
 0x2e6   : > { %v3962_v39 = vpop.f32.mrf.mxu1 }
 0x2e7   : > { %v3963_v7 = vadd.f32 %v3962_v39, %v3943_v16 }
 0x2ec   : > { %v15894_v25 = vpop.f32.mrf.mxu0 }
 0x2ee   : > { %v15896_v15 = vpop.f32.mrf.mxu1 }
 0x2f4   : > { %v4014_v22 = vpop.f32.mrf.mxu0 }
 0x2f6   : > { %v4033_v29 = vpop.f32.mrf.mxu1 }
 0x2f7   : > { %v4034_v13 = vadd.f32 %v4033_v29, %v4014_v22  ;;  %v4157_v29 = vld [vmem:[%s20549_s26] sm:$0x1]  ;;  %s773_s26 = sand.u32 1, %s12474_s2  }
 0x2f8   : > { %s18955_s29 = smul.u32 448, %s773_s26 }
 0x2fa   : > { %s19023_s27 = scalar_lea.vmem [#allocation2], %s18955_s29  ;;  %s19638_s29 = scalar_lea.sflag [#allocation3], %s773_s26 }
 0x2fc   : > { %v4016_v50 = vpop.f32.mrf.mxu0 }
 0x2fe   : > { %v4035_v61 = vpop.f32.mrf.mxu1 }
 0x2ff   : > { %v4036_v58 = vadd.f32 %v4035_v61, %v4016_v50 }
 0x304   : > { %v4019_v35 = vpop.f32.mrf.mxu0 }
 0x306   : > { %v4038_v36 = vpop.f32.mrf.mxu1 }
 0x307   : > { %v4039_v60 = vadd.f32 %v4038_v36, %v4019_v35 }
 0x30c   : > { %v4021_v3 = vpop.f32.mrf.mxu0 }
 0x30e   : > { %v4040_v37 = vpop.f32.mrf.mxu1 }
 0x30f   : > { %v4041_v34 = vadd.f32 %v4040_v37, %v4021_v3 }
 0x314   : > { %v3976_v1 = vpop.f32.mrf.mxu2  ;;  %v3995_v23 = vpop.f32.mrf.mxu3 }
 0x315   : > { %v3977_v30 = vadd.f32 %v3976_v1, %v3958_v4 }
 0x317   : > { %v3996_v40 = vadd.f32 %v3995_v23, %v3977_v30 }
 0x31c   : > { %v3978_v54 = vpop.f32.mrf.mxu2  ;;  %v3997_v41 = vpop.f32.mrf.mxu3 }
 0x31d   : > { %v3979_v52 = vadd.f32 %v3978_v54, %v3960_v17  ;;  %v3965_v54 = vadd.f32 %v15896_v15, %v15894_v25  ;;  %v4297_v25 = vpack.i.b16 %v4157_v29, %v4157_v29 }
 0x31f   : > { %v3998_v38 = vadd.f32 %v3997_v41, %v3979_v52 }
 0x324   : > { %v3981_v47 = vpop.f32.mrf.mxu2  ;;  %v15901_v21 = vpop.f32.mrf.mxu3 }
 0x325   : > { %v3982_v33 = vadd.f32 %v3981_v47, %v3963_v7 }
 0x327   : > { %v4001_v23 = vadd.f32 %v15901_v21, %v3982_v33 }
 0x32c   : > { %v15909_v62 = vpop.f32.mrf.mxu2  ;;  %v15911_v20 = vpop.f32.mrf.mxu3 }
 0x32d   : > { %v3984_v22 = vadd.f32 %v15909_v62, %v3965_v54  ;;  %v4299_v62 = vperm.slane %v4297_v25, 0  ;;  %v12024_v54 = vld [vmem:[%s20550_s28 + $0x18] sm:$0xff] }
 0x32f   : > { %v4003_v15 = vadd.f32 %v15911_v20, %v3984_v22  ;;  %v15944_v42 = vunpack.c.l.bf16 %v4299_v62  ;;  %v12021_v22 = vld [vmem:[%s20550_s28] sm:$0xff] }
 0x334   : > { %v4052_v10 = vpop.f32.mrf.mxu2  ;;  %v4071_v0 = vpop.f32.mrf.mxu3 }
 0x335   : > { %v4053_v2 = vadd.f32 %v4052_v10, %v4034_v13 }
 0x337   : > { %v4072_v51 = vadd.f32 %v4071_v0, %v4053_v2 }
 0x339   : > { %v4081_v44 = vpack.c.bf16 %v4072_v51, %v3996_v40 }
 0x33b   : > { %v4085_v32 = vunpack.c.l.bf16 %v4081_v44  ;;  %v4086_v59 = vunpack.c.h.bf16 %v4081_v44 }
 0x33c   : > { %v4054_v28 = vpop.f32.mrf.mxu2  ;;  %v4073_v55 = vpop.f32.mrf.mxu3 }
 0x33d   : > { %v4055_v24 = vadd.f32 %v4054_v28, %v4036_v58  ;;  %v4093_v27 = vadd.f32 %v4085_v32, %v15875_v56  ;;  %v4094_v18 = vadd.f32 %v4086_v59, %v15878_v43 }
 0x33f   : > { %v4074_v63 = vadd.f32 %v4073_v55, %v4055_v24  ;;  %v4113_v12 = vmax.f32 %v4093_v27, 0.0  ;;  %v4114_v46 = vmax.f32 %v4094_v18, 0.0 }
 0x341   : > { %v4082_v49 = vpack.c.bf16 %v4074_v63, %v3998_v38 }
 0x343   : > { %v4087_v8 = vunpack.c.l.bf16 %v4082_v49  ;;  %v4088_v14 = vunpack.c.h.bf16 %v4082_v49 }
 0x344   : > { %v4057_v57 = vpop.f32.mrf.mxu2  ;;  %v4076_v31 = vpop.f32.mrf.mxu3 }
 0x345   : > { %v4095_v45 = vadd.f32 %v4087_v8, %v15875_v56  ;;  %v4096_v5 = vadd.f32 %v4088_v14, %v15878_v43  ;;  %v4058_v11 = vadd.f32 %v4057_v57, %v4039_v60 }
 0x347   : > { %v4115_v16 = vmax.f32 %v4095_v45, 0.0  ;;  %v4116_v39 = vmax.f32 %v4096_v5, 0.0  ;;  %v4077_v1 = vadd.f32 %v4076_v31, %v4058_v11 }
 0x349   : > { %v4121_v41 = vpack.c.bf16 %v4115_v16, %v4113_v12  ;;  %v4122_v48 = vpack.c.bf16 %v4116_v39, %v4114_v46  ;;  %v4083_v47 = vpack.c.bf16 %v4077_v1, %v4001_v23  ;;  %v12028_v16 = vld [vmem:[%s20550_s28 + $0x38] sm:$0xff]  ;;  %v12027_v39 = vld [vmem:[%s20550_s28 + $0x30] sm:$0xff]  ;;  %v12026_v1 = vld [vmem:[%s20550_s28 + $0x28] sm:$0xff] }
 0x34a   : > { %4612 = vmatpush.bf16.msrb.mxu2 %v12028_v16  ;;  %4662 = vmatpush.bf16.msrb.mxu3 %v12028_v16  ;;  %v12025_v23 = vld [vmem:[%s20550_s28 + $0x20] sm:$0xff]  ;;  %v12036_v16 = vld [vmem:[%s20552_s11 + $0x38] sm:$0xff] }
 0x34b   : > { %4331 = vmatmul.bf16.vlgmr.msra.gmra.mxu2 %v4121_v41  ;;  %4350 = vmatmul.bf16.vlgmr.msra.gmra.mxu3 %v4122_v48  ;;  %v4089_v61 = vunpack.c.l.bf16 %v4083_v47  ;;  %v4090_v21 = vunpack.c.h.bf16 %v4083_v47  ;;  %v12023_v41 = vld [vmem:[%s20550_s28 + $0x10] sm:$0xff]  ;;  %v12022_v48 = vld [vmem:[%s20550_s28 + $0x8] sm:$0xff] }
 0x34c   : > { %v4059_v19 = vpop.f32.mrf.mxu2  ;;  %v4078_v50 = vpop.f32.mrf.mxu3  ;;  %4772 = vmatpush.bf16.msra.mxu0 %v12036_v16  ;;  %4822 = vmatpush.bf16.msra.mxu1 %v12036_v16 }
 0x34d   : > { %v4060_v9 = vadd.f32 %v4059_v19, %v4041_v34  ;;  %v4097_v0 = vadd.f32 %v4089_v61, %v15875_v56  ;;  %v4098_v2 = vadd.f32 %v4090_v21, %v15878_v43 }
 0x34e   : > { %v4263_v4 = vpop.f32.mrf.mxu0  ;;  %v4282_v53 = vpop.f32.mrf.mxu1  ;;  %4613 = vmatpush.bf16.msrb.mxu2 %v12027_v39  ;;  %4663 = vmatpush.bf16.msrb.mxu3 %v12027_v39  ;;  %v12035_v39 = vld [vmem:[%s20552_s11 + $0x30] sm:$0xff] }
 0x34f   : > { %v4079_v13 = vadd.f32 %v4078_v50, %v4060_v9  ;;  %v4283_v30 = vadd.f32 %v4282_v53, %v4263_v4  ;;  %v4117_v20 = vmax.f32 %v4097_v0, 0.0  ;;  %v4118_v36 = vmax.f32 %v4098_v2, 0.0 }
 0x350   : > { %4773 = vmatpush.bf16.msra.mxu0 %v12035_v39  ;;  %4823 = vmatpush.bf16.msra.mxu1 %v12035_v39 }
 0x351   : > { %v4084_v10 = vpack.c.bf16 %v4079_v13, %v4003_v15  ;;  %v4292_v40 = vpack.c.bf16 %v4283_v30, %v4283_v30  ;;  %v4403_v15 = vld [vmem:[%s20551_s30] sm:$0x1] }
 0x352   : > { %4614 = vmatpush.bf16.msrb.mxu2 %v12026_v1  ;;  %4664 = vmatpush.bf16.msrb.mxu3 %v12026_v1  ;;  %v12034_v1 = vld [vmem:[%s20552_s11 + $0x28] sm:$0xff] }
 0x353   : > { %v4091_v6 = vunpack.c.l.bf16 %v4084_v10  ;;  %v4092_v51 = vunpack.c.h.bf16 %v4084_v10  ;;  %v4300_v52 = vunpack.c.l.bf16 %v4292_v40 }
 0x354   : > { %4774 = vmatpush.bf16.msra.mxu0 %v12034_v1  ;;  %4824 = vmatpush.bf16.msra.mxu1 %v12034_v1 }
 0x355   : > { %v4099_v17 = vadd.f32 %v4091_v6, %v15875_v56  ;;  %v4100_v44 = vadd.f32 %v4092_v51, %v15878_v43  ;;  %v4305_v59 = vadd.f32 %v15944_v42, %v4300_v52  ;;  %v4476_v6 = vpack.i.b16 %v4403_v15, %v4403_v15 }
 0x356   : > { %v4265_v58 = vpop.f32.mrf.mxu0  ;;  %v4284_v35 = vpop.f32.mrf.mxu1  ;;  %4615 = vmatpush.bf16.msrb.mxu2 %v12025_v23  ;;  %4665 = vmatpush.bf16.msrb.mxu3 %v12025_v23  ;;  %v12033_v23 = vld [vmem:[%s20552_s11 + $0x20] sm:$0xff] }
 0x357   : > { %v4285_v28 = vadd.f32 %v4284_v35, %v4265_v58  ;;  %v4119_v55 = vmax.f32 %v4099_v17, 0.0  ;;  %v4120_v24 = vmax.f32 %v4100_v44, 0.0  ;;  %v4317_v7 = vmax.f32 %v4305_v59, 0.0 }
 0x358   : > { %v4478_v58 = vperm.slane %v4476_v6, 0  ;;  %4775 = vmatpush.bf16.msra.mxu0 %v12033_v23  ;;  %4825 = vmatpush.bf16.msra.mxu1 %v12033_v23 }
 0x359   : > { %v4293_v32 = vpack.c.bf16 %v4285_v28, %v4285_v28  ;;  %v4123_v26 = vpack.c.bf16 %v4119_v55, %v4117_v20  ;;  %v4124_v38 = vpack.c.bf16 %v4120_v24, %v4118_v36 }
 0x35a   : > { %4616 = vmatpush.bf16.msrb.mxu2 %v12024_v54  ;;  %4666 = vmatpush.bf16.msrb.mxu3 %v12024_v54  ;;  %v15979_v28 = vunpack.c.l.bf16 %v4478_v58  ;;  %v12032_v54 = vld [vmem:[%s20552_s11 + $0x18] sm:$0xff] }
 0x35b   : > { %v4301_v63 = vunpack.c.l.bf16 %v4293_v32  ;;  %4336 = vmatmul.bf16.gmra.mxu2 %v4123_v26  ;;  %4355 = vmatmul.bf16.gmra.mxu3 %v4124_v38 }
 0x35c   : > { %4776 = vmatpush.bf16.msra.mxu0 %v12032_v54  ;;  %4826 = vmatpush.bf16.msra.mxu1 %v12032_v54 }
 0x35d   : > { %v4306_v56 = vadd.f32 %v15944_v42, %v4301_v63 }
 0x35e   : > { %v4268_v43 = vpop.f32.mrf.mxu0  ;;  %v4287_v49 = vpop.f32.mrf.mxu1  ;;  %4617 = vmatpush.bf16.msrb.mxu2 %v12023_v41  ;;  %4667 = vmatpush.bf16.msrb.mxu3 %v12023_v41  ;;  %v12031_v41 = vld [vmem:[%s20552_s11 + $0x10] sm:$0xff] }
 0x35f   : > { %v4318_v27 = vmax.f32 %v4306_v56, 0.0  ;;  %v4288_v60 = vadd.f32 %v4287_v49, %v4268_v43 }
 0x360   : > { %4777 = vmatpush.bf16.msra.mxu0 %v12031_v41  ;;  %4827 = vmatpush.bf16.msra.mxu1 %v12031_v41 }
 0x361   : > { %v4321_v18 = vpack.c.bf16 %v4318_v27, %v4317_v7  ;;  %v4294_v8 = vpack.c.bf16 %v4288_v60, %v4288_v60 }
 0x362   : > { %4618 = vmatpush.bf16.msrb.mxu2 %v12022_v48  ;;  %4668 = vmatpush.bf16.msrb.mxu3 %v12022_v48 }
 0x363   : > { %4460 = vmatmul.bf16.vlgmr.msrb.gmra.mxu0 %v4321_v18  ;;  %v4302_v57 = vunpack.c.l.bf16 %v4294_v8 }
 0x365   : > { %v4307_v5 = vadd.f32 %v15944_v42, %v4302_v57 }
 0x366   : > { %v4270_v14 = vpop.f32.mrf.mxu0  ;;  %v4289_v33 = vpop.f32.mrf.mxu1  ;;  %4619 = vmatpush.bf16.msrb.mxu2 %v12021_v22  ;;  %4669 = vmatpush.bf16.msrb.mxu3 %v12021_v22  ;;  %v12029_v22 = vld [vmem:[%s20552_s11] sm:$0xff] }
 0x367   : > { %v4290_v31 = vadd.f32 %v4289_v33, %v4270_v14  ;;  %v4319_v37 = vmax.f32 %v4307_v5, 0.0 }
 0x369   : > { %v4295_v45 = vpack.c.bf16 %v4290_v31, %v4290_v31 }
 0x36b   : > { %v4303_v11 = vunpack.c.l.bf16 %v4295_v45 }
 0x36d   : > { %v4308_v3 = vadd.f32 %v15944_v42, %v4303_v11 }
 0x36f   : > { %v4320_v12 = vmax.f32 %v4308_v3, 0.0 }
 0x371   : > { %v4322_v46 = vpack.c.bf16 %v4320_v12, %v4319_v37 }
 0x373   : > { %4465 = vmatmul.bf16.gmra.mxu0 %v4322_v46 }
 0x3ce   : > { %v4332_v47 = vpop.f32.mrf.mxu2  ;;  %v4351_v34 = vpop.f32.mrf.mxu3 }
 0x3cf   : > { %v4352_v29 = vadd.f32 %v4351_v34, %v4332_v47  ;;  %v12030_v47 = vld [vmem:[%s20552_s11 + $0x8] sm:$0xff] }
 0x3d0   : > { %4778 = vmatpush.bf16.msra.mxu0 %v12030_v47  ;;  %4828 = vmatpush.bf16.msra.mxu1 %v12030_v47  ;;  %v4723_v47 = vld [vmem:[%s20555_s12] sm:$0x1] }
 0x3d1   : > { %v4361_v19 = vpack.c.bf16 %v4352_v29, %v4352_v29 }
 0x3d3   : > { %v4365_v61 = vunpack.c.l.bf16 %v4361_v19 }
 0x3d4   : > { %4779 = vmatpush.bf16.msra.mxu0 %v12029_v22  ;;  %4829 = vmatpush.bf16.msra.mxu1 %v12029_v22 }
 0x3d5   : > { %v4369_v53 = vadd.f32 %v4365_v61, %v15944_v42 }
 0x3d6   : > { %v4334_v9 = vpop.f32.mrf.mxu2  ;;  %v4353_v50 = vpop.f32.mrf.mxu3 }
 0x3d7   : > { %v4354_v21 = vadd.f32 %v4353_v50, %v4334_v9  ;;  %v4381_v62 = vmax.f32 %v4369_v53, 0.0 }
 0x3d9   : > { %v4362_v4 = vpack.c.bf16 %v4354_v21, %v4354_v21 }
 0x3db   : > { %v4366_v25 = vunpack.c.l.bf16 %v4362_v4 }
 0x3dd   : > { %v4370_v13 = vadd.f32 %v4366_v25, %v15944_v42 }
 0x3de   : > { %v4337_v30 = vpop.f32.mrf.mxu2  ;;  %v4356_v10 = vpop.f32.mrf.mxu3 }
 0x3df   : > { %v4382_v0 = vmax.f32 %v4370_v13, 0.0  ;;  %v4357_v2 = vadd.f32 %v4356_v10, %v4337_v30  ;;  %v4563_v13 = vld [vmem:[%s20553_s10] sm:$0x1] }
 0x3e0   : > { %v4461_v51 = vpop.f32.mrf.mxu0  ;;  %v4636_v10 = vpack.i.b16 %v4563_v13, %v4563_v13 }
 0x3e1   : > { %v4385_v40 = vpack.c.bf16 %v4382_v0, %v4381_v62  ;;  %v4363_v17 = vpack.c.bf16 %v4357_v2, %v4357_v2  ;;  %v4471_v44 = vpack.c.bf16 %v4461_v51, %v4461_v51 }
 0x3e2   : > { %v4638_v51 = vperm.slane %v4636_v10, 0 }
 0x3e3   : > { %4510 = vmatmul.bf16.vlgmr.msrb.gmra.mxu1 %v4385_v40  ;;  %v4367_v36 = vunpack.c.l.bf16 %v4363_v17  ;;  %v4479_v52 = vunpack.c.l.bf16 %v4471_v44 }
 0x3e5   : > { %v4371_v38 = vadd.f32 %v4367_v36, %v15944_v42  ;;  %v4484_v59 = vadd.f32 %v15979_v28, %v4479_v52 }
 0x3e6   : > { %v4339_v35 = vpop.f32.mrf.mxu2  ;;  %v4358_v20 = vpop.f32.mrf.mxu3 }
 0x3e7   : > { %v4359_v55 = vadd.f32 %v4358_v20, %v4339_v35  ;;  %v4383_v7 = vmax.f32 %v4371_v38, 0.0  ;;  %v4496_v27 = vmax.f32 %v4484_v59, 0.0  ;;  %v16017_v35 = vunpack.c.l.bf16 %v4638_v51 }
 0x3e8   : > { %v4463_v24 = vpop.f32.mrf.mxu0 }
 0x3e9   : > { %v4364_v32 = vpack.c.bf16 %v4359_v55, %v4359_v55  ;;  %v4472_v26 = vpack.c.bf16 %v4463_v24, %v4463_v24 }
 0x3eb   : > { %v4368_v63 = vunpack.c.l.bf16 %v4364_v32  ;;  %v4480_v56 = vunpack.c.l.bf16 %v4472_v26 }
 0x3ed   : > { %v4372_v43 = vadd.f32 %v4368_v63, %v15944_v42  ;;  %v4485_v49 = vadd.f32 %v15979_v28, %v4480_v56 }
 0x3ef   : > { %v4384_v60 = vmax.f32 %v4372_v43, 0.0  ;;  %v4497_v18 = vmax.f32 %v4485_v49, 0.0 }
 0x3f0   : > { %v4466_v8 = vpop.f32.mrf.mxu0 }
 0x3f1   : > { %v4500_v14 = vpack.c.bf16 %v4497_v18, %v4496_v27  ;;  %v4386_v33 = vpack.c.bf16 %v4384_v60, %v4383_v7  ;;  %v4473_v57 = vpack.c.bf16 %v4466_v8, %v4466_v8 }
 0x3f3   : > { %4515 = vmatmul.bf16.gmra.mxu1 %v4386_v33  ;;  %4620 = vmatmul.bf16.vlgmr.msrb.gmra.mxu2 %v4500_v14  ;;  %v4481_v31 = vunpack.c.l.bf16 %v4473_v57 }
 0x3f5   : > { %v4486_v11 = vadd.f32 %v15979_v28, %v4481_v31 }
 0x3f7   : > { %v4498_v37 = vmax.f32 %v4486_v11, 0.0  ;;  %v12042_v11 = vld [vmem:[%s20554_s13 + $0x28] sm:$0xff] }
 0x3f8   : > { %v4468_v45 = vpop.f32.mrf.mxu0 }
 0x3f9   : > { %v4474_v5 = vpack.c.bf16 %v4468_v45, %v4468_v45  ;;  %v12044_v45 = vld [vmem:[%s20554_s13 + $0x38] sm:$0xff] }
 0x3fa   : > { %4932 = vmatpush.bf16.msra.mxu2 %v12044_v45  ;;  %4982 = vmatpush.bf16.msra.mxu3 %v12044_v45 }
 0x3fb   : > { %v4482_v3 = vunpack.c.l.bf16 %v4474_v5  ;;  %v12043_v5 = vld [vmem:[%s20554_s13 + $0x30] sm:$0xff] }
 0x3fd   : > { %v4487_v42 = vadd.f32 %v15979_v28, %v4482_v3  ;;  %v12041_v3 = vld [vmem:[%s20554_s13 + $0x20] sm:$0xff] }
 0x3fe   : > { %4933 = vmatpush.bf16.msra.mxu2 %v12043_v5  ;;  %4983 = vmatpush.bf16.msra.mxu3 %v12043_v5  ;;  %v12045_v5 = vld [vmem:[%s19711_s15] sm:$0xff] }
 0x3ff   : > { %v4499_v12 = vmax.f32 %v4487_v42, 0.0  ;;  %v12040_v42 = vld [vmem:[%s20554_s13 + $0x18] sm:$0xff] }
 0x401   : > { %v4501_v46 = vpack.c.bf16 %v4499_v12, %v4498_v37  ;;  %v12039_v37 = vld [vmem:[%s20554_s13 + $0x10] sm:$0xff]  ;;  %v12038_v12 = vld [vmem:[%s20554_s13 + $0x8] sm:$0xff] }
 0x402   : > { %4934 = vmatpush.bf16.msra.mxu2 %v12042_v11  ;;  %4984 = vmatpush.bf16.msra.mxu3 %v12042_v11 }
 0x403   : > { %4625 = vmatmul.bf16.gmra.mxu2 %v4501_v46  ;;  %v12037_v46 = vld [vmem:[%s20554_s13] sm:$0xff] }
 0x406   : > { %4935 = vmatpush.bf16.msra.mxu2 %v12041_v3  ;;  %4985 = vmatpush.bf16.msra.mxu3 %v12041_v3 }
 0x40a   : > { %4936 = vmatpush.bf16.msra.mxu2 %v12040_v42  ;;  %4986 = vmatpush.bf16.msra.mxu3 %v12040_v42 }
 0x40e   : > { %4937 = vmatpush.bf16.msra.mxu2 %v12039_v37  ;;  %4987 = vmatpush.bf16.msra.mxu3 %v12039_v37 }
 0x412   : > { %4938 = vmatpush.bf16.msra.mxu2 %v12038_v12  ;;  %4988 = vmatpush.bf16.msra.mxu3 %v12038_v12 }
 0x416   : > { %4939 = vmatpush.bf16.msra.mxu2 %v12037_v46  ;;  %4989 = vmatpush.bf16.msra.mxu3 %v12037_v46 }
 0x460   : > { %v4511_v48 = vpop.f32.mrf.mxu1 }
 0x461   : > { %v4521_v34 = vpack.c.bf16 %v4511_v48, %v4511_v48 }
 0x463   : > { %v4525_v29 = vunpack.c.l.bf16 %v4521_v34 }
 0x465   : > { %v4529_v50 = vadd.f32 %v4525_v29, %v15979_v28 }
 0x467   : > { %v4541_v4 = vmax.f32 %v4529_v50, 0.0 }
 0x468   : > { %v4513_v19 = vpop.f32.mrf.mxu1 }
 0x469   : > { %v4522_v9 = vpack.c.bf16 %v4513_v19, %v4513_v19  ;;  %v4796_v19 = vpack.i.b16 %v4723_v47, %v4723_v47 }
 0x46b   : > { %v4526_v61 = vunpack.c.l.bf16 %v4522_v9 }
 0x46d   : > { %v4530_v21 = vadd.f32 %v4526_v61, %v15979_v28 }
 0x46f   : > { %v4542_v53 = vmax.f32 %v4530_v21, 0.0 }
 0x470   : > { %v4516_v25 = vpop.f32.mrf.mxu1 }
 0x471   : > { %v4545_v15 = vpack.c.bf16 %v4542_v53, %v4541_v4  ;;  %v4523_v30 = vpack.c.bf16 %v4516_v25, %v4516_v25  ;;  %v4798_v53 = vperm.slane %v4796_v19, 0 }
 0x473   : > { %4670 = vmatmul.bf16.vlgmr.msrb.gmra.mxu3 %v4545_v15  ;;  %v4527_v0 = vunpack.c.l.bf16 %v4523_v30  ;;  %v16053_v13 = vunpack.c.l.bf16 %v4798_v53 }
 0x475   : > { %v4531_v17 = vadd.f32 %v4527_v0, %v15979_v28 }
 0x476   : > { %v4621_v62 = vpop.f32.mrf.mxu2 }
 0x477   : > { %v4631_v6 = vpack.c.bf16 %v4621_v62, %v4621_v62  ;;  %v4543_v52 = vmax.f32 %v4531_v17, 0.0 }
 0x478   : > { %v4518_v2 = vpop.f32.mrf.mxu1 }
 0x479   : > { %v4524_v40 = vpack.c.bf16 %v4518_v2, %v4518_v2  ;;  %v4639_v58 = vunpack.c.l.bf16 %v4631_v6 }
 0x47b   : > { %v4528_v44 = vunpack.c.l.bf16 %v4524_v40  ;;  %v4644_v32 = vadd.f32 %v16017_v35, %v4639_v58 }
 0x47d   : > { %v4532_v20 = vadd.f32 %v4528_v44, %v15979_v28  ;;  %v4656_v63 = vmax.f32 %v4644_v32, 0.0 }
 0x47e   : > { %v4623_v36 = vpop.f32.mrf.mxu2 }
 0x47f   : > { %v4544_v55 = vmax.f32 %v4532_v20, 0.0  ;;  %v4632_v24 = vpack.c.bf16 %v4623_v36, %v4623_v36 }
 0x481   : > { %v4640_v26 = vunpack.c.l.bf16 %v4632_v24  ;;  %v4546_v38 = vpack.c.bf16 %v4544_v55, %v4543_v52 }
 0x483   : > { %v4645_v59 = vadd.f32 %v16017_v35, %v4640_v26  ;;  %4675 = vmatmul.bf16.gmra.mxu3 %v4546_v38 }
 0x485   : > { %v4657_v56 = vmax.f32 %v4645_v59, 0.0 }
 0x486   : > { %v4626_v43 = vpop.f32.mrf.mxu2 }
 0x487   : > { %v4660_v49 = vpack.c.bf16 %v4657_v56, %v4656_v63  ;;  %v4633_v7 = vpack.c.bf16 %v4626_v43, %v4626_v43 }
 0x489   : > { %4780 = vmatmul.bf16.vlgmr.msra.gmra.mxu0 %v4660_v49  ;;  %v4641_v27 = vunpack.c.l.bf16 %v4633_v7 }
 0x48b   : > { %v4646_v18 = vadd.f32 %v16017_v35, %v4641_v27 }
 0x48d   : > { %v4658_v33 = vmax.f32 %v4646_v18, 0.0  ;;  %v12050_v18 = vld [vmem:[%s19711_s15 + $0x28] sm:$0xff] }
 0x48e   : > { %v4628_v60 = vpop.f32.mrf.mxu2 }
 0x48f   : > { %v4634_v28 = vpack.c.bf16 %v4628_v60, %v4628_v60  ;;  %v12052_v60 = vld [vmem:[%s19711_s15 + $0x38] sm:$0xff] }
 0x490   : > { %5092 = vmatpush.bf16.msrb.mxu0 %v12052_v60  ;;  %5142 = vmatpush.bf16.msrb.mxu1 %v12052_v60 }
 0x491   : > { %v4642_v8 = vunpack.c.l.bf16 %v4634_v28  ;;  %v12051_v28 = vld [vmem:[%s19711_s15 + $0x30] sm:$0xff] }
 0x493   : > { %v4647_v14 = vadd.f32 %v16017_v35, %v4642_v8  ;;  %v12049_v8 = vld [vmem:[%s19711_s15 + $0x20] sm:$0xff] }
 0x494   : > { %5093 = vmatpush.bf16.msrb.mxu0 %v12051_v28  ;;  %5143 = vmatpush.bf16.msrb.mxu1 %v12051_v28 }
 0x495   : > { %v4659_v57 = vmax.f32 %v4647_v14, 0.0  ;;  %v12048_v14 = vld [vmem:[%s19711_s15 + $0x18] sm:$0xff] }
 0x497   : > { %v4661_v31 = vpack.c.bf16 %v4659_v57, %v4658_v33  ;;  %v12047_v33 = vld [vmem:[%s19711_s15 + $0x10] sm:$0xff] }
 0x498   : > { %5094 = vmatpush.bf16.msrb.mxu0 %v12050_v18  ;;  %5144 = vmatpush.bf16.msrb.mxu1 %v12050_v18 }
 0x499   : > { %4785 = vmatmul.bf16.gmra.mxu0 %v4661_v31  ;;  %v12046_v31 = vld [vmem:[%s19711_s15 + $0x8] sm:$0xff] }
 0x49c   : > { %5095 = vmatpush.bf16.msrb.mxu0 %v12049_v8  ;;  %5145 = vmatpush.bf16.msrb.mxu1 %v12049_v8 }
 0x4a0   : > { %5096 = vmatpush.bf16.msrb.mxu0 %v12048_v14  ;;  %5146 = vmatpush.bf16.msrb.mxu1 %v12048_v14 }
 0x4a4   : > { %5097 = vmatpush.bf16.msrb.mxu0 %v12047_v33  ;;  %5147 = vmatpush.bf16.msrb.mxu1 %v12047_v33 }
 0x4a8   : > { %5098 = vmatpush.bf16.msrb.mxu0 %v12046_v31  ;;  %5148 = vmatpush.bf16.msrb.mxu1 %v12046_v31  ;;  %v5043_v31 = vld [vmem:[%s19712_s16] sm:$0x1] }
 0x4ac   : > { %5099 = vmatpush.bf16.msrb.mxu0 %v12045_v5  ;;  %5149 = vmatpush.bf16.msrb.mxu1 %v12045_v5 }
 0x4f6   : > { %v4671_v16 = vpop.f32.mrf.mxu3 }
 0x4f7   : > { %v4681_v39 = vpack.c.bf16 %v4671_v16, %v4671_v16 }
 0x4f9   : > { %v4685_v1 = vunpack.c.l.bf16 %v4681_v39 }
 0x4fb   : > { %v4689_v41 = vadd.f32 %v4685_v1, %v16017_v35 }
 0x4fd   : > { %v4701_v22 = vmax.f32 %v4689_v41, 0.0 }
 0x4fe   : > { %v4673_v23 = vpop.f32.mrf.mxu3 }
 0x4ff   : > { %v4682_v54 = vpack.c.bf16 %v4673_v23, %v4673_v23 }
 0x501   : > { %v4686_v48 = vunpack.c.l.bf16 %v4682_v54  ;;  %v4883_v54 = vld [vmem:[%s19710_s14] sm:$0x1] }
 0x503   : > { %v4690_v34 = vadd.f32 %v4686_v48, %v16017_v35  ;;  %v4956_v48 = vpack.i.b16 %v4883_v54, %v4883_v54 }
 0x505   : > { %v4702_v29 = vmax.f32 %v4690_v34, 0.0  ;;  %v4958_v19 = vperm.slane %v4956_v48, 0 }
 0x506   : > { %v4676_v9 = vpop.f32.mrf.mxu3  ;;  %v4781_v50 = vpop.f32.mrf.mxu0 }
 0x507   : > { %v4705_v61 = vpack.c.bf16 %v4702_v29, %v4701_v22  ;;  %v4683_v21 = vpack.c.bf16 %v4676_v9, %v4676_v9  ;;  %v4791_v4 = vpack.c.bf16 %v4781_v50, %v4781_v50 }
 0x509   : > { %4830 = vmatmul.bf16.vlgmr.msra.gmra.mxu1 %v4705_v61  ;;  %v4687_v25 = vunpack.c.l.bf16 %v4683_v21  ;;  %v4799_v15 = vunpack.c.l.bf16 %v4791_v4  ;;  %v16091_v4 = vunpack.c.l.bf16 %v4958_v19 }
 0x50b   : > { %v4691_v2 = vadd.f32 %v4687_v25, %v16017_v35  ;;  %v4804_v6 = vadd.f32 %v16053_v13, %v4799_v15 }
 0x50d   : > { %v4703_v58 = vmax.f32 %v4691_v2, 0.0  ;;  %v4816_v20 = vmax.f32 %v4804_v6, 0.0 }
 0x50e   : > { %v4678_v30 = vpop.f32.mrf.mxu3  ;;  %v4783_v10 = vpop.f32.mrf.mxu0 }
 0x50f   : > { %v4684_v62 = vpack.c.bf16 %v4678_v30, %v4678_v30  ;;  %v4792_v0 = vpack.c.bf16 %v4783_v10, %v4783_v10 }
 0x511   : > { %v4688_v51 = vunpack.c.l.bf16 %v4684_v62  ;;  %v4800_v40 = vunpack.c.l.bf16 %v4792_v0 }
 0x513   : > { %v4692_v17 = vadd.f32 %v4688_v51, %v16017_v35  ;;  %v4805_v44 = vadd.f32 %v16053_v13, %v4800_v40 }
 0x515   : > { %v4704_v36 = vmax.f32 %v4692_v17, 0.0  ;;  %v4817_v52 = vmax.f32 %v4805_v44, 0.0 }
 0x516   : > { %v4786_v55 = vpop.f32.mrf.mxu0 }
 0x517   : > { %v4820_v24 = vpack.c.bf16 %v4817_v52, %v4816_v20  ;;  %v4706_v32 = vpack.c.bf16 %v4704_v36, %v4703_v58  ;;  %v4793_v26 = vpack.c.bf16 %v4786_v55, %v4786_v55 }
 0x519   : > { %4835 = vmatmul.bf16.gmra.mxu1 %v4706_v32  ;;  %4940 = vmatmul.bf16.vlgmr.msra.gmra.mxu2 %v4820_v24  ;;  %v4801_v38 = vunpack.c.l.bf16 %v4793_v26 }
 0x51b   : > { %v4806_v56 = vadd.f32 %v16053_v13, %v4801_v38 }
 0x51d   : > { %v4818_v49 = vmax.f32 %v4806_v56, 0.0  ;;  %v12058_v56 = vld [vmem:[%s19713_s17 + $0x28] sm:$0xff] }
 0x51e   : > { %v4788_v59 = vpop.f32.mrf.mxu0 }
 0x51f   : > { %v4794_v63 = vpack.c.bf16 %v4788_v59, %v4788_v59  ;;  %v12060_v59 = vld [vmem:[%s19713_s17 + $0x38] sm:$0xff] }
 0x520   : > { %5252 = vmatpush.bf16.msrb.mxu2 %v12060_v59  ;;  %5302 = vmatpush.bf16.msrb.mxu3 %v12060_v59  ;;  %v12073_v59 = vld [vmem:[%s19715_s19 + $0x64] sm:$0xf] }
 0x521   : > { %v4802_v43 = vunpack.c.l.bf16 %v4794_v63  ;;  %v12059_v63 = vld [vmem:[%s19713_s17 + $0x30] sm:$0xff] }
 0x523   : > { %v4807_v35 = vadd.f32 %v16053_v13, %v4802_v43  ;;  %v12057_v43 = vld [vmem:[%s19713_s17 + $0x20] sm:$0xff] }
 0x524   : > { %5253 = vmatpush.bf16.msrb.mxu2 %v12059_v63  ;;  %5303 = vmatpush.bf16.msrb.mxu3 %v12059_v63 }
 0x525   : > { %v4819_v7 = vmax.f32 %v4807_v35, 0.0  ;;  %v12056_v35 = vld [vmem:[%s19713_s17 + $0x18] sm:$0xff] }
 0x527   : > { %v4821_v27 = vpack.c.bf16 %v4819_v7, %v4818_v49  ;;  %v12055_v49 = vld [vmem:[%s19713_s17 + $0x10] sm:$0xff]  ;;  %v12054_v7 = vld [vmem:[%s19713_s17 + $0x8] sm:$0xff] }
 0x528   : > { %5254 = vmatpush.bf16.msrb.mxu2 %v12058_v56  ;;  %5304 = vmatpush.bf16.msrb.mxu3 %v12058_v56  ;;  %v10564_v56 = vld [vmem:[%s19715_s19 + $0x68] sm:$0xf0] }
 0x529   : > { %4945 = vmatmul.bf16.gmra.mxu2 %v4821_v27  ;;  %v12053_v27 = vld [vmem:[%s19713_s17] sm:$0xff] }
 0x52c   : > { %5255 = vmatpush.bf16.msrb.mxu2 %v12057_v43  ;;  %5305 = vmatpush.bf16.msrb.mxu3 %v12057_v43  ;;  %v10567_v43 = vor.u32 %v12073_v59, %v10564_v56 }
 0x530   : > { %5256 = vmatpush.bf16.msrb.mxu2 %v12056_v35  ;;  %5306 = vmatpush.bf16.msrb.mxu3 %v12056_v35  ;;  %v10554_v35 = vld [vmem:[%s19715_s19 + $0x50] sm:$0xf] }
 0x534   : > { %5257 = vmatpush.bf16.msrb.mxu2 %v12055_v49  ;;  %5307 = vmatpush.bf16.msrb.mxu3 %v12055_v49  ;;  %v12072_v49 = vld [vmem:[%s19715_s19 + $0x54] sm:$0xf0] }
 0x538   : > { %5258 = vmatpush.bf16.msrb.mxu2 %v12054_v7  ;;  %5308 = vmatpush.bf16.msrb.mxu3 %v12054_v7  ;;  %v12071_v7 = vld [vmem:[%s19715_s19 + $0x54] sm:$0xf] }
 0x53c   : > { %5259 = vmatpush.bf16.msrb.mxu2 %v12053_v27  ;;  %5309 = vmatpush.bf16.msrb.mxu3 %v12053_v27  ;;  %v10555_v27 = vor.u32 %v12072_v49, %v10554_v35 }
 0x586   : > { %v4831_v57 = vpop.f32.mrf.mxu1 }
 0x587   : > { %v4841_v45 = vpack.c.bf16 %v4831_v57, %v4831_v57 }
 0x589   : > { %v4845_v11 = vunpack.c.l.bf16 %v4841_v45 }
 0x58b   : > { %v4849_v37 = vadd.f32 %v4845_v11, %v16053_v13 }
 0x58d   : > { %v4861_v16 = vmax.f32 %v4849_v37, 0.0 }
 0x58e   : > { %v4833_v3 = vpop.f32.mrf.mxu1 }
 0x58f   : > { %v4842_v42 = vpack.c.bf16 %v4833_v3, %v4833_v3  ;;  %v5116_v3 = vpack.i.b16 %v5043_v31, %v5043_v31 }
 0x591   : > { %v4846_v12 = vunpack.c.l.bf16 %v4842_v42 }
 0x593   : > { %v4850_v46 = vadd.f32 %v4846_v12, %v16053_v13 }
 0x595   : > { %v4862_v39 = vmax.f32 %v4850_v46, 0.0 }
 0x596   : > { %v4836_v1 = vpop.f32.mrf.mxu1 }
 0x597   : > { %v4865_v23 = vpack.c.bf16 %v4862_v39, %v4861_v16  ;;  %v4843_v41 = vpack.c.bf16 %v4836_v1, %v4836_v1  ;;  %v5118_v39 = vperm.slane %v5116_v3, 0  ;;  %v12067_v3 = vld [vmem:[%s19715_s19 + $0x34] sm:$0xf] }
 0x599   : > { %4990 = vmatmul.bf16.vlgmr.msra.gmra.mxu3 %v4865_v23  ;;  %v4847_v34 = vunpack.c.l.bf16 %v4843_v41  ;;  %v16127_v54 = vunpack.c.l.bf16 %v5118_v39 }
 0x59b   : > { %v4851_v50 = vadd.f32 %v4847_v34, %v16053_v13 }
 0x59c   : > { %v4941_v47 = vpop.f32.mrf.mxu2 }
 0x59d   : > { %v4951_v29 = vpack.c.bf16 %v4941_v47, %v4941_v47  ;;  %v4863_v15 = vmax.f32 %v4851_v50, 0.0 }
 0x59e   : > { %v4838_v22 = vpop.f32.mrf.mxu1 }
 0x59f   : > { %v4844_v9 = vpack.c.bf16 %v4838_v22, %v4838_v22  ;;  %v4959_v21 = vunpack.c.l.bf16 %v4951_v29 }
 0x5a1   : > { %v4848_v61 = vunpack.c.l.bf16 %v4844_v9  ;;  %v4964_v62 = vadd.f32 %v16091_v4, %v4959_v21 }
 0x5a3   : > { %v4852_v53 = vadd.f32 %v4848_v61, %v16053_v13  ;;  %v4976_v51 = vmax.f32 %v4964_v62, 0.0 }
 0x5a4   : > { %v4943_v25 = vpop.f32.mrf.mxu2 }
 0x5a5   : > { %v4864_v30 = vmax.f32 %v4852_v53, 0.0  ;;  %v4952_v10 = vpack.c.bf16 %v4943_v25, %v4943_v25 }
 0x5a7   : > { %v4960_v0 = vunpack.c.l.bf16 %v4952_v10  ;;  %v4866_v2 = vpack.c.bf16 %v4864_v30, %v4863_v15 }
 0x5a9   : > { %v4965_v6 = vadd.f32 %v16091_v4, %v4960_v0  ;;  %4995 = vmatmul.bf16.gmra.mxu3 %v4866_v2 }
 0x5ab   : > { %v4977_v40 = vmax.f32 %v4965_v6, 0.0 }
 0x5ac   : > { %v4946_v17 = vpop.f32.mrf.mxu2 }
 0x5ad   : > { %v4980_v44 = vpack.c.bf16 %v4977_v40, %v4976_v51  ;;  %v4953_v58 = vpack.c.bf16 %v4946_v17, %v4946_v17 }
 0x5af   : > { %5100 = vmatmul.bf16.vlgmr.msrb.gmra.mxu0 %v4980_v44  ;;  %v4961_v20 = vunpack.c.l.bf16 %v4953_v58 }
 0x5b1   : > { %v4966_v52 = vadd.f32 %v16091_v4, %v4961_v20 }
 0x5b3   : > { %v4978_v32 = vmax.f32 %v4966_v52, 0.0  ;;  %v12075_v52 = vld [vmem:[%s19715_s19 + $0x74] sm:$0xf] }
 0x5b4   : > { %v4948_v36 = vpop.f32.mrf.mxu2 }
 0x5b5   : > { %v4954_v13 = vpack.c.bf16 %v4948_v36, %v4948_v36  ;;  %v10570_v36 = vld [vmem:[%s19715_s19 + $0x70] sm:$0xf] }
 0x5b7   : > { %v4962_v55 = vunpack.c.l.bf16 %v4954_v13  ;;  %v12076_v13 = vld [vmem:[%s19715_s19 + $0x74] sm:$0xf0] }
 0x5b9   : > { %v4967_v24 = vadd.f32 %v16091_v4, %v4962_v55  ;;  %v10571_v55 = vor.u32 %v12076_v13, %v10570_v36 }
 0x5bb   : > { %v4979_v26 = vmax.f32 %v4967_v24, 0.0  ;;  %v10572_v24 = vld [vmem:[%s19715_s19 + $0x78] sm:$0xf0]  ;;  %5444 = vmatpush.bf16.msra.mxu0 %v10571_v55  ;;  %5538 = vmatpush.bf16.msra.mxu2 %v10571_v55 }
 0x5bd   : > { %v4981_v38 = vpack.c.bf16 %v4979_v26, %v4978_v32  ;;  %v10575_v32 = vor.u32 %v12075_v52, %v10572_v24  ;;  %v10562_v26 = vld [vmem:[%s19715_s19 + $0x60] sm:$0xf] }
 0x5bf   : > { %5105 = vmatmul.bf16.gmra.mxu0 %v4981_v38  ;;  %5463 = vmatpush.bf16.msra.mxu1 %v10575_v32  ;;  %v12074_v38 = vld [vmem:[%s19715_s19 + $0x64] sm:$0xf0] }
 0x5c0   : > { %5557 = vmatpush.bf16.msra.mxu3 %v10575_v32  ;;  %v10563_v63 = vor.u32 %v12074_v38, %v10562_v26 }
 0x5c2   : > { %5445 = vmatpush.bf16.msra.mxu0 %v10563_v63  ;;  %5539 = vmatpush.bf16.msra.mxu2 %v10563_v63 }
 0x5c3   : > { %5464 = vmatpush.bf16.msra.mxu1 %v10567_v43 }
 0x5c4   : > { %5558 = vmatpush.bf16.msra.mxu3 %v10567_v43 }
 0x5c6   : > { %5446 = vmatpush.bf16.msra.mxu0 %v10555_v27  ;;  %5540 = vmatpush.bf16.msra.mxu2 %v10555_v27 }
 0x61c   : > { %v4991_v60 = vpop.f32.mrf.mxu3 }
 0x61d   : > { %v5001_v28 = vpack.c.bf16 %v4991_v60, %v4991_v60  ;;  %v10556_v60 = vld [vmem:[%s19715_s19 + $0x58] sm:$0xf0] }
 0x61f   : > { %v5005_v18 = vunpack.c.l.bf16 %v5001_v28  ;;  %v10559_v28 = vor.u32 %v12071_v7, %v10556_v60 }
 0x621   : > { %v5009_v33 = vadd.f32 %v5005_v18, %v16091_v4  ;;  %5465 = vmatpush.bf16.msra.mxu1 %v10559_v28  ;;  %v10546_v18 = vld [vmem:[%s19715_s19 + $0x40] sm:$0xf]  ;;  %5559 = vmatpush.bf16.msra.mxu3 %v10559_v28 }
 0x623   : > { %v5021_v5 = vmax.f32 %v5009_v33, 0.0 }
 0x624   : > { %v4993_v8 = vpop.f32.mrf.mxu3 }
 0x625   : > { %v5002_v14 = vpack.c.bf16 %v4993_v8, %v4993_v8  ;;  %v12070_v8 = vld [vmem:[%s19715_s19 + $0x44] sm:$0xf0] }
 0x626   : > { %v10547_v33 = vor.u32 %v12070_v8, %v10546_v18 }
 0x627   : > { %v5006_v57 = vunpack.c.l.bf16 %v5002_v14  ;;  %v12069_v14 = vld [vmem:[%s19715_s19 + $0x44] sm:$0xf] }
 0x628   : > { %5447 = vmatpush.bf16.msra.mxu0 %v10547_v33  ;;  %5541 = vmatpush.bf16.msra.mxu2 %v10547_v33 }
 0x629   : > { %v5010_v45 = vadd.f32 %v5006_v57, %v16091_v4  ;;  %v10548_v57 = vld [vmem:[%s19715_s19 + $0x48] sm:$0xf0] }
 0x62a   : > { %v10551_v31 = vor.u32 %v12069_v14, %v10548_v57 }
 0x62b   : > { %v5022_v11 = vmax.f32 %v5010_v45, 0.0  ;;  %v10538_v45 = vld [vmem:[%s19715_s19 + $0x30] sm:$0xf] }
 0x62c   : > { %v4996_v42 = vpop.f32.mrf.mxu3  ;;  %v5101_v37 = vpop.f32.mrf.mxu0  ;;  %5466 = vmatpush.bf16.msra.mxu1 %v10551_v31  ;;  %5560 = vmatpush.bf16.msra.mxu3 %v10551_v31 }
 0x62d   : > { %v5025_v12 = vpack.c.bf16 %v5022_v11, %v5021_v5  ;;  %v5003_v46 = vpack.c.bf16 %v4996_v42, %v4996_v42  ;;  %v5111_v16 = vpack.c.bf16 %v5101_v37, %v5101_v37  ;;  %v12068_v5 = vld [vmem:[%s19715_s19 + $0x34] sm:$0xf0]  ;;  %v10540_v42 = vld [vmem:[%s19715_s19 + $0x38] sm:$0xf0] }
 0x62e   : > { %v10539_v11 = vor.u32 %v12068_v5, %v10538_v45  ;;  %v10543_v37 = vor.u32 %v12067_v3, %v10540_v42 }
 0x62f   : > { %5150 = vmatmul.bf16.vlgmr.msrb.gmra.mxu1 %v5025_v12  ;;  %v5007_v1 = vunpack.c.l.bf16 %v5003_v46  ;;  %v5119_v23 = vunpack.c.l.bf16 %v5111_v16  ;;  %v10530_v12 = vld [vmem:[%s19715_s19 + $0x20] sm:$0xf]  ;;  %v12066_v46 = vld [vmem:[%s19715_s19 + $0x24] sm:$0xf0]  ;;  %v12065_v16 = vld [vmem:[%s19715_s19 + $0x24] sm:$0xf] }
 0x630   : > { %5448 = vmatpush.bf16.msra.mxu0 %v10539_v11  ;;  %5542 = vmatpush.bf16.msra.mxu2 %v10539_v11  ;;  %v10531_v39 = vor.u32 %v12066_v46, %v10530_v12 }
 0x631   : > { %v5011_v22 = vadd.f32 %v5007_v1, %v16091_v4  ;;  %v5124_v29 = vadd.f32 %v16127_v54, %v5119_v23  ;;  %5467 = vmatpush.bf16.msra.mxu1 %v10543_v37  ;;  %5561 = vmatpush.bf16.msra.mxu3 %v10543_v37  ;;  %v10532_v1 = vld [vmem:[%s19715_s19 + $0x28] sm:$0xf0] }
 0x632   : > { %v10535_v23 = vor.u32 %v12065_v16, %v10532_v1  ;;  %v10690_v16 = vld [vmem:[%s19717_s21 + $0xe0] sm:$0xf] }
 0x633   : > { %v5023_v21 = vmax.f32 %v5011_v22, 0.0  ;;  %v5136_v53 = vmax.f32 %v5124_v29, 0.0  ;;  %v10524_v29 = vld [vmem:[%s19715_s19 + $0x18] sm:$0xf0]  ;;  %v10818_v1 = vld [vmem:[%s19717_s21 + $0x1e0] sm:$0xf] }
 0x634   : > { %v4998_v41 = vpop.f32.mrf.mxu3  ;;  %v5103_v48 = vpop.f32.mrf.mxu0  ;;  %5449 = vmatpush.bf16.msra.mxu0 %v10531_v39  ;;  %5543 = vmatpush.bf16.msra.mxu2 %v10531_v39  ;;  %v12107_v39 = vld [vmem:[%s19717_s21 + $0xec] sm:$0xf0] }
 0x635   : > { %v5004_v47 = vpack.c.bf16 %v4998_v41, %v4998_v41  ;;  %v5112_v34 = vpack.c.bf16 %v5103_v48, %v5103_v48  ;;  %5468 = vmatpush.bf16.msra.mxu1 %v10535_v23  ;;  %v10522_v41 = vld [vmem:[%s19715_s19 + $0x10] sm:$0xf]  ;;  %v12064_v48 = vld [vmem:[%s19715_s19 + $0x14] sm:$0xf0]  ;;  %5562 = vmatpush.bf16.msra.mxu3 %v10535_v23  ;;  %v16253_v23 = vor.u32 %v12107_v39, %v10690_v16  ;;  %v12093_v16 = vld [vmem:[%s19717_s21 + $0x84] sm:$0xf] }
 0x636   : > { %v10523_v22 = vor.u32 %v12064_v48, %v10522_v41  ;;  %v12139_v41 = vld [vmem:[%s19717_s21 + $0x1ec] sm:$0xf0]  ;;  %v10644_v39 = vld [vmem:[%s19717_s21 + $0x90] sm:$0xf0] }
 0x637   : > { %v5008_v19 = vunpack.c.l.bf16 %v5004_v47  ;;  %v5120_v9 = vunpack.c.l.bf16 %v5112_v34  ;;  %v12063_v47 = vld [vmem:[%s19715_s19 + $0x14] sm:$0xf]  ;;  %v16258_v48 = vor.u32 %v12139_v41, %v10818_v1  ;;  %v12125_v1 = vld [vmem:[%s19717_s21 + $0x184] sm:$0xf]  ;;  %v16440_v41 = vor.u32 %v12093_v16, %v10644_v39 }
 0x638   : > { %5450 = vmatpush.bf16.msra.mxu0 %v10523_v22  ;;  %5544 = vmatpush.bf16.msra.mxu2 %v10523_v22  ;;  %v10802_v22 = vld [vmem:[%s19717_s21 + $0x1c0] sm:$0xf]  ;;  %v12081_v39 = vld [vmem:[%s19717_s21 + $0x24] sm:$0xf] }
 0x639   : > { %v5012_v50 = vadd.f32 %v5008_v19, %v16091_v4  ;;  %v5125_v61 = vadd.f32 %v16127_v54, %v5120_v9  ;;  %v10527_v19 = vor.u32 %v12063_v47, %v10524_v29  ;;  %v10674_v47 = vld [vmem:[%s19717_s21 + $0xc0] sm:$0xf] }
 0x63b   : > { %v5024_v25 = vmax.f32 %v5012_v50, 0.0  ;;  %v5137_v15 = vmax.f32 %v5125_v61, 0.0  ;;  %5469 = vmatpush.bf16.msra.mxu1 %v10527_v19  ;;  %v10514_v50 = vld [vmem:[%s19715_s19] sm:$0xf]  ;;  %v12062_v61 = vld [vmem:[%s19715_s19 + $0x4] sm:$0xf0]  ;;  %5563 = vmatpush.bf16.msra.mxu3 %v10527_v19 }
 0x63c   : > { %v5106_v30 = vpop.f32.mrf.mxu0  ;;  %v12135_v19 = vld [vmem:[%s19717_s21 + $0x1cc] sm:$0xf0] }
 0x63d   : > { %v5140_v10 = vpack.c.bf16 %v5137_v15, %v5136_v53  ;;  %v5026_v62 = vpack.c.bf16 %v5024_v25, %v5023_v21  ;;  %v5113_v0 = vpack.c.bf16 %v5106_v30, %v5106_v30  ;;  %v12061_v21 = vld [vmem:[%s19715_s19 + $0x4] sm:$0xf]  ;;  %v10515_v53 = vor.u32 %v12062_v61, %v10514_v50  ;;  %v10516_v25 = vld [vmem:[%s19715_s19 + $0x8] sm:$0xf0]  ;;  %v10658_v50 = vld [vmem:[%s19717_s21 + $0xa0] sm:$0xf] }
 0x63e   : > { %v10519_v15 = vor.u32 %v12061_v21, %v10516_v25  ;;  %v12099_v61 = vld [vmem:[%s19717_s21 + $0xac] sm:$0xf0]  ;;  %v10786_v21 = vld [vmem:[%s19717_s21 + $0x1a0] sm:$0xf] }
 0x63f   : > { %5155 = vmatmul.bf16.gmra.mxu1 %v5026_v62  ;;  %5260 = vmatmul.bf16.vlgmr.msrb.gmra.mxu2 %v5140_v10  ;;  %v5121_v2 = vunpack.c.l.bf16 %v5113_v0  ;;  %v12131_v25 = vld [vmem:[%s19717_s21 + $0x1ac] sm:$0xf0] }
 0x640   : > { %5451 = vmatpush.bf16.msra.mxu0 %v10515_v53  ;;  %5545 = vmatpush.bf16.msra.mxu2 %v10515_v53  ;;  %v16289_v53 = vor.u32 %v12099_v61, %v10658_v50 }
 0x641   : > { %v5126_v40 = vadd.f32 %v16127_v54, %v5121_v2  ;;  %5470 = vmatpush.bf16.msra.mxu1 %v10519_v15  ;;  %5564 = vmatpush.bf16.msra.mxu3 %v10519_v15  ;;  %v16294_v15 = vor.u32 %v12131_v25, %v10786_v21  ;;  %v10706_v21 = vld [vmem:[%s19717_s21 + $0x100] sm:$0xf]  ;;  %v12111_v25 = vld [vmem:[%s19717_s21 + $0x10c] sm:$0xf0] }
 0x643   : > { %v5138_v44 = vmax.f32 %v5126_v40, 0.0 }
 0x644   : > { %v5108_v6 = vpop.f32.mrf.mxu0  ;;  %6005 = vmatpush.bf16.msrb.mxu0 %v16253_v23 }
 0x645   : > { %v5114_v51 = vpack.c.bf16 %v5108_v6, %v5108_v6  ;;  %6024 = vmatpush.bf16.msrb.mxu1 %v16258_v48 }
 0x647   : > { %v5122_v17 = vunpack.c.l.bf16 %v5114_v51 }
 0x649   : > { %v5127_v4 = vadd.f32 %v16127_v54, %v5122_v17 }
 0x64b   : > { %v5139_v58 = vmax.f32 %v5127_v4, 0.0 }
 0x64d   : > { %v5141_v20 = vpack.c.bf16 %v5139_v58, %v5138_v44  ;;  %v5203_v44 = vld [vmem:[%s19714_s18] sm:$0x1] }
 0x64f   : > { %5265 = vmatmul.bf16.gmra.mxu2 %v5141_v20  ;;  %v5276_v20 = vpack.i.b16 %v5203_v44, %v5203_v44  ;;  %v10820_v44 = vld [vmem:[%s19717_s21 + $0x1f0] sm:$0xf0] }
 0x651   : > { %v5278_v24 = vperm.slane %v5276_v20, 0 }
 0x653   : > { %v16237_v63 = vunpack.c.l.bf16 %v5278_v24 }
 0x6ac   : > { %v5151_v34 = vpop.f32.mrf.mxu1 }
 0x6ad   : > { %v5161_v9 = vpack.c.bf16 %v5151_v34, %v5151_v34  ;;  %v12103_v34 = vld [vmem:[%s19717_s21 + $0xcc] sm:$0xf0] }
 0x6ae   : > { %v16271_v29 = vor.u32 %v12103_v34, %v10674_v47  ;;  %v10772_v47 = vld [vmem:[%s19717_s21 + $0x190] sm:$0xf0]  ;;  %v10578_v34 = vld [vmem:[%s19717_s21] sm:$0xf] }
 0x6af   : > { %v5165_v30 = vunpack.c.l.bf16 %v5161_v9  ;;  %v16276_v9 = vor.u32 %v12135_v19, %v10802_v22  ;;  %v12079_v22 = vld [vmem:[%s19717_s21 + $0xc] sm:$0xf0]  ;;  %v16451_v50 = vor.u32 %v12125_v1, %v10772_v47  ;;  %v10596_v1 = vld [vmem:[%s19717_s21 + $0x30] sm:$0xf0] }
 0x6b0   : > { %6006 = vmatpush.bf16.msrb.mxu0 %v16271_v29  ;;  %v16453_v61 = vor.u32 %v12079_v22, %v10578_v34  ;;  %v16551_v22 = vor.u32 %v12081_v39, %v10596_v1 }
 0x6b1   : > { %v5169_v0 = vadd.f32 %v5165_v30, %v16127_v54  ;;  %6025 = vmatpush.bf16.msrb.mxu1 %v16276_v9  ;;  %v10642_v30 = vld [vmem:[%s19717_s21 + $0x80] sm:$0xf] }
 0x6b3   : > { %v5181_v51 = vmax.f32 %v5169_v0, 0.0 }
 0x6b4   : > { %v5153_v10 = vpop.f32.mrf.mxu1  ;;  %6007 = vmatpush.bf16.msrb.mxu0 %v16289_v53 }
 0x6b5   : > { %v5162_v62 = vpack.c.bf16 %v5153_v10, %v5153_v10  ;;  %6026 = vmatpush.bf16.msrb.mxu1 %v16294_v15  ;;  %v12095_v10 = vld [vmem:[%s19717_s21 + $0x8c] sm:$0xf0] }
 0x6b6   : > { %v16307_v0 = vor.u32 %v12095_v10, %v10642_v30  ;;  %v16462_v30 = vor.u32 %v12111_v25, %v10706_v21  ;;  %v12089_v10 = vld [vmem:[%s19717_s21 + $0x64] sm:$0xf]  ;;  %v10666_v21 = vld [vmem:[%s19717_s21 + $0xa8] sm:$0xf]  ;;  %v12100_v25 = vld [vmem:[%s19717_s21 + $0xb4] sm:$0xf0] }
 0x6b7   : > { %v5166_v2 = vunpack.c.l.bf16 %v5162_v62  ;;  %v10770_v62 = vld [vmem:[%s19717_s21 + $0x180] sm:$0xf] }
 0x6b8   : > { %6008 = vmatpush.bf16.msrb.mxu0 %v16307_v0 }
 0x6b9   : > { %v5170_v6 = vadd.f32 %v5166_v2, %v16127_v54  ;;  %v12127_v2 = vld [vmem:[%s19717_s21 + $0x18c] sm:$0xf0] }
 0x6bb   : > { %v5182_v40 = vmax.f32 %v5170_v6, 0.0  ;;  %v16312_v6 = vor.u32 %v12127_v2, %v10770_v62  ;;  %v10628_v62 = vld [vmem:[%s19717_s21 + $0x70] sm:$0xf0]  ;;  %v12121_v2 = vld [vmem:[%s19717_s21 + $0x164] sm:$0xf] }
 0x6bc   : > { %v5156_v17 = vpop.f32.mrf.mxu1 }
 0x6bd   : > { %v5185_v4 = vpack.c.bf16 %v5182_v40, %v5181_v51  ;;  %v5163_v58 = vpack.c.bf16 %v5156_v17, %v5156_v17  ;;  %6027 = vmatpush.bf16.msrb.mxu1 %v16312_v6  ;;  %v12105_v51 = vld [vmem:[%s19717_s21 + $0xe4] sm:$0xf]  ;;  %v10692_v40 = vld [vmem:[%s19717_s21 + $0xf0] sm:$0xf0] }
 0x6be   : > { %v16322_v17 = vor.u32 %v12105_v51, %v10692_v40  ;;  %v16476_v40 = vor.u32 %v12089_v10, %v10628_v62  ;;  %v16564_v62 = vor.u32 %v12100_v25, %v10666_v21  ;;  %v10700_v21 = vld [vmem:[%s19717_s21 + $0xf8] sm:$0xf0]  ;;  %v12138_v25 = vld [vmem:[%s19717_s21 + $0x1ec] sm:$0xf] }
 0x6bf   : > { %5310 = vmatmul.bf16.vlgmr.msrb.gmra.mxu3 %v5185_v4  ;;  %v5167_v13 = vunpack.c.l.bf16 %v5163_v58  ;;  %v12137_v4 = vld [vmem:[%s19717_s21 + $0x1e4] sm:$0xf]  ;;  %v10626_v58 = vld [vmem:[%s19717_s21 + $0x60] sm:$0xf] }
 0x6c0   : > { %v16333_v20 = vor.u32 %v12137_v4, %v10820_v44  ;;  %6043 = vmatpush.bf16.msrb.mxu2 %v16322_v17  ;;  %v10756_v4 = vld [vmem:[%s19717_s21 + $0x170] sm:$0xf0]  ;;  %v10698_v44 = vld [vmem:[%s19717_s21 + $0xe8] sm:$0xf] }
 0x6c1   : > { %v5171_v26 = vadd.f32 %v5167_v13, %v16127_v54  ;;  %v10754_v13 = vld [vmem:[%s19717_s21 + $0x160] sm:$0xf] }
 0x6c2   : > { %v5261_v36 = vpop.f32.mrf.mxu2  ;;  %6062 = vmatpush.bf16.msrb.mxu3 %v16333_v20 }
 0x6c3   : > { %v5271_v55 = vpack.c.bf16 %v5261_v36, %v5261_v36  ;;  %v5183_v35 = vmax.f32 %v5171_v26, 0.0  ;;  %v12091_v36 = vld [vmem:[%s19717_s21 + $0x6c] sm:$0xf0] }
 0x6c4   : > { %v5158_v52 = vpop.f32.mrf.mxu1  ;;  %v16351_v26 = vld [vmem:[#allocation1 + $0x9] sm:$0xff] }
 0x6c5   : > { %v5164_v32 = vpack.c.bf16 %v5158_v52, %v5158_v52  ;;  %v5279_v59 = vunpack.c.l.bf16 %v5271_v55  ;;  %v12123_v52 = vld [vmem:[%s19717_s21 + $0x16c] sm:$0xf0]  ;;  %v16345_v55 = vor.u32 %v12091_v36, %v10626_v58  ;;  %v12108_v58 = vld [vmem:[%s19717_s21 + $0xf4] sm:$0xf0]  ;;  %v16487_v36 = vor.u32 %v12121_v2, %v10756_v4  ;;  %v10794_v2 = vld [vmem:[%s19717_s21 + $0x1a8] sm:$0xf] }
 0x6c6   : > { %v16347_v24 = vor.u32 %v12123_v52, %v10754_v13  ;;  %v16489_v13 = vor.u32 %v12108_v58, %v10698_v44  ;;  %v10826_v52 = vld [vmem:[%s19717_s21 + $0x1e8] sm:$0xf]  ;;  %v5493_v58 = vpack.i.b16 %v16351_v26, %v16351_v26 }
 0x6c7   : > { %v5168_v38 = vunpack.c.l.bf16 %v5164_v32  ;;  %v5284_v27 = vadd.f32 %v16237_v63, %v5279_v59  ;;  %v16349_v32 = vld [vmem:[#allocation1] sm:$0xff]  ;;  %v10676_v59 = vld [vmem:[%s19717_s21 + $0xd0] sm:$0xf0]  ;;  %6009 = vmatpush.bf16.msrb.mxu0 %v16345_v55 }
 0x6c8   : > { %6028 = vmatpush.bf16.msrb.mxu1 %v16347_v24 }
 0x6c9   : > { %v5172_v56 = vadd.f32 %v5168_v38, %v16127_v54  ;;  %v5296_v8 = vmax.f32 %v5284_v27, 0.0  ;;  %v12101_v38 = vld [vmem:[%s19717_s21 + $0xc4] sm:$0xf]  ;;  %v5684_v27 = vld [vmem:[%s19718_s22] sm:$0xf] }
 0x6ca   : > { %v5263_v43 = vpop.f32.mrf.mxu2  ;;  %6166 = vst [vmem:[#allocation1] ss:$9 sm:$0xff] %v5684_v27 }
 0x6cb   : > { %v5184_v49 = vmax.f32 %v5172_v56, 0.0  ;;  %v5272_v7 = vpack.c.bf16 %v5263_v43, %v5263_v43  ;;  %v12133_v56 = vld [vmem:[%s19717_s21 + $0x1c4] sm:$0xf]  ;;  %v16365_v43 = vor.u32 %v12101_v38, %v10676_v59  ;;  %v12140_v38 = vld [vmem:[%s19717_s21 + $0x1f4] sm:$0xf0] }
 0x6cc   : > { %v16498_v59 = vor.u32 %v12140_v38, %v10826_v52  ;;  %v12077_v38 = vld [vmem:[%s19717_s21 + $0x4] sm:$0xf] }
 0x6cd   : > { %v5280_v60 = vunpack.c.l.bf16 %v5272_v7  ;;  %v5186_v28 = vpack.c.bf16 %v5184_v49, %v5183_v35  ;;  %v10804_v35 = vld [vmem:[%s19717_s21 + $0x1d0] sm:$0xf0]  ;;  %v10610_v49 = vld [vmem:[%s19717_s21 + $0x40] sm:$0xf]  ;;  %v12087_v7 = vld [vmem:[%s19717_s21 + $0x4c] sm:$0xf0]  ;;  %6044 = vmatpush.bf16.msrb.mxu2 %v16365_v43 }
 0x6cf   : > { %v5285_v18 = vadd.f32 %v16237_v63, %v5280_v60  ;;  %5315 = vmatmul.bf16.gmra.mxu3 %v5186_v28  ;;  %v16379_v60 = vor.u32 %v12133_v56, %v10804_v35  ;;  %v16381_v28 = vor.u32 %v12087_v7, %v10610_v49  ;;  %v12085_v56 = vld [vmem:[%s19717_s21 + $0x44] sm:$0xf]  ;;  %v10612_v35 = vld [vmem:[%s19717_s21 + $0x50] sm:$0xf0] }
 0x6d0   : > { %v12117_v49 = vld [vmem:[%s19717_s21 + $0x144] sm:$0xf]  ;;  %v16512_v27 = vor.u32 %v12085_v56, %v10612_v35  ;;  %v10580_v56 = vld [vmem:[%s19717_s21 + $0x10] sm:$0xf0] }
 0x6d1   : > { %v5297_v14 = vmax.f32 %v5285_v18, 0.0  ;;  %v10738_v18 = vld [vmem:[%s19717_s21 + $0x140] sm:$0xf]  ;;  %6063 = vmatpush.bf16.msrb.mxu3 %v16379_v60  ;;  %6010 = vmatpush.bf16.msrb.mxu0 %v16381_v28  ;;  %v12109_v35 = vld [vmem:[%s19717_s21 + $0x104] sm:$0xf] }
 0x6d2   : > { %v5266_v33 = vpop.f32.mrf.mxu2 }
 0x6d3   : > { %v5300_v57 = vpack.c.bf16 %v5297_v14, %v5296_v8  ;;  %v5273_v31 = vpack.c.bf16 %v5266_v33, %v5266_v33  ;;  %v12119_v8 = vld [vmem:[%s19717_s21 + $0x14c] sm:$0xf0]  ;;  %v12097_v33 = vld [vmem:[%s19717_s21 + $0xa4] sm:$0xf] }
 0x6d4   : > { %v16390_v14 = vor.u32 %v12119_v8, %v10738_v18  ;;  %v10740_v18 = vld [vmem:[%s19717_s21 + $0x150] sm:$0xf0]  ;;  %v10682_v8 = vld [vmem:[%s19717_s21 + $0xc8] sm:$0xf] }
 0x6d5   : > { %5452 = vmatmul.bf16.vlgmr.msra.gmra.mxu0 %v5300_v57  ;;  %5471 = vmatmul.bf16.vlgmr.msra.gmra.mxu1 %v5300_v57  ;;  %v5281_v45 = vunpack.c.l.bf16 %v5273_v31  ;;  %v10660_v57 = vld [vmem:[%s19717_s21 + $0xb0] sm:$0xf0]  ;;  %v12129_v31 = vld [vmem:[%s19717_s21 + $0x1a4] sm:$0xf] }
 0x6d6   : > { %6029 = vmatpush.bf16.msrb.mxu1 %v16390_v14 }
 0x6d7   : > { %v5286_v11 = vadd.f32 %v16237_v63, %v5281_v45  ;;  %v16404_v45 = vor.u32 %v12097_v33, %v10660_v57  ;;  %v16520_v57 = vor.u32 %v12117_v49, %v10740_v18  ;;  %v10708_v18 = vld [vmem:[%s19717_s21 + $0x110] sm:$0xf0] }
 0x6d9   : > { %v5298_v37 = vmax.f32 %v5286_v11, 0.0  ;;  %v12083_v11 = vld [vmem:[%s19717_s21 + $0x2c] sm:$0xf0]  ;;  %6045 = vmatpush.bf16.msrb.mxu2 %v16404_v45 }
 0x6da   : > { %v5268_v54 = vpop.f32.mrf.mxu2 }
 0x6db   : > { %v5274_v5 = vpack.c.bf16 %v5268_v54, %v5268_v54  ;;  %v10788_v54 = vld [vmem:[%s19717_s21 + $0x1b0] sm:$0xf0] }
 0x6dd   : > { %v5282_v3 = vunpack.c.l.bf16 %v5274_v5  ;;  %v10594_v5 = vld [vmem:[%s19717_s21 + $0x20] sm:$0xf]  ;;  %6046 = vmatpush.bf16.msrb.mxu2 %v16440_v41 }
 0x6df   : > { %v5287_v42 = vadd.f32 %v16237_v63, %v5282_v3  ;;  %v16415_v3 = vor.u32 %v12129_v31, %v10788_v54  ;;  %v12104_v31 = vld [vmem:[%s19717_s21 + $0xd4] sm:$0xf0]  ;;  %v10810_v54 = vld [vmem:[%s19717_s21 + $0x1c8] sm:$0xf] }
 0x6e1   : > { %v5299_v12 = vmax.f32 %v5287_v42, 0.0  ;;  %v16417_v42 = vor.u32 %v12083_v11, %v10594_v5  ;;  %6064 = vmatpush.bf16.msrb.mxu3 %v16415_v3  ;;  %6047 = vmatpush.bf16.msrb.mxu2 %v16476_v40  ;;  %v12136_v5 = vld [vmem:[%s19717_s21 + $0x1d4] sm:$0xf0] }
 0x6e2   : > { %v16536_v16 = vor.u32 %v12136_v5, %v10810_v54  ;;  %v16598_v54 = vor.u32 %v12109_v35, %v10708_v18  ;;  %v12096_v5 = vld [vmem:[%s19717_s21 + $0x94] sm:$0xf0] }
 0x6e3   : > { %v5301_v46 = vpack.c.bf16 %v5299_v12, %v5298_v37  ;;  %v10722_v37 = vld [vmem:[%s19717_s21 + $0x120] sm:$0xf]  ;;  %v12115_v12 = vld [vmem:[%s19717_s21 + $0x12c] sm:$0xf0]  ;;  %6011 = vmatpush.bf16.msrb.mxu0 %v16417_v42  ;;  %v12124_v18 = vld [vmem:[%s19717_s21 + $0x174] sm:$0xf0] }
 0x6e4   : > { %20557 = vst [vmem:[#allocation44_spill] sm:$0xff] %v16598_v54 }
 0x6e5   : > { %5457 = vmatmul.bf16.gmra.mxu0 %v5301_v46  ;;  %5476 = vmatmul.bf16.gmra.mxu1 %v5301_v46  ;;  %v16426_v46 = vor.u32 %v12115_v12, %v10722_v37  ;;  %v5490_v37 = vpack.i.b16 %v16349_v32, %v16349_v32  ;;  %v16534_v12 = vor.u32 %v12104_v31, %v10682_v8  ;;  %v12113_v32 = vld [vmem:[%s19717_s21 + $0x124] sm:$0xf]  ;;  %v10650_v8 = vld [vmem:[%s19717_s21 + $0x88] sm:$0xf] }
 0x6e6   : > { %6065 = vmatpush.bf16.msrb.mxu3 %v16451_v50  ;;  %6048 = vmatpush.bf16.msrb.mxu2 %v16512_v27 }
 0x6e7   : > { %6030 = vmatpush.bf16.msrb.mxu1 %v16426_v46  ;;  %6012 = vmatpush.bf16.msrb.mxu0 %v16453_v61  ;;  %v5492_v44 = vperm.slane %v5490_v37, 0  ;;  %v12128_v37 = vld [vmem:[%s19717_s21 + $0x194] sm:$0xf0] }
 0x6ea   : > { %6066 = vmatpush.bf16.msrb.mxu3 %v16487_v36  ;;  %6049 = vmatpush.bf16.msrb.mxu2 %v16551_v22 }
 0x6eb   : > { %6031 = vmatpush.bf16.msrb.mxu1 %v16462_v30  ;;  %6081 = vmatpush.bf16.msra.mxu0 %v16489_v13 }
 0x6ee   : > { %6067 = vmatpush.bf16.msrb.mxu3 %v16520_v57 }
 0x6ef   : > { %6100 = vmatpush.bf16.msra.mxu1 %v16498_v59  ;;  %6082 = vmatpush.bf16.msra.mxu0 %v16534_v12 }
 0x6f3   : > { %6101 = vmatpush.bf16.msra.mxu1 %v16536_v16  ;;  %6083 = vmatpush.bf16.msra.mxu0 %v16564_v62 }
 0x742   : > { %v5311_v19 = vpop.f32.mrf.mxu3 }
 0x743   : > { %v5321_v51 = vpack.c.bf16 %v5311_v19, %v5311_v19  ;;  %v10724_v19 = vld [vmem:[%s19717_s21 + $0x130] sm:$0xf0] }
 0x744   : > { %v16562_v10 = vor.u32 %v12113_v32, %v10724_v19  ;;  %v5495_v32 = vperm.slane %v5493_v58, 0  ;;  %v12106_v19 = vld [vmem:[%s19717_s21 + $0xec] sm:$0xf]  ;;  %v10828_v58 = vld [vmem:[%s19717_s21 + $0x1f8] sm:$0xf0] }
 0x745   : > { %v5325_v7 = vunpack.c.l.bf16 %v5321_v51  ;;  %v12132_v51 = vld [vmem:[%s19717_s21 + $0x1b4] sm:$0xf0]  ;;  %v16637_v35 = vor.u32 %v12138_v25, %v10828_v58  ;;  %v10746_v25 = vld [vmem:[%s19717_s21 + $0x148] sm:$0xf] }
 0x746   : > { %v16576_v52 = vor.u32 %v12132_v51, %v10794_v2  ;;  %6068 = vmatpush.bf16.msrb.mxu3 %v16562_v10 }
 0x747   : > { %v5329_v47 = vadd.f32 %v5325_v7, %v16237_v63  ;;  %v16590_v7 = vor.u32 %v12077_v38, %v10580_v56  ;;  %v10634_v38 = vld [vmem:[%s19717_s21 + $0x68] sm:$0xf]  ;;  %v12092_v56 = vld [vmem:[%s19717_s21 + $0x74] sm:$0xf0]  ;;  %20561 = vst [vmem:[#allocation51_spill] sm:$0xff] %v16637_v35 }
 0x748   : > { %6102 = vmatpush.bf16.msra.mxu1 %v16576_v52 }
 0x749   : > { %v5341_v49 = vmax.f32 %v5329_v47, 0.0  ;;  %20556 = vst [vmem:[#allocation47_spill] sm:$0xff] %v16590_v7  ;;  %6050 = vmatpush.bf16.msrb.mxu2 %v16590_v7  ;;  %v16610_v47 = vor.u32 %v12096_v5, %v10650_v8  ;;  %v12102_v8 = vld [vmem:[%s19717_s21 + $0xcc] sm:$0xf] }
 0x74a   : > { %v5313_v33 = vpop.f32.mrf.mxu3  ;;  %6069 = vmatpush.bf16.msrb.mxu3 %v16598_v54  ;;  %v12134_v5 = vld [vmem:[%s19717_s21 + $0x1cc] sm:$0xf]  ;;  %v10586_v54 = vld [vmem:[%s19717_s21 + $0x8] sm:$0xf] }
 0x74b   : > { %v5322_v11 = vpack.c.bf16 %v5313_v33, %v5313_v33  ;;  %20558 = vst [vmem:[#allocation48_spill] sm:$0xff] %v16610_v47  ;;  %6084 = vmatpush.bf16.msra.mxu0 %v16610_v47 }
 0x74d   : > { %v5326_v34 = vunpack.c.l.bf16 %v5322_v11  ;;  %v10778_v11 = vld [vmem:[%s19717_s21 + $0x188] sm:$0xf] }
 0x74f   : > { %v5330_v4 = vadd.f32 %v5326_v34, %v16237_v63  ;;  %v16612_v34 = vor.u32 %v12128_v37, %v10778_v11  ;;  %v10812_v11 = vld [vmem:[%s19717_s21 + $0x1d8] sm:$0xf0]  ;;  %v16662_v37 = vunpack.c.l.bf16 %v5492_v44 }
 0x751   : > { %v5342_v26 = vmax.f32 %v5330_v4, 0.0  ;;  %20559 = vst [vmem:[#allocation38_spill] sm:$0xff] %v16612_v34  ;;  %v16624_v4 = vor.u32 %v12106_v19, %v10700_v21  ;;  %6103 = vmatpush.bf16.msra.mxu1 %v16612_v34  ;;  %v10618_v19 = vld [vmem:[%s19717_s21 + $0x48] sm:$0xf]  ;;  %v12088_v21 = vld [vmem:[%s19717_s21 + $0x54] sm:$0xf0] }
 0x752   : > { %v5316_v33 = vpop.f32.mrf.mxu3  ;;  %v5453_v31 = vpop.f32.mrf.mxu0 }
 0x753   : > { %v5345_v39 = vpack.c.bf16 %v5342_v26, %v5341_v49  ;;  %v5472_v1 = vpop.f32.mrf.mxu1  ;;  %v5323_v2 = vpack.c.bf16 %v5316_v33, %v5316_v33  ;;  %20560 = vst [vmem:[#allocation50_spill] sm:$0xff] %v16624_v4  ;;  %v16639_v49 = vor.u32 %v12092_v56, %v10634_v38  ;;  %v10762_v26 = vld [vmem:[%s19717_s21 + $0x168] sm:$0xf]  ;;  %v16678_v56 = vunpack.c.l.bf16 %v5495_v32  ;;  %v10668_v32 = vld [vmem:[%s19717_s21 + $0xb8] sm:$0xf0] }
 0x754   : > { %v5482_v51 = vpack.c.bf16 %v5472_v1, %v5453_v31  ;;  %v16651_v33 = vor.u32 %v12124_v18, %v10762_v26  ;;  %v10684_v31 = vld [vmem:[%s19717_s21 + $0xd8] sm:$0xf0]  ;;  %v16667_v1 = vor.u32 %v12134_v5, %v10812_v11  ;;  %v12120_v26 = vld [vmem:[%s19717_s21 + $0x154] sm:$0xf0]  ;;  %v12098_v18 = vld [vmem:[%s19717_s21 + $0xac] sm:$0xf]  ;;  %v16688_v5 = vor.u32 %v12088_v21, %v10618_v19 }
 0x755   : > { %5546 = vmatmul.bf16.vlgmr.msra.gmra.mxu2 %v5345_v39  ;;  %5565 = vmatmul.bf16.vlgmr.msra.gmra.mxu3 %v5345_v39  ;;  %20562 = vst [vmem:[#allocation52_spill] sm:$0xff] %v16639_v49  ;;  %v16665_v39 = vor.u32 %v12102_v8, %v10684_v31  ;;  %v5327_v44 = vunpack.c.l.bf16 %v5323_v2  ;;  %v16690_v2 = vor.u32 %v12120_v26, %v10746_v25  ;;  %v10796_v19 = vld [vmem:[%s19717_s21 + $0x1b8] sm:$0xf0]  ;;  %v10602_v21 = vld [vmem:[%s19717_s21 + $0x28] sm:$0xf] }
 0x756   : > { %6119 = vmatpush.bf16.msra.mxu2 %v16624_v4  ;;  %20563 = vst [vmem:[#allocation42_spill] sm:$0xff] %v16651_v33  ;;  %6138 = vmatpush.bf16.msra.mxu3 %v16637_v35  ;;  %v5496_v58 = vunpack.c.l.bf16 %v5482_v51  ;;  %v5497_v38 = vunpack.c.h.bf16 %v5482_v51  ;;  %v12130_v51 = vld [vmem:[%s19717_s21 + $0x1ac] sm:$0xf]  ;;  %v16699_v47 = vor.u32 %v12098_v18, %v10668_v32  ;;  %v12084_v25 = vld [vmem:[%s19717_s21 + $0x34] sm:$0xf0] }
 0x757   : > { %20564 = vst [vmem:[#allocation54_spill] sm:$0xff] %v16665_v39  ;;  %6085 = vmatpush.bf16.msra.mxu0 %v16639_v49  ;;  %6104 = vmatpush.bf16.msra.mxu1 %v16651_v33  ;;  %v10730_v18 = vld [vmem:[%s19717_s21 + $0x128] sm:$0xf]  ;;  %v12116_v32 = vld [vmem:[%s19717_s21 + $0x134] sm:$0xf0]  ;;  %v5331_v49 = vadd.f32 %v5327_v44, %v16237_v63  ;;  %v16736_v44 = vor.u32 %v12084_v25, %v10602_v21 }
 0x758   : > { %20565 = vst [vmem:[#allocation55_spill] sm:$0xff] %v16667_v1  ;;  %v12094_v33 = vld [vmem:[%s19717_s21 + $0x8c] sm:$0xf]  ;;  %v12112_v25 = vld [vmem:[%s19717_s21 + $0x114] sm:$0xf0] }
 0x759   : > { %20566 = vst [vmem:[#allocation56_spill] sm:$0xff] %v16688_v5 }
 0x75a   : > { %v5318_v8 = vpop.f32.mrf.mxu3  ;;  %v5455_v31 = vpop.f32.mrf.mxu0  ;;  %20567 = vst [vmem:[#allocation49_spill] sm:$0xff] %v16690_v2  ;;  %6120 = vmatpush.bf16.msra.mxu2 %v16665_v39  ;;  %6139 = vmatpush.bf16.msra.mxu3 %v16667_v1  ;;  %v12126_v1 = vld [vmem:[%s19717_s21 + $0x18c] sm:$0xf]  ;;  %v10780_v39 = vld [vmem:[%s19717_s21 + $0x198] sm:$0xf0] }
 0x75b   : > { %v5324_v11 = vpack.c.bf16 %v5318_v8, %v5318_v8  ;;  %v5474_v34 = vpop.f32.mrf.mxu1  ;;  %20568 = vst [vmem:[#allocation58_spill] sm:$0xff] %v16699_v47  ;;  %v16711_v8 = vor.u32 %v12130_v51, %v10796_v19  ;;  %v10652_v19 = vld [vmem:[%s19717_s21 + $0x98] sm:$0xf0]  ;;  %6086 = vmatpush.bf16.msra.mxu0 %v16688_v5  ;;  %6105 = vmatpush.bf16.msra.mxu1 %v16690_v2 }
 0x75c   : > { %v5483_v26 = vpack.c.bf16 %v5474_v34, %v5455_v31  ;;  %v5506_v34 = vadd.f32 %v16662_v37, %v5496_v58  ;;  %v5507_v31 = vadd.f32 %v16678_v56, %v5497_v38  ;;  %v16738_v58 = vor.u32 %v12116_v32, %v10730_v18 }
 0x75d   : > { %20569 = vst [vmem:[#allocation59_spill] sm:$0xff] %v16711_v8  ;;  %v5328_v51 = vunpack.c.l.bf16 %v5324_v11  ;;  %v16742_v11 = vor.u32 %v12094_v33, %v10652_v19  ;;  %v16750_v21 = vor.u32 %v12126_v1, %v10780_v39  ;;  %v10714_v33 = vld [vmem:[%s19717_s21 + $0x108] sm:$0xf]  ;;  %v5343_v18 = vmax.f32 %v5331_v49, 0.0 }
 0x75e   : > { %v5498_v35 = vunpack.c.l.bf16 %v5483_v26  ;;  %v5499_v4 = vunpack.c.h.bf16 %v5483_v26  ;;  %6121 = vmatpush.bf16.msra.mxu2 %v16699_v47  ;;  %6140 = vmatpush.bf16.msra.mxu3 %v16711_v8  ;;  %v5526_v32 = vmax.f32 %v5506_v34, 0.0  ;;  %v16766_v47 = vor.u32 %v12112_v25, %v10714_v33  ;;  %v10636_v34 = vld [vmem:[%s19717_s21 + $0x78] sm:$0xf0]  ;;  %v12086_v33 = vld [vmem:[%s19717_s21 + $0x4c] sm:$0xf] }
 0x75f   : > { %v5332_v38 = vadd.f32 %v5328_v51, %v16237_v63  ;;  %v12080_v63 = vld [vmem:[%s19717_s21 + $0x14] sm:$0xf0]  ;;  %6087 = vmatpush.bf16.msra.mxu0 %v16736_v44  ;;  %6106 = vmatpush.bf16.msra.mxu1 %v16738_v58  ;;  %v12118_v25 = vld [vmem:[%s19717_s21 + $0x14c] sm:$0xf] }
 0x760   : > { %v5508_v26 = vadd.f32 %v16662_v37, %v5498_v35  ;;  %v5509_v5 = vadd.f32 %v16678_v56, %v5499_v4  ;;  %v5527_v4 = vmax.f32 %v5507_v31, 0.0  ;;  %v16764_v8 = vor.u32 %v12080_v63, %v10586_v54  ;;  %v12122_v54 = vld [vmem:[%s19717_s21 + $0x16c] sm:$0xf] }
 0x761   : > { %v5344_v35 = vmax.f32 %v5332_v38, 0.0  ;;  %v10764_v38 = vld [vmem:[%s19717_s21 + $0x178] sm:$0xf0] }
 0x762   : > { %v5528_v51 = vmax.f32 %v5508_v26, 0.0  ;;  %v5529_v19 = vmax.f32 %v5509_v5, 0.0  ;;  %v5458_v39 = vpop.f32.mrf.mxu0  ;;  %6122 = vmatpush.bf16.msra.mxu2 %v16742_v11  ;;  %6141 = vmatpush.bf16.msra.mxu3 %v16750_v21  ;;  %v12090_v5 = vld [vmem:[%s19717_s21 + $0x6c] sm:$0xf]  ;;  %v16789_v63 = vor.u32 %v12122_v54, %v10764_v38 }
 0x763   : > { %v5477_v1 = vpop.f32.mrf.mxu1  ;;  %v5346_v2 = vpack.c.bf16 %v5344_v35, %v5343_v18  ;;  %v16782_v31 = vor.u32 %v12090_v5, %v10636_v34  ;;  %6088 = vmatpush.bf16.msra.mxu0 %v16764_v8  ;;  %6107 = vmatpush.bf16.msra.mxu1 %v16766_v47  ;;  %v10748_v18 = vld [vmem:[%s19717_s21 + $0x158] sm:$0xf0] }
 0x764   : > { %v16768_v7 = vpack.c.bf16 %v5528_v51, %v5526_v32  ;;  %v16770_v49 = vpack.c.bf16 %v5529_v19, %v5527_v4  ;;  %v5484_v26 = vpack.c.bf16 %v5477_v1, %v5458_v39  ;;  %v16809_v32 = vor.u32 %v12118_v25, %v10748_v18  ;;  %v12082_v4 = vld [vmem:[%s19717_s21 + $0x2c] sm:$0xf]  ;;  %v10604_v51 = vld [vmem:[%s19717_s21 + $0x38] sm:$0xf0] }
 0x765   : > { %5551 = vmatmul.bf16.gmra.mxu2 %v5346_v2  ;;  %5570 = vmatmul.bf16.gmra.mxu3 %v5346_v2  ;;  %v10620_v2 = vld [vmem:[%s19717_s21 + $0x58] sm:$0xf0]  ;;  %v12114_v19 = vld [vmem:[%s19717_s21 + $0x12c] sm:$0xf] }
 0x766   : > { %6013 = vmatmul.bf16.vlgmr.msrb.gmra.mxu0 %v16768_v7  ;;  %6032 = vmatmul.bf16.vlgmr.msrb.gmra.mxu1 %v16770_v49  ;;  %v16807_v35 = vor.u32 %v12086_v33, %v10620_v2  ;;  %20570 = vst [vmem:[#allocation60_spill] sm:$0xff] %v16809_v32  ;;  %v10732_v39 = vld [vmem:[%s19717_s21 + $0x138] sm:$0xf0]  ;;  %v5500_v1 = vunpack.c.l.bf16 %v5484_v26  ;;  %v5501_v5 = vunpack.c.h.bf16 %v5484_v26  ;;  %v16827_v33 = vor.u32 %v12082_v4, %v10604_v51  ;;  %v12078_v25 = vld [vmem:[%s19717_s21 + $0xc] sm:$0xf] }
 0x767   : > { %6123 = vmatpush.bf16.msra.mxu2 %v16782_v31  ;;  %6142 = vmatpush.bf16.msra.mxu3 %v16789_v63  ;;  %v16829_v2 = vor.u32 %v12114_v19, %v10732_v39  ;;  %v10716_v26 = vld [vmem:[%s19717_s21 + $0x118] sm:$0xf0] }
 0x768   : > { %6267 = vmatpush.bf16.msrb.mxu0 %v16253_v23  ;;  %6286 = vmatpush.bf16.msrb.mxu1 %v16258_v48  ;;  %v10588_v23 = vld [vmem:[%s19717_s21 + $0x18] sm:$0xf0]  ;;  %v12110_v48 = vld [vmem:[%s19717_s21 + $0x10c] sm:$0xf]  ;;  %v5510_v18 = vadd.f32 %v16662_v37, %v5500_v1  ;;  %v5511_v4 = vadd.f32 %v16678_v56, %v5501_v5 }
 0x769   : > { %v16847_v39 = vor.u32 %v12078_v25, %v10588_v23  ;;  %v11478_v23 = vld [vmem:[%s19719_s23 + $0x508] sm:$0xf] }
 0x76a   : > { %v5460_v34 = vpop.f32.mrf.mxu0 }
 0x76b   : > { %v5479_v54 = vpop.f32.mrf.mxu1  ;;  %6124 = vmatpush.bf16.msra.mxu2 %v16807_v35  ;;  %6143 = vmatpush.bf16.msra.mxu3 %v16809_v32  ;;  %v16853_v32 = vor.u32 %v12110_v48, %v10716_v26  ;;  %v12305_v48 = vld [vmem:[%s19719_s23 + $0x520] sm:$0xf0]  ;;  %v11702_v26 = vld [vmem:[%s19719_s23 + $0x6c8] sm:$0xf] }
 0x76c   : > { %v5485_v38 = vpack.c.bf16 %v5479_v54, %v5460_v34  ;;  %6268 = vmatpush.bf16.msrb.mxu0 %v16271_v29  ;;  %6287 = vmatpush.bf16.msrb.mxu1 %v16276_v9  ;;  %v5530_v29 = vmax.f32 %v5510_v18, 0.0  ;;  %v5531_v9 = vmax.f32 %v5511_v4, 0.0  ;;  %v16977_v4 = vor.u32 %v12305_v48, %v11478_v23 }
 0x76e   : > { %v5502_v51 = vunpack.c.l.bf16 %v5485_v38  ;;  %v5503_v19 = vunpack.c.h.bf16 %v5485_v38 }
 0x76f   : > { %6125 = vmatpush.bf16.msra.mxu2 %v16827_v33  ;;  %6144 = vmatpush.bf16.msra.mxu3 %v16829_v2 }
 0x770   : > { %v5512_v34 = vadd.f32 %v16662_v37, %v5502_v51  ;;  %v5513_v54 = vadd.f32 %v16678_v56, %v5503_v19  ;;  %6269 = vmatpush.bf16.msrb.mxu0 %v16289_v53  ;;  %6288 = vmatpush.bf16.msrb.mxu1 %v16294_v15  ;;  %v20571_v53 = vld [vmem:[#allocation47_spill] sm:$0xff]  ;;  %v20572_v15 = vld [vmem:[#allocation44_spill] sm:$0xff] }
 0x771   : > { %v12361_v51 = vld [vmem:[%s19719_s23 + $0x6e0] sm:$0xf0] }
 0x772   : > { %v5532_v1 = vmax.f32 %v5512_v34, 0.0  ;;  %v5533_v5 = vmax.f32 %v5513_v54, 0.0  ;;  %v16983_v19 = vor.u32 %v12361_v51, %v11702_v26  ;;  %v12186_v34 = vld [vmem:[%s19719_s23 + $0x168] sm:$0xf0]  ;;  %v11226_v54 = vld [vmem:[%s19719_s23 + $0x310] sm:$0xf] }
 0x773   : > { %6126 = vmatpush.bf16.msra.mxu2 %v16847_v39  ;;  %6145 = vmatpush.bf16.msra.mxu3 %v16853_v32 }
 0x774   : > { %v16857_v38 = vpack.c.bf16 %v5532_v1, %v5530_v29  ;;  %v16859_v25 = vpack.c.bf16 %v5533_v5, %v5531_v9  ;;  %6270 = vmatpush.bf16.msrb.mxu0 %v16307_v0  ;;  %6289 = vmatpush.bf16.msrb.mxu1 %v16312_v6  ;;  %v20573_v0 = vld [vmem:[#allocation50_spill] sm:$0xff]  ;;  %v20574_v6 = vld [vmem:[#allocation51_spill] sm:$0xff]  ;;  %v12242_v1 = vld [vmem:[%s19719_s23 + $0x328] sm:$0xf0] }
 0x775   : > { %6051 = vmatmul.bf16.vlgmr.msrb.gmra.mxu2 %v16768_v7  ;;  %6070 = vmatmul.bf16.vlgmr.msrb.gmra.mxu3 %v16770_v49 }
 0x776   : > { %6018 = vmatmul.bf16.gmra.mxu0 %v16857_v38  ;;  %6037 = vmatmul.bf16.gmra.mxu1 %v16859_v25 }
 0x777   : > { %6305 = vmatpush.bf16.msrb.mxu2 %v16322_v17  ;;  %6324 = vmatpush.bf16.msrb.mxu3 %v16333_v20  ;;  %v20575_v17 = vld [vmem:[#allocation48_spill] sm:$0xff]  ;;  %v20576_v20 = vld [vmem:[#allocation38_spill] sm:$0xff] }
 0x778   : > { %6271 = vmatpush.bf16.msrb.mxu0 %v16345_v55  ;;  %6290 = vmatpush.bf16.msrb.mxu1 %v16347_v24  ;;  %v20577_v55 = vld [vmem:[#allocation54_spill] sm:$0xff]  ;;  %v20578_v24 = vld [vmem:[#allocation55_spill] sm:$0xff] }
 0x77b   : > { %6306 = vmatpush.bf16.msrb.mxu2 %v16365_v43  ;;  %6325 = vmatpush.bf16.msrb.mxu3 %v16379_v60  ;;  %v20579_v43 = vld [vmem:[#allocation52_spill] sm:$0xff]  ;;  %v20580_v60 = vld [vmem:[#allocation42_spill] sm:$0xff] }
 0x77c   : > { %6272 = vmatpush.bf16.msrb.mxu0 %v16381_v28  ;;  %6291 = vmatpush.bf16.msrb.mxu1 %v16390_v14  ;;  %v20581_v28 = vld [vmem:[#allocation58_spill] sm:$0xff]  ;;  %v20582_v14 = vld [vmem:[#allocation59_spill] sm:$0xff] }
 0x77f   : > { %6307 = vmatpush.bf16.msrb.mxu2 %v16404_v45  ;;  %6326 = vmatpush.bf16.msrb.mxu3 %v16415_v3  ;;  %v20583_v45 = vld [vmem:[#allocation56_spill] sm:$0xff]  ;;  %v20584_v3 = vld [vmem:[#allocation49_spill] sm:$0xff] }
 0x780   : > { %6273 = vmatpush.bf16.msrb.mxu0 %v16417_v42  ;;  %6292 = vmatpush.bf16.msrb.mxu1 %v16426_v46  ;;  %v20585_v42 = vld [vmem:[#allocation60_spill] sm:$0xff] }
 0x783   : > { %6308 = vmatpush.bf16.msrb.mxu2 %v16440_v41  ;;  %6327 = vmatpush.bf16.msrb.mxu3 %v16451_v50 }
 0x784   : > { %6274 = vmatpush.bf16.msrb.mxu0 %v16453_v61  ;;  %6293 = vmatpush.bf16.msrb.mxu1 %v16462_v30 }
 0x785   : > { %6056 = vmatmul.bf16.gmra.mxu2 %v16857_v38  ;;  %6075 = vmatmul.bf16.gmra.mxu3 %v16859_v25 }
 0x786   : > { %6089 = vmatmul.bf16.vlgmr.msra.gmra.mxu0 %v16768_v7  ;;  %6108 = vmatmul.bf16.vlgmr.msra.gmra.mxu1 %v16770_v49 }
 0x787   : > { %6309 = vmatpush.bf16.msrb.mxu2 %v16476_v40  ;;  %6328 = vmatpush.bf16.msrb.mxu3 %v16487_v36 }
 0x788   : > { %6343 = vmatpush.bf16.msra.mxu0 %v16489_v13  ;;  %6362 = vmatpush.bf16.msra.mxu1 %v16498_v59 }
 0x78b   : > { %6310 = vmatpush.bf16.msrb.mxu2 %v16512_v27  ;;  %6329 = vmatpush.bf16.msrb.mxu3 %v16520_v57 }
 0x78c   : > { %6344 = vmatpush.bf16.msra.mxu0 %v16534_v12  ;;  %6363 = vmatpush.bf16.msra.mxu1 %v16536_v16 }
 0x78f   : > { %6311 = vmatpush.bf16.msrb.mxu2 %v16551_v22  ;;  %6330 = vmatpush.bf16.msrb.mxu3 %v16562_v10 }
 0x790   : > { %6345 = vmatpush.bf16.msra.mxu0 %v16564_v62  ;;  %6364 = vmatpush.bf16.msra.mxu1 %v16576_v52 }
 0x793   : > { %6312 = vmatpush.bf16.msrb.mxu2 %v20571_v53  ;;  %6331 = vmatpush.bf16.msrb.mxu3 %v20572_v15  ;;  %v11450_v53 = vld [vmem:[%s19719_s23 + $0x4d0] sm:$0xf]  ;;  %v12298_v15 = vld [vmem:[%s19719_s23 + $0x4e8] sm:$0xf0] }
 0x794   : > { %6346 = vmatpush.bf16.msra.mxu0 %v20575_v17  ;;  %6365 = vmatpush.bf16.msra.mxu1 %v20576_v20 }
 0x795   : > { %6127 = vmatmul.bf16.vlgmr.msra.gmra.mxu2 %v16768_v7  ;;  %6146 = vmatmul.bf16.vlgmr.msra.gmra.mxu3 %v16770_v49 }
 0x796   : > { %6094 = vmatmul.bf16.gmra.mxu0 %v16857_v38  ;;  %6113 = vmatmul.bf16.gmra.mxu1 %v16859_v25 }
 0x797   : > { %6381 = vmatpush.bf16.msra.mxu2 %v20573_v0  ;;  %6400 = vmatpush.bf16.msra.mxu3 %v20574_v6  ;;  %v11674_v0 = vld [vmem:[%s19719_s23 + $0x690] sm:$0xf] }
 0x798   : > { %6347 = vmatpush.bf16.msra.mxu0 %v20579_v43  ;;  %6366 = vmatpush.bf16.msra.mxu1 %v20580_v60  ;;  %v12354_v43 = vld [vmem:[%s19719_s23 + $0x6a8] sm:$0xf0] }
 0x799   : > { %v17024_v60 = vor.u32 %v12354_v43, %v11674_v0  ;;  %v12277_v0 = vld [vmem:[%s19719_s23 + $0x440] sm:$0xf0] }
 0x79a   : > { %v12333_v43 = vld [vmem:[%s19719_s23 + $0x600] sm:$0xf0] }
 0x79b   : > { %6382 = vmatpush.bf16.msra.mxu2 %v20577_v55  ;;  %6401 = vmatpush.bf16.msra.mxu3 %v20578_v24  ;;  %v17018_v24 = vor.u32 %v12298_v15, %v11450_v53  ;;  %v11366_v15 = vld [vmem:[%s19719_s23 + $0x428] sm:$0xf] }
 0x79c   : > { %6348 = vmatpush.bf16.msra.mxu0 %v20583_v45  ;;  %6367 = vmatpush.bf16.msra.mxu1 %v20584_v3  ;;  %v11198_v45 = vld [vmem:[%s19719_s23 + $0x2d8] sm:$0xf] }
 0x79f   : > { %6383 = vmatpush.bf16.msra.mxu2 %v20581_v28  ;;  %6402 = vmatpush.bf16.msra.mxu3 %v20582_v14  ;;  %v10974_v28 = vld [vmem:[%s19719_s23 + $0x118] sm:$0xf]  ;;  %v12179_v14 = vld [vmem:[%s19719_s23 + $0x130] sm:$0xf0] }
 0x7a0   : > { %6349 = vmatpush.bf16.msra.mxu0 %v16736_v44  ;;  %6368 = vmatpush.bf16.msra.mxu1 %v16738_v58 }
 0x7a3   : > { %6384 = vmatpush.bf16.msra.mxu2 %v16742_v11  ;;  %6403 = vmatpush.bf16.msra.mxu3 %v16750_v21 }
 0x7a4   : > { %6350 = vmatpush.bf16.msra.mxu0 %v16764_v8  ;;  %6369 = vmatpush.bf16.msra.mxu1 %v16766_v47 }
 0x7a5   : > { %6132 = vmatmul.bf16.gmra.mxu2 %v16857_v38  ;;  %6151 = vmatmul.bf16.gmra.mxu3 %v16859_v25  ;;  %v17001_v25 = vor.u32 %v12242_v1, %v11226_v54  ;;  %v11142_v54 = vld [vmem:[%s19719_s23 + $0x268] sm:$0xf] }
 0x7a7   : > { %6385 = vmatpush.bf16.msra.mxu2 %v16782_v31  ;;  %6404 = vmatpush.bf16.msra.mxu3 %v16789_v63  ;;  %v11030_v31 = vld [vmem:[%s19719_s23 + $0x188] sm:$0xf]  ;;  %v12193_v63 = vld [vmem:[%s19719_s23 + $0x1a0] sm:$0xf0] }
 0x7ab   : > { %6386 = vmatpush.bf16.msra.mxu2 %v16807_v35  ;;  %6405 = vmatpush.bf16.msra.mxu3 %v20585_v42  ;;  %v11254_v35 = vld [vmem:[%s19719_s23 + $0x348] sm:$0xf] }
 0x7af   : > { %6387 = vmatpush.bf16.msra.mxu2 %v16827_v33  ;;  %6406 = vmatpush.bf16.msra.mxu3 %v16829_v2  ;;  %v12249_v33 = vld [vmem:[%s19719_s23 + $0x360] sm:$0xf0] }
 0x7b0   : > { %v16965_v2 = vor.u32 %v12249_v33, %v11254_v35  ;;  %v12284_v35 = vld [vmem:[%s19719_s23 + $0x478] sm:$0xf0]  ;;  %v11618_v33 = vld [vmem:[%s19719_s23 + $0x620] sm:$0xf] }
 0x7b3   : > { %6388 = vmatpush.bf16.msra.mxu2 %v16847_v39  ;;  %6407 = vmatpush.bf16.msra.mxu3 %v16853_v32  ;;  %v16958_v32 = vor.u32 %v12193_v63, %v11030_v31  ;;  %v11002_v39 = vld [vmem:[%s19719_s23 + $0x150] sm:$0xf]  ;;  %v11394_v63 = vld [vmem:[%s19719_s23 + $0x460] sm:$0xf] }
 0x7b4   : > { %v16995_v9 = vor.u32 %v12186_v34, %v11002_v39  ;;  %v17101_v26 = vor.u32 %v12284_v35, %v11394_v63  ;;  %v10918_v39 = vld [vmem:[%s19719_s23 + $0xa8] sm:$0xf]  ;;  %v12165_v34 = vld [vmem:[%s19719_s23 + $0xc0] sm:$0xf0]  ;;  %v11310_v63 = vld [vmem:[%s19719_s23 + $0x3b8] sm:$0xf] }
 0x7b5   : > { %v12263_v35 = vld [vmem:[%s19719_s23 + $0x3d0] sm:$0xf0] }
 0x7d8   : > { %v5547_v46 = vpop.f32.mrf.mxu2  ;;  %v5566_v41 = vpop.f32.mrf.mxu3 }
 0x7d9   : > { %v5576_v50 = vpack.c.bf16 %v5566_v41, %v5547_v46  ;;  %v17037_v41 = vor.u32 %v12179_v14, %v10974_v28  ;;  %v10890_v14 = vld [vmem:[%s19719_s23 + $0x70] sm:$0xf] }
 0x7db   : > { %v5580_v61 = vunpack.c.l.bf16 %v5576_v50  ;;  %v5581_v30 = vunpack.c.h.bf16 %v5576_v50  ;;  %v12235_v50 = vld [vmem:[%s19719_s23 + $0x2f0] sm:$0xf0] }
 0x7dd   : > { %v5588_v59 = vadd.f32 %v5580_v61, %v16662_v37  ;;  %v5589_v27 = vadd.f32 %v5581_v30, %v16678_v56  ;;  %v17043_v61 = vor.u32 %v12235_v50, %v11198_v45  ;;  %v11422_v30 = vld [vmem:[%s19719_s23 + $0x498] sm:$0xf]  ;;  %v12158_v45 = vld [vmem:[%s19719_s23 + $0x88] sm:$0xf0] }
 0x7df   : > { %v5608_v10 = vmax.f32 %v5588_v59, 0.0  ;;  %v5609_v62 = vmax.f32 %v5589_v27, 0.0 }
 0x7e0   : > { %v5549_v40 = vpop.f32.mrf.mxu2  ;;  %v5568_v36 = vpop.f32.mrf.mxu3 }
 0x7e1   : > { %v5577_v13 = vpack.c.bf16 %v5568_v36, %v5549_v40  ;;  %v12291_v40 = vld [vmem:[%s19719_s23 + $0x4b0] sm:$0xf0]  ;;  %v11646_v36 = vld [vmem:[%s19719_s23 + $0x658] sm:$0xf] }
 0x7e3   : > { %v5582_v57 = vunpack.c.l.bf16 %v5577_v13  ;;  %v5583_v12 = vunpack.c.h.bf16 %v5577_v13  ;;  %v16939_v47 = vpop.f32.mrf.mxu0  ;;  %v16941_v8 = vpop.f32.mrf.mxu1 }
 0x7e5   : > { %v5590_v16 = vadd.f32 %v5582_v57, %v16662_v37  ;;  %v5591_v22 = vadd.f32 %v5583_v12, %v16678_v56  ;;  %v17057_v57 = vor.u32 %v12291_v40, %v11422_v30  ;;  %v12347_v12 = vld [vmem:[%s19719_s23 + $0x670] sm:$0xf0] }
 0x7e7   : > { %v5610_v52 = vmax.f32 %v5590_v16, 0.0  ;;  %v5611_v7 = vmax.f32 %v5591_v22, 0.0  ;;  %v17063_v16 = vor.u32 %v12347_v12, %v11646_v36  ;;  %v10946_v22 = vld [vmem:[%s19719_s23 + $0xe0] sm:$0xf]  ;;  %v11338_v36 = vld [vmem:[%s19719_s23 + $0x3f0] sm:$0xf] }
 0x7e8   : > { %v5552_v44 = vpop.f32.mrf.mxu2  ;;  %v5571_v58 = vpop.f32.mrf.mxu3  ;;  %v12326_v12 = vld [vmem:[%s19719_s23 + $0x5c8] sm:$0xf0] }
 0x7e9   : > { %v16943_v11 = vpack.c.bf16 %v5610_v52, %v5608_v10  ;;  %v16945_v21 = vpack.c.bf16 %v5611_v7, %v5609_v62  ;;  %v5578_v49 = vpack.c.bf16 %v5571_v58, %v5552_v44  ;;  %v12228_v44 = vld [vmem:[%s19719_s23 + $0x2b8] sm:$0xf0] }
 0x7eb   : > { %6275 = vmatmul.bf16.vlgmr.msrb.gmra.mxu0 %v16943_v11  ;;  %6294 = vmatmul.bf16.vlgmr.msrb.gmra.mxu1 %v16945_v21  ;;  %v5584_v18 = vunpack.c.l.bf16 %v5578_v49  ;;  %v5585_v29 = vunpack.c.h.bf16 %v5578_v49  ;;  %v17013_v17 = vpop.f32.mrf.mxu0  ;;  %v17015_v20 = vpop.f32.mrf.mxu1 }
 0x7ec   : > { %6313 = vmatmul.bf16.vlgmr.msrb.gmra.mxu2 %v16943_v11  ;;  %6332 = vmatmul.bf16.vlgmr.msrb.gmra.mxu3 %v16945_v21 }
 0x7ed   : > { %7931 = vmatpush.bf16.msrb.mxu0 %v16958_v32  ;;  %7950 = vmatpush.bf16.msrb.mxu1 %v16965_v2  ;;  %v5592_v6 = vadd.f32 %v5584_v18, %v16662_v37  ;;  %v5593_v3 = vadd.f32 %v5585_v29, %v16678_v56  ;;  %v12340_v18 = vld [vmem:[%s19719_s23 + $0x638] sm:$0xf0] }
 0x7ee   : > { %7969 = vmatpush.bf16.msrb.mxu2 %v16977_v4  ;;  %7988 = vmatpush.bf16.msrb.mxu3 %v16983_v19  ;;  %v17107_v51 = vor.u32 %v12340_v18, %v11618_v33  ;;  %v11534_v33 = vld [vmem:[%s19719_s23 + $0x578] sm:$0xf] }
 0x7ef   : > { %v5612_v13 = vmax.f32 %v5592_v6, 0.0  ;;  %v5613_v10 = vmax.f32 %v5593_v3, 0.0  ;;  %v17141_v6 = vor.u32 %v12277_v0, %v11366_v15  ;;  %v11114_v3 = vld [vmem:[%s19719_s23 + $0x230] sm:$0xf]  ;;  %v10834_v15 = vld [vmem:[%s19719_s23] sm:$0xf] }
 0x7f0   : > { %v5554_v5 = vpop.f32.mrf.mxu2  ;;  %v5573_v38 = vpop.f32.mrf.mxu3  ;;  %v12144_v0 = vld [vmem:[%s19719_s23 + $0x18] sm:$0xf0] }
 0x7f1   : > { %v5579_v55 = vpack.c.bf16 %v5573_v38, %v5554_v5  ;;  %7932 = vmatpush.bf16.msrb.mxu0 %v16995_v9  ;;  %7951 = vmatpush.bf16.msrb.mxu1 %v17001_v25  ;;  %v17124_v5 = vor.u32 %v12165_v34, %v10918_v39  ;;  %v12221_v38 = vld [vmem:[%s19719_s23 + $0x280] sm:$0xf0]  ;;  %v17224_v34 = vor.u32 %v12263_v35, %v11310_v63  ;;  %v12246_v63 = vld [vmem:[%s19719_s23 + $0x34c] sm:$0xf] }
 0x7f2   : > { %7970 = vmatpush.bf16.msrb.mxu2 %v17018_v24  ;;  %7989 = vmatpush.bf16.msrb.mxu3 %v17024_v60  ;;  %v17131_v53 = vor.u32 %v12221_v38, %v11142_v54  ;;  %v12319_v54 = vld [vmem:[%s19719_s23 + $0x590] sm:$0xf0]  ;;  %v6167_v35 = vld [vmem:[#allocation1] sm:$0xff] }
 0x7f3   : > { %v5586_v42 = vunpack.c.l.bf16 %v5579_v55  ;;  %v5587_v46 = vunpack.c.h.bf16 %v5579_v55  ;;  %v17118_v29 = vpop.f32.mrf.mxu0  ;;  %v17120_v1 = vpop.f32.mrf.mxu1  ;;  %v11590_v55 = vld [vmem:[%s19719_s23 + $0x5e8] sm:$0xf]  ;;  %20586 = vst [vmem:[#allocation53_spill] sm:$0xff] %v17224_v34  ;;  %v17231_v38 = vor.u32 %v12319_v54, %v11534_v33 }
 0x7f4   : > { %v17151_v28 = vor.u32 %v12333_v43, %v11590_v55  ;;  %v11058_v55 = vld [vmem:[%s19719_s23 + $0x1c0] sm:$0xf]  ;;  %v17242_v43 = vor.u32 %v12144_v0, %v10834_v15  ;;  %v11256_v33 = vld [vmem:[%s19719_s23 + $0x364] sm:$0xf0]  ;;  %v12302_v0 = vld [vmem:[%s19719_s23 + $0x50c] sm:$0xf] }
 0x7f5   : > { %v5594_v59 = vadd.f32 %v5586_v42, %v16662_v37  ;;  %v5595_v27 = vadd.f32 %v5587_v46, %v16678_v56  ;;  %7933 = vmatpush.bf16.msrb.mxu0 %v17037_v41  ;;  %7952 = vmatpush.bf16.msrb.mxu1 %v17043_v61  ;;  %v12172_v37 = vld [vmem:[%s19719_s23 + $0xf8] sm:$0xf0]  ;;  %v11170_v56 = vld [vmem:[%s19719_s23 + $0x2a0] sm:$0xf]  ;;  %v17162_v42 = vor.u32 %v12158_v45, %v10890_v14  ;;  %v12214_v46 = vld [vmem:[%s19719_s23 + $0x248] sm:$0xf0] }
 0x7f6   : > { %7971 = vmatpush.bf16.msrb.mxu2 %v17057_v57  ;;  %v17075_v7 = vor.u32 %v12172_v37, %v10946_v22  ;;  %7990 = vmatpush.bf16.msrb.mxu3 %v17063_v16  ;;  %v17085_v31 = vor.u32 %v12228_v44, %v11170_v56  ;;  %v17171_v40 = vor.u32 %v12214_v46, %v11114_v3  ;;  %v10862_v37 = vld [vmem:[%s19719_s23 + $0x38] sm:$0xf]  ;;  %v12151_v56 = vld [vmem:[%s19719_s23 + $0x50] sm:$0xf0]  ;;  %v12200_v14 = vld [vmem:[%s19719_s23 + $0x1d8] sm:$0xf0] }
 0x7f7   : > { %v5614_v62 = vmax.f32 %v5594_v59, 0.0  ;;  %v5615_v52 = vmax.f32 %v5595_v27, 0.0  ;;  %v11562_v59 = vld [vmem:[%s19719_s23 + $0x5b0] sm:$0xf]  ;;  %20587 = vst [vmem:[#allocation62_spill] sm:$0xff] %v17231_v38  ;;  %v17251_v46 = vor.u32 %v12200_v14, %v11058_v55  ;;  %v17291_v15 = vor.u32 %v12246_v63, %v11256_v33 }
 0x7f8   : > { %v17080_v58 = vpop.f32.mrf.mxu2  ;;  %v17082_v49 = vpop.f32.mrf.mxu3  ;;  %v17191_v22 = vor.u32 %v12326_v12, %v11562_v59  ;;  %20588 = vst [vmem:[#allocation63_spill] sm:$0xff] %v17242_v43  ;;  %v11506_v59 = vld [vmem:[%s19719_s23 + $0x540] sm:$0xf]  ;;  %v11480_v55 = vld [vmem:[%s19719_s23 + $0x524] sm:$0xf0] }
 0x7f9   : > { %v17096_v23 = vpack.c.bf16 %v5614_v62, %v5612_v13  ;;  %v17098_v48 = vpack.c.bf16 %v5615_v52, %v5613_v10  ;;  %7934 = vmatpush.bf16.msrb.mxu0 %v17075_v7  ;;  %7953 = vmatpush.bf16.msrb.mxu1 %v17085_v31  ;;  %v12270_v13 = vld [vmem:[%s19719_s23 + $0x408] sm:$0xf0]  ;;  %v11086_v10 = vld [vmem:[%s19719_s23 + $0x1f8] sm:$0xf]  ;;  %v17202_v62 = vor.u32 %v12151_v56, %v10862_v37  ;;  %v12207_v52 = vld [vmem:[%s19719_s23 + $0x210] sm:$0xf0] }
 0x7fa   : > { %7972 = vmatpush.bf16.msrb.mxu2 %v17101_v26  ;;  %7991 = vmatpush.bf16.msrb.mxu3 %v17107_v51  ;;  %v17184_v27 = vor.u32 %v12270_v13, %v11338_v36  ;;  %v17207_v44 = vor.u32 %v12207_v52, %v11086_v10  ;;  %20589 = vst [vmem:[#allocation64_spill] sm:$0xff] %v17251_v46  ;;  %v11282_v36 = vld [vmem:[%s19719_s23 + $0x380] sm:$0xf]  ;;  %v12256_v13 = vld [vmem:[%s19719_s23 + $0x398] sm:$0xf0] }
 0x7fb   : > { %6280 = vmatmul.bf16.gmra.mxu0 %v17096_v23  ;;  %6299 = vmatmul.bf16.gmra.mxu1 %v17098_v48  ;;  %v17218_v18 = vpop.f32.mrf.mxu0  ;;  %v17220_v39 = vpop.f32.mrf.mxu1  ;;  %v17264_v12 = vor.u32 %v12256_v13, %v11282_v36  ;;  %v12312_v37 = vld [vmem:[%s19719_s23 + $0x558] sm:$0xf0]  ;;  %v12190_v10 = vld [vmem:[%s19719_s23 + $0x18c] sm:$0xf]  ;;  %v11032_v52 = vld [vmem:[%s19719_s23 + $0x1a4] sm:$0xf0] }
 0x7fc   : > { %6318 = vmatmul.bf16.gmra.mxu2 %v17096_v23  ;;  %6337 = vmatmul.bf16.gmra.mxu3 %v17098_v48  ;;  %v17271_v56 = vor.u32 %v12312_v37, %v11506_v59  ;;  %v17289_v54 = vor.u32 %v12190_v10, %v11032_v52  ;;  %20593 = vst [vmem:[#allocation68_spill] sm:$0xff] %v17291_v15  ;;  %v12358_v14 = vld [vmem:[%s19719_s23 + $0x6cc] sm:$0xf]  ;;  %v12183_v13 = vld [vmem:[%s19719_s23 + $0x154] sm:$0xf] }
 0x7fd   : > { %7935 = vmatpush.bf16.msrb.mxu0 %v17124_v5  ;;  %7954 = vmatpush.bf16.msrb.mxu1 %v17131_v53  ;;  %20590 = vst [vmem:[#allocation57_spill] sm:$0xff] %v17264_v12  ;;  %v11004_v59 = vld [vmem:[%s19719_s23 + $0x16c] sm:$0xf0]  ;;  %v12239_v37 = vld [vmem:[%s19719_s23 + $0x314] sm:$0xf]  ;;  %v6171_v52 = vpack.i.b16 %v6167_v35, %v6167_v35 }
 0x7fe   : > { %7973 = vmatpush.bf16.msrb.mxu2 %v17141_v6  ;;  %7992 = vmatpush.bf16.msrb.mxu3 %v17151_v28  ;;  %20591 = vst [vmem:[#allocation66_spill] sm:$0xff] %v17271_v56  ;;  %v6168_v10 = vld [vmem:[#allocation1 + $0x9] sm:$0xff]  ;;  %v12295_v35 = vld [vmem:[%s19719_s23 + $0x4d4] sm:$0xf] }
 0x7ff   : > { %20592 = vst [vmem:[#allocation67_spill] sm:$0xff] %v17289_v54 }
 0x800   : > { %v17167_v50 = vpop.f32.mrf.mxu2  ;;  %v17169_v30 = vpop.f32.mrf.mxu3 }
 0x801   : > { %7936 = vmatpush.bf16.msrb.mxu0 %v17162_v42  ;;  %7955 = vmatpush.bf16.msrb.mxu1 %v17171_v40 }
 0x802   : > { %7974 = vmatpush.bf16.msrb.mxu2 %v17184_v27  ;;  %7993 = vmatpush.bf16.msrb.mxu3 %v17191_v22 }
 0x803   : > { %v17322_v63 = vpop.f32.mrf.mxu0  ;;  %v17324_v33 = vpop.f32.mrf.mxu1 }
 0x805   : > { %7937 = vmatpush.bf16.msrb.mxu0 %v17202_v62  ;;  %7956 = vmatpush.bf16.msrb.mxu1 %v17207_v44 }
 0x806   : > { %7975 = vmatpush.bf16.msrb.mxu2 %v17224_v34  ;;  %7994 = vmatpush.bf16.msrb.mxu3 %v17231_v38  ;;  %v11088_v38 = vld [vmem:[%s19719_s23 + $0x214] sm:$0xf0]  ;;  %v12260_v34 = vld [vmem:[%s19719_s23 + $0x3bc] sm:$0xf] }
 0x808   : > { %v17247_v45 = vpop.f32.mrf.mxu2  ;;  %v17249_v3 = vpop.f32.mrf.mxu3 }
 0x809   : > { %7938 = vmatpush.bf16.msrb.mxu0 %v17242_v43  ;;  %7957 = vmatpush.bf16.msrb.mxu1 %v17251_v46  ;;  %v10864_v46 = vld [vmem:[%s19719_s23 + $0x54] sm:$0xf0]  ;;  %v12204_v43 = vld [vmem:[%s19719_s23 + $0x1fc] sm:$0xf] }
 0x80a   : > { %7976 = vmatpush.bf16.msrb.mxu2 %v17264_v12  ;;  %7995 = vmatpush.bf16.msrb.mxu3 %v17271_v56  ;;  %v12176_v12 = vld [vmem:[%s19719_s23 + $0x11c] sm:$0xf] }
 0x80b   : > { %6351 = vmatmul.bf16.vlgmr.msra.gmra.mxu0 %v16943_v11  ;;  %6370 = vmatmul.bf16.vlgmr.msra.gmra.mxu1 %v16945_v21 }
 0x80c   : > { %6389 = vmatmul.bf16.vlgmr.msra.gmra.mxu2 %v16943_v11  ;;  %6408 = vmatmul.bf16.vlgmr.msra.gmra.mxu3 %v16945_v21  ;;  %v17304_v11 = vor.u32 %v12302_v0, %v11480_v55  ;;  %v11704_v21 = vld [vmem:[%s19719_s23 + $0x6e4] sm:$0xf0]  ;;  %v17327_v0 = vor.u32 %v12183_v13, %v11004_v59  ;;  %v11228_v55 = vld [vmem:[%s19719_s23 + $0x32c] sm:$0xf0]  ;;  %v12351_v59 = vld [vmem:[%s19719_s23 + $0x694] sm:$0xf] }
 0x80d   : > { %8007 = vmatpush.bf16.msra.mxu0 %v17289_v54  ;;  %8026 = vmatpush.bf16.msra.mxu1 %v17291_v15  ;;  %v17311_v36 = vor.u32 %v12358_v14, %v11704_v21  ;;  %v17337_v15 = vor.u32 %v12239_v37, %v11228_v55  ;;  %v11452_v13 = vld [vmem:[%s19719_s23 + $0x4ec] sm:$0xf0]  ;;  %v6174_v55 = vpack.i.b16 %v6168_v10, %v6168_v10 }
 0x80e   : > { %20594 = vst [vmem:[#allocation61_spill] sm:$0xff] %v17304_v11  ;;  %8045 = vmatpush.bf16.msra.mxu2 %v17304_v11  ;;  %v6072_v11 = vadd.f32 %v17082_v49, %v17080_v58  ;;  %v6169_v54 = vld [vmem:[#allocation1 + $0x12] sm:$0xff]  ;;  %v17350_v56 = vor.u32 %v12295_v35, %v11452_v13  ;;  %v12232_v49 = vld [vmem:[%s19719_s23 + $0x2dc] sm:$0xf]  ;;  %v6034_v10 = vadd.f32 %v16941_v8, %v16939_v47  ;;  %v6173_v35 = vperm.slane %v6171_v52, 0 }
 0x80f   : > { %20595 = vst [vmem:[#allocation70_spill] sm:$0xff] %v17311_v36  ;;  %8064 = vmatpush.bf16.msra.mxu3 %v17311_v36  ;;  %v11676_v37 = vld [vmem:[%s19719_s23 + $0x6ac] sm:$0xf0]  ;;  %v10976_v58 = vld [vmem:[%s19719_s23 + $0x134] sm:$0xf0]  ;;  %v6074_v13 = vadd.f32 %v17169_v30, %v17167_v50  ;;  %v6036_v30 = vadd.f32 %v17015_v20, %v17013_v17  ;;  %v6177_v52 = vpack.i.b16 %v6169_v54, %v6169_v54  ;;  %v6176_v54 = vperm.slane %v6174_v55, 0 }
 0x810   : > { %20596 = vst [vmem:[#allocation71_spill] sm:$0xff] %v17327_v0  ;;  %v17332_v14 = vpop.f32.mrf.mxu2  ;;  %v17334_v21 = vpop.f32.mrf.mxu3  ;;  %v17357_v36 = vor.u32 %v12351_v59, %v11676_v37  ;;  %v6170_v59 = vld [vmem:[#allocation1 + $0x1b] sm:$0xff]  ;;  %v17373_v37 = vor.u32 %v12176_v12, %v10976_v58  ;;  %v17392_v12 = vpack.c.bf16 %v6072_v11, %v6034_v10  ;;  %v12225_v20 = vld [vmem:[%s19719_s23 + $0x2a4] sm:$0xf] }
 0x811   : > { %20597 = vst [vmem:[#allocation72_spill] sm:$0xff] %v17337_v15  ;;  %8008 = vmatpush.bf16.msra.mxu0 %v17327_v0  ;;  %8027 = vmatpush.bf16.msra.mxu1 %v17337_v15  ;;  %v11200_v15 = vld [vmem:[%s19719_s23 + $0x2f4] sm:$0xf0]  ;;  %v12288_v47 = vld [vmem:[%s19719_s23 + $0x49c] sm:$0xf]  ;;  %v17412_v11 = vpack.c.bf16 %v6074_v13, %v6036_v30  ;;  %v6180_v10 = vpack.i.b16 %v6170_v59, %v6170_v59  ;;  %v6179_v30 = vperm.slane %v6177_v52, 0 }
 0x812   : > { %20598 = vst [vmem:[#allocation65_spill] sm:$0xff] %v17350_v56  ;;  %8046 = vmatpush.bf16.msra.mxu2 %v17350_v56  ;;  %v17379_v0 = vor.u32 %v12232_v49, %v11200_v15  ;;  %v11424_v8 = vld [vmem:[%s19719_s23 + $0x4b4] sm:$0xf0]  ;;  %v12344_v50 = vld [vmem:[%s19719_s23 + $0x65c] sm:$0xf] }
 0x813   : > { %20599 = vst [vmem:[#allocation74_spill] sm:$0xff] %v17357_v36  ;;  %8065 = vmatpush.bf16.msra.mxu3 %v17357_v36  ;;  %v17394_v15 = vor.u32 %v12288_v47, %v11424_v8  ;;  %v11648_v58 = vld [vmem:[%s19719_s23 + $0x674] sm:$0xf0]  ;;  %v12169_v36 = vld [vmem:[%s19719_s23 + $0xe4] sm:$0xf] }
 0x814   : > { %20600 = vst [vmem:[#allocation75_spill] sm:$0xff] %v17373_v37  ;;  %v17401_v49 = vor.u32 %v12344_v50, %v11648_v58  ;;  %v10948_v17 = vld [vmem:[%s19719_s23 + $0xfc] sm:$0xf0]  ;;  %v17420_v50 = vunpack.c.l.bf16 %v6173_v35  ;;  %v12281_v55 = vld [vmem:[%s19719_s23 + $0x464] sm:$0xf]  ;;  %v6183_v35 = vunpack.c.l.bf16 %v17392_v12 }
 0x815   : > { %20601 = vst [vmem:[#allocation76_spill] sm:$0xff] %v17379_v0  ;;  %8009 = vmatpush.bf16.msra.mxu0 %v17373_v37  ;;  %8028 = vmatpush.bf16.msra.mxu1 %v17379_v0  ;;  %v17415_v47 = vor.u32 %v12169_v36, %v10948_v17  ;;  %v11172_v8 = vld [vmem:[%s19719_s23 + $0x2bc] sm:$0xf0]  ;;  %v12337_v13 = vld [vmem:[%s19719_s23 + $0x624] sm:$0xf] }
 0x816   : > { %20602 = vst [vmem:[#allocation69_spill] sm:$0xff] %v17394_v15  ;;  %8047 = vmatpush.bf16.msra.mxu2 %v17394_v15  ;;  %v17423_v37 = vor.u32 %v12225_v20, %v11172_v8  ;;  %v11396_v36 = vld [vmem:[%s19719_s23 + $0x47c] sm:$0xf0]  ;;  %v6110_v8 = vadd.f32 %v17324_v33, %v17322_v63  ;;  %v6111_v15 = vpop.f32.mrf.mxu1  ;;  %v10920_v52 = vld [vmem:[%s19719_s23 + $0xc4] sm:$0xf0]  ;;  %v6184_v33 = vunpack.c.h.bf16 %v17392_v12 }
 0x817   : > { %20603 = vst [vmem:[#allocation77_spill] sm:$0xff] %v17401_v49  ;;  %8066 = vmatpush.bf16.msra.mxu3 %v17401_v49  ;;  %v17435_v17 = vor.u32 %v12281_v55, %v11396_v36  ;;  %v11620_v20 = vld [vmem:[%s19719_s23 + $0x63c] sm:$0xf0]  ;;  %v6092_v49 = vpop.f32.mrf.mxu0  ;;  %v12218_v63 = vld [vmem:[%s19719_s23 + $0x26c] sm:$0xf]  ;;  %v6187_v55 = vunpack.c.l.bf16 %v17412_v11  ;;  %v6182_v36 = vperm.slane %v6180_v10, 0 }
 0x818   : > { %20604 = vst [vmem:[#allocation78_spill] sm:$0xff] %v17415_v47  ;;  %v6128_v58 = vpop.f32.mrf.mxu2  ;;  %v6147_v0 = vpop.f32.mrf.mxu3  ;;  %v17444_v56 = vor.u32 %v12337_v13, %v11620_v20  ;;  %v11144_v13 = vld [vmem:[%s19719_s23 + $0x284] sm:$0xf0]  ;;  %v6188_v20 = vunpack.c.h.bf16 %v17412_v11  ;;  %v12274_v10 = vld [vmem:[%s19719_s23 + $0x42c] sm:$0xf] }
 0x819   : > { %20605 = vst [vmem:[#allocation79_spill] sm:$0xff] %v17423_v37  ;;  %v6148_v59 = vadd.f32 %v6147_v0, %v6128_v58  ;;  %8010 = vmatpush.bf16.msra.mxu0 %v17415_v47  ;;  %8029 = vmatpush.bf16.msra.mxu1 %v17423_v37  ;;  %v12162_v0 = vld [vmem:[%s19719_s23 + $0xac] sm:$0xf]  ;;  %v17456_v58 = vunpack.c.l.bf16 %v6176_v54  ;;  %v17471_v54 = vor.u32 %v12218_v63, %v11144_v13  ;;  %v11368_v47 = vld [vmem:[%s19719_s23 + $0x444] sm:$0xf0] }
 0x81a   : > { %20606 = vst [vmem:[#allocation73_spill] sm:$0xff] %v17435_v17  ;;  %v17469_v12 = vor.u32 %v12162_v0, %v10920_v52  ;;  %v12330_v11 = vld [vmem:[%s19719_s23 + $0x5ec] sm:$0xf]  ;;  %8048 = vmatpush.bf16.msra.mxu2 %v17435_v17  ;;  %v10892_v0 = vld [vmem:[%s19719_s23 + $0x8c] sm:$0xf0] }
 0x81b   : > { %20607 = vst [vmem:[#allocation81_spill] sm:$0xff] %v17444_v56  ;;  %6356 = vmatmul.bf16.gmra.mxu0 %v17096_v23  ;;  %6375 = vmatmul.bf16.gmra.mxu1 %v17098_v48  ;;  %v17465_v37 = vpack.c.bf16 %v6148_v59, %v6110_v8  ;;  %v11592_v59 = vld [vmem:[%s19719_s23 + $0x604] sm:$0xf0]  ;;  %v12155_v8 = vld [vmem:[%s19719_s23 + $0x74] sm:$0xf] }
 0x81c   : > { %6394 = vmatmul.bf16.gmra.mxu2 %v17096_v23  ;;  %6413 = vmatmul.bf16.gmra.mxu3 %v17098_v48  ;;  %20608 = vst [vmem:[#allocation82_spill] sm:$0xff] %v17469_v12  ;;  %v17483_v23 = vadd.f32 %v17420_v50, %v6183_v35  ;;  %v17487_v48 = vor.u32 %v12274_v10, %v11368_v47  ;;  %v17498_v35 = vunpack.c.l.bf16 %v6179_v30  ;;  %v12211_v63 = vld [vmem:[%s19719_s23 + $0x234] sm:$0xf]  ;;  %v11116_v13 = vld [vmem:[%s19719_s23 + $0x24c] sm:$0xf0] }
 0x81d   : > { %20609 = vst [vmem:[#allocation80_spill] sm:$0xff] %v17471_v54  ;;  %8067 = vmatpush.bf16.msra.mxu3 %v17444_v56  ;;  %8011 = vmatpush.bf16.msra.mxu0 %v17469_v12  ;;  %v17502_v47 = vor.u32 %v12330_v11, %v11592_v59  ;;  %v17504_v52 = vor.u32 %v12155_v8, %v10892_v0  ;;  %v12267_v30 = vld [vmem:[%s19719_s23 + $0x3f4] sm:$0xf]  ;;  %v17521_v59 = vunpack.c.l.bf16 %v6182_v36  ;;  %v11340_v0 = vld [vmem:[%s19719_s23 + $0x40c] sm:$0xf0]  ;;  %v6185_v36 = vunpack.c.l.bf16 %v17465_v37 }
 0x81e   : > { %8030 = vmatpush.bf16.msra.mxu1 %v17471_v54  ;;  %v17516_v10 = vadd.f32 %v17456_v58, %v6184_v33  ;;  %v17519_v11 = vadd.f32 %v17420_v50, %v6187_v55  ;;  %v17523_v8 = vor.u32 %v12211_v63, %v11116_v13  ;;  %v12323_v54 = vld [vmem:[%s19719_s23 + $0x5b4] sm:$0xf]  ;;  %v11564_v33 = vld [vmem:[%s19719_s23 + $0x5cc] sm:$0xf0]  ;;  %v6208_v12 = vadd.f32 %v17456_v58, %v6188_v20  ;;  %v12148_v17 = vld [vmem:[%s19719_s23 + $0x3c] sm:$0xf] }
 0x81f   : > { %20610 = vst [vmem:[#allocation84_spill] sm:$0xff] %v17502_v47  ;;  %v6112_v55 = vadd.f32 %v6111_v15, %v6092_v49  ;;  %v6186_v63 = vunpack.c.h.bf16 %v17465_v37  ;;  %v6243_v15 = vmax.f32 %v17483_v23, 0.0  ;;  %8049 = vmatpush.bf16.msra.mxu2 %v17487_v48  ;;  %v17549_v37 = vor.u32 %v12267_v30, %v11340_v0  ;;  %v12316_v0 = vld [vmem:[%s19719_s23 + $0x57c] sm:$0xf] }
 0x820   : > { %20611 = vst [vmem:[#allocation86_spill] sm:$0xff] %v17504_v52  ;;  %v6130_v13 = vpop.f32.mrf.mxu2  ;;  %v6149_v56 = vpop.f32.mrf.mxu3  ;;  %v17551_v20 = vor.u32 %v12323_v54, %v11564_v33  ;;  %v6077_v23 = vadd.f32 %v17249_v3, %v17247_v45  ;;  %v17565_v30 = vor.u32 %v12204_v43, %v11088_v38  ;;  %v11312_v54 = vld [vmem:[%s19719_s23 + $0x3d4] sm:$0xf0]  ;;  %v6039_v3 = vadd.f32 %v17120_v1, %v17118_v29  ;;  %v10836_v33 = vld [vmem:[%s19719_s23 + $0x1c] sm:$0xf0] }
 0x821   : > { %20612 = vst [vmem:[#allocation83_spill] sm:$0xff] %v17523_v8  ;;  %v6150_v49 = vadd.f32 %v6149_v56, %v6130_v13  ;;  %8068 = vmatpush.bf16.msra.mxu3 %v17502_v47  ;;  %8012 = vmatpush.bf16.msra.mxu0 %v17504_v52  ;;  %v17563_v56 = vor.u32 %v12148_v17, %v10864_v46  ;;  %v11536_v45 = vld [vmem:[%s19719_s23 + $0x594] sm:$0xf0]  ;;  %v12141_v17 = vld [vmem:[%s19719_s23 + $0x4] sm:$0xf]  ;;  %v6247_v29 = vmax.f32 %v17519_v11, 0.0 }
 0x822   : > { %20613 = vst [vmem:[#allocation88_spill] sm:$0xff] %v17551_v20  ;;  %8031 = vmatpush.bf16.msra.mxu1 %v17523_v8  ;;  %v6041_v46 = vadd.f32 %v17220_v39, %v17218_v18  ;;  %v6079_v38 = vadd.f32 %v17334_v21, %v17332_v14  ;;  %v12197_v13 = vld [vmem:[%s19719_s23 + $0x1c4] sm:$0xf]  ;;  %v6248_v1 = vmax.f32 %v6208_v12, 0.0  ;;  %v6095_v18 = vpop.f32.mrf.mxu0  ;;  %v6114_v39 = vpop.f32.mrf.mxu1  ;;  %v6205_v14 = vadd.f32 %v17498_v35, %v6185_v36 }
 0x823   : > { %20614 = vst [vmem:[#allocation90_spill] sm:$0xff] %v17563_v56  ;;  %v6160_v43 = vpack.c.bf16 %v6150_v49, %v6112_v55  ;;  %v6206_v21 = vadd.f32 %v17521_v59, %v6186_v63  ;;  %v11060_v55 = vld [vmem:[%s19719_s23 + $0x1dc] sm:$0xf0]  ;;  %8050 = vmatpush.bf16.msra.mxu2 %v17549_v37  ;;  %v17599_v52 = vor.u32 %v12260_v34, %v11312_v54  ;;  %v6244_v12 = vmax.f32 %v17516_v10, 0.0 }
 0x824   : > { %20615 = vst [vmem:[#allocation87_spill] sm:$0xff] %v17565_v30  ;;  %v17601_v11 = vor.u32 %v12316_v0, %v11536_v45  ;;  %v17604_v47 = vpack.c.bf16 %v6077_v23, %v6039_v3  ;;  %v17608_v36 = vor.u32 %v12141_v17, %v10836_v33  ;;  %v17610_v63 = vor.u32 %v12197_v13, %v11060_v55  ;;  %v11284_v23 = vld [vmem:[%s19719_s23 + $0x39c] sm:$0xf0]  ;;  %v12309_v0 = vld [vmem:[%s19719_s23 + $0x544] sm:$0xf] }
 0x825   : > { %v6189_v49 = vunpack.c.l.bf16 %v6160_v43  ;;  %v6190_v8 = vunpack.c.h.bf16 %v6160_v43  ;;  %8069 = vmatpush.bf16.msra.mxu3 %v17551_v20  ;;  %20616 = vst [vmem:[#allocation92_spill] sm:$0xff] %v17599_v52  ;;  %8013 = vmatpush.bf16.msra.mxu0 %v17563_v56  ;;  %v12253_v43 = vld [vmem:[%s19719_s23 + $0x384] sm:$0xf]  ;;  %v17615_v34 = vpack.c.bf16 %v6079_v38, %v6041_v46  ;;  %v11508_v45 = vld [vmem:[%s19719_s23 + $0x55c] sm:$0xf0]  ;;  %v17628_v3 = vpack.c.bf16 %v6247_v29, %v6243_v15 }
 0x826   : > { %20617 = vst [vmem:[#allocation94_spill] sm:$0xff] %v17601_v11  ;;  %8032 = vmatpush.bf16.msra.mxu1 %v17565_v30  ;;  %v17630_v46 = vpack.c.bf16 %v6248_v1, %v6244_v12  ;;  %v6245_v38 = vmax.f32 %v6205_v14, 0.0  ;;  %v6191_v30 = vunpack.c.l.bf16 %v17604_v47  ;;  %v17637_v15 = vor.u32 %v12253_v43, %v11284_v23  ;;  %v11038_v1 = vld [vmem:[%s19719_s23 + $0x190] sm:$0xf]  ;;  %v12194_v14 = vld [vmem:[%s19719_s23 + $0x1a8] sm:$0xf0] }
 0x827   : > { %20618 = vst [vmem:[#allocation91_spill] sm:$0xff] %v17608_v36  ;;  %v6209_v54 = vadd.f32 %v17498_v35, %v6189_v49  ;;  %v6210_v10 = vadd.f32 %v17521_v59, %v6190_v8  ;;  %v6246_v8 = vmax.f32 %v6206_v21, 0.0  ;;  %8051 = vmatpush.bf16.msra.mxu2 %v17599_v52  ;;  %v17639_v29 = vor.u32 %v12309_v0, %v11508_v45  ;;  %v11262_v21 = vld [vmem:[%s19719_s23 + $0x350] sm:$0xf]  ;;  %v12250_v23 = vld [vmem:[%s19719_s23 + $0x368] sm:$0xf0] }
 0x828   : > { %20619 = vst [vmem:[#allocation96_spill] sm:$0xff] %v17610_v63  ;;  %v6133_v17 = vpop.f32.mrf.mxu2  ;;  %v6152_v33 = vpop.f32.mrf.mxu3  ;;  %v6195_v12 = vunpack.c.l.bf16 %v17615_v34  ;;  %v6196_v0 = vunpack.c.h.bf16 %v17615_v34  ;;  %v17661_v45 = vor.u32 %v12194_v14, %v11038_v1  ;;  %v6211_v1 = vadd.f32 %v17420_v50, %v6191_v30 }
 0x829   : > { %v6249_v13 = vmax.f32 %v6209_v54, 0.0  ;;  %v6250_v55 = vmax.f32 %v6210_v10, 0.0  ;;  %v6153_v49 = vadd.f32 %v6152_v33, %v6133_v17  ;;  %8070 = vmatpush.bf16.msra.mxu3 %v17601_v11  ;;  %8014 = vmatpush.bf16.msra.mxu0 %v17608_v36  ;;  %20620 = vst [vmem:[#allocation98_spill] sm:$0xff] %v17637_v15  ;;  %v6115_v54 = vadd.f32 %v6114_v39, %v6095_v18  ;;  %v11486_v18 = vld [vmem:[%s19719_s23 + $0x510] sm:$0xf] }
 0x82a   : > { %8033 = vmatpush.bf16.msra.mxu1 %v17610_v63  ;;  %20621 = vst [vmem:[#allocation95_spill] sm:$0xff] %v17639_v29  ;;  %v17663_v17 = vor.u32 %v12250_v23, %v11262_v21  ;;  %v12306_v39 = vld [vmem:[%s19719_s23 + $0x528] sm:$0xf0]  ;;  %v6097_v14 = vpop.f32.mrf.mxu0  ;;  %v6116_v21 = vpop.f32.mrf.mxu1  ;;  %v11234_v23 = vld [vmem:[%s19719_s23 + $0x318] sm:$0xf]  ;;  %v6215_v30 = vadd.f32 %v17420_v50, %v6195_v12  ;;  %v6251_v11 = vmax.f32 %v6211_v1, 0.0 }
 0x82b   : > { %v17651_v10 = vpack.c.bf16 %v6249_v13, %v6245_v38  ;;  %v17653_v43 = vpack.c.bf16 %v6250_v55, %v6246_v8  ;;  %7939 = vmatmul.bf16.vlgmr.msrb.gmra.mxu0 %v17628_v3  ;;  %7958 = vmatmul.bf16.vlgmr.msrb.gmra.mxu1 %v17630_v46  ;;  %20622 = vst [vmem:[#allocation100_spill] sm:$0xff] %v17661_v45  ;;  %v11710_v38 = vld [vmem:[%s19719_s23 + $0x6d0] sm:$0xf]  ;;  %v12362_v8 = vld [vmem:[%s19719_s23 + $0x6e8] sm:$0xf0] }
 0x82c   : > { %20623 = vst [vmem:[#allocation103_spill] sm:$0xff] %v17663_v17  ;;  %v6162_v33 = vpack.c.bf16 %v6153_v49, %v6115_v54  ;;  %v17676_v34 = vor.u32 %v12306_v39, %v11486_v18  ;;  %v11010_v13 = vld [vmem:[%s19719_s23 + $0x158] sm:$0xf]  ;;  %v12187_v55 = vld [vmem:[%s19719_s23 + $0x170] sm:$0xf0]  ;;  %v6192_v49 = vunpack.c.h.bf16 %v17604_v47  ;;  %8052 = vmatpush.bf16.msra.mxu2 %v17637_v15  ;;  %v17691_v54 = vor.u32 %v12362_v8, %v11710_v38 }
 0x82d   : > { %7977 = vmatmul.bf16.vlgmr.msrb.gmra.mxu2 %v17651_v10  ;;  %7996 = vmatmul.bf16.vlgmr.msrb.gmra.mxu3 %v17653_v43  ;;  %v12243_v18 = vld [vmem:[%s19719_s23 + $0x330] sm:$0xf0]  ;;  %v11458_v47 = vld [vmem:[%s19719_s23 + $0x4d8] sm:$0xf]  ;;  %v17705_v39 = vor.u32 %v12187_v55, %v11010_v13  ;;  %v6117_v63 = vadd.f32 %v6116_v21, %v6097_v14  ;;  %v11654_v14 = vld [vmem:[%s19719_s23 + $0x660] sm:$0xf] }
 0x82e   : > { %20624 = vst [vmem:[#allocation99_spill] sm:$0xff] %v17676_v34  ;;  %8071 = vmatpush.bf16.msra.mxu3 %v17639_v29  ;;  %8083 = vmatpush.bf16.msrb.mxu0 %v17661_v45  ;;  %v17707_v38 = vor.u32 %v12243_v18, %v11234_v23  ;;  %v12299_v8 = vld [vmem:[%s19719_s23 + $0x4f0] sm:$0xf0]  ;;  %v11682_v29 = vld [vmem:[%s19719_s23 + $0x698] sm:$0xf]  ;;  %v6216_v45 = vadd.f32 %v17456_v58, %v6196_v0  ;;  %v6194_v36 = vunpack.c.h.bf16 %v6162_v33 }
 0x82f   : > { %20625 = vst [vmem:[#allocation104_spill] sm:$0xff] %v17691_v54  ;;  %8102 = vmatpush.bf16.msrb.mxu1 %v17663_v17  ;;  %v12355_v12 = vld [vmem:[%s19719_s23 + $0x6b0] sm:$0xf0]  ;;  %v17721_v13 = vor.u32 %v12299_v8, %v11458_v47  ;;  %v10982_v23 = vld [vmem:[%s19719_s23 + $0x120] sm:$0xf]  ;;  %v6212_v8 = vadd.f32 %v17456_v58, %v6192_v49 }
 0x830   : > { %20626 = vst [vmem:[#allocation108_spill] sm:$0xff] %v17705_v39  ;;  %v6135_v15 = vpop.f32.mrf.mxu2  ;;  %v6154_v17 = vpop.f32.mrf.mxu3  ;;  %8121 = vmatpush.bf16.msrb.mxu2 %v17676_v34  ;;  %v17723_v55 = vor.u32 %v12355_v12, %v11682_v29  ;;  %v12180_v18 = vld [vmem:[%s19719_s23 + $0x138] sm:$0xf0]  ;;  %v11206_v0 = vld [vmem:[%s19719_s23 + $0x2e0] sm:$0xf]  ;;  %v6193_v34 = vunpack.c.l.bf16 %v6162_v33  ;;  %v6256_v52 = vmax.f32 %v6216_v45, 0.0 }
 0x831   : > { %20627 = vst [vmem:[#allocation101_spill] sm:$0xff] %v17707_v38  ;;  %v12236_v29 = vld [vmem:[%s19719_s23 + $0x2f8] sm:$0xf0]  ;;  %v11430_v47 = vld [vmem:[%s19719_s23 + $0x4a0] sm:$0xf]  ;;  %v17752_v21 = vor.u32 %v12180_v18, %v10982_v23 }
 0x832   : > { %8140 = vmatpush.bf16.msrb.mxu3 %v17691_v54  ;;  %20628 = vst [vmem:[#allocation106_spill] sm:$0xff] %v17721_v13  ;;  %v6155_v54 = vadd.f32 %v6154_v17, %v6135_v15  ;;  %v12292_v12 = vld [vmem:[%s19719_s23 + $0x4b8] sm:$0xf0]  ;;  %v6255_v17 = vmax.f32 %v6215_v30, 0.0  ;;  %8084 = vmatpush.bf16.msrb.mxu0 %v17705_v39  ;;  %v17754_v49 = vor.u32 %v12236_v29, %v11206_v0  ;;  %v12173_v45 = vld [vmem:[%s19719_s23 + $0x100] sm:$0xf0] }
 0x833   : > { %20629 = vst [vmem:[#allocation85_spill] sm:$0xff] %v17723_v55  ;;  %v12348_v15 = vld [vmem:[%s19719_s23 + $0x678] sm:$0xf0]  ;;  %8103 = vmatpush.bf16.msrb.mxu1 %v17707_v38  ;;  %v17758_v56 = vor.u32 %v12292_v12, %v11430_v47  ;;  %v6214_v30 = vadd.f32 %v17521_v59, %v6194_v36  ;;  %v11178_v1 = vld [vmem:[%s19719_s23 + $0x2a8] sm:$0xf]  ;;  %v6252_v29 = vmax.f32 %v6212_v8, 0.0 }
 0x834   : > { %v6164_v33 = vpack.c.bf16 %v6155_v54, %v6117_v63  ;;  %20630 = vst [vmem:[#allocation109_spill] sm:$0xff] %v17752_v21  ;;  %8122 = vmatpush.bf16.msrb.mxu2 %v17721_v13  ;;  %v17760_v20 = vor.u32 %v12348_v15, %v11654_v14  ;;  %v10954_v63 = vld [vmem:[%s19719_s23 + $0xe8] sm:$0xf]  ;;  %v6213_v54 = vadd.f32 %v17498_v35, %v6193_v34  ;;  %v12229_v0 = vld [vmem:[%s19719_s23 + $0x2c0] sm:$0xf0] }
 0x835   : > { %20631 = vst [vmem:[#allocation105_spill] sm:$0xff] %v17754_v49  ;;  %v11402_v34 = vld [vmem:[%s19719_s23 + $0x468] sm:$0xf]  ;;  %v17779_v36 = vpack.c.bf16 %v6255_v17, %v6251_v11  ;;  %v12285_v14 = vld [vmem:[%s19719_s23 + $0x480] sm:$0xf0]  ;;  %v17794_v15 = vpack.c.bf16 %v6256_v52, %v6252_v29  ;;  %v17798_v17 = vor.u32 %v12173_v45, %v10954_v63 }
 0x836   : > { %8141 = vmatpush.bf16.msrb.mxu3 %v17723_v55  ;;  %20632 = vst [vmem:[#allocation111_spill] sm:$0xff] %v17758_v56  ;;  %v6197_v23 = vunpack.c.l.bf16 %v6164_v33  ;;  %v6198_v18 = vunpack.c.h.bf16 %v6164_v33  ;;  %8085 = vmatpush.bf16.msrb.mxu0 %v17752_v21  ;;  %v11626_v8 = vld [vmem:[%s19719_s23 + $0x628] sm:$0xf]  ;;  %v12341_v11 = vld [vmem:[%s19719_s23 + $0x640] sm:$0xf0]  ;;  %v17800_v33 = vor.u32 %v12229_v0, %v11178_v1  ;;  %v17802_v55 = vor.u32 %v12285_v14, %v11402_v34 }
 0x837   : > { %20633 = vst [vmem:[#allocation89_spill] sm:$0xff] %v17760_v20  ;;  %8104 = vmatpush.bf16.msrb.mxu1 %v17754_v49  ;;  %v17804_v13 = vor.u32 %v12341_v11, %v11626_v8  ;;  %v10926_v52 = vld [vmem:[%s19719_s23 + $0xb0] sm:$0xf]  ;;  %v12166_v29 = vld [vmem:[%s19719_s23 + $0xc8] sm:$0xf0] }
 0x838   : > { %v6217_v47 = vadd.f32 %v17498_v35, %v6197_v23  ;;  %v6218_v12 = vadd.f32 %v17521_v59, %v6198_v18  ;;  %8123 = vmatpush.bf16.msrb.mxu2 %v17758_v56  ;;  %20634 = vst [vmem:[#allocation113_spill] sm:$0xff] %v17798_v17  ;;  %v6253_v23 = vmax.f32 %v6213_v54, 0.0  ;;  %v6254_v18 = vmax.f32 %v6214_v30, 0.0  ;;  %v11150_v63 = vld [vmem:[%s19719_s23 + $0x270] sm:$0xf] }
 0x839   : > { %20635 = vst [vmem:[#allocation110_spill] sm:$0xff] %v17800_v33  ;;  %v12222_v45 = vld [vmem:[%s19719_s23 + $0x288] sm:$0xf0]  ;;  %v17826_v1 = vor.u32 %v12166_v29, %v10926_v52  ;;  %v11598_v34 = vld [vmem:[%s19719_s23 + $0x5f0] sm:$0xf] }
 0x83a   : > { %8142 = vmatpush.bf16.msrb.mxu3 %v17760_v20  ;;  %v6257_v49 = vmax.f32 %v6217_v47, 0.0  ;;  %v6258_v21 = vmax.f32 %v6218_v12, 0.0  ;;  %20636 = vst [vmem:[#allocation115_spill] sm:$0xff] %v17802_v55  ;;  %8086 = vmatpush.bf16.msrb.mxu0 %v17798_v17  ;;  %v17828_v0 = vor.u32 %v12222_v45, %v11150_v63  ;;  %v12334_v47 = vld [vmem:[%s19719_s23 + $0x608] sm:$0xf0] }
 0x83b   : > { %20637 = vst [vmem:[#allocation93_spill] sm:$0xff] %v17804_v13  ;;  %7944 = vmatmul.bf16.gmra.mxu0 %v17779_v36  ;;  %7963 = vmatmul.bf16.gmra.mxu1 %v17794_v15  ;;  %v10898_v12 = vld [vmem:[%s19719_s23 + $0x78] sm:$0xf]  ;;  %v12159_v14 = vld [vmem:[%s19719_s23 + $0x90] sm:$0xf0]  ;;  %v17854_v11 = vor.u32 %v12334_v47, %v11598_v34 }
 0x83c   : > { %v17815_v54 = vpack.c.bf16 %v6257_v49, %v6253_v23  ;;  %v17817_v30 = vpack.c.bf16 %v6258_v21, %v6254_v18  ;;  %8105 = vmatpush.bf16.msrb.mxu1 %v17800_v33  ;;  %20638 = vst [vmem:[#allocation117_spill] sm:$0xff] %v17826_v1  ;;  %v11374_v21 = vld [vmem:[%s19719_s23 + $0x430] sm:$0xf]  ;;  %v12278_v49 = vld [vmem:[%s19719_s23 + $0x448] sm:$0xf0]  ;;  %8124 = vmatpush.bf16.msrb.mxu2 %v17802_v55 }
 0x83d   : > { %20639 = vst [vmem:[#allocation114_spill] sm:$0xff] %v17828_v0  ;;  %v17852_v8 = vor.u32 %v12278_v49, %v11374_v21  ;;  %v11122_v23 = vld [vmem:[%s19719_s23 + $0x238] sm:$0xf]  ;;  %v12215_v18 = vld [vmem:[%s19719_s23 + $0x250] sm:$0xf0]  ;;  %v17876_v21 = vor.u32 %v12159_v14, %v10898_v12 }
 0x83e   : > { %7982 = vmatmul.bf16.gmra.mxu2 %v17815_v54  ;;  %8001 = vmatmul.bf16.gmra.mxu3 %v17817_v30  ;;  %20641 = vst [vmem:[#allocation97_spill] sm:$0xff] %v17854_v11  ;;  %v11346_v52 = vld [vmem:[%s19719_s23 + $0x3f8] sm:$0xf]  ;;  %v12271_v29 = vld [vmem:[%s19719_s23 + $0x410] sm:$0xf0]  ;;  %v17878_v49 = vor.u32 %v12215_v18, %v11122_v23 }
 0x83f   : > { %8143 = vmatpush.bf16.msrb.mxu3 %v17804_v13  ;;  %20640 = vst [vmem:[#allocation120_spill] sm:$0xff] %v17852_v8  ;;  %v11570_v63 = vld [vmem:[%s19719_s23 + $0x5b8] sm:$0xf]  ;;  %v12327_v45 = vld [vmem:[%s19719_s23 + $0x5d0] sm:$0xf0]  ;;  %8087 = vmatpush.bf16.msrb.mxu0 %v17826_v1  ;;  %v17894_v12 = vor.u32 %v12271_v29, %v11346_v52 }
 0x840   : > { %8106 = vmatpush.bf16.msrb.mxu1 %v17828_v0  ;;  %20642 = vst [vmem:[#allocation121_spill] sm:$0xff] %v17876_v21  ;;  %v10870_v34 = vld [vmem:[%s19719_s23 + $0x40] sm:$0xf]  ;;  %v12152_v47 = vld [vmem:[%s19719_s23 + $0x58] sm:$0xf0]  ;;  %8125 = vmatpush.bf16.msrb.mxu2 %v17852_v8  ;;  %v17896_v14 = vor.u32 %v12327_v45, %v11570_v63 }
 0x841   : > { %20643 = vst [vmem:[#allocation118_spill] sm:$0xff] %v17878_v49  ;;  %v11094_v13 = vld [vmem:[%s19719_s23 + $0x200] sm:$0xf]  ;;  %v12208_v0 = vld [vmem:[%s19719_s23 + $0x218] sm:$0xf0]  ;;  %v17912_v29 = vor.u32 %v12152_v47, %v10870_v34 }
 0x842   : > { %20644 = vst [vmem:[#allocation124_spill] sm:$0xff] %v17894_v12  ;;  %v11318_v23 = vld [vmem:[%s19719_s23 + $0x3c0] sm:$0xf]  ;;  %v12264_v18 = vld [vmem:[%s19719_s23 + $0x3d8] sm:$0xf0]  ;;  %v17914_v63 = vor.u32 %v12208_v0, %v11094_v13 }
 0x843   : > { %8144 = vmatpush.bf16.msrb.mxu3 %v17854_v11  ;;  %20645 = vst [vmem:[#allocation102_spill] sm:$0xff] %v17896_v14  ;;  %v11542_v1 = vld [vmem:[%s19719_s23 + $0x580] sm:$0xf]  ;;  %v12320_v52 = vld [vmem:[%s19719_s23 + $0x598] sm:$0xf0]  ;;  %8088 = vmatpush.bf16.msrb.mxu0 %v17876_v21  ;;  %v17918_v45 = vor.u32 %v12264_v18, %v11318_v23 }
 0x844   : > { %8107 = vmatpush.bf16.msrb.mxu1 %v17878_v49  ;;  %20646 = vst [vmem:[#allocation125_spill] sm:$0xff] %v17912_v29  ;;  %8126 = vmatpush.bf16.msrb.mxu2 %v17894_v12  ;;  %v17920_v11 = vor.u32 %v12320_v52, %v11542_v1  ;;  %v10842_v8 = vld [vmem:[%s19719_s23 + $0x8] sm:$0xf]  ;;  %v12145_v49 = vld [vmem:[%s19719_s23 + $0x20] sm:$0xf0] }
 0x845   : > { %20647 = vst [vmem:[#allocation122_spill] sm:$0xff] %v17914_v63  ;;  %v11066_v13 = vld [vmem:[%s19719_s23 + $0x1c8] sm:$0xf]  ;;  %v12201_v0 = vld [vmem:[%s19719_s23 + $0x1e0] sm:$0xf0]  ;;  %v17937_v1 = vor.u32 %v12145_v49, %v10842_v8 }
 0x846   : > { %20648 = vst [vmem:[#allocation128_spill] sm:$0xff] %v17918_v45  ;;  %v17939_v34 = vor.u32 %v12201_v0, %v11066_v13  ;;  %v11290_v47 = vld [vmem:[%s19719_s23 + $0x388] sm:$0xf]  ;;  %v12257_v23 = vld [vmem:[%s19719_s23 + $0x3a0] sm:$0xf0] }
 0x847   : > { %8145 = vmatpush.bf16.msrb.mxu3 %v17896_v14  ;;  %20649 = vst [vmem:[#allocation107_spill] sm:$0xff] %v17920_v11  ;;  %8089 = vmatpush.bf16.msrb.mxu0 %v17912_v29  ;;  %v11514_v18 = vld [vmem:[%s19719_s23 + $0x548] sm:$0xf]  ;;  %v12313_v52 = vld [vmem:[%s19719_s23 + $0x560] sm:$0xf0]  ;;  %v17955_v8 = vor.u32 %v12257_v23, %v11290_v47 }
 0x848   : > { %8108 = vmatpush.bf16.msrb.mxu1 %v17914_v63  ;;  %20650 = vst [vmem:[#allocation129_spill] sm:$0xff] %v17937_v1  ;;  %8127 = vmatpush.bf16.msrb.mxu2 %v17918_v45  ;;  %v17957_v49 = vor.u32 %v12313_v52, %v11514_v18  ;;  %v12191_v13 = vld [vmem:[%s19719_s23 + $0x194] sm:$0xf]  ;;  %v11040_v0 = vld [vmem:[%s19719_s23 + $0x1ac] sm:$0xf0] }
 0x849   : > { %20651 = vst [vmem:[#allocation126_spill] sm:$0xff] %v17939_v34  ;;  %v12247_v63 = vld [vmem:[%s19719_s23 + $0x354] sm:$0xf]  ;;  %v17970_v47 = vor.u32 %v12191_v13, %v11040_v0  ;;  %v11264_v23 = vld [vmem:[%s19719_s23 + $0x36c] sm:$0xf0] }
 0x84a   : > { %20652 = vst [vmem:[#allocation131_spill] sm:$0xff] %v17955_v8  ;;  %v17977_v18 = vor.u32 %v12247_v63, %v11264_v23  ;;  %v12303_v52 = vld [vmem:[%s19719_s23 + $0x514] sm:$0xf]  ;;  %v11712_v63 = vld [vmem:[%s19719_s23 + $0x6ec] sm:$0xf0] }
 0x84b   : > { %8146 = vmatpush.bf16.msrb.mxu3 %v17920_v11  ;;  %20653 = vst [vmem:[#allocation112_spill] sm:$0xff] %v17957_v49  ;;  %8015 = vmatmul.bf16.vlgmr.msra.gmra.mxu0 %v17628_v3  ;;  %v11488_v11 = vld [vmem:[%s19719_s23 + $0x52c] sm:$0xf0]  ;;  %v12359_v13 = vld [vmem:[%s19719_s23 + $0x6d4] sm:$0xf] }
 0x84c   : > { %8034 = vmatmul.bf16.vlgmr.msra.gmra.mxu1 %v17630_v46  ;;  %20654 = vst [vmem:[#allocation133_spill] sm:$0xff] %v17970_v47  ;;  %8090 = vmatpush.bf16.msrb.mxu0 %v17937_v1  ;;  %v17990_v0 = vor.u32 %v12303_v52, %v11488_v11  ;;  %v17997_v23 = vor.u32 %v12359_v13, %v11712_v63  ;;  %v11012_v1 = vld [vmem:[%s19719_s23 + $0x174] sm:$0xf0]  ;;  %v12240_v11 = vld [vmem:[%s19719_s23 + $0x31c] sm:$0xf] }
 0x84d   : > { %8109 = vmatpush.bf16.msrb.mxu1 %v17939_v34  ;;  %20655 = vst [vmem:[#allocation130_spill] sm:$0xff] %v17977_v18  ;;  %8128 = vmatpush.bf16.msrb.mxu2 %v17955_v8  ;;  %v12184_v34 = vld [vmem:[%s19719_s23 + $0x15c] sm:$0xf]  ;;  %v11236_v13 = vld [vmem:[%s19719_s23 + $0x334] sm:$0xf0] }
 0x84e   : > { %8053 = vmatmul.bf16.vlgmr.msra.gmra.mxu2 %v17651_v10  ;;  %8072 = vmatmul.bf16.vlgmr.msra.gmra.mxu3 %v17653_v43  ;;  %20656 = vst [vmem:[#allocation135_spill] sm:$0xff] %v17990_v0  ;;  %v18010_v52 = vor.u32 %v12184_v34, %v11012_v1  ;;  %v18017_v63 = vor.u32 %v12240_v11, %v11236_v13  ;;  %v12352_v1 = vld [vmem:[%s19719_s23 + $0x69c] sm:$0xf]  ;;  %v12177_v13 = vld [vmem:[%s19719_s23 + $0x124] sm:$0xf] }
 0x84f   : > { %8147 = vmatpush.bf16.msrb.mxu3 %v17957_v49  ;;  %20657 = vst [vmem:[#allocation116_spill] sm:$0xff] %v17997_v23  ;;  %v12296_v49 = vld [vmem:[%s19719_s23 + $0x4dc] sm:$0xf]  ;;  %v11376_v8 = vld [vmem:[%s19719_s23 + $0x44c] sm:$0xf0] }
 0x850   : > { %8159 = vmatpush.bf16.msra.mxu0 %v17970_v47  ;;  %20658 = vst [vmem:[#allocation137_spill] sm:$0xff] %v18010_v52  ;;  %v12233_v47 = vld [vmem:[%s19719_s23 + $0x2e4] sm:$0xf]  ;;  %v12331_v45 = vld [vmem:[%s19719_s23 + $0x5f4] sm:$0xf] }
 0x851   : > { %8178 = vmatpush.bf16.msra.mxu1 %v17977_v18  ;;  %8197 = vmatpush.bf16.msra.mxu2 %v17990_v0  ;;  %20659 = vst [vmem:[#allocation132_spill] sm:$0xff] %v18017_v63  ;;  %v11460_v18 = vld [vmem:[%s19719_s23 + $0x4f4] sm:$0xf0]  ;;  %v10984_v0 = vld [vmem:[%s19719_s23 + $0x13c] sm:$0xf0] }
 0x852   : > { %v18028_v34 = vor.u32 %v12296_v49, %v11460_v18  ;;  %v18046_v49 = vor.u32 %v12177_v13, %v10984_v0  ;;  %v11208_v18 = vld [vmem:[%s19719_s23 + $0x2fc] sm:$0xf0]  ;;  %v12345_v0 = vld [vmem:[%s19719_s23 + $0x664] sm:$0xf]  ;;  %v11292_v29 = vld [vmem:[%s19719_s23 + $0x3a4] sm:$0xf0] }
 0x853   : > { %8216 = vmatpush.bf16.msra.mxu3 %v17997_v23  ;;  %v11684_v23 = vld [vmem:[%s19719_s23 + $0x6b4] sm:$0xf0]  ;;  %v12310_v14 = vld [vmem:[%s19719_s23 + $0x54c] sm:$0xf] }
 0x854   : > { %20660 = vst [vmem:[#allocation119_spill] sm:$0xff] %v18028_v34  ;;  %v18033_v11 = vor.u32 %v12352_v1, %v11684_v23  ;;  %8160 = vmatpush.bf16.msra.mxu0 %v18010_v52  ;;  %v18053_v23 = vor.u32 %v12233_v47, %v11208_v18  ;;  %v12289_v1 = vld [vmem:[%s19719_s23 + $0x4a4] sm:$0xf]  ;;  %v12170_v18 = vld [vmem:[%s19719_s23 + $0xec] sm:$0xf] }
 0x855   : > { %8179 = vmatpush.bf16.msra.mxu1 %v18017_v63  ;;  %20662 = vst [vmem:[#allocation138_spill] sm:$0xff] %v18046_v49  ;;  %8198 = vmatpush.bf16.msra.mxu2 %v18028_v34  ;;  %v11432_v63 = vld [vmem:[%s19719_s23 + $0x4bc] sm:$0xf0]  ;;  %v10956_v34 = vld [vmem:[%s19719_s23 + $0x104] sm:$0xf0] }
 0x856   : > { %20661 = vst [vmem:[#allocation139_spill] sm:$0xff] %v18033_v11  ;;  %v18064_v13 = vor.u32 %v12289_v1, %v11432_v63  ;;  %v12226_v52 = vld [vmem:[%s19719_s23 + $0x2ac] sm:$0xf]  ;;  %v11180_v63 = vld [vmem:[%s19719_s23 + $0x2c4] sm:$0xf0] }
 0x857   : > { %8217 = vmatpush.bf16.msra.mxu3 %v18033_v11  ;;  %20663 = vst [vmem:[#allocation136_spill] sm:$0xff] %v18053_v23  ;;  %v11656_v11 = vld [vmem:[%s19719_s23 + $0x67c] sm:$0xf0]  ;;  %v18089_v1 = vor.u32 %v12226_v52, %v11180_v63  ;;  %v10928_v63 = vld [vmem:[%s19719_s23 + $0xcc] sm:$0xf0] }
 0x858   : > { %20664 = vst [vmem:[#allocation123_spill] sm:$0xff] %v18064_v13  ;;  %v18069_v47 = vor.u32 %v12345_v0, %v11656_v11  ;;  %8161 = vmatpush.bf16.msra.mxu0 %v18046_v49  ;;  %v18087_v11 = vor.u32 %v12170_v18, %v10956_v34  ;;  %v12282_v0 = vld [vmem:[%s19719_s23 + $0x46c] sm:$0xf]  ;;  %v12163_v18 = vld [vmem:[%s19719_s23 + $0xb4] sm:$0xf] }
 0x859   : > { %8180 = vmatpush.bf16.msra.mxu1 %v18053_v23  ;;  %8199 = vmatpush.bf16.msra.mxu2 %v18064_v13  ;;  %20667 = vst [vmem:[#allocation127_spill] sm:$0xff] %v18089_v1  ;;  %v11404_v23 = vld [vmem:[%s19719_s23 + $0x484] sm:$0xf0]  ;;  %v12338_v49 = vld [vmem:[%s19719_s23 + $0x62c] sm:$0xf] }
 0x85a   : > { %20665 = vst [vmem:[#allocation142_spill] sm:$0xff] %v18069_v47  ;;  %v18103_v34 = vor.u32 %v12282_v0, %v11404_v23  ;;  %v12219_v13 = vld [vmem:[%s19719_s23 + $0x274] sm:$0xf]  ;;  %v18123_v23 = vor.u32 %v12163_v18, %v10928_v63 }
 0x85b   : > { %8218 = vmatpush.bf16.msra.mxu3 %v18069_v47  ;;  %20666 = vst [vmem:[#allocation141_spill] sm:$0xff] %v18087_v11  ;;  %v11628_v47 = vld [vmem:[%s19719_s23 + $0x644] sm:$0xf0]  ;;  %8020 = vmatmul.bf16.gmra.mxu0 %v17779_v36  ;;  %v12275_v0 = vld [vmem:[%s19719_s23 + $0x434] sm:$0xf] }
 0x85c   : > { %20668 = vst [vmem:[#allocation145_spill] sm:$0xff] %v18103_v34  ;;  %v18105_v52 = vor.u32 %v12338_v49, %v11628_v47  ;;  %8039 = vmatmul.bf16.gmra.mxu1 %v17794_v15  ;;  %v11152_v49 = vld [vmem:[%s19719_s23 + $0x28c] sm:$0xf0]  ;;  %8162 = vmatpush.bf16.msra.mxu0 %v18087_v11  ;;  %v18143_v18 = vor.u32 %v12275_v0, %v11376_v8  ;;  %v12212_v11 = vld [vmem:[%s19719_s23 + $0x23c] sm:$0xf] }
 0x85d   : > { %8181 = vmatpush.bf16.msra.mxu1 %v18089_v1  ;;  %20670 = vst [vmem:[#allocation134_spill] sm:$0xff] %v18123_v23  ;;  %v18125_v47 = vor.u32 %v12219_v13, %v11152_v49  ;;  %v11600_v13 = vld [vmem:[%s19719_s23 + $0x60c] sm:$0xf0]  ;;  %8200 = vmatpush.bf16.msra.mxu2 %v18103_v34  ;;  %v12156_v49 = vld [vmem:[%s19719_s23 + $0x7c] sm:$0xf] }
 0x85e   : > { %20669 = vst [vmem:[#allocation144_spill] sm:$0xff] %v18105_v52  ;;  %8058 = vmatmul.bf16.gmra.mxu2 %v17815_v54  ;;  %8077 = vmatmul.bf16.gmra.mxu3 %v17817_v30  ;;  %v18145_v63 = vor.u32 %v12331_v45, %v11600_v13  ;;  %v10900_v1 = vld [vmem:[%s19719_s23 + $0x94] sm:$0xf0]  ;;  %v12268_v0 = vld [vmem:[%s19719_s23 + $0x3fc] sm:$0xf] }
 0x85f   : > { %20671 = vst [vmem:[#allocation146_spill] sm:$0xff] %v18125_v47  ;;  %8219 = vmatpush.bf16.msra.mxu3 %v18105_v52  ;;  %v11124_v52 = vld [vmem:[%s19719_s23 + $0x254] sm:$0xf0]  ;;  %v18161_v45 = vor.u32 %v12156_v49, %v10900_v1  ;;  %v12324_v34 = vld [vmem:[%s19719_s23 + $0x5bc] sm:$0xf] }
 0x860   : > { %20672 = vst [vmem:[#allocation140_spill] sm:$0xff] %v18143_v18  ;;  %8163 = vmatpush.bf16.msra.mxu0 %v18123_v23  ;;  %v18163_v8 = vor.u32 %v12212_v11, %v11124_v52  ;;  %v11348_v13 = vld [vmem:[%s19719_s23 + $0x414] sm:$0xf0]  ;;  %v12149_v52 = vld [vmem:[%s19719_s23 + $0x44] sm:$0xf] }
 0x861   : > { %20673 = vst [vmem:[#allocation152_spill] sm:$0xff] %v18145_v63  ;;  %8182 = vmatpush.bf16.msra.mxu1 %v18125_v47  ;;  %v11572_v47 = vld [vmem:[%s19719_s23 + $0x5d4] sm:$0xf0]  ;;  %8201 = vmatpush.bf16.msra.mxu2 %v18143_v18  ;;  %v18179_v11 = vor.u32 %v12268_v0, %v11348_v13  ;;  %v10872_v49 = vld [vmem:[%s19719_s23 + $0x5c] sm:$0xf0] }
 0x862   : > { %20674 = vst [vmem:[#allocation149_spill] sm:$0xff] %v18161_v45  ;;  %v18181_v1 = vor.u32 %v12324_v34, %v11572_v47  ;;  %v12205_v23 = vld [vmem:[%s19719_s23 + $0x204] sm:$0xf]  ;;  %v18197_v34 = vor.u32 %v12149_v52, %v10872_v49  ;;  %v11320_v13 = vld [vmem:[%s19719_s23 + $0x3dc] sm:$0xf0] }
 0x863   : > { %20675 = vst [vmem:[#allocation143_spill] sm:$0xff] %v18163_v8  ;;  %8220 = vmatpush.bf16.msra.mxu3 %v18145_v63  ;;  %v11096_v63 = vld [vmem:[%s19719_s23 + $0x21c] sm:$0xf0]  ;;  %v12261_v0 = vld [vmem:[%s19719_s23 + $0x3c4] sm:$0xf] }
 0x864   : > { %20676 = vst [vmem:[#allocation157_spill] sm:$0xff] %v18179_v11  ;;  %8164 = vmatpush.bf16.msra.mxu0 %v18161_v45  ;;  %v18199_v47 = vor.u32 %v12205_v23, %v11096_v63  ;;  %v12317_v18 = vld [vmem:[%s19719_s23 + $0x584] sm:$0xf]  ;;  %v18215_v23 = vor.u32 %v12261_v0, %v11320_v13  ;;  %v12142_v52 = vld [vmem:[%s19719_s23 + $0xc] sm:$0xf] }
 0x865   : > { %20677 = vst [vmem:[#allocation154_spill] sm:$0xff] %v18181_v1  ;;  %8183 = vmatpush.bf16.msra.mxu1 %v18163_v8  ;;  %v11544_v8 = vld [vmem:[%s19719_s23 + $0x59c] sm:$0xf0]  ;;  %8202 = vmatpush.bf16.msra.mxu2 %v18179_v11  ;;  %v10844_v49 = vld [vmem:[%s19719_s23 + $0x24] sm:$0xf0] }
 0x866   : > { %20678 = vst [vmem:[#allocation147_spill] sm:$0xff] %v18197_v34  ;;  %v18217_v63 = vor.u32 %v12317_v18, %v11544_v8  ;;  %v12198_v45 = vld [vmem:[%s19719_s23 + $0x1cc] sm:$0xf]  ;;  %v18233_v18 = vor.u32 %v12142_v52, %v10844_v49  ;;  %v11516_v52 = vld [vmem:[%s19719_s23 + $0x564] sm:$0xf0] }
 0x867   : > { %20679 = vst [vmem:[#allocation158_spill] sm:$0xff] %v18199_v47  ;;  %8221 = vmatpush.bf16.msra.mxu3 %v18181_v1  ;;  %v11068_v1 = vld [vmem:[%s19719_s23 + $0x1e4] sm:$0xf0]  ;;  %v12254_v11 = vld [vmem:[%s19719_s23 + $0x38c] sm:$0xf] }
 0x868   : > { %20680 = vst [vmem:[#allocation150_spill] sm:$0xff] %v18215_v23  ;;  %v6276_v0 = vpop.f32.mrf.mxu0  ;;  %v6295_v13 = vpop.f32.mrf.mxu1  ;;  %8165 = vmatpush.bf16.msra.mxu0 %v18197_v34  ;;  %v18235_v8 = vor.u32 %v12198_v45, %v11068_v1  ;;  %v18251_v45 = vor.u32 %v12254_v11, %v11292_v29  ;;  %v18253_v1 = vor.u32 %v12310_v14, %v11516_v52  ;;  %v11046_v49 = vld [vmem:[%s19719_s23 + $0x198] sm:$0xf]  ;;  %v12251_v14 = vld [vmem:[%s19719_s23 + $0x370] sm:$0xf0] }
 0x869   : > { %20681 = vst [vmem:[#allocation164_spill] sm:$0xff] %v18217_v63  ;;  %8184 = vmatpush.bf16.msra.mxu1 %v18199_v47  ;;  %v6296_v12 = vadd.f32 %v6295_v13, %v6276_v0  ;;  %8203 = vmatpush.bf16.msra.mxu2 %v18215_v23  ;;  %v12195_v0 = vld [vmem:[%s19719_s23 + $0x1b0] sm:$0xf0]  ;;  %v11270_v13 = vld [vmem:[%s19719_s23 + $0x358] sm:$0xf] }
 0x86a   : > { %20682 = vst [vmem:[#allocation159_spill] sm:$0xff] %v18233_v18  ;;  %v18266_v29 = vor.u32 %v12195_v0, %v11046_v49  ;;  %v18273_v11 = vor.u32 %v12251_v14, %v11270_v13  ;;  %v11494_v52 = vld [vmem:[%s19719_s23 + $0x518] sm:$0xf]  ;;  %v12363_v13 = vld [vmem:[%s19719_s23 + $0x6f0] sm:$0xf0] }
 0x86b   : > { %20683 = vst [vmem:[#allocation148_spill] sm:$0xff] %v18235_v8  ;;  %8222 = vmatpush.bf16.msra.mxu3 %v18217_v63  ;;  %8091 = vmatmul.bf16.vlgmr.msrb.gmra.mxu0 %v17628_v3  ;;  %v12307_v63 = vld [vmem:[%s19719_s23 + $0x530] sm:$0xf0]  ;;  %v11718_v49 = vld [vmem:[%s19719_s23 + $0x6d8] sm:$0xf] }
 0x86c   : > { %20684 = vst [vmem:[#allocation151_spill] sm:$0xff] %v18251_v45  ;;  %8110 = vmatmul.bf16.vlgmr.msrb.gmra.mxu1 %v17630_v46  ;;  %8166 = vmatpush.bf16.msra.mxu0 %v18233_v18  ;;  %v18286_v0 = vor.u32 %v12307_v63, %v11494_v52  ;;  %v18293_v14 = vor.u32 %v12363_v13, %v11718_v49  ;;  %v12188_v18 = vld [vmem:[%s19719_s23 + $0x178] sm:$0xf0]  ;;  %v11242_v63 = vld [vmem:[%s19719_s23 + $0x320] sm:$0xf] }
 0x86d   : > { %20685 = vst [vmem:[#allocation166_spill] sm:$0xff] %v18253_v1  ;;  %8185 = vmatpush.bf16.msra.mxu1 %v18235_v8  ;;  %8204 = vmatpush.bf16.msra.mxu2 %v18251_v45  ;;  %v11018_v8 = vld [vmem:[%s19719_s23 + $0x160] sm:$0xf]  ;;  %v12244_v13 = vld [vmem:[%s19719_s23 + $0x338] sm:$0xf0] }
 0x86e   : > { %20686 = vst [vmem:[#allocation162_spill] sm:$0xff] %v18266_v29  ;;  %8129 = vmatmul.bf16.vlgmr.msrb.gmra.mxu2 %v17651_v10  ;;  %8148 = vmatmul.bf16.vlgmr.msrb.gmra.mxu3 %v17653_v43  ;;  %v18306_v49 = vor.u32 %v12188_v18, %v11018_v8  ;;  %v18313_v34 = vor.u32 %v12244_v13, %v11242_v63  ;;  %v12300_v18 = vld [vmem:[%s19719_s23 + $0x4f8] sm:$0xf0] }
 0x86f   : > { %20687 = vst [vmem:[#allocation153_spill] sm:$0xff] %v18273_v11  ;;  %8223 = vmatpush.bf16.msra.mxu3 %v18253_v1  ;;  %v6314_v52 = vpop.f32.mrf.mxu2  ;;  %v6333_v23 = vpop.f32.mrf.mxu3  ;;  %v12356_v63 = vld [vmem:[%s19719_s23 + $0x6b8] sm:$0xf0] }
 0x870   : > { %20688 = vst [vmem:[#allocation155_spill] sm:$0xff] %v18286_v0  ;;  %8235 = vmatpush.bf16.msrb.mxu0 %v18266_v29  ;;  %v6334_v1 = vadd.f32 %v6333_v23, %v6314_v52  ;;  %v6278_v45 = vpop.f32.mrf.mxu0  ;;  %v6297_v47 = vpop.f32.mrf.mxu1  ;;  %v11466_v29 = vld [vmem:[%s19719_s23 + $0x4e0] sm:$0xf] }
 0x871   : > { %20689 = vst [vmem:[#allocation167_spill] sm:$0xff] %v18293_v14  ;;  %8254 = vmatpush.bf16.msrb.mxu1 %v18273_v11  ;;  %8273 = vmatpush.bf16.msrb.mxu2 %v18286_v0  ;;  %v11690_v23 = vld [vmem:[%s19719_s23 + $0x6a0] sm:$0xf]  ;;  %v6298_v8 = vadd.f32 %v6297_v47, %v6278_v45  ;;  %v18324_v52 = vor.u32 %v12300_v18, %v11466_v29  ;;  %v10990_v0 = vld [vmem:[%s19719_s23 + $0x128] sm:$0xf] }
 0x872   : > { %20690 = vst [vmem:[#allocation156_spill] sm:$0xff] %v18306_v49  ;;  %v6419_v13 = vpack.c.bf16 %v6334_v1, %v6296_v12  ;;  %v12181_v11 = vld [vmem:[%s19719_s23 + $0x140] sm:$0xf0]  ;;  %v11214_v47 = vld [vmem:[%s19719_s23 + $0x2e8] sm:$0xf] }
 0x873   : > { %8292 = vmatpush.bf16.msrb.mxu3 %v18293_v14  ;;  %20691 = vst [vmem:[#allocation161_spill] sm:$0xff] %v18313_v34  ;;  %v18329_v14 = vor.u32 %v12356_v63, %v11690_v23  ;;  %v18342_v45 = vor.u32 %v12181_v11, %v10990_v0  ;;  %v12237_v12 = vld [vmem:[%s19719_s23 + $0x300] sm:$0xf0]  ;;  %v11438_v29 = vld [vmem:[%s19719_s23 + $0x4a8] sm:$0xf] }
 0x874   : > { %20692 = vst [vmem:[#allocation170_spill] sm:$0xff] %v18324_v52  ;;  %8236 = vmatpush.bf16.msrb.mxu0 %v18306_v49  ;;  %v18349_v1 = vor.u32 %v12237_v12, %v11214_v47  ;;  %v12293_v18 = vld [vmem:[%s19719_s23 + $0x4c0] sm:$0xf0]  ;;  %v11662_v11 = vld [vmem:[%s19719_s23 + $0x668] sm:$0xf] }
 0x875   : > { %20693 = vst [vmem:[#allocation160_spill] sm:$0xff] %v18329_v14  ;;  %8255 = vmatpush.bf16.msrb.mxu1 %v18313_v34  ;;  %8274 = vmatpush.bf16.msrb.mxu2 %v18324_v52  ;;  %v18360_v0 = vor.u32 %v12293_v18, %v11438_v29  ;;  %v12349_v23 = vld [vmem:[%s19719_s23 + $0x680] sm:$0xf0]  ;;  %v10962_v47 = vld [vmem:[%s19719_s23 + $0xf0] sm:$0xf]  ;;  %v6427_v29 = vunpack.c.l.bf16 %v6419_v13  ;;  %v6428_v18 = vunpack.c.h.bf16 %v6419_v13 }
 0x876   : > { %20694 = vst [vmem:[#allocation165_spill] sm:$0xff] %v18342_v45  ;;  %v18365_v63 = vor.u32 %v12349_v23, %v11662_v11  ;;  %v12174_v12 = vld [vmem:[%s19719_s23 + $0x108] sm:$0xf0] }
 0x877   : > { %8293 = vmatpush.bf16.msrb.mxu3 %v18329_v14  ;;  %20695 = vst [vmem:[#allocation163_spill] sm:$0xff] %v18349_v1  ;;  %v11186_v14 = vld [vmem:[%s19719_s23 + $0x2b0] sm:$0xf]  ;;  %v6316_v52 = vpop.f32.mrf.mxu2  ;;  %v6335_v34 = vpop.f32.mrf.mxu3  ;;  %v12230_v11 = vld [vmem:[%s19719_s23 + $0x2c8] sm:$0xf0]  ;;  %v18383_v55 = vor.u32 %v12174_v12, %v10962_v47 }
 0x878   : > { %20696 = vst [vmem:[#allocation169_spill] sm:$0xff] %v18360_v0  ;;  %8237 = vmatpush.bf16.msrb.mxu0 %v18342_v45  ;;  %v6336_v23 = vadd.f32 %v6335_v34, %v6316_v52  ;;  %v6281_v49 = vpop.f32.mrf.mxu0  ;;  %v6300_v21 = vpop.f32.mrf.mxu1  ;;  %v18385_v13 = vor.u32 %v12230_v11, %v11186_v14  ;;  %v11410_v45 = vld [vmem:[%s19719_s23 + $0x470] sm:$0xf]  ;;  %v12342_v52 = vld [vmem:[%s19719_s23 + $0x648] sm:$0xf0] }
 0x879   : > { %20697 = vst [vmem:[#allocation168_spill] sm:$0xff] %v18365_v63  ;;  %8256 = vmatpush.bf16.msrb.mxu1 %v18349_v1  ;;  %8275 = vmatpush.bf16.msrb.mxu2 %v18360_v0  ;;  %v12286_v1 = vld [vmem:[%s19719_s23 + $0x488] sm:$0xf0]  ;;  %v6301_v33 = vadd.f32 %v6300_v21, %v6281_v49  ;;  %v11634_v34 = vld [vmem:[%s19719_s23 + $0x630] sm:$0xf] }
 0x87a   : > { %20698 = vst [vmem:[#allocation171_spill] sm:$0xff] %v18383_v55  ;;  %v6421_v47 = vpack.c.bf16 %v6336_v23, %v6298_v8  ;;  %v18399_v14 = vor.u32 %v12286_v1, %v11410_v45  ;;  %v18401_v12 = vor.u32 %v12342_v52, %v11634_v34  ;;  %v10934_v11 = vld [vmem:[%s19719_s23 + $0xb8] sm:$0xf]  ;;  %v12167_v21 = vld [vmem:[%s19719_s23 + $0xd0] sm:$0xf0]  ;;  %v6444_v8 = vadd.f32 %v6428_v18, %v17456_v58 }
 0x87b   : > { %8294 = vmatpush.bf16.msrb.mxu3 %v18365_v63  ;;  %20699 = vst [vmem:[#allocation20_spill] sm:$0xff] %v18385_v13  ;;  %v11158_v49 = vld [vmem:[%s19719_s23 + $0x278] sm:$0xf]  ;;  %v6443_v63 = vadd.f32 %v6427_v29, %v17420_v50  ;;  %8096 = vmatmul.bf16.gmra.mxu0 %v17779_v36  ;;  %v12223_v45 = vld [vmem:[%s19719_s23 + $0x290] sm:$0xf0]  ;;  %v18421_v34 = vor.u32 %v12167_v21, %v10934_v11 }
 0x87c   : > { %20700 = vst [vmem:[#allocation17_spill] sm:$0xff] %v18399_v14  ;;  %8115 = vmatmul.bf16.gmra.mxu1 %v17794_v15  ;;  %v6431_v1 = vunpack.c.l.bf16 %v6421_v47  ;;  %v6432_v23 = vunpack.c.h.bf16 %v6421_v47  ;;  %8238 = vmatpush.bf16.msrb.mxu0 %v18383_v55  ;;  %v18423_v52 = vor.u32 %v12223_v45, %v11158_v49  ;;  %v11382_v29 = vld [vmem:[%s19719_s23 + $0x438] sm:$0xf]  ;;  %v12279_v18 = vld [vmem:[%s19719_s23 + $0x450] sm:$0xf0] }
 0x87d   : > { %20701 = vst [vmem:[#allocation19_spill] sm:$0xff] %v18401_v12  ;;  %8257 = vmatpush.bf16.msrb.mxu1 %v18385_v13  ;;  %v11606_v47 = vld [vmem:[%s19719_s23 + $0x5f8] sm:$0xf]  ;;  %v18436_v11 = vor.u32 %v12279_v18, %v11382_v29  ;;  %v12335_v21 = vld [vmem:[%s19719_s23 + $0x610] sm:$0xf0]  ;;  %8276 = vmatpush.bf16.msrb.mxu2 %v18399_v14  ;;  %v6483_v18 = vmax.f32 %v6443_v63, 0.0 }
 0x87e   : > { %20702 = vst [vmem:[#allocation21_spill] sm:$0xff] %v18421_v34  ;;  %8134 = vmatmul.bf16.gmra.mxu2 %v17815_v54  ;;  %8153 = vmatmul.bf16.gmra.mxu3 %v17817_v30  ;;  %v6447_v49 = vadd.f32 %v6431_v1, %v17420_v50  ;;  %v6448_v45 = vadd.f32 %v6432_v23, %v17456_v58  ;;  %v10906_v55 = vld [vmem:[%s19719_s23 + $0x80] sm:$0xf]  ;;  %v12160_v29 = vld [vmem:[%s19719_s23 + $0x98] sm:$0xf0]  ;;  %v6484_v23 = vmax.f32 %v6444_v8, 0.0 }
 0x87f   : > { %20703 = vst [vmem:[#allocation13_spill] sm:$0xff] %v18423_v52  ;;  %8295 = vmatpush.bf16.msrb.mxu3 %v18401_v12  ;;  %v18445_v13 = vor.u32 %v12335_v21, %v11606_v47  ;;  %v11130_v1 = vld [vmem:[%s19719_s23 + $0x240] sm:$0xf]  ;;  %v6319_v0 = vpop.f32.mrf.mxu2  ;;  %v6338_v14 = vpop.f32.mrf.mxu3  ;;  %v18456_v17 = vor.u32 %v12160_v29, %v10906_v55  ;;  %v12216_v47 = vld [vmem:[%s19719_s23 + $0x258] sm:$0xf0] }
 0x880   : > { %20704 = vst [vmem:[#allocation22_spill] sm:$0xff] %v18436_v11  ;;  %v6487_v21 = vmax.f32 %v6447_v49, 0.0  ;;  %v6488_v12 = vmax.f32 %v6448_v45, 0.0  ;;  %v6339_v20 = vadd.f32 %v6338_v14, %v6319_v0  ;;  %v6283_v56 = vpop.f32.mrf.mxu0  ;;  %v6302_v38 = vpop.f32.mrf.mxu1  ;;  %8239 = vmatpush.bf16.msrb.mxu0 %v18421_v34  ;;  %v18463_v39 = vor.u32 %v12216_v47, %v11130_v1  ;;  %v11354_v55 = vld [vmem:[%s19719_s23 + $0x400] sm:$0xf] }
 0x881   : > { %20705 = vst [vmem:[#allocation24_spill] sm:$0xff] %v18445_v13  ;;  %8258 = vmatpush.bf16.msrb.mxu1 %v18423_v52  ;;  %v12272_v63 = vld [vmem:[%s19719_s23 + $0x418] sm:$0xf0]  ;;  %v6303_v8 = vadd.f32 %v6302_v38, %v6283_v56  ;;  %v11578_v0 = vld [vmem:[%s19719_s23 + $0x5c0] sm:$0xf]  ;;  %8277 = vmatpush.bf16.msrb.mxu2 %v18436_v11 }
 0x882   : > { %20706 = vst [vmem:[#allocation23_spill] sm:$0xff] %v18456_v17  ;;  %v18471_v49 = vor.u32 %v12272_v63, %v11354_v55  ;;  %v12328_v14 = vld [vmem:[%s19719_s23 + $0x5d8] sm:$0xf0]  ;;  %v18479_v45 = vpack.c.bf16 %v6487_v21, %v6483_v18  ;;  %v18481_v29 = vpack.c.bf16 %v6488_v12, %v6484_v23  ;;  %v6423_v1 = vpack.c.bf16 %v6339_v20, %v6301_v33  ;;  %v10878_v56 = vld [vmem:[%s19719_s23 + $0x48] sm:$0xf] }
 0x883   : > { %20707 = vst [vmem:[#allocation16_spill] sm:$0xff] %v18463_v39  ;;  %8296 = vmatpush.bf16.msrb.mxu3 %v18445_v13  ;;  %v12153_v38 = vld [vmem:[%s19719_s23 + $0x60] sm:$0xf0]  ;;  %v11102_v18 = vld [vmem:[%s19719_s23 + $0x208] sm:$0xf]  ;;  %v18494_v47 = vor.u32 %v12328_v14, %v11578_v0 }
 0x884   : > { %20708 = vst [vmem:[#allocation18_spill] sm:$0xff] %v18471_v49  ;;  %v12209_v20 = vld [vmem:[%s19719_s23 + $0x220] sm:$0xf0]  ;;  %8240 = vmatpush.bf16.msrb.mxu0 %v18456_v17  ;;  %v18501_v33 = vor.u32 %v12153_v38, %v10878_v56  ;;  %v11326_v23 = vld [vmem:[%s19719_s23 + $0x3c8] sm:$0xf] }
 0x885   : > { %20709 = vst [vmem:[#allocation26_spill] sm:$0xff] %v18494_v47  ;;  %8259 = vmatpush.bf16.msrb.mxu1 %v18463_v39  ;;  %v18503_v12 = vor.u32 %v12209_v20, %v11102_v18  ;;  %v12265_v21 = vld [vmem:[%s19719_s23 + $0x3e0] sm:$0xf0]  ;;  %v11550_v55 = vld [vmem:[%s19719_s23 + $0x588] sm:$0xf]  ;;  %8278 = vmatpush.bf16.msrb.mxu2 %v18471_v49  ;;  %v6435_v20 = vunpack.c.l.bf16 %v6423_v1  ;;  %v6436_v49 = vunpack.c.h.bf16 %v6423_v1 }
 0x886   : > { %20710 = vst [vmem:[#allocation25_spill] sm:$0xff] %v18501_v33  ;;  %v12321_v63 = vld [vmem:[%s19719_s23 + $0x5a0] sm:$0xf0]  ;;  %v18519_v0 = vor.u32 %v12265_v21, %v11326_v23  ;;  %v10850_v56 = vld [vmem:[%s19719_s23 + $0x10] sm:$0xf] }
 0x887   : > { %20711 = vst [vmem:[#allocation27_spill] sm:$0xff] %v18503_v12  ;;  %8297 = vmatpush.bf16.msrb.mxu3 %v18494_v47  ;;  %v18521_v14 = vor.u32 %v12321_v63, %v11550_v55  ;;  %v12146_v38 = vld [vmem:[%s19719_s23 + $0x28] sm:$0xf0]  ;;  %v11074_v18 = vld [vmem:[%s19719_s23 + $0x1d0] sm:$0xf]  ;;  %v6321_v39 = vpop.f32.mrf.mxu2  ;;  %v6340_v47 = vpop.f32.mrf.mxu3 }
 0x888   : > { %20712 = vst [vmem:[#allocation29_spill] sm:$0xff] %v18519_v0  ;;  %v12202_v23 = vld [vmem:[%s19719_s23 + $0x1e8] sm:$0xf0]  ;;  %v6341_v21 = vadd.f32 %v6340_v47, %v6321_v39  ;;  %v6352_v55 = vpop.f32.mrf.mxu0  ;;  %v6371_v63 = vpop.f32.mrf.mxu1  ;;  %8241 = vmatpush.bf16.msrb.mxu0 %v18501_v33  ;;  %v18537_v17 = vor.u32 %v12146_v38, %v10850_v56  ;;  %v11298_v13 = vld [vmem:[%s19719_s23 + $0x390] sm:$0xf] }
 0x889   : > { %20713 = vst [vmem:[#allocation28_spill] sm:$0xff] %v18521_v14  ;;  %8260 = vmatpush.bf16.msrb.mxu1 %v18503_v12  ;;  %v18542_v1 = vadd.f32 %v6371_v63, %v6352_v55  ;;  %v18544_v11 = vor.u32 %v12202_v23, %v11074_v18  ;;  %v12258_v39 = vld [vmem:[%s19719_s23 + $0x3a8] sm:$0xf0]  ;;  %v11522_v47 = vld [vmem:[%s19719_s23 + $0x550] sm:$0xf]  ;;  %8279 = vmatpush.bf16.msrb.mxu2 %v18519_v0 }
 0x88a   : > { %20714 = vst [vmem:[#allocation30_spill] sm:$0xff] %v18537_v17  ;;  %v12314_v56 = vld [vmem:[%s19719_s23 + $0x568] sm:$0xf0]  ;;  %v6425_v38 = vpack.c.bf16 %v6341_v21, %v6303_v8  ;;  %v18557_v55 = vor.u32 %v12258_v39, %v11298_v13  ;;  %v12192_v23 = vld [vmem:[%s19719_s23 + $0x19c] sm:$0xf]  ;;  %v6451_v21 = vadd.f32 %v6435_v20, %v17420_v50 }
 0x88b   : > { %20715 = vst [vmem:[#allocation32_spill] sm:$0xff] %v18544_v11  ;;  %8298 = vmatpush.bf16.msrb.mxu3 %v18521_v14  ;;  %v18559_v18 = vor.u32 %v12314_v56, %v11522_v47  ;;  %v11048_v63 = vld [vmem:[%s19719_s23 + $0x1b4] sm:$0xf0]  ;;  %v12248_v8 = vld [vmem:[%s19719_s23 + $0x35c] sm:$0xf]  ;;  %v6452_v14 = vadd.f32 %v6436_v49, %v17456_v58  ;;  %8167 = vmatmul.bf16.vlgmr.msra.gmra.mxu0 %v17628_v3 }
 0x88c   : > { %20716 = vst [vmem:[#allocation31_spill] sm:$0xff] %v18557_v55  ;;  %8186 = vmatmul.bf16.vlgmr.msra.gmra.mxu1 %v17630_v46  ;;  %v18574_v13 = vor.u32 %v12192_v23, %v11048_v63  ;;  %v11272_v39 = vld [vmem:[%s19719_s23 + $0x374] sm:$0xf0]  ;;  %v6439_v47 = vunpack.c.l.bf16 %v6425_v38  ;;  %v6440_v56 = vunpack.c.h.bf16 %v6425_v38  ;;  %8242 = vmatpush.bf16.msrb.mxu0 %v18537_v17  ;;  %v12304_v49 = vld [vmem:[%s19719_s23 + $0x51c] sm:$0xf] }
 0x88d   : > { %20717 = vst [vmem:[#allocation36_spill] sm:$0xff] %v18559_v18  ;;  %8261 = vmatpush.bf16.msrb.mxu1 %v18544_v11  ;;  %v18581_v0 = vor.u32 %v12248_v8, %v11272_v39  ;;  %v11496_v20 = vld [vmem:[%s19719_s23 + $0x534] sm:$0xf0]  ;;  %v12360_v23 = vld [vmem:[%s19719_s23 + $0x6dc] sm:$0xf]  ;;  %8280 = vmatpush.bf16.msrb.mxu2 %v18557_v55 }
 0x88e   : > { %20718 = vst [vmem:[#allocation33_spill] sm:$0xff] %v18574_v13  ;;  %8205 = vmatmul.bf16.vlgmr.msra.gmra.mxu2 %v17651_v10  ;;  %8224 = vmatmul.bf16.vlgmr.msra.gmra.mxu3 %v17653_v43  ;;  %v18594_v38 = vor.u32 %v12304_v49, %v11496_v20  ;;  %v11720_v63 = vld [vmem:[%s19719_s23 + $0x6f4] sm:$0xf0]  ;;  %v6455_v8 = vadd.f32 %v6439_v47, %v17420_v50  ;;  %v12185_v17 = vld [vmem:[%s19719_s23 + $0x164] sm:$0xf]  ;;  %v6491_v47 = vmax.f32 %v6451_v21, 0.0 }
 0x88f   : > { %20719 = vst [vmem:[#allocation35_spill] sm:$0xff] %v18581_v0  ;;  %v6456_v39 = vadd.f32 %v6440_v56, %v17456_v58  ;;  %8299 = vmatpush.bf16.msrb.mxu3 %v18559_v18  ;;  %v18603_v11 = vor.u32 %v12360_v23, %v11720_v63  ;;  %v11020_v49 = vld [vmem:[%s19719_s23 + $0x17c] sm:$0xf0]  ;;  %v12241_v50 = vld [vmem:[%s19719_s23 + $0x324] sm:$0xf]  ;;  %v6492_v58 = vmax.f32 %v6452_v14, 0.0  ;;  %v6390_v56 = vpop.f32.mrf.mxu2  ;;  %v6409_v20 = vpop.f32.mrf.mxu3 }
 0x890   : > { %20720 = vst [vmem:[#allocation40_spill] sm:$0xff] %v18594_v38  ;;  %8311 = vmatpush.bf16.msra.mxu0 %v18574_v13  ;;  %v18616_v23 = vor.u32 %v12185_v17, %v11020_v49  ;;  %v11244_v63 = vld [vmem:[%s19719_s23 + $0x33c] sm:$0xf0]  ;;  %v6495_v18 = vmax.f32 %v6455_v8, 0.0  ;;  %v6410_v12 = vadd.f32 %v6409_v20, %v6390_v56  ;;  %v6354_v33 = vpop.f32.mrf.mxu0  ;;  %v6373_v52 = vpop.f32.mrf.mxu1  ;;  %v12297_v17 = vld [vmem:[%s19719_s23 + $0x4e4] sm:$0xf] }
 0x891   : > { %20721 = vst [vmem:[#allocation39_spill] sm:$0xff] %v18603_v11  ;;  %8330 = vmatpush.bf16.msra.mxu1 %v18581_v0  ;;  %v6496_v55 = vmax.f32 %v6456_v39, 0.0  ;;  %8349 = vmatpush.bf16.msra.mxu2 %v18594_v38  ;;  %v18623_v14 = vor.u32 %v12241_v50, %v11244_v63  ;;  %v11468_v21 = vld [vmem:[%s19719_s23 + $0x4fc] sm:$0xf0]  ;;  %v6374_v49 = vadd.f32 %v6373_v52, %v6354_v33  ;;  %v12353_v39 = vld [vmem:[%s19719_s23 + $0x6a4] sm:$0xf] }
 0x892   : > { %20722 = vst [vmem:[#allocation37_spill] sm:$0xff] %v18616_v23  ;;  %v18631_v8 = vor.u32 %v12297_v17, %v11468_v21  ;;  %v11692_v50 = vld [vmem:[%s19719_s23 + $0x6bc] sm:$0xf0]  ;;  %v18639_v56 = vpack.c.bf16 %v6495_v18, %v6491_v47  ;;  %v6420_v63 = vpack.c.bf16 %v6410_v12, %v18542_v1  ;;  %v12178_v52 = vld [vmem:[%s19719_s23 + $0x12c] sm:$0xf] }
 0x893   : > { %8368 = vmatpush.bf16.msra.mxu3 %v18603_v11  ;;  %20723 = vst [vmem:[#allocation41_spill] sm:$0xff] %v18623_v14  ;;  %v18641_v20 = vpack.c.bf16 %v6496_v55, %v6492_v58  ;;  %v18644_v11 = vor.u32 %v12353_v39, %v11692_v50  ;;  %v10992_v33 = vld [vmem:[%s19719_s23 + $0x144] sm:$0xf0]  ;;  %v12234_v17 = vld [vmem:[%s19719_s23 + $0x2ec] sm:$0xf] }
 0x894   : > { %20724 = vst [vmem:[#allocation43_spill] sm:$0xff] %v18631_v8  ;;  %8312 = vmatpush.bf16.msra.mxu0 %v18616_v23  ;;  %v18657_v55 = vor.u32 %v12178_v52, %v10992_v33  ;;  %v11216_v12 = vld [vmem:[%s19719_s23 + $0x304] sm:$0xf0]  ;;  %v12290_v18 = vld [vmem:[%s19719_s23 + $0x4ac] sm:$0xf] }
 0x895   : > { %20725 = vst [vmem:[#allocation46_spill] sm:$0xff] %v18639_v56  ;;  %8331 = vmatpush.bf16.msra.mxu1 %v18623_v14  ;;  %8350 = vmatpush.bf16.msra.mxu2 %v18631_v8  ;;  %v18664_v1 = vor.u32 %v12234_v17, %v11216_v12  ;;  %v11440_v47 = vld [vmem:[%s19719_s23 + $0x4c4] sm:$0xf0]  ;;  %v12346_v58 = vld [vmem:[%s19719_s23 + $0x66c] sm:$0xf]  ;;  %v6429_v12 = vunpack.c.l.bf16 %v6420_v63 }
 0x896   : > { %20726 = vst [vmem:[#allocation45_spill] sm:$0xff] %v18641_v20  ;;  %v18675_v21 = vor.u32 %v12290_v18, %v11440_v47  ;;  %v11664_v39 = vld [vmem:[%s19719_s23 + $0x684] sm:$0xf0]  ;;  %v12171_v52 = vld [vmem:[%s19719_s23 + $0xf4] sm:$0xf]  ;;  %v6430_v18 = vunpack.c.h.bf16 %v6420_v63 }
 0x897   : > { %20727 = vst [vmem:[#allocation34_spill] sm:$0xff] %v18644_v11  ;;  %8369 = vmatpush.bf16.msra.mxu3 %v18644_v11  ;;  %v18680_v50 = vor.u32 %v12346_v58, %v11664_v39  ;;  %v10964_v33 = vld [vmem:[%s19719_s23 + $0x10c] sm:$0xf0]  ;;  %v12227_v17 = vld [vmem:[%s19719_s23 + $0x2b4] sm:$0xf]  ;;  %v6392_v47 = vpop.f32.mrf.mxu2  ;;  %v6411_v11 = vpop.f32.mrf.mxu3 }
 0x898   : > { %20728 = vst [vmem:[#allocation14_spill] sm:$0xff] %v18657_v55  ;;  %8313 = vmatpush.bf16.msra.mxu0 %v18657_v55  ;;  %v11188_v58 = vld [vmem:[%s19719_s23 + $0x2cc] sm:$0xf0]  ;;  %v6412_v39 = vadd.f32 %v6411_v11, %v6392_v47  ;;  %v6357_v8 = vpop.f32.mrf.mxu0  ;;  %v6376_v14 = vpop.f32.mrf.mxu1  ;;  %v18698_v23 = vor.u32 %v12171_v52, %v10964_v33  ;;  %v12283_v55 = vld [vmem:[%s19719_s23 + $0x474] sm:$0xf] }
 0x899   : > { %20729 = vst [vmem:[#allocation15_spill] sm:$0xff] %v18664_v1  ;;  %8332 = vmatpush.bf16.msra.mxu1 %v18664_v1  ;;  %8351 = vmatpush.bf16.msra.mxu2 %v18675_v21  ;;  %v18700_v63 = vor.u32 %v12227_v17, %v11188_v58  ;;  %v11412_v1 = vld [vmem:[%s19719_s23 + $0x48c] sm:$0xf0]  ;;  %v6377_v38 = vadd.f32 %v6376_v14, %v6357_v8  ;;  %v12339_v11 = vld [vmem:[%s19719_s23 + $0x634] sm:$0xf] }
 0x89a   : > { %20730 = vst [vmem:[#allocation47_spill] sm:$0xff] %v18675_v21  ;;  %v11636_v52 = vld [vmem:[%s19719_s23 + $0x64c] sm:$0xf0]  ;;  %v6422_v33 = vpack.c.bf16 %v6412_v39, %v6374_v49  ;;  %v18714_v17 = vor.u32 %v12283_v55, %v11412_v1  ;;  %v12164_v58 = vld [vmem:[%s19719_s23 + $0xbc] sm:$0xf]  ;;  %v6446_v49 = vadd.f32 %v6430_v18, %v17521_v59 }
 0x89b   : > { %20731 = vst [vmem:[#allocation44_spill] sm:$0xff] %v18680_v50  ;;  %8370 = vmatpush.bf16.msra.mxu3 %v18680_v50  ;;  %v18716_v47 = vor.u32 %v12339_v11, %v11636_v52  ;;  %v10936_v14 = vld [vmem:[%s19719_s23 + $0xd4] sm:$0xf0]  ;;  %v12220_v8 = vld [vmem:[%s19719_s23 + $0x27c] sm:$0xf]  ;;  %v6445_v50 = vadd.f32 %v6429_v12, %v17498_v35  ;;  %8172 = vmatmul.bf16.gmra.mxu0 %v17779_v36 }
 0x89c   : > { %20732 = vst [vmem:[#allocation50_spill] sm:$0xff] %v18698_v23  ;;  %8191 = vmatmul.bf16.gmra.mxu1 %v17794_v15  ;;  %v11160_v55 = vld [vmem:[%s19719_s23 + $0x294] sm:$0xf0]  ;;  %v6433_v1 = vunpack.c.l.bf16 %v6422_v33  ;;  %v6434_v39 = vunpack.c.h.bf16 %v6422_v33  ;;  %8314 = vmatpush.bf16.msra.mxu0 %v18698_v23  ;;  %v18736_v11 = vor.u32 %v12164_v58, %v10936_v14  ;;  %v12276_v12 = vld [vmem:[%s19719_s23 + $0x43c] sm:$0xf] }
 0x89d   : > { %20733 = vst [vmem:[#allocation51_spill] sm:$0xff] %v18700_v63  ;;  %8333 = vmatpush.bf16.msra.mxu1 %v18700_v63  ;;  %v18738_v52 = vor.u32 %v12220_v8, %v11160_v55  ;;  %v11384_v18 = vld [vmem:[%s19719_s23 + $0x454] sm:$0xf0]  ;;  %v12332_v33 = vld [vmem:[%s19719_s23 + $0x5fc] sm:$0xf]  ;;  %8352 = vmatpush.bf16.msra.mxu2 %v18714_v17 }
 0x89e   : > { %20734 = vst [vmem:[#allocation48_spill] sm:$0xff] %v18714_v17  ;;  %8210 = vmatmul.bf16.gmra.mxu2 %v17815_v54  ;;  %8229 = vmatmul.bf16.gmra.mxu3 %v17817_v30  ;;  %v18751_v58 = vor.u32 %v12276_v12, %v11384_v18  ;;  %v11608_v14 = vld [vmem:[%s19719_s23 + $0x614] sm:$0xf0]  ;;  %v6449_v8 = vadd.f32 %v6433_v1, %v17498_v35  ;;  %v12157_v23 = vld [vmem:[%s19719_s23 + $0x84] sm:$0xf]  ;;  %v6485_v18 = vmax.f32 %v6445_v50, 0.0 }
 0x89f   : > { %20735 = vst [vmem:[#allocation38_spill] sm:$0xff] %v18716_v47  ;;  %v6450_v55 = vadd.f32 %v6434_v39, %v17521_v59  ;;  %8371 = vmatpush.bf16.msra.mxu3 %v18716_v47  ;;  %v18760_v63 = vor.u32 %v12332_v33, %v11608_v14  ;;  %v10908_v12 = vld [vmem:[%s19719_s23 + $0x9c] sm:$0xf0]  ;;  %v12213_v1 = vld [vmem:[%s19719_s23 + $0x244] sm:$0xf]  ;;  %v6486_v39 = vmax.f32 %v6446_v49, 0.0  ;;  %v6395_v21 = vpop.f32.mrf.mxu2  ;;  %v6414_v17 = vpop.f32.mrf.mxu3 }
 0x8a0   : > { %20736 = vst [vmem:[#allocation54_spill] sm:$0xff] %v18736_v11  ;;  %v18771_v0 = vor.u32 %v12157_v23, %v10908_v12  ;;  %v11132_v33 = vld [vmem:[%s19719_s23 + $0x25c] sm:$0xf0]  ;;  %v6489_v14 = vmax.f32 %v6449_v8, 0.0  ;;  %v6415_v13 = vadd.f32 %v6414_v17, %v6395_v21  ;;  %v6359_v34 = vpop.f32.mrf.mxu0  ;;  %v6378_v20 = vpop.f32.mrf.mxu1  ;;  %8315 = vmatpush.bf16.msra.mxu0 %v18736_v11  ;;  %v12269_v23 = vld [vmem:[%s19719_s23 + $0x404] sm:$0xf] }
 0x8a1   : > { %20737 = vst [vmem:[#allocation55_spill] sm:$0xff] %v18738_v52  ;;  %v6490_v47 = vmax.f32 %v6450_v55, 0.0  ;;  %8334 = vmatpush.bf16.msra.mxu1 %v18738_v52  ;;  %v18778_v56 = vor.u32 %v12213_v1, %v11132_v33  ;;  %v11356_v50 = vld [vmem:[%s19719_s23 + $0x41c] sm:$0xf0]  ;;  %v6379_v49 = vadd.f32 %v6378_v20, %v6359_v34  ;;  %v12325_v21 = vld [vmem:[%s19719_s23 + $0x5c4] sm:$0xf]  ;;  %8353 = vmatpush.bf16.msra.mxu2 %v18751_v58 }
 0x8a2   : > { %20738 = vst [vmem:[#allocation52_spill] sm:$0xff] %v18751_v58  ;;  %v18786_v8 = vor.u32 %v12269_v23, %v11356_v50  ;;  %v11580_v17 = vld [vmem:[%s19719_s23 + $0x5dc] sm:$0xf0]  ;;  %v18794_v55 = vpack.c.bf16 %v6489_v14, %v6485_v18  ;;  %v6424_v1 = vpack.c.bf16 %v6415_v13, %v6377_v38  ;;  %v12150_v34 = vld [vmem:[%s19719_s23 + $0x4c] sm:$0xf] }
 0x8a3   : > { %20739 = vst [vmem:[#allocation42_spill] sm:$0xff] %v18760_v63  ;;  %v18796_v12 = vpack.c.bf16 %v6490_v47, %v6486_v39  ;;  %8372 = vmatpush.bf16.msra.mxu3 %v18760_v63  ;;  %v10880_v20 = vld [vmem:[%s19719_s23 + $0x64] sm:$0xf0]  ;;  %v12206_v18 = vld [vmem:[%s19719_s23 + $0x20c] sm:$0xf]  ;;  %v18809_v33 = vor.u32 %v12325_v21, %v11580_v17 }
 0x8a4   : > { %20740 = vst [vmem:[#allocation58_spill] sm:$0xff] %v18771_v0  ;;  %v11104_v13 = vld [vmem:[%s19719_s23 + $0x224] sm:$0xf0]  ;;  %8316 = vmatpush.bf16.msra.mxu0 %v18771_v0  ;;  %v18816_v38 = vor.u32 %v12150_v34, %v10880_v20  ;;  %v12262_v39 = vld [vmem:[%s19719_s23 + $0x3cc] sm:$0xf] }
 0x8a5   : > { %20741 = vst [vmem:[#allocation59_spill] sm:$0xff] %v18778_v56  ;;  %8335 = vmatpush.bf16.msra.mxu1 %v18778_v56  ;;  %v18818_v47 = vor.u32 %v12206_v18, %v11104_v13  ;;  %v11328_v14 = vld [vmem:[%s19719_s23 + $0x3e4] sm:$0xf0]  ;;  %v12318_v23 = vld [vmem:[%s19719_s23 + $0x58c] sm:$0xf]  ;;  %8354 = vmatpush.bf16.msra.mxu2 %v18786_v8  ;;  %v6437_v56 = vunpack.c.l.bf16 %v6424_v1 }
 0x8a6   : > { %20742 = vst [vmem:[#allocation56_spill] sm:$0xff] %v18786_v8  ;;  %v18832_v50 = vld [vmem:[%s19720_s24] sm:$0x7f]  ;;  %v11552_v21 = vld [vmem:[%s19719_s23 + $0x5a4] sm:$0xf0]  ;;  %v18839_v17 = vor.u32 %v12262_v39, %v11328_v14  ;;  %v6438_v8 = vunpack.c.h.bf16 %v6424_v1 }
 0x8a7   : > { %20743 = vst [vmem:[#allocation49_spill] sm:$0xff] %v18809_v33  ;;  %8373 = vmatpush.bf16.msra.mxu3 %v18809_v33  ;;  %v18841_v34 = vor.u32 %v12318_v23, %v11552_v21  ;;  %v12143_v20 = vld [vmem:[%s19719_s23 + $0x14] sm:$0xf]  ;;  %v10852_v18 = vld [vmem:[%s19719_s23 + $0x2c] sm:$0xf0]  ;;  %v6397_v0 = vpop.f32.mrf.mxu2  ;;  %v6416_v33 = vpop.f32.mrf.mxu3  ;;  %v18856_v23 = vperm.slane %v18832_v50, 0 }
 0x8a8   : > { %20744 = vst [vmem:[#allocation60_spill] sm:$0xff] %v18816_v38  ;;  %v12199_v13 = vld [vmem:[%s19719_s23 + $0x1d4] sm:$0xf]  ;;  %v11076_v39 = vld [vmem:[%s19719_s23 + $0x1ec] sm:$0xf0]  ;;  %v6417_v14 = vadd.f32 %v6416_v33, %v6397_v0  ;;  %v7940_v21 = vpop.f32.mrf.mxu0  ;;  %v7959_v63 = vpop.f32.mrf.mxu1  ;;  %8317 = vmatpush.bf16.msra.mxu0 %v18816_v38  ;;  %v18860_v58 = vor.u32 %v12143_v20, %v10852_v18 }
 0x8a9   : > { %20745 = vst [vmem:[#allocation172_spill] sm:$0xff] %v18818_v47  ;;  %8336 = vmatpush.bf16.msra.mxu1 %v18818_v47  ;;  %v12255_v1 = vld [vmem:[%s19719_s23 + $0x394] sm:$0xf]  ;;  %v18865_v52 = vor.u32 %v12199_v13, %v11076_v39  ;;  %v11300_v0 = vld [vmem:[%s19719_s23 + $0x3ac] sm:$0xf0]  ;;  %8355 = vmatpush.bf16.msra.mxu2 %v18839_v17 }
 0x8aa   : > { %20746 = vst [vmem:[#allocation173_spill] sm:$0xff] %v18839_v17  ;;  %v12311_v33 = vld [vmem:[%s19719_s23 + $0x554] sm:$0xf]  ;;  %v11524_v47 = vld [vmem:[%s19719_s23 + $0x56c] sm:$0xf0]  ;;  %v6426_v20 = vpack.c.bf16 %v6417_v14, %v6379_v49  ;;  %v18878_v18 = vor.u32 %v12255_v1, %v11300_v0  ;;  %v6453_v14 = vadd.f32 %v6437_v56, %v17498_v35  ;;  %v7941_v17 = vadd.f32 %v7940_v21, %v18856_v23 }
 0x8ab   : > { %20747 = vst [vmem:[#allocation174_spill] sm:$0xff] %v18841_v34  ;;  %8374 = vmatpush.bf16.msra.mxu3 %v18841_v34  ;;  %v18880_v13 = vor.u32 %v12311_v33, %v11524_v47  ;;  %v11054_v39 = vld [vmem:[%s19719_s23 + $0x1a0] sm:$0xf]  ;;  %v12196_v38 = vld [vmem:[%s19719_s23 + $0x1b8] sm:$0xf0]  ;;  %v6454_v34 = vadd.f32 %v6438_v8, %v17521_v59  ;;  %8243 = vmatmul.bf16.vlgmr.msrb.gmra.mxu0 %v17628_v3 }
 0x8ac   : > { %20748 = vst [vmem:[#allocation175_spill] sm:$0xff] %v18860_v58  ;;  %v11278_v49 = vld [vmem:[%s19719_s23 + $0x360] sm:$0xf]  ;;  %8262 = vmatmul.bf16.vlgmr.msrb.gmra.mxu1 %v17630_v46  ;;  %v18895_v47 = vor.u32 %v12196_v38, %v11054_v39  ;;  %v12252_v1 = vld [vmem:[%s19719_s23 + $0x378] sm:$0xf0]  ;;  %v6441_v0 = vunpack.c.l.bf16 %v6426_v20  ;;  %v6442_v33 = vunpack.c.h.bf16 %v6426_v20  ;;  %8318 = vmatpush.bf16.msra.mxu0 %v18860_v58 }
 0x8ad   : > { %20749 = vst [vmem:[#allocation176_spill] sm:$0xff] %v18865_v52  ;;  %8337 = vmatpush.bf16.msra.mxu1 %v18865_v52  ;;  %v18903_v56 = vor.u32 %v12252_v1, %v11278_v49  ;;  %v11502_v8 = vld [vmem:[%s19719_s23 + $0x520] sm:$0xf]  ;;  %v12308_v38 = vld [vmem:[%s19719_s23 + $0x538] sm:$0xf0]  ;;  %8356 = vmatpush.bf16.msra.mxu2 %v18878_v18 }
 0x8ae   : > { %20750 = vst [vmem:[#allocation177_spill] sm:$0xff] %v18878_v18  ;;  %v11726_v20 = vld [vmem:[%s19719_s23 + $0x6e0] sm:$0xf]  ;;  %8281 = vmatmul.bf16.vlgmr.msrb.gmra.mxu2 %v17651_v10  ;;  %8300 = vmatmul.bf16.vlgmr.msrb.gmra.mxu3 %v17653_v43  ;;  %v18916_v21 = vor.u32 %v12308_v38, %v11502_v8  ;;  %v12364_v39 = vld [vmem:[%s19719_s23 + $0x6f8] sm:$0xf0]  ;;  %v6457_v49 = vadd.f32 %v6441_v0, %v17498_v35  ;;  %v6493_v0 = vmax.f32 %v6453_v14, 0.0 }
 0x8af   : > { %20751 = vst [vmem:[#allocation178_spill] sm:$0xff] %v18880_v13  ;;  %v6458_v1 = vadd.f32 %v6442_v33, %v17521_v59  ;;  %8375 = vmatpush.bf16.msra.mxu3 %v18880_v13  ;;  %v18925_v52 = vor.u32 %v12364_v39, %v11726_v20  ;;  %v11026_v58 = vld [vmem:[%s19719_s23 + $0x168] sm:$0xf]  ;;  %v12189_v8 = vld [vmem:[%s19719_s23 + $0x180] sm:$0xf0]  ;;  %v6494_v59 = vmax.f32 %v6454_v34, 0.0  ;;  %v7960_v13 = vadd.f32 %v7959_v63, %v7941_v17 }
 0x8b0   : > { %20752 = vst [vmem:[#allocation179_spill] sm:$0xff] %v18903_v56  ;;  %v11250_v35 = vld [vmem:[%s19719_s23 + $0x328] sm:$0xf]  ;;  %8387 = vmatpush.bf16.msrb.mxu0 %v18895_v47  ;;  %v18938_v33 = vor.u32 %v12189_v8, %v11026_v58  ;;  %v12245_v38 = vld [vmem:[%s19719_s23 + $0x340] sm:$0xf0]  ;;  %v6497_v20 = vmax.f32 %v6457_v49, 0.0  ;;  %v7942_v18 = vpop.f32.mrf.mxu0  ;;  %v7961_v11 = vpop.f32.mrf.mxu1 }
 0x8b1   : > { %20753 = vst [vmem:[#allocation180_spill] sm:$0xff] %v18916_v21  ;;  %8406 = vmatpush.bf16.msrb.mxu1 %v18903_v56  ;;  %v6498_v39 = vmax.f32 %v6458_v1, 0.0  ;;  %8425 = vmatpush.bf16.msrb.mxu2 %v18916_v21  ;;  %v18945_v34 = vor.u32 %v12245_v38, %v11250_v35  ;;  %v11474_v58 = vld [vmem:[%s19719_s23 + $0x4e8] sm:$0xf]  ;;  %v12301_v14 = vld [vmem:[%s19719_s23 + $0x500] sm:$0xf0]  ;;  %v7978_v8 = vpop.f32.mrf.mxu2  ;;  %v7997_v63 = vpop.f32.mrf.mxu3 }
 0x8b2   : > { %20754 = vst [vmem:[#allocation181_spill] sm:$0xff] %v18925_v52  ;;  %v18957_v17 = vor.u32 %v12301_v14, %v11474_v58  ;;  %v11698_v49 = vld [vmem:[%s19719_s23 + $0x6a8] sm:$0xf]  ;;  %v12357_v1 = vld [vmem:[%s19719_s23 + $0x6c0] sm:$0xf0]  ;;  %v18965_v35 = vpack.c.bf16 %v6497_v20, %v6493_v0 }
 0x8b3   : > { %20755 = vst [vmem:[#allocation182_spill] sm:$0xff] %v18938_v33  ;;  %8444 = vmatpush.bf16.msrb.mxu3 %v18925_v52  ;;  %v18967_v38 = vpack.c.bf16 %v6498_v39, %v6494_v59  ;;  %v7979_v52 = vadd.f32 %v7978_v8, %v7960_v13  ;;  %v18969_v21 = vor.u32 %v12357_v1, %v11698_v49  ;;  %v10998_v58 = vld [vmem:[%s19719_s23 + $0x130] sm:$0xf]  ;;  %v12182_v14 = vld [vmem:[%s19719_s23 + $0x148] sm:$0xf0] }
 0x8b4   : > { %20756 = vst [vmem:[#allocation183_spill] sm:$0xff] %v18945_v34  ;;  %v11222_v56 = vld [vmem:[%s19719_s23 + $0x2f0] sm:$0xf]  ;;  %8388 = vmatpush.bf16.msrb.mxu0 %v18938_v33  ;;  %v18982_v0 = vor.u32 %v12182_v14, %v10998_v58  ;;  %v12238_v13 = vld [vmem:[%s19719_s23 + $0x308] sm:$0xf0]  ;;  %v7943_v59 = vadd.f32 %v7942_v18, %v18856_v23 }
 0x8b5   : > { %20757 = vst [vmem:[#allocation184_spill] sm:$0xff] %v18957_v17  ;;  %8407 = vmatpush.bf16.msrb.mxu1 %v18945_v34  ;;  %v7998_v20 = vadd.f32 %v7997_v63, %v7979_v52  ;;  %8426 = vmatpush.bf16.msrb.mxu2 %v18957_v17  ;;  %v18990_v39 = vor.u32 %v12238_v13, %v11222_v56  ;;  %v11446_v8 = vld [vmem:[%s19719_s23 + $0x4b0] sm:$0xf]  ;;  %v12294_v49 = vld [vmem:[%s19719_s23 + $0x4c8] sm:$0xf0] }
 0x8b6   : > { %20758 = vst [vmem:[#allocation185_spill] sm:$0xff] %v18969_v21  ;;  %v11670_v18 = vld [vmem:[%s19719_s23 + $0x670] sm:$0xf]  ;;  %v19001_v52 = vor.u32 %v12294_v49, %v11446_v8  ;;  %v12350_v63 = vld [vmem:[%s19719_s23 + $0x688] sm:$0xf0]  ;;  %v7962_v8 = vadd.f32 %v7961_v11, %v7943_v59 }
 0x8b7   : > { %20759 = vst [vmem:[#allocation186_spill] sm:$0xff] %v18982_v0  ;;  %8445 = vmatpush.bf16.msrb.mxu3 %v18969_v21  ;;  %v8463_v56 = vmax.f32 %v7998_v20, 0.0  ;;  %v19006_v1 = vor.u32 %v12350_v63, %v11670_v18  ;;  %v10970_v58 = vld [vmem:[%s19719_s23 + $0xf8] sm:$0xf]  ;;  %v12175_v14 = vld [vmem:[%s19719_s23 + $0x110] sm:$0xf0] }
 0x8b8   : > { %20760 = vst [vmem:[#allocation187_spill] sm:$0xff] %v18990_v39  ;;  %8389 = vmatpush.bf16.msrb.mxu0 %v18982_v0  ;;  %v11194_v13 = vld [vmem:[%s19719_s23 + $0x2b8] sm:$0xf]  ;;  %v12231_v20 = vld [vmem:[%s19719_s23 + $0x2d0] sm:$0xf0]  ;;  %v7945_v49 = vpop.f32.mrf.mxu0  ;;  %v7964_v18 = vpop.f32.mrf.mxu1  ;;  %v19028_v63 = vor.u32 %v12175_v14, %v10970_v58 }
 0x8b9   : > { %20761 = vst [vmem:[#allocation188_spill] sm:$0xff] %v19001_v52  ;;  %8408 = vmatpush.bf16.msrb.mxu1 %v18990_v39  ;;  %8427 = vmatpush.bf16.msrb.mxu2 %v19001_v52  ;;  %v19030_v39 = vor.u32 %v12231_v20, %v11194_v13  ;;  %v11418_v0 = vld [vmem:[%s19719_s23 + $0x478] sm:$0xf]  ;;  %v12287_v11 = vld [vmem:[%s19719_s23 + $0x490] sm:$0xf0]  ;;  %v7999_v52 = vpop.f32.mrf.mxu3  ;;  %v7946_v34 = vadd.f32 %v7945_v49, %v18856_v23 }
 0x8ba   : > { %20762 = vst [vmem:[#allocation189_spill] sm:$0xff] %v19006_v1  ;;  %v11642_v59 = vld [vmem:[%s19719_s23 + $0x638] sm:$0xf]  ;;  %v12343_v58 = vld [vmem:[%s19719_s23 + $0x650] sm:$0xf0]  ;;  %v19044_v13 = vor.u32 %v12287_v11, %v11418_v0 }
 0x8bb   : > { %9051 = vst [vmem:[%s19023_s27] sm:$0xff] %v8463_v56  ;;  %8446 = vmatpush.bf16.msrb.mxu3 %v19006_v1  ;;  %v7980_v56 = vpop.f32.mrf.mxu2  ;;  %v19046_v20 = vor.u32 %v12343_v58, %v11642_v59  ;;  %v10942_v1 = vld [vmem:[%s19719_s23 + $0xc0] sm:$0xf]  ;;  %v12168_v21 = vld [vmem:[%s19719_s23 + $0xd8] sm:$0xf0]  ;;  %8248 = vmatmul.bf16.gmra.mxu0 %v17779_v36  ;;  %v12259_v33 = vld [vmem:[%s19719_s23 + $0x3b0] sm:$0xf0] }
 0x8bc   : > { %20763 = vst [vmem:[#allocation190_spill] sm:$0xff] %v19028_v63  ;;  %v7981_v14 = vadd.f32 %v7980_v56, %v7962_v8  ;;  %v11166_v17 = vld [vmem:[%s19719_s23 + $0x280] sm:$0xf]  ;;  %8267 = vmatmul.bf16.gmra.mxu1 %v17794_v15  ;;  %v12224_v0 = vld [vmem:[%s19719_s23 + $0x298] sm:$0xf0]  ;;  %8390 = vmatpush.bf16.msrb.mxu0 %v19028_v63  ;;  %v19065_v11 = vor.u32 %v12168_v21, %v10942_v1 }
 0x8bd   : > { %20764 = vst [vmem:[#allocation191_spill] sm:$0xff] %v19030_v39  ;;  %8409 = vmatpush.bf16.msrb.mxu1 %v19030_v39  ;;  %v19067_v59 = vor.u32 %v12224_v0, %v11166_v17  ;;  %v11390_v49 = vld [vmem:[%s19719_s23 + $0x440] sm:$0xf]  ;;  %v12280_v56 = vld [vmem:[%s19719_s23 + $0x458] sm:$0xf0]  ;;  %8428 = vmatpush.bf16.msrb.mxu2 %v19044_v13 }
 0x8be   : > { %20765 = vst [vmem:[#allocation192_spill] sm:$0xff] %v19044_v13  ;;  %v8000_v8 = vadd.f32 %v7999_v52, %v7981_v14  ;;  %v11614_v52 = vld [vmem:[%s19719_s23 + $0x600] sm:$0xf]  ;;  %8286 = vmatmul.bf16.gmra.mxu2 %v17815_v54  ;;  %8305 = vmatmul.bf16.gmra.mxu3 %v17817_v30  ;;  %v12336_v21 = vld [vmem:[%s19719_s23 + $0x618] sm:$0xf0]  ;;  %v19085_v1 = vor.u32 %v12280_v56, %v11390_v49 }
 0x8bf   : > { %20766 = vst [vmem:[#allocation193_spill] sm:$0xff] %v19046_v20  ;;  %8447 = vmatpush.bf16.msrb.mxu3 %v19046_v20  ;;  %v19087_v58 = vor.u32 %v12336_v21, %v11614_v52  ;;  %v10914_v14 = vld [vmem:[%s19719_s23 + $0x88] sm:$0xf]  ;;  %v12161_v0 = vld [vmem:[%s19719_s23 + $0xa0] sm:$0xf0]  ;;  %v7965_v49 = vadd.f32 %v7964_v18, %v7946_v34 }
 0x8c0   : > { %20767 = vst [vmem:[#allocation194_spill] sm:$0xff] %v19065_v11  ;;  %v8470_v17 = vmax.f32 %v8000_v8, 0.0  ;;  %v11138_v8 = vld [vmem:[%s19719_s23 + $0x248] sm:$0xf]  ;;  %v12217_v20 = vld [vmem:[%s19719_s23 + $0x260] sm:$0xf0]  ;;  %v7947_v56 = vpop.f32.mrf.mxu0  ;;  %v7966_v52 = vpop.f32.mrf.mxu1  ;;  %8391 = vmatpush.bf16.msrb.mxu0 %v19065_v11  ;;  %v19104_v21 = vor.u32 %v12161_v0, %v10914_v14 }
 0x8c1   : > { %20768 = vst [vmem:[#allocation195_spill] sm:$0xff] %v19067_v59  ;;  %8410 = vmatpush.bf16.msrb.mxu1 %v19067_v59  ;;  %v19106_v13 = vor.u32 %v12217_v20, %v11138_v8  ;;  %v11362_v39 = vld [vmem:[%s19719_s23 + $0x408] sm:$0xf]  ;;  %v12273_v63 = vld [vmem:[%s19719_s23 + $0x420] sm:$0xf0]  ;;  %v8002_v18 = vpop.f32.mrf.mxu3  ;;  %8429 = vmatpush.bf16.msrb.mxu2 %v19085_v1 }
 0x8c2   : > { %20769 = vst [vmem:[#allocation196_spill] sm:$0xff] %v19085_v1  ;;  %v12329_v14 = vld [vmem:[%s19719_s23 + $0x5e0] sm:$0xf0]  ;;  %v19122_v0 = vor.u32 %v12273_v63, %v11362_v39  ;;  %v10886_v59 = vld [vmem:[%s19719_s23 + $0x50] sm:$0xf] }
 0x8c3   : > { %20770 = vst [vmem:[#allocation197_spill] sm:$0xff] %v19087_v58  ;;  %v7983_v34 = vpop.f32.mrf.mxu2  ;;  %8448 = vmatpush.bf16.msrb.mxu3 %v19087_v58  ;;  %v12154_v11 = vld [vmem:[%s19719_s23 + $0x68] sm:$0xf0]  ;;  %v11334_v58 = vld [vmem:[%s19719_s23 + $0x3d0] sm:$0xf] }
 0x8c4   : > { %9058 = vst [vmem:[%s19023_s27 + $0x38] sm:$0xff] %v8470_v17  ;;  %v11586_v17 = vld [vmem:[%s19719_s23 + $0x5c8] sm:$0xf]  ;;  %v7984_v20 = vadd.f32 %v7983_v34, %v7965_v49  ;;  %v11110_v49 = vld [vmem:[%s19719_s23 + $0x210] sm:$0xf]  ;;  %v7948_v34 = vadd.f32 %v7947_v56, %v18856_v23  ;;  %8392 = vmatpush.bf16.msrb.mxu0 %v19104_v21 }
 0x8c5   : > { %20771 = vst [vmem:[#allocation198_spill] sm:$0xff] %v19104_v21  ;;  %v19124_v8 = vor.u32 %v12329_v14, %v11586_v17  ;;  %v12210_v39 = vld [vmem:[%s19719_s23 + $0x228] sm:$0xf0]  ;;  %8411 = vmatpush.bf16.msrb.mxu1 %v19106_v13  ;;  %v19141_v17 = vor.u32 %v12154_v11, %v10886_v59  ;;  %8430 = vmatpush.bf16.msrb.mxu2 %v19122_v0  ;;  %v19170_v21 = vperm.slane %v18832_v50, 1  ;;  %v11306_v1 = vld [vmem:[%s19719_s23 + $0x398] sm:$0xf] }
 0x8c6   : > { %20772 = vst [vmem:[#allocation199_spill] sm:$0xff] %v19106_v13  ;;  %v8003_v63 = vadd.f32 %v8002_v18, %v7984_v20  ;;  %v19143_v14 = vor.u32 %v12210_v39, %v11110_v49  ;;  %v12266_v56 = vld [vmem:[%s19719_s23 + $0x3e8] sm:$0xf0]  ;;  %v11558_v18 = vld [vmem:[%s19719_s23 + $0x590] sm:$0xf] }
 0x8c7   : > { %20773 = vst [vmem:[#allocation200_spill] sm:$0xff] %v19122_v0  ;;  %v12322_v11 = vld [vmem:[%s19719_s23 + $0x5a8] sm:$0xf0]  ;;  %8449 = vmatpush.bf16.msrb.mxu3 %v19124_v8  ;;  %v19159_v20 = vor.u32 %v12266_v56, %v11334_v58  ;;  %v10858_v39 = vld [vmem:[%s19719_s23 + $0x18] sm:$0xf]  ;;  %v7967_v56 = vadd.f32 %v7966_v52, %v7948_v34 }
 0x8c8   : > { %20774 = vst [vmem:[#allocation201_spill] sm:$0xff] %v19124_v8  ;;  %v8477_v59 = vmax.f32 %v8003_v63, 0.0  ;;  %v19161_v49 = vor.u32 %v12322_v11, %v11558_v18  ;;  %v12147_v13 = vld [vmem:[%s19719_s23 + $0x30] sm:$0xf0]  ;;  %v11082_v63 = vld [vmem:[%s19719_s23 + $0x1d8] sm:$0xf]  ;;  %v8016_v18 = vpop.f32.mrf.mxu0  ;;  %8393 = vmatpush.bf16.msrb.mxu0 %v19141_v17 }
 0x8c9   : > { %20775 = vst [vmem:[#allocation202_spill] sm:$0xff] %v19141_v17  ;;  %v12203_v58 = vld [vmem:[%s19719_s23 + $0x1f0] sm:$0xf0]  ;;  %v8035_v11 = vpop.f32.mrf.mxu1  ;;  %8412 = vmatpush.bf16.msrb.mxu1 %v19143_v14  ;;  %v19181_v8 = vor.u32 %v12147_v13, %v10858_v39  ;;  %v8004_v34 = vpop.f32.mrf.mxu3  ;;  %8431 = vmatpush.bf16.msrb.mxu2 %v19159_v20  ;;  %v8017_v17 = vadd.f32 %v8016_v18, %v19170_v21 }
 0x8ca   : > { %20776 = vst [vmem:[#allocation203_spill] sm:$0xff] %v19143_v14  ;;  %v19183_v0 = vor.u32 %v12203_v58, %v11082_v63  ;;  %v12315_v13 = vld [vmem:[%s19719_s23 + $0x570] sm:$0xf0]  ;;  %v19199_v63 = vor.u32 %v12259_v33, %v11306_v1 }
 0x8cb   : > { %9065 = vst [vmem:[%s19023_s27 + $0x70] sm:$0xff] %v8477_v59  ;;  %v7985_v52 = vpop.f32.mrf.mxu2  ;;  %v11530_v59 = vld [vmem:[%s19719_s23 + $0x558] sm:$0xf]  ;;  %8450 = vmatpush.bf16.msrb.mxu3 %v19161_v49  ;;  %8319 = vmatmul.bf16.vlgmr.msra.gmra.mxu0 %v17628_v3  ;;  %v8036_v33 = vadd.f32 %v8035_v11, %v8017_v17 }
 0x8cc   : > { %v7986_v39 = vadd.f32 %v7985_v52, %v7967_v56  ;;  %v19201_v58 = vor.u32 %v12315_v13, %v11530_v59  ;;  %8338 = vmatmul.bf16.vlgmr.msra.gmra.mxu1 %v17630_v46  ;;  %8394 = vmatpush.bf16.msrb.mxu0 %v19181_v8 }
 0x8cd   : > { %8413 = vmatpush.bf16.msrb.mxu1 %v19183_v0  ;;  %8432 = vmatpush.bf16.msrb.mxu2 %v19199_v63 }
 0x8ce   : > { %v8005_v14 = vadd.f32 %v8004_v34, %v7986_v39  ;;  %8357 = vmatmul.bf16.vlgmr.msra.gmra.mxu2 %v17651_v10  ;;  %8376 = vmatmul.bf16.vlgmr.msra.gmra.mxu3 %v17653_v43 }
 0x8cf   : > { %8451 = vmatpush.bf16.msrb.mxu3 %v19201_v58 }
 0x8d0   : > { %v8484_v56 = vmax.f32 %v8005_v14, 0.0  ;;  %8491 = vmatpush.bf16.msra.mxu0 %v16958_v32  ;;  %v8018_v1 = vpop.f32.mrf.mxu0 }
 0x8d1   : > { %8510 = vmatpush.bf16.msra.mxu1 %v16965_v2  ;;  %v8037_v18 = vpop.f32.mrf.mxu1  ;;  %8529 = vmatpush.bf16.msra.mxu2 %v16977_v4  ;;  %v8073_v34 = vpop.f32.mrf.mxu3  ;;  %v8019_v32 = vadd.f32 %v8018_v1, %v19170_v21 }
 0x8d2   : > { %9072 = vst [vmem:[%s19023_s27 + $0xa8] sm:$0xff] %v8484_v56 }
 0x8d3   : > { %8548 = vmatpush.bf16.msra.mxu3 %v16983_v19  ;;  %v8054_v52 = vpop.f32.mrf.mxu2  ;;  %v8038_v4 = vadd.f32 %v8037_v18, %v8019_v32  ;;  %v20779_v18 = vld [vmem:[#allocation63_spill] sm:$0xff] }
 0x8d4   : > { %v8055_v14 = vadd.f32 %v8054_v52, %v8036_v33  ;;  %8492 = vmatpush.bf16.msra.mxu0 %v16995_v9  ;;  %v20781_v52 = vld [vmem:[#allocation57_spill] sm:$0xff] }
 0x8d5   : > { %8511 = vmatpush.bf16.msra.mxu1 %v17001_v25  ;;  %8530 = vmatpush.bf16.msra.mxu2 %v17018_v24 }
 0x8d6   : > { %v8074_v59 = vadd.f32 %v8073_v34, %v8055_v14  ;;  %v20782_v34 = vld [vmem:[#allocation66_spill] sm:$0xff]  ;;  %v20783_v14 = vld [vmem:[#allocation67_spill] sm:$0xff] }
 0x8d7   : > { %8549 = vmatpush.bf16.msra.mxu3 %v17024_v60 }
 0x8d8   : > { %v8464_v2 = vmax.f32 %v8074_v59, 0.0  ;;  %8493 = vmatpush.bf16.msra.mxu0 %v17037_v41  ;;  %v8021_v19 = vpop.f32.mrf.mxu0 }
 0x8d9   : > { %8512 = vmatpush.bf16.msra.mxu1 %v17043_v61  ;;  %v8040_v17 = vpop.f32.mrf.mxu1  ;;  %8531 = vmatpush.bf16.msra.mxu2 %v17057_v57  ;;  %v8075_v25 = vpop.f32.mrf.mxu3  ;;  %v8022_v24 = vadd.f32 %v8021_v19, %v19170_v21 }
 0x8da   : > { %9052 = vst [vmem:[%s19023_s27 + $0x8] sm:$0xff] %v8464_v2  ;;  %v20785_v2 = vld [vmem:[#allocation61_spill] sm:$0xff] }
 0x8db   : > { %8550 = vmatpush.bf16.msra.mxu3 %v17063_v16  ;;  %v8056_v9 = vpop.f32.mrf.mxu2  ;;  %8324 = vmatmul.bf16.gmra.mxu0 %v17779_v36  ;;  %v8041_v61 = vadd.f32 %v8040_v17, %v8022_v24  ;;  %v20787_v17 = vld [vmem:[#allocation71_spill] sm:$0xff]  ;;  %v20789_v24 = vld [vmem:[#allocation65_spill] sm:$0xff] }
 0x8dc   : > { %v8057_v11 = vadd.f32 %v8056_v9, %v8038_v4  ;;  %8343 = vmatmul.bf16.gmra.mxu1 %v17794_v15  ;;  %8494 = vmatpush.bf16.msra.mxu0 %v17075_v7  ;;  %v20786_v4 = vld [vmem:[#allocation70_spill] sm:$0xff]  ;;  %v20788_v9 = vld [vmem:[#allocation72_spill] sm:$0xff] }
 0x8dd   : > { %8513 = vmatpush.bf16.msra.mxu1 %v17085_v31  ;;  %8532 = vmatpush.bf16.msra.mxu2 %v17101_v26 }
 0x8de   : > { %v8076_v60 = vadd.f32 %v8075_v25, %v8057_v11  ;;  %8362 = vmatmul.bf16.gmra.mxu2 %v17815_v54  ;;  %8381 = vmatmul.bf16.gmra.mxu3 %v17817_v30 }
 0x8df   : > { %8551 = vmatpush.bf16.msra.mxu3 %v17107_v51 }
 0x8e0   : > { %v8471_v41 = vmax.f32 %v8076_v60, 0.0  ;;  %v8023_v57 = vpop.f32.mrf.mxu0  ;;  %8495 = vmatpush.bf16.msra.mxu0 %v17124_v5  ;;  %v20790_v60 = vld [vmem:[#allocation74_spill] sm:$0xff] }
 0x8e1   : > { %v8042_v16 = vpop.f32.mrf.mxu1  ;;  %8514 = vmatpush.bf16.msra.mxu1 %v17131_v53  ;;  %v8078_v31 = vpop.f32.mrf.mxu3  ;;  %8533 = vmatpush.bf16.msra.mxu2 %v17141_v6  ;;  %v8024_v26 = vadd.f32 %v8023_v57, %v19170_v21  ;;  %v19248_v53 = vperm.slane %v18832_v50, 2  ;;  %v20792_v57 = vld [vmem:[#allocation76_spill] sm:$0xff] }
 0x8e2   : > { %9059 = vst [vmem:[%s19023_s27 + $0x40] sm:$0xff] %v8471_v41 }
 0x8e3   : > { %v8059_v7 = vpop.f32.mrf.mxu2  ;;  %8552 = vmatpush.bf16.msra.mxu3 %v17151_v28  ;;  %v8043_v5 = vadd.f32 %v8042_v16, %v8024_v26  ;;  %v20794_v26 = vld [vmem:[#allocation77_spill] sm:$0xff] }
 0x8e4   : > { %v8060_v13 = vadd.f32 %v8059_v7, %v8041_v61  ;;  %8496 = vmatpush.bf16.msra.mxu0 %v17162_v42  ;;  %v20791_v61 = vld [vmem:[#allocation75_spill] sm:$0xff] }
 0x8e5   : > { %8515 = vmatpush.bf16.msra.mxu1 %v17171_v40  ;;  %8534 = vmatpush.bf16.msra.mxu2 %v17184_v27  ;;  %v20777_v40 = vld [vmem:[#allocation53_spill] sm:$0xff]  ;;  %v20778_v27 = vld [vmem:[#allocation62_spill] sm:$0xff] }
 0x8e6   : > { %v8079_v39 = vadd.f32 %v8078_v31, %v8060_v13  ;;  %v20793_v13 = vld [vmem:[#allocation69_spill] sm:$0xff] }
 0x8e7   : > { %8553 = vmatpush.bf16.msra.mxu3 %v17191_v22 }
 0x8e8   : > { %v8478_v51 = vmax.f32 %v8079_v39, 0.0  ;;  %v8092_v6 = vpop.f32.mrf.mxu0  ;;  %8497 = vmatpush.bf16.msra.mxu0 %v17202_v62  ;;  %v20780_v62 = vld [vmem:[#allocation64_spill] sm:$0xff] }
 0x8e9   : > { %v8111_v56 = vpop.f32.mrf.mxu1  ;;  %8516 = vmatpush.bf16.msra.mxu1 %v17207_v44  ;;  %v8080_v42 = vpop.f32.mrf.mxu3  ;;  %8535 = vmatpush.bf16.msra.mxu2 %v20777_v40  ;;  %v8093_v1 = vadd.f32 %v8092_v6, %v19248_v53  ;;  %v20797_v40 = vld [vmem:[#allocation73_spill] sm:$0xff] }
 0x8ea   : > { %9066 = vst [vmem:[%s19023_s27 + $0x78] sm:$0xff] %v8478_v51 }
 0x8eb   : > { %v8061_v28 = vpop.f32.mrf.mxu2  ;;  %8554 = vmatpush.bf16.msra.mxu3 %v20778_v27  ;;  %8395 = vmatmul.bf16.vlgmr.msrb.gmra.mxu0 %v17628_v3  ;;  %v20784_v3 = vld [vmem:[#allocation68_spill] sm:$0xff]  ;;  %v20798_v27 = vld [vmem:[#allocation81_spill] sm:$0xff] }
 0x8ec   : > { %v8062_v33 = vadd.f32 %v8061_v28, %v8043_v5  ;;  %8414 = vmatmul.bf16.vlgmr.msrb.gmra.mxu1 %v17630_v46  ;;  %8498 = vmatpush.bf16.msra.mxu0 %v20779_v18  ;;  %v8112_v46 = vadd.f32 %v8111_v56, %v8093_v1  ;;  %v20795_v28 = vld [vmem:[#allocation78_spill] sm:$0xff]  ;;  %v20800_v18 = vld [vmem:[#allocation80_spill] sm:$0xff] }
 0x8ed   : > { %8517 = vmatpush.bf16.msra.mxu1 %v20780_v62  ;;  %8536 = vmatpush.bf16.msra.mxu2 %v20781_v52  ;;  %v20799_v1 = vld [vmem:[#allocation82_spill] sm:$0xff] }
 0x8ee   : > { %v8081_v22 = vadd.f32 %v8080_v42, %v8062_v33  ;;  %8433 = vmatmul.bf16.vlgmr.msrb.gmra.mxu2 %v17651_v10  ;;  %8452 = vmatmul.bf16.vlgmr.msrb.gmra.mxu3 %v17653_v43  ;;  %v20796_v42 = vld [vmem:[#allocation79_spill] sm:$0xff] }
 0x8ef   : > { %8555 = vmatpush.bf16.msra.mxu3 %v20782_v34 }
 0x8f0   : > { %v8485_v44 = vmax.f32 %v8081_v22, 0.0  ;;  %8567 = vmatpush.bf16.msrb.mxu0 %v20783_v14  ;;  %v8094_v32 = vpop.f32.mrf.mxu0  ;;  %v20802_v14 = vld [vmem:[#allocation86_spill] sm:$0xff] }
 0x8f1   : > { %8586 = vmatpush.bf16.msrb.mxu1 %v20784_v3  ;;  %v8113_v59 = vpop.f32.mrf.mxu1  ;;  %8605 = vmatpush.bf16.msrb.mxu2 %v20785_v2  ;;  %v8149_v43 = vpop.f32.mrf.mxu3  ;;  %v8095_v25 = vadd.f32 %v8094_v32, %v19248_v53  ;;  %v20803_v3 = vld [vmem:[#allocation83_spill] sm:$0xff]  ;;  %v20804_v32 = vld [vmem:[#allocation88_spill] sm:$0xff]  ;;  %v19299_v2 = vperm.slane %v18832_v50, 3 }
 0x8f2   : > { %9073 = vst [vmem:[%s19023_s27 + $0xb0] sm:$0xff] %v8485_v44 }
 0x8f3   : > { %8624 = vmatpush.bf16.msrb.mxu3 %v20786_v4  ;;  %v8130_v10 = vpop.f32.mrf.mxu2  ;;  %v8114_v16 = vadd.f32 %v8113_v59, %v8095_v25  ;;  %v20807_v25 = vld [vmem:[#allocation92_spill] sm:$0xff] }
 0x8f4   : > { %v8131_v19 = vadd.f32 %v8130_v10, %v8112_v46  ;;  %8568 = vmatpush.bf16.msrb.mxu0 %v20787_v17  ;;  %v20805_v10 = vld [vmem:[#allocation90_spill] sm:$0xff] }
 0x8f5   : > { %8587 = vmatpush.bf16.msrb.mxu1 %v20788_v9  ;;  %8606 = vmatpush.bf16.msrb.mxu2 %v20789_v24 }
 0x8f6   : > { %v8150_v11 = vadd.f32 %v8149_v43, %v8131_v19  ;;  %v20806_v43 = vld [vmem:[#allocation87_spill] sm:$0xff] }
 0x8f7   : > { %8625 = vmatpush.bf16.msrb.mxu3 %v20790_v60  ;;  %v20809_v60 = vld [vmem:[#allocation91_spill] sm:$0xff] }
 0x8f8   : > { %v8465_v41 = vmax.f32 %v8150_v11, 0.0  ;;  %8569 = vmatpush.bf16.msrb.mxu0 %v20791_v61  ;;  %v8097_v7 = vpop.f32.mrf.mxu0 }
 0x8f9   : > { %8588 = vmatpush.bf16.msrb.mxu1 %v20792_v57  ;;  %v8116_v31 = vpop.f32.mrf.mxu1  ;;  %8607 = vmatpush.bf16.msrb.mxu2 %v20793_v13  ;;  %v8151_v51 = vpop.f32.mrf.mxu3  ;;  %v8098_v6 = vadd.f32 %v8097_v7, %v19248_v53  ;;  %v20811_v57 = vld [vmem:[#allocation98_spill] sm:$0xff]  ;;  %v20813_v7 = vld [vmem:[#allocation100_spill] sm:$0xff] }
 0x8fa   : > { %9053 = vst [vmem:[%s19023_s27 + $0x10] sm:$0xff] %v8465_v41  ;;  %v20810_v41 = vld [vmem:[#allocation96_spill] sm:$0xff] }
 0x8fb   : > { %8626 = vmatpush.bf16.msrb.mxu3 %v20794_v26  ;;  %v8132_v39 = vpop.f32.mrf.mxu2  ;;  %8400 = vmatmul.bf16.gmra.mxu0 %v17779_v36  ;;  %v8117_v22 = vadd.f32 %v8116_v31, %v8098_v6  ;;  %v20814_v31 = vld [vmem:[#allocation103_spill] sm:$0xff] }
 0x8fc   : > { %v8133_v5 = vadd.f32 %v8132_v39, %v8114_v16  ;;  %8419 = vmatmul.bf16.gmra.mxu1 %v17794_v15  ;;  %8570 = vmatpush.bf16.msrb.mxu0 %v20795_v28  ;;  %v20812_v16 = vld [vmem:[#allocation95_spill] sm:$0xff] }
 0x8fd   : > { %8589 = vmatpush.bf16.msrb.mxu1 %v20796_v42  ;;  %8608 = vmatpush.bf16.msrb.mxu2 %v20797_v40  ;;  %v20817_v42 = vld [vmem:[#allocation108_spill] sm:$0xff] }
 0x8fe   : > { %v8152_v56 = vadd.f32 %v8151_v51, %v8133_v5  ;;  %8438 = vmatmul.bf16.gmra.mxu2 %v17815_v54  ;;  %8457 = vmatmul.bf16.gmra.mxu3 %v17817_v30  ;;  %v20801_v54 = vld [vmem:[#allocation84_spill] sm:$0xff]  ;;  %v20815_v51 = vld [vmem:[#allocation99_spill] sm:$0xff] }
 0x8ff   : > { %8627 = vmatpush.bf16.msrb.mxu3 %v20798_v27  ;;  %v20816_v5 = vld [vmem:[#allocation104_spill] sm:$0xff] }
 0x900   : > { %v8472_v33 = vmax.f32 %v8152_v56, 0.0  ;;  %v8099_v36 = vpop.f32.mrf.mxu0  ;;  %8571 = vmatpush.bf16.msrb.mxu0 %v20799_v1  ;;  %v20821_v1 = vld [vmem:[#allocation109_spill] sm:$0xff] }
 0x901   : > { %v8118_v15 = vpop.f32.mrf.mxu1  ;;  %8590 = vmatpush.bf16.msrb.mxu1 %v20800_v18  ;;  %v8154_v44 = vpop.f32.mrf.mxu3  ;;  %8609 = vmatpush.bf16.msrb.mxu2 %v17487_v48  ;;  %v8100_v30 = vadd.f32 %v8099_v36, %v19248_v53  ;;  %v20820_v36 = vld [vmem:[#allocation85_spill] sm:$0xff] }
 0x902   : > { %9060 = vst [vmem:[%s19023_s27 + $0x48] sm:$0xff] %v8472_v33  ;;  %v20818_v33 = vld [vmem:[#allocation101_spill] sm:$0xff] }
 0x903   : > { %v8135_v62 = vpop.f32.mrf.mxu2  ;;  %8628 = vmatpush.bf16.msrb.mxu3 %v20801_v54  ;;  %v8119_v59 = vadd.f32 %v8118_v15, %v8100_v30  ;;  %v20822_v18 = vld [vmem:[#allocation105_spill] sm:$0xff]  ;;  %v20823_v54 = vld [vmem:[#allocation111_spill] sm:$0xff] }
 0x904   : > { %v8136_v52 = vadd.f32 %v8135_v62, %v8117_v22  ;;  %8572 = vmatpush.bf16.msrb.mxu0 %v20802_v14  ;;  %v20819_v22 = vld [vmem:[#allocation106_spill] sm:$0xff]  ;;  %v20824_v30 = vld [vmem:[#allocation89_spill] sm:$0xff] }
 0x905   : > { %8591 = vmatpush.bf16.msrb.mxu1 %v20803_v3  ;;  %8610 = vmatpush.bf16.msrb.mxu2 %v17549_v37  ;;  %v20808_v37 = vld [vmem:[#allocation94_spill] sm:$0xff] }
 0x906   : > { %v8155_v34 = vadd.f32 %v8154_v44, %v8136_v52 }
 0x907   : > { %8629 = vmatpush.bf16.msrb.mxu3 %v20804_v32  ;;  %v20826_v32 = vld [vmem:[#allocation45_spill] sm:$0xff] }
 0x908   : > { %v8479_v46 = vmax.f32 %v8155_v34, 0.0  ;;  %v8168_v48 = vpop.f32.mrf.mxu0  ;;  %8573 = vmatpush.bf16.msrb.mxu0 %v20805_v10  ;;  %v20828_v10 = vld [vmem:[#allocation110_spill] sm:$0xff] }
 0x909   : > { %v8187_v4 = vpop.f32.mrf.mxu1  ;;  %8592 = vmatpush.bf16.msrb.mxu1 %v20806_v43  ;;  %v8156_v17 = vpop.f32.mrf.mxu3  ;;  %8611 = vmatpush.bf16.msrb.mxu2 %v20807_v25  ;;  %v8169_v24 = vadd.f32 %v8168_v48, %v19299_v2 }
 0x90a   : > { %9067 = vst [vmem:[%s19023_s27 + $0x80] sm:$0xff] %v8479_v46  ;;  %v20825_v46 = vld [vmem:[#allocation46_spill] sm:$0xff] }
 0x90b   : > { %v8137_v19 = vpop.f32.mrf.mxu2  ;;  %8630 = vmatpush.bf16.msrb.mxu3 %v20808_v37  ;;  %8499 = vmatmul.bf16.vlgmr.msra.gmra.mxu0 %v18479_v45  ;;  %v8188_v13 = vadd.f32 %v8187_v4, %v8169_v24  ;;  %v20827_v4 = vld [vmem:[#allocation113_spill] sm:$0xff]  ;;  %v20832_v24 = vld [vmem:[#allocation114_spill] sm:$0xff] }
 0x90c   : > { %v8138_v9 = vadd.f32 %v8137_v19, %v8119_v59  ;;  %8518 = vmatmul.bf16.vlgmr.msra.gmra.mxu1 %v18481_v29  ;;  %8574 = vmatpush.bf16.msrb.mxu0 %v20809_v60  ;;  %v20829_v19 = vld [vmem:[#allocation115_spill] sm:$0xff] }
 0x90d   : > { %8593 = vmatpush.bf16.msrb.mxu1 %v20810_v41  ;;  %8612 = vmatpush.bf16.msrb.mxu2 %v20811_v57  ;;  %v20833_v57 = vld [vmem:[#allocation120_spill] sm:$0xff] }
 0x90e   : > { %v8157_v11 = vadd.f32 %v8156_v17, %v8138_v9  ;;  %8537 = vmatmul.bf16.vlgmr.msra.gmra.mxu2 %v18794_v55  ;;  %8556 = vmatmul.bf16.vlgmr.msra.gmra.mxu3 %v18796_v12  ;;  %v20830_v17 = vld [vmem:[#allocation93_spill] sm:$0xff] }
 0x90f   : > { %8631 = vmatpush.bf16.msrb.mxu3 %v20812_v16  ;;  %v20834_v16 = vld [vmem:[#allocation97_spill] sm:$0xff] }
 0x910   : > { %v8486_v61 = vmax.f32 %v8157_v11, 0.0  ;;  %8643 = vmatpush.bf16.msra.mxu0 %v20813_v7  ;;  %v8170_v26 = vpop.f32.mrf.mxu0  ;;  %v20831_v11 = vld [vmem:[#allocation117_spill] sm:$0xff] }
 0x911   : > { %8662 = vmatpush.bf16.msra.mxu1 %v20814_v31  ;;  %v8189_v39 = vpop.f32.mrf.mxu1  ;;  %8681 = vmatpush.bf16.msra.mxu2 %v20815_v51  ;;  %v8225_v56 = vpop.f32.mrf.mxu3  ;;  %v8171_v40 = vadd.f32 %v8170_v26, %v19299_v2  ;;  %v20836_v26 = vld [vmem:[#allocation118_spill] sm:$0xff]  ;;  %v20837_v51 = vld [vmem:[#allocation124_spill] sm:$0xff] }
 0x912   : > { %9074 = vst [vmem:[%s19023_s27 + $0xb8] sm:$0xff] %v8486_v61 }
 0x913   : > { %8700 = vmatpush.bf16.msra.mxu3 %v20816_v5  ;;  %v8206_v6 = vpop.f32.mrf.mxu2  ;;  %v8190_v62 = vadd.f32 %v8189_v39, %v8171_v40  ;;  %v20838_v5 = vld [vmem:[#allocation102_spill] sm:$0xff] }
 0x914   : > { %v8207_v28 = vadd.f32 %v8206_v6, %v8188_v13  ;;  %8644 = vmatpush.bf16.msra.mxu0 %v20817_v42  ;;  %v20835_v13 = vld [vmem:[#allocation121_spill] sm:$0xff]  ;;  %v20840_v40 = vld [vmem:[#allocation122_spill] sm:$0xff] }
 0x915   : > { %8663 = vmatpush.bf16.msra.mxu1 %v20818_v33  ;;  %8682 = vmatpush.bf16.msra.mxu2 %v20819_v22  ;;  %v20839_v33 = vld [vmem:[#allocation125_spill] sm:$0xff] }
 0x916   : > { %v8226_v27 = vadd.f32 %v8225_v56, %v8207_v28  ;;  %v19350_v56 = vperm.slane %v18832_v50, 4 }
 0x917   : > { %8701 = vmatpush.bf16.msra.mxu3 %v20820_v36 }
 0x918   : > { %v8466_v15 = vmax.f32 %v8226_v27, 0.0  ;;  %8645 = vmatpush.bf16.msra.mxu0 %v20821_v1  ;;  %v8173_v44 = vpop.f32.mrf.mxu0  ;;  %v20842_v1 = vld [vmem:[#allocation107_spill] sm:$0xff] }
 0x919   : > { %8664 = vmatpush.bf16.msra.mxu1 %v20822_v18  ;;  %v8192_v52 = vpop.f32.mrf.mxu1  ;;  %8683 = vmatpush.bf16.msra.mxu2 %v20823_v54  ;;  %v8227_v14 = vpop.f32.mrf.mxu3  ;;  %v8174_v59 = vadd.f32 %v8173_v44, %v19299_v2  ;;  %v20844_v44 = vld [vmem:[#allocation126_spill] sm:$0xff]  ;;  %v20845_v54 = vld [vmem:[#allocation131_spill] sm:$0xff] }
 0x91a   : > { %9054 = vst [vmem:[%s19023_s27 + $0x18] sm:$0xff] %v8466_v15  ;;  %v20841_v15 = vld [vmem:[#allocation128_spill] sm:$0xff] }
 0x91b   : > { %8702 = vmatpush.bf16.msra.mxu3 %v20824_v30  ;;  %v8208_v34 = vpop.f32.mrf.mxu2  ;;  %8504 = vmatmul.bf16.gmra.mxu0 %v20825_v46  ;;  %v8193_v9 = vadd.f32 %v8192_v52, %v8174_v59  ;;  %v20846_v30 = vld [vmem:[#allocation112_spill] sm:$0xff] }
 0x91c   : > { %v8209_v3 = vadd.f32 %v8208_v34, %v8190_v62  ;;  %8523 = vmatmul.bf16.gmra.mxu1 %v20826_v32  ;;  %8646 = vmatpush.bf16.msra.mxu0 %v20827_v4  ;;  %v20843_v62 = vld [vmem:[#allocation129_spill] sm:$0xff]  ;;  %v20849_v4 = vld [vmem:[#allocation135_spill] sm:$0xff] }
 0x91d   : > { %8665 = vmatpush.bf16.msra.mxu1 %v20828_v10  ;;  %8684 = vmatpush.bf16.msra.mxu2 %v20829_v19  ;;  %v20847_v34 = vld [vmem:[#allocation133_spill] sm:$0xff]  ;;  %v20850_v10 = vld [vmem:[#allocation116_spill] sm:$0xff] }
 0x91e   : > { %v8228_v48 = vadd.f32 %v8227_v14, %v8209_v3  ;;  %8542 = vmatmul.bf16.gmra.mxu2 %v18965_v35  ;;  %8561 = vmatmul.bf16.gmra.mxu3 %v18967_v38  ;;  %v20848_v14 = vld [vmem:[#allocation130_spill] sm:$0xff] }
 0x91f   : > { %8703 = vmatpush.bf16.msra.mxu3 %v20830_v17 }
 0x920   : > { %v8473_v43 = vmax.f32 %v8228_v48, 0.0  ;;  %v8175_v25 = vpop.f32.mrf.mxu0  ;;  %8647 = vmatpush.bf16.msra.mxu0 %v20831_v11 }
 0x921   : > { %v8194_v37 = vpop.f32.mrf.mxu1  ;;  %8666 = vmatpush.bf16.msra.mxu1 %v20832_v24  ;;  %v8230_v41 = vpop.f32.mrf.mxu3  ;;  %8685 = vmatpush.bf16.msra.mxu2 %v20833_v57  ;;  %v8176_v7 = vadd.f32 %v8175_v25, %v19299_v2  ;;  %v20852_v25 = vld [vmem:[#allocation132_spill] sm:$0xff]  ;;  %v20853_v24 = vld [vmem:[#allocation119_spill] sm:$0xff] }
 0x922   : > { %9061 = vst [vmem:[%s19023_s27 + $0x50] sm:$0xff] %v8473_v43  ;;  %v20856_v57 = vld [vmem:[#allocation136_spill] sm:$0xff] }
 0x923   : > { %v8211_v60 = vpop.f32.mrf.mxu2  ;;  %8704 = vmatpush.bf16.msra.mxu3 %v20834_v16  ;;  %v8195_v6 = vadd.f32 %v8194_v37, %v8176_v7 }
 0x924   : > { %v8212_v61 = vadd.f32 %v8211_v60, %v8193_v9  ;;  %8648 = vmatpush.bf16.msra.mxu0 %v20835_v13  ;;  %v20851_v9 = vld [vmem:[#allocation137_spill] sm:$0xff]  ;;  %v20854_v60 = vld [vmem:[#allocation139_spill] sm:$0xff] }
 0x925   : > { %8667 = vmatpush.bf16.msra.mxu1 %v20836_v26  ;;  %8686 = vmatpush.bf16.msra.mxu2 %v20837_v51  ;;  %v20857_v13 = vld [vmem:[#allocation123_spill] sm:$0xff]  ;;  %v20858_v26 = vld [vmem:[#allocation142_spill] sm:$0xff] }
 0x926   : > { %v8231_v31 = vadd.f32 %v8230_v41, %v8212_v61  ;;  %v20855_v61 = vld [vmem:[#allocation138_spill] sm:$0xff] }
 0x927   : > { %8705 = vmatpush.bf16.msra.mxu3 %v20838_v5 }
 0x928   : > { %v8480_v39 = vmax.f32 %v8231_v31, 0.0  ;;  %v8244_v28 = vpop.f32.mrf.mxu0  ;;  %8649 = vmatpush.bf16.msra.mxu0 %v20839_v33  ;;  %v20860_v33 = vld [vmem:[#allocation127_spill] sm:$0xff] }
 0x929   : > { %v8263_v42 = vpop.f32.mrf.mxu1  ;;  %8668 = vmatpush.bf16.msra.mxu1 %v20840_v40  ;;  %v8232_v22 = vpop.f32.mrf.mxu3  ;;  %8687 = vmatpush.bf16.msra.mxu2 %v20841_v15  ;;  %v8245_v18 = vadd.f32 %v8244_v28, %v19350_v56 }
 0x92a   : > { %9068 = vst [vmem:[%s19023_s27 + $0x88] sm:$0xff] %v8480_v39 }
 0x92b   : > { %v8213_v27 = vpop.f32.mrf.mxu2  ;;  %8706 = vmatpush.bf16.msra.mxu3 %v20842_v1  ;;  %8575 = vmatmul.bf16.vlgmr.msrb.gmra.mxu0 %v18479_v45  ;;  %v8264_v3 = vadd.f32 %v8263_v42, %v8245_v18  ;;  %v20859_v42 = vld [vmem:[#allocation141_spill] sm:$0xff]  ;;  %v20864_v18 = vld [vmem:[#allocation146_spill] sm:$0xff] }
 0x92c   : > { %v8214_v36 = vadd.f32 %v8213_v27, %v8195_v6  ;;  %8594 = vmatmul.bf16.vlgmr.msrb.gmra.mxu1 %v18481_v29  ;;  %8650 = vmatpush.bf16.msra.mxu0 %v20843_v62  ;;  %v20861_v27 = vld [vmem:[#allocation145_spill] sm:$0xff] }
 0x92d   : > { %8669 = vmatpush.bf16.msra.mxu1 %v20844_v44  ;;  %8688 = vmatpush.bf16.msra.mxu2 %v20845_v54  ;;  %v20865_v54 = vld [vmem:[#allocation140_spill] sm:$0xff] }
 0x92e   : > { %v8233_v50 = vadd.f32 %v8232_v22, %v8214_v36  ;;  %8613 = vmatmul.bf16.vlgmr.msrb.gmra.mxu2 %v18794_v55  ;;  %8632 = vmatmul.bf16.vlgmr.msrb.gmra.mxu3 %v18796_v12  ;;  %v20862_v22 = vld [vmem:[#allocation144_spill] sm:$0xff] }
 0x92f   : > { %8707 = vmatpush.bf16.msra.mxu3 %v20846_v30  ;;  %v20866_v30 = vld [vmem:[#allocation152_spill] sm:$0xff] }
 0x930   : > { %v8487_v52 = vmax.f32 %v8233_v50, 0.0  ;;  %8719 = vmatpush.bf16.msrb.mxu0 %v20847_v34  ;;  %v8246_v59 = vpop.f32.mrf.mxu0  ;;  %v20863_v50 = vld [vmem:[#allocation134_spill] sm:$0xff] }
 0x931   : > { %8738 = vmatpush.bf16.msrb.mxu1 %v20848_v14  ;;  %v8265_v48 = vpop.f32.mrf.mxu1  ;;  %8757 = vmatpush.bf16.msrb.mxu2 %v20849_v4  ;;  %v8301_v19 = vpop.f32.mrf.mxu3  ;;  %v8247_v37 = vadd.f32 %v8246_v59, %v19350_v56  ;;  %v20868_v59 = vld [vmem:[#allocation143_spill] sm:$0xff]  ;;  %v20869_v4 = vld [vmem:[#allocation157_spill] sm:$0xff] }
 0x932   : > { %9075 = vst [vmem:[%s19023_s27 + $0xc0] sm:$0xff] %v8487_v52 }
 0x933   : > { %8776 = vmatpush.bf16.msrb.mxu3 %v20850_v10  ;;  %v8282_v43 = vpop.f32.mrf.mxu2  ;;  %v8266_v16 = vadd.f32 %v8265_v48, %v8247_v37  ;;  %v20870_v10 = vld [vmem:[#allocation154_spill] sm:$0xff]  ;;  %v20871_v37 = vld [vmem:[#allocation147_spill] sm:$0xff] }
 0x934   : > { %v8283_v17 = vadd.f32 %v8282_v43, %v8264_v3  ;;  %8720 = vmatpush.bf16.msrb.mxu0 %v20851_v9  ;;  %v20867_v3 = vld [vmem:[#allocation149_spill] sm:$0xff] }
 0x935   : > { %8739 = vmatpush.bf16.msrb.mxu1 %v20852_v25  ;;  %8758 = vmatpush.bf16.msrb.mxu2 %v20853_v24 }
 0x936   : > { %v8302_v11 = vadd.f32 %v8301_v19, %v8283_v17  ;;  %v19403_v19 = vld [vmem:[%s19720_s24] sm:$0x7f] }
 0x937   : > { %8777 = vmatpush.bf16.msrb.mxu3 %v20854_v60  ;;  %v19406_v17 = vperm.slane %v19403_v19, 5 }
 0x938   : > { %v8467_v41 = vmax.f32 %v8302_v11, 0.0  ;;  %8721 = vmatpush.bf16.msrb.mxu0 %v20855_v61  ;;  %v8249_v7 = vpop.f32.mrf.mxu0  ;;  %v20872_v11 = vld [vmem:[#allocation158_spill] sm:$0xff] }
 0x939   : > { %8740 = vmatpush.bf16.msrb.mxu1 %v20856_v57  ;;  %v8268_v31 = vpop.f32.mrf.mxu1  ;;  %8759 = vmatpush.bf16.msrb.mxu2 %v20857_v13  ;;  %v8303_v51 = vpop.f32.mrf.mxu3  ;;  %v8250_v6 = vadd.f32 %v8249_v7, %v19350_v56  ;;  %v20873_v61 = vld [vmem:[#allocation150_spill] sm:$0xff]  ;;  %v20874_v57 = vld [vmem:[#allocation164_spill] sm:$0xff] }
 0x93a   : > { %9055 = vst [vmem:[%s19023_s27 + $0x20] sm:$0xff] %v8467_v41  ;;  %v20876_v13 = vld [vmem:[#allocation148_spill] sm:$0xff] }
 0x93b   : > { %8778 = vmatpush.bf16.msrb.mxu3 %v20858_v26  ;;  %v8284_v39 = vpop.f32.mrf.mxu2  ;;  %8580 = vmatmul.bf16.gmra.mxu0 %v20825_v46  ;;  %v8269_v36 = vadd.f32 %v8268_v31, %v8250_v6  ;;  %v20875_v31 = vld [vmem:[#allocation159_spill] sm:$0xff]  ;;  %v20880_v6 = vld [vmem:[#allocation153_spill] sm:$0xff] }
 0x93c   : > { %v8285_v5 = vadd.f32 %v8284_v39, %v8266_v16  ;;  %8599 = vmatmul.bf16.gmra.mxu1 %v20826_v32  ;;  %8722 = vmatpush.bf16.msrb.mxu0 %v20859_v42  ;;  %v20877_v39 = vld [vmem:[#allocation151_spill] sm:$0xff] }
 0x93d   : > { %8741 = vmatpush.bf16.msrb.mxu1 %v20860_v33  ;;  %8760 = vmatpush.bf16.msrb.mxu2 %v20861_v27  ;;  %v20882_v27 = vld [vmem:[#allocation167_spill] sm:$0xff] }
 0x93e   : > { %v8304_v28 = vadd.f32 %v8303_v51, %v8285_v5  ;;  %8618 = vmatmul.bf16.gmra.mxu2 %v18965_v35  ;;  %8637 = vmatmul.bf16.gmra.mxu3 %v18967_v38  ;;  %v20878_v51 = vld [vmem:[#allocation166_spill] sm:$0xff] }
 0x93f   : > { %8779 = vmatpush.bf16.msrb.mxu3 %v20862_v22  ;;  %v20879_v5 = vld [vmem:[#allocation162_spill] sm:$0xff] }
 0x940   : > { %v8474_v40 = vmax.f32 %v8304_v28, 0.0  ;;  %v8251_v15 = vpop.f32.mrf.mxu0  ;;  %8723 = vmatpush.bf16.msrb.mxu0 %v20863_v50  ;;  %v20884_v50 = vld [vmem:[#allocation161_spill] sm:$0xff] }
 0x941   : > { %v8270_v1 = vpop.f32.mrf.mxu1  ;;  %8742 = vmatpush.bf16.msrb.mxu1 %v20864_v18  ;;  %v8306_v44 = vpop.f32.mrf.mxu3  ;;  %8761 = vmatpush.bf16.msrb.mxu2 %v20865_v54  ;;  %v8252_v34 = vadd.f32 %v8251_v15, %v19350_v56 }
 0x942   : > { %9062 = vst [vmem:[%s19023_s27 + $0x58] sm:$0xff] %v8474_v40  ;;  %v20881_v40 = vld [vmem:[#allocation155_spill] sm:$0xff] }
 0x943   : > { %v8287_v62 = vpop.f32.mrf.mxu2  ;;  %8780 = vmatpush.bf16.msrb.mxu3 %v20866_v30  ;;  %v8271_v43 = vadd.f32 %v8270_v1, %v8252_v34  ;;  %v20883_v1 = vld [vmem:[#allocation156_spill] sm:$0xff]  ;;  %v20887_v30 = vld [vmem:[#allocation165_spill] sm:$0xff]  ;;  %v20888_v34 = vld [vmem:[#allocation163_spill] sm:$0xff] }
 0x944   : > { %v8288_v52 = vadd.f32 %v8287_v62, %v8269_v36  ;;  %8724 = vmatpush.bf16.msrb.mxu0 %v20867_v3 }
 0x945   : > { %8743 = vmatpush.bf16.msrb.mxu1 %v20868_v59  ;;  %8762 = vmatpush.bf16.msrb.mxu2 %v20869_v4  ;;  %v20890_v4 = vld [vmem:[#allocation168_spill] sm:$0xff] }
 0x946   : > { %v8307_v14 = vadd.f32 %v8306_v44, %v8288_v52  ;;  %v20885_v44 = vld [vmem:[#allocation170_spill] sm:$0xff]  ;;  %v20886_v52 = vld [vmem:[#allocation160_spill] sm:$0xff] }
 0x947   : > { %8781 = vmatpush.bf16.msrb.mxu3 %v20870_v10 }
 0x948   : > { %v8481_v48 = vmax.f32 %v8307_v14, 0.0  ;;  %v8320_v9 = vpop.f32.mrf.mxu0  ;;  %8725 = vmatpush.bf16.msrb.mxu0 %v20871_v37 }
 0x949   : > { %v8339_v25 = vpop.f32.mrf.mxu1  ;;  %8744 = vmatpush.bf16.msrb.mxu1 %v20872_v11  ;;  %v8308_v60 = vpop.f32.mrf.mxu3  ;;  %8763 = vmatpush.bf16.msrb.mxu2 %v20873_v61  ;;  %v8321_v7 = vadd.f32 %v8320_v9, %v19406_v17  ;;  %v20891_v11 = vld [vmem:[#allocation171_spill] sm:$0xff] }
 0x94a   : > { %9069 = vst [vmem:[%s19023_s27 + $0x90] sm:$0xff] %v8481_v48  ;;  %v20889_v48 = vld [vmem:[#allocation169_spill] sm:$0xff]  ;;  %v20894_v61 = vld [vmem:[#allocation19_spill] sm:$0xff] }
 0x94b   : > { %v8289_v24 = vpop.f32.mrf.mxu2  ;;  %8782 = vmatpush.bf16.msrb.mxu3 %v20874_v57  ;;  %8651 = vmatmul.bf16.vlgmr.msra.gmra.mxu0 %v18479_v45  ;;  %v8340_v28 = vadd.f32 %v8339_v25, %v8321_v7 }
 0x94c   : > { %v8290_v41 = vadd.f32 %v8289_v24, %v8271_v43  ;;  %8670 = vmatmul.bf16.vlgmr.msra.gmra.mxu1 %v18481_v29  ;;  %8726 = vmatpush.bf16.msrb.mxu0 %v20875_v31  ;;  %v20892_v24 = vld [vmem:[#allocation20_spill] sm:$0xff]  ;;  %v20895_v31 = vld [vmem:[#allocation21_spill] sm:$0xff] }
 0x94d   : > { %8745 = vmatpush.bf16.msrb.mxu1 %v20876_v13  ;;  %8764 = vmatpush.bf16.msrb.mxu2 %v20877_v39  ;;  %v20896_v13 = vld [vmem:[#allocation13_spill] sm:$0xff] }
 0x94e   : > { %v8309_v16 = vadd.f32 %v8308_v60, %v8290_v41  ;;  %8689 = vmatmul.bf16.vlgmr.msra.gmra.mxu2 %v18794_v55  ;;  %8708 = vmatmul.bf16.vlgmr.msra.gmra.mxu3 %v18796_v12  ;;  %v20893_v41 = vld [vmem:[#allocation17_spill] sm:$0xff] }
 0x94f   : > { %8783 = vmatpush.bf16.msrb.mxu3 %v20878_v51 }
 0x950   : > { %v8488_v26 = vmax.f32 %v8309_v16, 0.0  ;;  %8795 = vmatpush.bf16.msra.mxu0 %v20879_v5  ;;  %v8322_v42 = vpop.f32.mrf.mxu0  ;;  %v20897_v5 = vld [vmem:[#allocation22_spill] sm:$0xff] }
 0x951   : > { %8814 = vmatpush.bf16.msra.mxu1 %v20880_v6  ;;  %v8341_v33 = vpop.f32.mrf.mxu1  ;;  %8833 = vmatpush.bf16.msra.mxu2 %v20881_v40  ;;  %v8377_v36 = vpop.f32.mrf.mxu3  ;;  %v8323_v18 = vadd.f32 %v8322_v42, %v19406_v17  ;;  %v20898_v6 = vld [vmem:[#allocation24_spill] sm:$0xff] }
 0x952   : > { %9076 = vst [vmem:[%s19023_s27 + $0xc8] sm:$0xff] %v8488_v26  ;;  %v20900_v40 = vld [vmem:[#allocation16_spill] sm:$0xff] }
 0x953   : > { %8852 = vmatpush.bf16.msra.mxu3 %v20882_v27  ;;  %v8358_v22 = vpop.f32.mrf.mxu2  ;;  %v8342_v14 = vadd.f32 %v8341_v33, %v8323_v18  ;;  %v20899_v33 = vld [vmem:[#allocation23_spill] sm:$0xff] }
 0x954   : > { %v8359_v15 = vadd.f32 %v8358_v22, %v8340_v28  ;;  %8796 = vmatpush.bf16.msra.mxu0 %v20883_v1  ;;  %v20901_v22 = vld [vmem:[#allocation18_spill] sm:$0xff]  ;;  %v19457_v1 = vperm.slane %v19403_v19, 6 }
 0x955   : > { %8815 = vmatpush.bf16.msra.mxu1 %v20884_v50  ;;  %8834 = vmatpush.bf16.msra.mxu2 %v20885_v44  ;;  %v20904_v44 = vld [vmem:[#allocation27_spill] sm:$0xff] }
 0x956   : > { %v8378_v62 = vadd.f32 %v8377_v36, %v8359_v15  ;;  %v20902_v36 = vld [vmem:[#allocation26_spill] sm:$0xff] }
 0x957   : > { %8853 = vmatpush.bf16.msra.mxu3 %v20886_v52 }
 0x958   : > { %v8468_v54 = vmax.f32 %v8378_v62, 0.0  ;;  %8797 = vmatpush.bf16.msra.mxu0 %v20887_v30  ;;  %v8325_v3 = vpop.f32.mrf.mxu0  ;;  %v20903_v62 = vld [vmem:[#allocation25_spill] sm:$0xff] }
 0x959   : > { %8816 = vmatpush.bf16.msra.mxu1 %v20888_v34  ;;  %v8344_v59 = vpop.f32.mrf.mxu1  ;;  %8835 = vmatpush.bf16.msra.mxu2 %v20889_v48  ;;  %v8379_v43 = vpop.f32.mrf.mxu3  ;;  %v8326_v25 = vadd.f32 %v8325_v3, %v19406_v17  ;;  %v20905_v34 = vld [vmem:[#allocation29_spill] sm:$0xff]  ;;  %v20908_v48 = vld [vmem:[#allocation32_spill] sm:$0xff] }
 0x95a   : > { %9056 = vst [vmem:[%s19023_s27 + $0x28] sm:$0xff] %v8468_v54 }
 0x95b   : > { %8854 = vmatpush.bf16.msra.mxu3 %v20890_v4  ;;  %v8360_v10 = vpop.f32.mrf.mxu2  ;;  %8656 = vmatmul.bf16.gmra.mxu0 %v20825_v46  ;;  %v8345_v57 = vadd.f32 %v8344_v59, %v8326_v25  ;;  %v20907_v59 = vld [vmem:[#allocation30_spill] sm:$0xff]  ;;  %v20912_v25 = vld [vmem:[#allocation35_spill] sm:$0xff] }
 0x95c   : > { %v8361_v9 = vadd.f32 %v8360_v10, %v8342_v14  ;;  %8675 = vmatmul.bf16.gmra.mxu1 %v20826_v32  ;;  %8798 = vmatpush.bf16.msra.mxu0 %v20891_v11  ;;  %v20906_v14 = vld [vmem:[#allocation28_spill] sm:$0xff]  ;;  %v20909_v10 = vld [vmem:[#allocation31_spill] sm:$0xff] }
 0x95d   : > { %8817 = vmatpush.bf16.msra.mxu1 %v20892_v24  ;;  %8836 = vmatpush.bf16.msra.mxu2 %v20893_v41  ;;  %v20914_v41 = vld [vmem:[#allocation39_spill] sm:$0xff] }
 0x95e   : > { %v8380_v37 = vadd.f32 %v8379_v43, %v8361_v9  ;;  %8694 = vmatmul.bf16.gmra.mxu2 %v18965_v35  ;;  %8713 = vmatmul.bf16.gmra.mxu3 %v18967_v38  ;;  %v20910_v43 = vld [vmem:[#allocation36_spill] sm:$0xff]  ;;  %v20911_v9 = vld [vmem:[#allocation33_spill] sm:$0xff] }
 0x95f   : > { %8855 = vmatpush.bf16.msra.mxu3 %v20894_v61 }
 0x960   : > { %v8475_v60 = vmax.f32 %v8380_v37, 0.0  ;;  %v8327_v16 = vpop.f32.mrf.mxu0  ;;  %8799 = vmatpush.bf16.msra.mxu0 %v20895_v31  ;;  %v20916_v31 = vld [vmem:[#allocation41_spill] sm:$0xff] }
 0x961   : > { %v8346_v7 = vpop.f32.mrf.mxu1  ;;  %8818 = vmatpush.bf16.msra.mxu1 %v20896_v13  ;;  %v8382_v39 = vpop.f32.mrf.mxu3  ;;  %8837 = vmatpush.bf16.msra.mxu2 %v20897_v5  ;;  %v8328_v28 = vadd.f32 %v8327_v16, %v19406_v17 }
 0x962   : > { %9063 = vst [vmem:[%s19023_s27 + $0x60] sm:$0xff] %v8475_v60  ;;  %v20913_v60 = vld [vmem:[#allocation40_spill] sm:$0xff] }
 0x963   : > { %v8363_v26 = vpop.f32.mrf.mxu2  ;;  %8856 = vmatpush.bf16.msra.mxu3 %v20898_v6  ;;  %v8347_v15 = vadd.f32 %v8346_v7, %v8328_v28  ;;  %v20915_v7 = vld [vmem:[#allocation37_spill] sm:$0xff]  ;;  %v20919_v6 = vld [vmem:[#allocation14_spill] sm:$0xff]  ;;  %v20920_v28 = vld [vmem:[#allocation15_spill] sm:$0xff] }
 0x964   : > { %v8364_v51 = vadd.f32 %v8363_v26, %v8345_v57  ;;  %8800 = vmatpush.bf16.msra.mxu0 %v20899_v33 }
 0x965   : > { %8819 = vmatpush.bf16.msra.mxu1 %v20900_v40  ;;  %8838 = vmatpush.bf16.msra.mxu2 %v20901_v22  ;;  %v20922_v22 = vld [vmem:[#allocation44_spill] sm:$0xff] }
 0x966   : > { %v8383_v42 = vadd.f32 %v8382_v39, %v8364_v51  ;;  %v20917_v39 = vld [vmem:[#allocation43_spill] sm:$0xff]  ;;  %v20918_v51 = vld [vmem:[#allocation34_spill] sm:$0xff] }
 0x967   : > { %8857 = vmatpush.bf16.msra.mxu3 %v20902_v36 }
 0x968   : > { %v8482_v27 = vmax.f32 %v8383_v42, 0.0  ;;  %v8396_v50 = vpop.f32.mrf.mxu0  ;;  %8801 = vmatpush.bf16.msra.mxu0 %v20903_v62 }
 0x969   : > { %v8415_v18 = vpop.f32.mrf.mxu1  ;;  %8820 = vmatpush.bf16.msra.mxu1 %v20904_v44  ;;  %v8384_v54 = vpop.f32.mrf.mxu3  ;;  %8839 = vmatpush.bf16.msra.mxu2 %v20905_v34  ;;  %v8397_v3 = vadd.f32 %v8396_v50, %v19457_v1  ;;  %v20923_v44 = vld [vmem:[#allocation50_spill] sm:$0xff] }
 0x96a   : > { %9070 = vst [vmem:[%s19023_s27 + $0x98] sm:$0xff] %v8482_v27  ;;  %v20921_v27 = vld [vmem:[#allocation47_spill] sm:$0xff]  ;;  %v20926_v34 = vld [vmem:[#allocation38_spill] sm:$0xff] }
 0x96b   : > { %v8365_v52 = vpop.f32.mrf.mxu2  ;;  %8858 = vmatpush.bf16.msra.mxu3 %v20906_v14  ;;  %8727 = vmatmul.bf16.vlgmr.msrb.gmra.mxu0 %v18479_v45  ;;  %v8416_v37 = vadd.f32 %v8415_v18, %v8397_v3 }
 0x96c   : > { %v8366_v30 = vadd.f32 %v8365_v52, %v8347_v15  ;;  %8746 = vmatmul.bf16.vlgmr.msrb.gmra.mxu1 %v18481_v29  ;;  %8802 = vmatpush.bf16.msra.mxu0 %v20907_v59  ;;  %v20924_v52 = vld [vmem:[#allocation51_spill] sm:$0xff]  ;;  %v20927_v59 = vld [vmem:[#allocation54_spill] sm:$0xff] }
 0x96d   : > { %8821 = vmatpush.bf16.msra.mxu1 %v20908_v48  ;;  %8840 = vmatpush.bf16.msra.mxu2 %v20909_v10  ;;  %v20928_v48 = vld [vmem:[#allocation55_spill] sm:$0xff] }
 0x96e   : > { %v8385_v19 = vadd.f32 %v8384_v54, %v8366_v30  ;;  %8765 = vmatmul.bf16.vlgmr.msrb.gmra.mxu2 %v18794_v55  ;;  %8784 = vmatmul.bf16.vlgmr.msrb.gmra.mxu3 %v18796_v12  ;;  %v20925_v30 = vld [vmem:[#allocation48_spill] sm:$0xff] }
 0x96f   : > { %8859 = vmatpush.bf16.msra.mxu3 %v20910_v43 }
 0x970   : > { %v8489_v4 = vmax.f32 %v8385_v19, 0.0  ;;  %8871 = vmatpush.bf16.msrb.mxu0 %v20911_v9  ;;  %v8398_v11 = vpop.f32.mrf.mxu0  ;;  %v20929_v9 = vld [vmem:[#allocation52_spill] sm:$0xff] }
 0x971   : > { %8890 = vmatpush.bf16.msrb.mxu1 %v20912_v25  ;;  %v8417_v24 = vpop.f32.mrf.mxu1  ;;  %8909 = vmatpush.bf16.msrb.mxu2 %v20913_v60  ;;  %v8453_v57 = vpop.f32.mrf.mxu3  ;;  %v8399_v13 = vadd.f32 %v8398_v11, %v19457_v1  ;;  %v20930_v25 = vld [vmem:[#allocation42_spill] sm:$0xff]  ;;  %v20932_v60 = vld [vmem:[#allocation59_spill] sm:$0xff] }
 0x972   : > { %9077 = vst [vmem:[%s19023_s27 + $0xd0] sm:$0xff] %v8489_v4 }
 0x973   : > { %8928 = vmatpush.bf16.msrb.mxu3 %v20914_v41  ;;  %v8434_v61 = vpop.f32.mrf.mxu2  ;;  %v8418_v42 = vadd.f32 %v8417_v24, %v8399_v13  ;;  %v20931_v24 = vld [vmem:[#allocation58_spill] sm:$0xff]  ;;  %v20935_v13 = vld [vmem:[#allocation60_spill] sm:$0xff] }
 0x974   : > { %v8435_v16 = vadd.f32 %v8434_v61, %v8416_v37  ;;  %8872 = vmatpush.bf16.msrb.mxu0 %v20915_v7  ;;  %v20933_v61 = vld [vmem:[#allocation56_spill] sm:$0xff] }
 0x975   : > { %8891 = vmatpush.bf16.msrb.mxu1 %v20916_v31  ;;  %8910 = vmatpush.bf16.msrb.mxu2 %v20917_v39 }
 0x976   : > { %v8454_v26 = vadd.f32 %v8453_v57, %v8435_v16  ;;  %v20934_v57 = vld [vmem:[#allocation49_spill] sm:$0xff] }
 0x977   : > { %8929 = vmatpush.bf16.msrb.mxu3 %v20918_v51 }
 0x978   : > { %v8469_v5 = vmax.f32 %v8454_v26, 0.0  ;;  %8873 = vmatpush.bf16.msrb.mxu0 %v20919_v6  ;;  %v8401_v33 = vpop.f32.mrf.mxu0  ;;  %v20936_v26 = vld [vmem:[#allocation172_spill] sm:$0xff]  ;;  %v20937_v6 = vld [vmem:[#allocation173_spill] sm:$0xff] }
 0x979   : > { %8892 = vmatpush.bf16.msrb.mxu1 %v20920_v28  ;;  %v8420_v40 = vpop.f32.mrf.mxu1  ;;  %8911 = vmatpush.bf16.msrb.mxu2 %v20921_v27  ;;  %v8455_v15 = vpop.f32.mrf.mxu3  ;;  %v8402_v18 = vadd.f32 %v8401_v33, %v19457_v1  ;;  %v20938_v28 = vld [vmem:[#allocation174_spill] sm:$0xff]  ;;  %v20940_v27 = vld [vmem:[#allocation176_spill] sm:$0xff] }
 0x97a   : > { %9057 = vst.msk [vmem:[%s19023_s27 + $0x30] sm:$0xff] %vm2047_vm0, %v8469_v5 }
 0x97b   : > { %8930 = vmatpush.bf16.msrb.mxu3 %v20922_v22  ;;  %v8436_v36 = vpop.f32.mrf.mxu2  ;;  %8732 = vmatmul.bf16.gmra.mxu0 %v20825_v46  ;;  %v8421_v14 = vadd.f32 %v8420_v40, %v8402_v18  ;;  %v20939_v40 = vld [vmem:[#allocation175_spill] sm:$0xff] }
 0x97c   : > { %v8437_v50 = vadd.f32 %v8436_v36, %v8418_v42  ;;  %8751 = vmatmul.bf16.gmra.mxu1 %v20826_v32  ;;  %8874 = vmatpush.bf16.msrb.mxu0 %v20923_v44  ;;  %v20941_v36 = vld [vmem:[#allocation177_spill] sm:$0xff] }
 0x97d   : > { %8893 = vmatpush.bf16.msrb.mxu1 %v20924_v52  ;;  %8912 = vmatpush.bf16.msrb.mxu2 %v20925_v30  ;;  %v20944_v52 = vld [vmem:[#allocation180_spill] sm:$0xff] }
 0x97e   : > { %v8456_v62 = vadd.f32 %v8455_v15, %v8437_v50  ;;  %8770 = vmatmul.bf16.gmra.mxu2 %v18965_v35  ;;  %8789 = vmatmul.bf16.gmra.mxu3 %v18967_v38  ;;  %v20942_v15 = vld [vmem:[#allocation178_spill] sm:$0xff]  ;;  %v20943_v50 = vld [vmem:[#allocation179_spill] sm:$0xff] }
 0x97f   : > { %8931 = vmatpush.bf16.msrb.mxu3 %v20926_v34 }
 0x980   : > { %v8476_v54 = vmax.f32 %v8456_v62, 0.0  ;;  %v8403_v19 = vpop.f32.mrf.mxu0  ;;  %8875 = vmatpush.bf16.msrb.mxu0 %v20927_v59 }
 0x981   : > { %v8422_v3 = vpop.f32.mrf.mxu1  ;;  %8894 = vmatpush.bf16.msrb.mxu1 %v20928_v48  ;;  %v8458_v10 = vpop.f32.mrf.mxu3  ;;  %8913 = vmatpush.bf16.msrb.mxu2 %v20929_v9  ;;  %v8404_v37 = vadd.f32 %v8403_v19, %v19457_v1  ;;  %v20946_v19 = vld [vmem:[#allocation182_spill] sm:$0xff]  ;;  %v20948_v48 = vld [vmem:[#allocation184_spill] sm:$0xff]  ;;  %v20951_v9 = vld [vmem:[#allocation187_spill] sm:$0xff] }
 0x982   : > { %9064 = vst.msk [vmem:[%s19023_s27 + $0x68] sm:$0xff] %vm2047_vm0, %v8476_v54  ;;  %v20945_v54 = vld [vmem:[#allocation181_spill] sm:$0xff] }
 0x983   : > { %v8439_v4 = vpop.f32.mrf.mxu2  ;;  %8932 = vmatpush.bf16.msrb.mxu3 %v20930_v25  ;;  %v8423_v16 = vadd.f32 %v8422_v3, %v8404_v37  ;;  %v20947_v3 = vld [vmem:[#allocation183_spill] sm:$0xff] }
 0x984   : > { %v8440_v43 = vadd.f32 %v8439_v4, %v8421_v14  ;;  %8876 = vmatpush.bf16.msrb.mxu0 %v20931_v24  ;;  %v20949_v4 = vld [vmem:[#allocation185_spill] sm:$0xff]  ;;  %v20952_v24 = vld [vmem:[#allocation188_spill] sm:$0xff] }
 0x985   : > { %8895 = vmatpush.bf16.msrb.mxu1 %v20932_v60  ;;  %8914 = vmatpush.bf16.msrb.mxu2 %v20933_v61  ;;  %v20953_v60 = vld [vmem:[#allocation189_spill] sm:$0xff] }
 0x986   : > { %v8459_v11 = vadd.f32 %v8458_v10, %v8440_v43  ;;  %v20950_v43 = vld [vmem:[#allocation186_spill] sm:$0xff] }
 0x987   : > { %8933 = vmatpush.bf16.msrb.mxu3 %v20934_v57 }
 0x988   : > { %v8483_v41 = vmax.f32 %v8459_v11, 0.0  ;;  %v8500_v7 = vpop.f32.mrf.mxu0  ;;  %8877 = vmatpush.bf16.msrb.mxu0 %v20935_v13  ;;  %v20955_v13 = vld [vmem:[#allocation191_spill] sm:$0xff] }
 0x989   : > { %v8519_v31 = vpop.f32.mrf.mxu1  ;;  %8896 = vmatpush.bf16.msrb.mxu1 %v20936_v26  ;;  %v8460_v51 = vpop.f32.mrf.mxu3  ;;  %8915 = vmatpush.bf16.msrb.mxu2 %v20937_v6  ;;  %v8501_v33 = vadd.f32 %v8500_v7, %v18856_v23 }
 0x98a   : > { %9071 = vst.msk [vmem:[%s19023_s27 + $0xa0] sm:$0xff] %vm2047_vm0, %v8483_v41 }
 0x98b   : > { %v8441_v39 = vpop.f32.mrf.mxu2  ;;  %8934 = vmatpush.bf16.msrb.mxu3 %v20938_v28  ;;  %8803 = vmatmul.bf16.vlgmr.msra.gmra.mxu0 %v18479_v45  ;;  %v8520_v18 = vadd.f32 %v8519_v31, %v8501_v33  ;;  %v20954_v31 = vld [vmem:[#allocation190_spill] sm:$0xff]  ;;  %v20959_v33 = vld [vmem:[#allocation195_spill] sm:$0xff] }
 0x98c   : > { %v8442_v5 = vadd.f32 %v8441_v39, %v8423_v16  ;;  %8822 = vmatmul.bf16.vlgmr.msra.gmra.mxu1 %v18481_v29  ;;  %8878 = vmatpush.bf16.msrb.mxu0 %v20939_v40  ;;  %v20956_v39 = vld [vmem:[#allocation192_spill] sm:$0xff] }
 0x98d   : > { %8897 = vmatpush.bf16.msrb.mxu1 %v20940_v27  ;;  %8916 = vmatpush.bf16.msrb.mxu2 %v20941_v36  ;;  %v20960_v36 = vld [vmem:[#allocation196_spill] sm:$0xff] }
 0x98e   : > { %v8461_v42 = vadd.f32 %v8460_v51, %v8442_v5  ;;  %8841 = vmatmul.bf16.vlgmr.msra.gmra.mxu2 %v18794_v55  ;;  %8860 = vmatmul.bf16.vlgmr.msra.gmra.mxu3 %v18796_v12  ;;  %v20957_v51 = vld [vmem:[#allocation193_spill] sm:$0xff] }
 0x98f   : > { %8935 = vmatpush.bf16.msrb.mxu3 %v20942_v15  ;;  %v20961_v15 = vld [vmem:[#allocation197_spill] sm:$0xff] }
 0x990   : > { %v8490_v22 = vmax.f32 %v8461_v42, 0.0  ;;  %8947 = vmatpush.bf16.msra.mxu0 %v18895_v47  ;;  %v8502_v62 = vpop.f32.mrf.mxu0  ;;  %v20958_v42 = vld [vmem:[#allocation194_spill] sm:$0xff] }
 0x991   : > { %8966 = vmatpush.bf16.msra.mxu1 %v20943_v50  ;;  %v8521_v44 = vpop.f32.mrf.mxu1  ;;  %8985 = vmatpush.bf16.msra.mxu2 %v20944_v52  ;;  %v8557_v34 = vpop.f32.mrf.mxu3  ;;  %v8503_v47 = vadd.f32 %v8502_v62, %v18856_v23  ;;  %v20962_v62 = vld [vmem:[#allocation198_spill] sm:$0xff] }
 0x992   : > { %9078 = vst.msk [vmem:[%s19023_s27 + $0xd8] sm:$0xff] %vm2047_vm0, %v8490_v22 }
 0x993   : > { %9004 = vmatpush.bf16.msra.mxu3 %v20945_v54  ;;  %v8538_v30 = vpop.f32.mrf.mxu2  ;;  %v8522_v25 = vadd.f32 %v8521_v44, %v8503_v47  ;;  %v20963_v44 = vld [vmem:[#allocation199_spill] sm:$0xff]  ;;  %v20964_v54 = vld [vmem:[#allocation200_spill] sm:$0xff] }
 0x994   : > { %v8539_v14 = vadd.f32 %v8538_v30, %v8520_v18  ;;  %8948 = vmatpush.bf16.msra.mxu0 %v20946_v19  ;;  %v20965_v30 = vld [vmem:[#allocation201_spill] sm:$0xff]  ;;  %v20967_v47 = vld [vmem:[#allocation203_spill] sm:$0xff] }
 0x995   : > { %8967 = vmatpush.bf16.msra.mxu1 %v20947_v3  ;;  %8986 = vmatpush.bf16.msra.mxu2 %v20948_v48  ;;  %v20966_v3 = vld [vmem:[#allocation202_spill] sm:$0xff] }
 0x996   : > { %v8558_v59 = vadd.f32 %v8557_v34, %v8539_v14 }
 0x997   : > { %9005 = vmatpush.bf16.msra.mxu3 %v20949_v4 }
 0x998   : > { %v9023_v10 = vmax.f32 %v8558_v59, 0.0  ;;  %8949 = vmatpush.bf16.msra.mxu0 %v20950_v43  ;;  %v8505_v37 = vpop.f32.mrf.mxu0 }
 0x999   : > { %8968 = vmatpush.bf16.msra.mxu1 %v20951_v9  ;;  %v8524_v11 = vpop.f32.mrf.mxu1  ;;  %8987 = vmatpush.bf16.msra.mxu2 %v20952_v24  ;;  %v8559_v61 = vpop.f32.mrf.mxu3  ;;  %v8506_v16 = vadd.f32 %v8505_v37, %v18856_v23 }
 0x99a   : > { %9079 = vst [vmem:[%s19023_s27 + $0xe0] sm:$0xff] %v9023_v10 }
 0x99b   : > { %9006 = vmatpush.bf16.msra.mxu3 %v20953_v60  ;;  %v8540_v41 = vpop.f32.mrf.mxu2  ;;  %8808 = vmatmul.bf16.gmra.mxu0 %v20825_v46  ;;  %v8525_v5 = vadd.f32 %v8524_v11, %v8506_v16 }
 0x99c   : > { %v8541_v57 = vadd.f32 %v8540_v41, %v8522_v25  ;;  %8827 = vmatmul.bf16.gmra.mxu1 %v20826_v32  ;;  %8950 = vmatpush.bf16.msra.mxu0 %v20954_v31 }
 0x99d   : > { %8969 = vmatpush.bf16.msra.mxu1 %v20955_v13  ;;  %8988 = vmatpush.bf16.msra.mxu2 %v20956_v39 }
 0x99e   : > { %v8560_v7 = vadd.f32 %v8559_v61, %v8541_v57  ;;  %8846 = vmatmul.bf16.gmra.mxu2 %v18965_v35  ;;  %8865 = vmatmul.bf16.gmra.mxu3 %v18967_v38 }
 0x99f   : > { %9007 = vmatpush.bf16.msra.mxu3 %v20957_v51 }
 0x9a0   : > { %v9030_v26 = vmax.f32 %v8560_v7, 0.0  ;;  %v8507_v6 = vpop.f32.mrf.mxu0  ;;  %8951 = vmatpush.bf16.msra.mxu0 %v20958_v42 }
 0x9a1   : > { %v8526_v28 = vpop.f32.mrf.mxu1  ;;  %8970 = vmatpush.bf16.msra.mxu1 %v20959_v33  ;;  %v8562_v27 = vpop.f32.mrf.mxu3  ;;  %8989 = vmatpush.bf16.msra.mxu2 %v20960_v36  ;;  %v8508_v50 = vadd.f32 %v8507_v6, %v18856_v23 }
 0x9a2   : > { %9086 = vst [vmem:[%s19023_s27 + $0x118] sm:$0xff] %v9030_v26 }
 0x9a3   : > { %v8543_v40 = vpop.f32.mrf.mxu2  ;;  %9008 = vmatpush.bf16.msra.mxu3 %v20961_v15  ;;  %v8527_v34 = vadd.f32 %v8526_v28, %v8508_v50 }
 0x9a4   : > { %v8544_v22 = vadd.f32 %v8543_v40, %v8525_v5  ;;  %8952 = vmatpush.bf16.msra.mxu0 %v20962_v62 }
 0x9a5   : > { %8971 = vmatpush.bf16.msra.mxu1 %v20963_v44  ;;  %8990 = vmatpush.bf16.msra.mxu2 %v20964_v54 }
 0x9a6   : > { %v8563_v18 = vadd.f32 %v8562_v27, %v8544_v22 }
 0x9a7   : > { %9009 = vmatpush.bf16.msra.mxu3 %v20965_v30 }
 0x9a8   : > { %v9037_v52 = vmax.f32 %v8563_v18, 0.0  ;;  %v8576_v14 = vpop.f32.mrf.mxu0  ;;  %8953 = vmatpush.bf16.msra.mxu0 %v20966_v3 }
 0x9a9   : > { %v8595_v19 = vpop.f32.mrf.mxu1  ;;  %8972 = vmatpush.bf16.msra.mxu1 %v20967_v47  ;;  %v8564_v23 = vpop.f32.mrf.mxu3  ;;  %8991 = vmatpush.bf16.msra.mxu2 %v19159_v20  ;;  %v8577_v10 = vadd.f32 %v8576_v14, %v19170_v21 }
 0x9aa   : > { %9093 = vst [vmem:[%s19023_s27 + $0x150] sm:$0xff] %v9037_v52 }
 0x9ab   : > { %v8545_v59 = vpop.f32.mrf.mxu2  ;;  %9010 = vmatpush.bf16.msra.mxu3 %v19161_v49  ;;  %8879 = vmatmul.bf16.vlgmr.msrb.gmra.mxu0 %v18479_v45  ;;  %v8596_v20 = vadd.f32 %v8595_v19, %v8577_v10 }
 0x9ac   : > { %v8546_v48 = vadd.f32 %v8545_v59, %v8527_v34  ;;  %8898 = vmatmul.bf16.vlgmr.msrb.gmra.mxu1 %v18481_v29  ;;  %8954 = vmatpush.bf16.msra.mxu0 %v19181_v8 }
 0x9ad   : > { %8973 = vmatpush.bf16.msra.mxu1 %v19183_v0  ;;  %8992 = vmatpush.bf16.msra.mxu2 %v19199_v63 }
 0x9ae   : > { %v8565_v4 = vadd.f32 %v8564_v23, %v8546_v48  ;;  %8917 = vmatmul.bf16.vlgmr.msrb.gmra.mxu2 %v18794_v55  ;;  %8936 = vmatmul.bf16.vlgmr.msrb.gmra.mxu3 %v18796_v12 }
 0x9af   : > { %9011 = vmatpush.bf16.msra.mxu3 %v19201_v58 }
 0x9b0   : > { %v9044_v43 = vmax.f32 %v8565_v4, 0.0  ;;  %v8578_v49 = vpop.f32.mrf.mxu0 }
 0x9b1   : > { %v8597_v9 = vpop.f32.mrf.mxu1  ;;  %v8633_v37 = vpop.f32.mrf.mxu3  ;;  %v8579_v8 = vadd.f32 %v8578_v49, %v19170_v21 }
 0x9b2   : > { %9100 = vst [vmem:[%s19023_s27 + $0x188] sm:$0xff] %v9044_v43 }
 0x9b3   : > { %v8614_v25 = vpop.f32.mrf.mxu2  ;;  %v8598_v60 = vadd.f32 %v8597_v9, %v8579_v8 }
 0x9b4   : > { %v8615_v11 = vadd.f32 %v8614_v25, %v8596_v20 }
 0x9b6   : > { %v8634_v0 = vadd.f32 %v8633_v37, %v8615_v11 }
 0x9b8   : > { %v9024_v24 = vmax.f32 %v8634_v0, 0.0  ;;  %v8581_v41 = vpop.f32.mrf.mxu0 }
 0x9b9   : > { %v8600_v61 = vpop.f32.mrf.mxu1  ;;  %v8635_v63 = vpop.f32.mrf.mxu3  ;;  %v8582_v58 = vadd.f32 %v8581_v41, %v19170_v21 }
 0x9ba   : > { %9080 = vst [vmem:[%s19023_s27 + $0xe8] sm:$0xff] %v9024_v24 }
 0x9bb   : > { %v8616_v57 = vpop.f32.mrf.mxu2  ;;  %8884 = vmatmul.bf16.gmra.mxu0 %v20825_v46  ;;  %v8601_v13 = vadd.f32 %v8600_v61, %v8582_v58 }
 0x9bc   : > { %v8617_v16 = vadd.f32 %v8616_v57, %v8598_v60  ;;  %8903 = vmatmul.bf16.gmra.mxu1 %v20826_v32 }
 0x9be   : > { %v8636_v7 = vadd.f32 %v8635_v63, %v8617_v16  ;;  %8922 = vmatmul.bf16.gmra.mxu2 %v18965_v35  ;;  %8941 = vmatmul.bf16.gmra.mxu3 %v18967_v38 }
 0x9c0   : > { %v9031_v31 = vmax.f32 %v8636_v7, 0.0  ;;  %v8583_v26 = vpop.f32.mrf.mxu0 }
 0x9c1   : > { %v8602_v39 = vpop.f32.mrf.mxu1  ;;  %v8638_v5 = vpop.f32.mrf.mxu3  ;;  %v8584_v28 = vadd.f32 %v8583_v26, %v19170_v21 }
 0x9c2   : > { %9087 = vst [vmem:[%s19023_s27 + $0x120] sm:$0xff] %v9031_v31 }
 0x9c3   : > { %v8619_v51 = vpop.f32.mrf.mxu2  ;;  %v8603_v40 = vadd.f32 %v8602_v39, %v8584_v28 }
 0x9c4   : > { %v8620_v6 = vadd.f32 %v8619_v51, %v8601_v13 }
 0x9c6   : > { %v8639_v42 = vadd.f32 %v8638_v5, %v8620_v6 }
 0x9c8   : > { %v9038_v33 = vmax.f32 %v8639_v42, 0.0  ;;  %v8652_v27 = vpop.f32.mrf.mxu0 }
 0x9c9   : > { %v8671_v22 = vpop.f32.mrf.mxu1  ;;  %v8640_v15 = vpop.f32.mrf.mxu3  ;;  %v8653_v62 = vadd.f32 %v8652_v27, %v19248_v53 }
 0x9ca   : > { %9094 = vst [vmem:[%s19023_s27 + $0x158] sm:$0xff] %v9038_v33 }
 0x9cb   : > { %v8621_v36 = vpop.f32.mrf.mxu2  ;;  %8955 = vmatmul.bf16.vlgmr.msra.gmra.mxu0 %v18479_v45  ;;  %v8672_v44 = vadd.f32 %v8671_v22, %v8653_v62 }
 0x9cc   : > { %v8622_v50 = vadd.f32 %v8621_v36, %v8603_v40  ;;  %8974 = vmatmul.bf16.vlgmr.msra.gmra.mxu1 %v18481_v29 }
 0x9ce   : > { %v8641_v18 = vadd.f32 %v8640_v15, %v8622_v50  ;;  %8993 = vmatmul.bf16.vlgmr.msra.gmra.mxu2 %v18794_v55  ;;  %9012 = vmatmul.bf16.vlgmr.msra.gmra.mxu3 %v18796_v12 }
 0x9d0   : > { %v9045_v21 = vmax.f32 %v8641_v18, 0.0  ;;  %v8654_v52 = vpop.f32.mrf.mxu0 }
 0x9d1   : > { %v8673_v54 = vpop.f32.mrf.mxu1  ;;  %v8709_v34 = vpop.f32.mrf.mxu3  ;;  %v8655_v45 = vadd.f32 %v8654_v52, %v19248_v53 }
 0x9d2   : > { %9101 = vst [vmem:[%s19023_s27 + $0x190] sm:$0xff] %v9045_v21 }
 0x9d3   : > { %v8690_v30 = vpop.f32.mrf.mxu2  ;;  %v8674_v3 = vadd.f32 %v8673_v54, %v8655_v45 }
 0x9d4   : > { %v8691_v14 = vadd.f32 %v8690_v30, %v8672_v44 }
 0x9d6   : > { %v8710_v19 = vadd.f32 %v8709_v34, %v8691_v14 }
 0x9d8   : > { %v9025_v29 = vmax.f32 %v8710_v19, 0.0  ;;  %v8657_v47 = vpop.f32.mrf.mxu0 }
 0x9d9   : > { %v8676_v59 = vpop.f32.mrf.mxu1  ;;  %v8711_v23 = vpop.f32.mrf.mxu3  ;;  %v8658_v48 = vadd.f32 %v8657_v47, %v19248_v53 }
 0x9da   : > { %9081 = vst [vmem:[%s19023_s27 + $0xf0] sm:$0xff] %v9025_v29 }
 0x9db   : > { %v8692_v55 = vpop.f32.mrf.mxu2  ;;  %8960 = vmatmul.bf16.gmra.mxu0 %v20825_v46  ;;  %v8677_v43 = vadd.f32 %v8676_v59, %v8658_v48 }
 0x9dc   : > { %v8693_v12 = vadd.f32 %v8692_v55, %v8674_v3  ;;  %8979 = vmatmul.bf16.gmra.mxu1 %v20826_v32 }
 0x9de   : > { %v8712_v4 = vadd.f32 %v8711_v23, %v8693_v12  ;;  %8998 = vmatmul.bf16.gmra.mxu2 %v18965_v35  ;;  %9017 = vmatmul.bf16.gmra.mxu3 %v18967_v38 }
 0x9e0   : > { %v9032_v10 = vmax.f32 %v8712_v4, 0.0  ;;  %v8659_v20 = vpop.f32.mrf.mxu0 }
 0x9e1   : > { %v8678_v49 = vpop.f32.mrf.mxu1  ;;  %v8714_v25 = vpop.f32.mrf.mxu3  ;;  %v8660_v46 = vadd.f32 %v8659_v20, %v19248_v53 }
 0x9e2   : > { %9088 = vst [vmem:[%s19023_s27 + $0x128] sm:$0xff] %v9032_v10 }
 0x9e3   : > { %v8695_v9 = vpop.f32.mrf.mxu2  ;;  %v8679_v8 = vadd.f32 %v8678_v49, %v8660_v46 }
 0x9e4   : > { %v8696_v37 = vadd.f32 %v8695_v9, %v8677_v43 }
 0x9e6   : > { %v8715_v32 = vadd.f32 %v8714_v25, %v8696_v37 }
 0x9e8   : > { %v9039_v11 = vmax.f32 %v8715_v32, 0.0  ;;  %v8728_v0 = vpop.f32.mrf.mxu0 }
 0x9e9   : > { %v8747_v24 = vpop.f32.mrf.mxu1  ;;  %v8716_v60 = vpop.f32.mrf.mxu3  ;;  %v8729_v61 = vadd.f32 %v8728_v0, %v19299_v2 }
 0x9ea   : > { %9095 = vst [vmem:[%s19023_s27 + $0x160] sm:$0xff] %v9039_v11 }
 0x9eb   : > { %v8697_v35 = vpop.f32.mrf.mxu2  ;;  %v8748_v63 = vadd.f32 %v8747_v24, %v8729_v61 }
 0x9ec   : > { %v8698_v38 = vadd.f32 %v8697_v35, %v8679_v8 }
 0x9ee   : > { %v8717_v41 = vadd.f32 %v8716_v60, %v8698_v38 }
 0x9f0   : > { %v9046_v57 = vmax.f32 %v8717_v41, 0.0  ;;  %v8730_v16 = vpop.f32.mrf.mxu0 }
 0x9f1   : > { %v8749_v58 = vpop.f32.mrf.mxu1  ;;  %v8785_v53 = vpop.f32.mrf.mxu3  ;;  %v8731_v13 = vadd.f32 %v8730_v16, %v19299_v2 }
 0x9f2   : > { %9102 = vst [vmem:[%s19023_s27 + $0x198] sm:$0xff] %v9046_v57 }
 0x9f3   : > { %v8766_v7 = vpop.f32.mrf.mxu2  ;;  %v8750_v51 = vadd.f32 %v8749_v58, %v8731_v13 }
 0x9f4   : > { %v8767_v31 = vadd.f32 %v8766_v7, %v8748_v63 }
 0x9f6   : > { %v8786_v26 = vadd.f32 %v8785_v53, %v8767_v31 }
 0x9f8   : > { %v9026_v39 = vmax.f32 %v8786_v26, 0.0  ;;  %v8733_v5 = vpop.f32.mrf.mxu0 }
 0x9f9   : > { %v8752_v6 = vpop.f32.mrf.mxu1  ;;  %v8787_v42 = vpop.f32.mrf.mxu3  ;;  %v8734_v40 = vadd.f32 %v8733_v5, %v19299_v2 }
 0x9fa   : > { %9082 = vst [vmem:[%s19023_s27 + $0xf8] sm:$0xff] %v9026_v39 }
 0x9fb   : > { %v8768_v28 = vpop.f32.mrf.mxu2  ;;  %v8753_v36 = vadd.f32 %v8752_v6, %v8734_v40 }
 0x9fc   : > { %v8769_v33 = vadd.f32 %v8768_v28, %v8750_v51 }
 0x9fe   : > { %v8788_v27 = vadd.f32 %v8787_v42, %v8769_v33 }
 0xa00   : > { %v9033_v22 = vmax.f32 %v8788_v27, 0.0  ;;  %v8735_v15 = vpop.f32.mrf.mxu0 }
 0xa01   : > { %v8754_v50 = vpop.f32.mrf.mxu1  ;;  %v8790_v62 = vpop.f32.mrf.mxu3  ;;  %v8736_v44 = vadd.f32 %v8735_v15, %v19299_v2 }
 0xa02   : > { %9089 = vst [vmem:[%s19023_s27 + $0x130] sm:$0xff] %v9033_v22 }
 0xa03   : > { %v8771_v18 = vpop.f32.mrf.mxu2  ;;  %v8755_v30 = vadd.f32 %v8754_v50, %v8736_v44 }
 0xa04   : > { %v8772_v21 = vadd.f32 %v8771_v18, %v8753_v36 }
 0xa06   : > { %v8791_v52 = vadd.f32 %v8790_v62, %v8772_v21 }
 0xa08   : > { %v9040_v54 = vmax.f32 %v8791_v52, 0.0  ;;  %v8804_v34 = vpop.f32.mrf.mxu0 }
 0xa09   : > { %v8823_v14 = vpop.f32.mrf.mxu1  ;;  %v8792_v19 = vpop.f32.mrf.mxu3  ;;  %v8805_v47 = vadd.f32 %v8804_v34, %v19350_v56 }
 0xa0a   : > { %9096 = vst [vmem:[%s19023_s27 + $0x168] sm:$0xff] %v9040_v54 }
 0xa0b   : > { %v8773_v45 = vpop.f32.mrf.mxu2  ;;  %v8824_v55 = vadd.f32 %v8823_v14, %v8805_v47 }
 0xa0c   : > { %v8774_v29 = vadd.f32 %v8773_v45, %v8755_v30 }
 0xa0e   : > { %v8793_v3 = vadd.f32 %v8792_v19, %v8774_v29 }
 0xa10   : > { %v9047_v59 = vmax.f32 %v8793_v3, 0.0  ;;  %v8806_v23 = vpop.f32.mrf.mxu0 }
 0xa11   : > { %v8825_v12 = vpop.f32.mrf.mxu1  ;;  %v8861_v2 = vpop.f32.mrf.mxu3  ;;  %v8807_v10 = vadd.f32 %v8806_v23, %v19350_v56 }
 0xa12   : > { %9103 = vst [vmem:[%s19023_s27 + $0x1a0] sm:$0xff] %v9047_v59 }
 0xa13   : > { %v8842_v48 = vpop.f32.mrf.mxu2  ;;  %v8826_v49 = vadd.f32 %v8825_v12, %v8807_v10 }
 0xa14   : > { %v8843_v4 = vadd.f32 %v8842_v48, %v8824_v55 }
 0xa16   : > { %v8862_v43 = vadd.f32 %v8861_v2, %v8843_v4 }
 0xa18   : > { %v9027_v20 = vmax.f32 %v8862_v43, 0.0  ;;  %v8809_v9 = vpop.f32.mrf.mxu0 }
 0xa19   : > { %v8828_v25 = vpop.f32.mrf.mxu1  ;;  %v8863_v46 = vpop.f32.mrf.mxu3  ;;  %v8810_v11 = vadd.f32 %v8809_v9, %v19350_v56 }
 0xa1a   : > { %9083 = vst [vmem:[%s19023_s27 + $0x100] sm:$0xff] %v9027_v20 }
 0xa1b   : > { %v8844_v37 = vpop.f32.mrf.mxu2  ;;  %v8829_v24 = vadd.f32 %v8828_v25, %v8810_v11 }
 0xa1c   : > { %v8845_v32 = vadd.f32 %v8844_v37, %v8826_v49 }
 0xa1e   : > { %v8864_v8 = vadd.f32 %v8863_v46, %v8845_v32 }
 0xa20   : > { %v9034_v0 = vmax.f32 %v8864_v8, 0.0  ;;  %v8811_v35 = vpop.f32.mrf.mxu0 }
 0xa21   : > { %v8830_v60 = vpop.f32.mrf.mxu1  ;;  %v8866_v41 = vpop.f32.mrf.mxu3  ;;  %v8812_v57 = vadd.f32 %v8811_v35, %v19350_v56 }
 0xa22   : > { %9090 = vst [vmem:[%s19023_s27 + $0x138] sm:$0xff] %v9034_v0 }
 0xa23   : > { %v8847_v38 = vpop.f32.mrf.mxu2  ;;  %v8831_v58 = vadd.f32 %v8830_v60, %v8812_v57 }
 0xa24   : > { %v8848_v61 = vadd.f32 %v8847_v38, %v8829_v24 }
 0xa26   : > { %v8867_v63 = vadd.f32 %v8866_v41, %v8848_v61 }
 0xa28   : > { %v9041_v16 = vmax.f32 %v8867_v63, 0.0  ;;  %v8880_v7 = vpop.f32.mrf.mxu0 }
 0xa29   : > { %v8899_v53 = vpop.f32.mrf.mxu1  ;;  %v8868_v13 = vpop.f32.mrf.mxu3  ;;  %v8881_v51 = vadd.f32 %v8880_v7, %v19406_v17 }
 0xa2a   : > { %9097 = vst [vmem:[%s19023_s27 + $0x170] sm:$0xff] %v9041_v16 }
 0xa2b   : > { %v8849_v31 = vpop.f32.mrf.mxu2  ;;  %v8900_v6 = vadd.f32 %v8899_v53, %v8881_v51 }
 0xa2c   : > { %v8850_v26 = vadd.f32 %v8849_v31, %v8831_v58 }
 0xa2e   : > { %v8869_v39 = vadd.f32 %v8868_v13, %v8850_v26 }
 0xa30   : > { %v9048_v5 = vmax.f32 %v8869_v39, 0.0  ;;  %v8882_v28 = vpop.f32.mrf.mxu0 }
 0xa31   : > { %v8901_v42 = vpop.f32.mrf.mxu1  ;;  %v8937_v56 = vpop.f32.mrf.mxu3  ;;  %v8883_v27 = vadd.f32 %v8882_v28, %v19406_v17 }
 0xa32   : > { %9104 = vst [vmem:[%s19023_s27 + $0x1a8] sm:$0xff] %v9048_v5 }
 0xa33   : > { %v8918_v33 = vpop.f32.mrf.mxu2  ;;  %v8902_v15 = vadd.f32 %v8901_v42, %v8883_v27 }
 0xa34   : > { %v8919_v40 = vadd.f32 %v8918_v33, %v8900_v6 }
 0xa36   : > { %v8938_v22 = vadd.f32 %v8937_v56, %v8919_v40 }
 0xa38   : > { %v9028_v36 = vmax.f32 %v8938_v22, 0.0  ;;  %v8885_v50 = vpop.f32.mrf.mxu0 }
 0xa39   : > { %v8904_v18 = vpop.f32.mrf.mxu1  ;;  %v8939_v21 = vpop.f32.mrf.mxu3  ;;  %v8886_v52 = vadd.f32 %v8885_v50, %v19406_v17 }
 0xa3a   : > { %9084 = vst [vmem:[%s19023_s27 + $0x108] sm:$0xff] %v9028_v36 }
 0xa3b   : > { %v8920_v62 = vpop.f32.mrf.mxu2  ;;  %v8905_v34 = vadd.f32 %v8904_v18, %v8886_v52 }
 0xa3c   : > { %v8921_v44 = vadd.f32 %v8920_v62, %v8902_v15 }
 0xa3e   : > { %v8940_v54 = vadd.f32 %v8939_v21, %v8921_v44 }
 0xa40   : > { %v9035_v30 = vmax.f32 %v8940_v54, 0.0  ;;  %v8887_v14 = vpop.f32.mrf.mxu0 }
 0xa41   : > { %v8906_v45 = vpop.f32.mrf.mxu1  ;;  %v8942_v29 = vpop.f32.mrf.mxu3  ;;  %v8888_v47 = vadd.f32 %v8887_v14, %v19406_v17 }
 0xa42   : > { %9091 = vst [vmem:[%s19023_s27 + $0x140] sm:$0xff] %v9035_v30 }
 0xa43   : > { %v8923_v19 = vpop.f32.mrf.mxu2  ;;  %v8907_v23 = vadd.f32 %v8906_v45, %v8888_v47 }
 0xa44   : > { %v8924_v3 = vadd.f32 %v8923_v19, %v8905_v34 }
 0xa46   : > { %v8943_v59 = vadd.f32 %v8942_v29, %v8924_v3 }
 0xa48   : > { %v9042_v55 = vmax.f32 %v8943_v59, 0.0  ;;  %v8956_v12 = vpop.f32.mrf.mxu0 }
 0xa49   : > { %v8975_v48 = vpop.f32.mrf.mxu1  ;;  %v8944_v4 = vpop.f32.mrf.mxu3  ;;  %v8957_v20 = vadd.f32 %v8956_v12, %v19457_v1 }
 0xa4a   : > { %9098 = vst [vmem:[%s19023_s27 + $0x178] sm:$0xff] %v9042_v55 }
 0xa4b   : > { %v8925_v2 = vpop.f32.mrf.mxu2  ;;  %v8976_v9 = vadd.f32 %v8975_v48, %v8957_v20 }
 0xa4c   : > { %v8926_v10 = vadd.f32 %v8925_v2, %v8907_v23 }
 0xa4e   : > { %v8945_v43 = vadd.f32 %v8944_v4, %v8926_v10 }
 0xa50   : > { %v9049_v49 = vmax.f32 %v8945_v43, 0.0  ;;  %v8958_v25 = vpop.f32.mrf.mxu0 }
 0xa51   : > { %v9013_v46 = vpop.f32.mrf.mxu3  ;;  %v8977_v32 = vpop.f32.mrf.mxu1  ;;  %v8959_v11 = vadd.f32 %v8958_v25, %v19457_v1 }
 0xa52   : > { %9105 = vst [vmem:[%s19023_s27 + $0x1b0] sm:$0xff] %v9049_v49 }
 0xa53   : > { %v8994_v37 = vpop.f32.mrf.mxu2  ;;  %v8978_v24 = vadd.f32 %v8977_v32, %v8959_v11 }
 0xa54   : > { %v8995_v17 = vadd.f32 %v8994_v37, %v8976_v9 }
 0xa56   : > { %v9014_v8 = vadd.f32 %v9013_v46, %v8995_v17 }
 0xa58   : > { %v9029_v0 = vmax.f32 %v9014_v8, 0.0  ;;  %v8961_v35 = vpop.f32.mrf.mxu0 }
 0xa59   : > { %v9015_v38 = vpop.f32.mrf.mxu3  ;;  %v8962_v61 = vadd.f32 %v8961_v35, %v19457_v1  ;;  %v8980_v63 = vpop.f32.mrf.mxu1 }
 0xa5a   : > { %9085 = vst.msk [vmem:[%s19023_s27 + $0x110] sm:$0xff] %vm2047_vm0, %v9029_v0 }
 0xa5b   : > { %v8996_v60 = vpop.f32.mrf.mxu2  ;;  %v8981_v58 = vadd.f32 %v8980_v63, %v8962_v61 }
 0xa5c   : > { %v8997_v41 = vadd.f32 %v8996_v60, %v8978_v24 }
 0xa5e   : > { %v9016_v57 = vadd.f32 %v9015_v38, %v8997_v41 }
 0xa60   : > { %v9036_v16 = vmax.f32 %v9016_v57, 0.0  ;;  %v8963_v7 = vpop.f32.mrf.mxu0 }
 0xa61   : > { %v9018_v31 = vpop.f32.mrf.mxu3  ;;  %v8964_v26 = vadd.f32 %v8963_v7, %v19457_v1  ;;  %v8982_v5 = vpop.f32.mrf.mxu1 }
 0xa62   : > { %9092 = vst.msk [vmem:[%s19023_s27 + $0x148] sm:$0xff] %vm2047_vm0, %v9036_v16 }
 0xa63   : > { %v8999_v53 = vpop.f32.mrf.mxu2  ;;  %v8983_v6 = vadd.f32 %v8982_v5, %v8964_v26 }
 0xa64   : > { %v9000_v13 = vadd.f32 %v8999_v53, %v8981_v58 }
 0xa66   : > { %v9019_v39 = vadd.f32 %v9018_v31, %v9000_v13 }
 0xa68   : > { %v9043_v51 = vmax.f32 %v9019_v39, 0.0 }
 0xa69   : > { %v9020_v33 = vpop.f32.mrf.mxu3 }
 0xa6a   : > { %9099 = vst.msk [vmem:[%s19023_s27 + $0x180] sm:$0xff] %vm2047_vm0, %v9043_v51 }
 0xa6b   : > { %v9001_v28 = vpop.f32.mrf.mxu2 }
 0xa6c   : > { %v9002_v42 = vadd.f32 %v9001_v28, %v8983_v6 }
 0xa6e   : > { %v9021_v56 = vadd.f32 %v9020_v33, %v9002_v42  ;;  %9114 = sbr.rel (!%p12655_p5) target bundleno = 2713 (0xa99), region = 124 }
 0xa70   : > { %v9050_v40 = vmax.f32 %v9021_v56, 0.0 }
 0xa72   : > { %9106 = vst.msk [vmem:[%s19023_s27 + $0x1b8] sm:$0xff] %vm2047_vm0, %v9050_v40 }
 0xa73   : > { %s20981_s0 = smov (!%p9117_p11, %s9116_s0), 8 }
 0xa74   : > { %s11730_s6 = smul.u32 56, %s20981_s0 }
 0xa76   : > { %s9121_s30 = ssub.s32 448, %s11730_s6 }
 0xa77   : > { %s9122_s3 = sshll.u32 %s9121_s30, 4 }
 0xa78   : > { %9123 = vsyncadd %s19638_s29, %s9122_s3  ;;  %s20969_s7 = sld [smem:[#allocation8_spill]]  ;;  %p19644_p12 = scmp.ne.s32.totalorder %s11730_s6, 0 }
 0xa79   : > { %s9129_s5 = sshll.u32 %s19023_s27, 4  ;;  %s19650_s4 = smul.u32 896, %s20981_s0  ;;  %s19655_s5 = int_to_ptr.vmem [resolvable:$true] %s9129_s5 }
 0xa7a   : > { %s20971_s8 = sld [smem:[#allocation218_spill]]  ;;  %s12409_s6 = sshra.s32 %s19655_s5, 4  ;;  %s12410_s6 = int_to_ptr.vmem [resolvable:$true] %s12409_s6 }
 0xa7b   : > { %s12411_s3 = sshrl.u32 %s19650_s4, 4  ;;  %s12484_s10 = smov [#allocation2]  }
 0xa7c   : > { %s12414_s27 = sadd.s32 1, %s12411_s3 }
 0xa7e   : > { %s12367_s26 = smul.u32 448, %s20969_s7  ;;  %s12447_s7 = sshll.u32 %s12411_s3, 4 }
 0xa7f   : > { %p12413_p13 = scmp.ne.s32.totalorder %s12447_s7, %s19650_s4 }
 0xa80   : > { %s9127_s11 = scalar_lea.hbm %s20971_s8, %s12367_s26  ;;  %s12420_s26 = scalar_lea.vmem %s12484_s10, 896 }
 0xa81   : > { %s9131_s30 = sshll.u32 %s9127_s11, 4  ;;  %s20983_s27 = smov (!%p12413_p13, %s12414_s27), %s12411_s3  ;;  %s19657_s30 = int_to_ptr.hbm [resolvable:$true] %s9131_s30 }
 0xa82   : > { %s12416_s0 = scalar_lea.vmem %s12410_s6, %s20983_s27 }
 0xa83   : > { %p12417_p0 = scmp.ne.s32.totalorder %s12410_s6, %s12416_s0  ;;  %p12422_p3 = scmp.lt.s32.totalorder %s12420_s26, %s12416_s0 }
 0xa85   : > { %p12418_p1 = pnand %p12417_p0, %p19644_p12 }
 0xa87   : > { %p12419_p2 = pneg %p12418_p1 }
 0xa89   : > { %p12424_p4 = pnand %p12422_p3, %p12419_p2 }
 0xa8b   : > { %12427 = shalt.err (!%p12424_p4)
}
 0xa8c   : > { %s12428_s11 = sshra.s32 %s19657_s30, 4  ;;  %s12439_s6 = scalar_lea.hbm %s20971_s8, 728  ;;  %s12429_s11 = int_to_ptr.hbm [resolvable:$true] %s12428_s11 }
 0xa8d   : > { %s12435_s9 = scalar_lea.hbm %s12429_s11, %s20983_s27  ;;  %p12440_p9 = scmp.lt.s32.totalorder %s12429_s11, %s20971_s8 }
 0xa8e   : > { %p12436_p5 = scmp.ne.s32.totalorder %s12429_s11, %s12435_s9  ;;  %p12441_p10 = scmp.lt.s32.totalorder %s12439_s6, %s12435_s9 }
 0xa90   : > { %p12437_p7 = pnand %p12436_p5, %p19644_p12  ;;  %p12442_p11 = por %p12441_p10, %p12440_p9 }
 0xa92   : > { %p12438_p8 = pneg %p12437_p7 }
 0xa94   : > { %p12443_p13 = pnand %p12442_p11, %p12438_p8 }
 0xa96   : > { %12446 = shalt.err (!%p12443_p13)
}
 0xa97   : > { %s12485_s0 = smov 896   ;;  %s12486_s27 = smov 56  }
 0xa98   : > { %9137 = dma.vmem_to_hbm [thread:$0]  (%p19644_p12), %s19655_s5, %s19650_s4, %s19657_s30, %s19638_s29, %s12485_s0, %s12485_s0, %s12486_s27  }
 0xa99 PF: > { %s20972_s10 = sld [smem:[#allocation7_spill]] }
 0xa9a   : > { %s20973_s26 = sld [smem:[#allocation5_spill]] }
 0xa9f   : > { %p12373_p0 = scmp.ge.s32.totalorder %s20972_s10, 2 }
 0xaa0   : > { %s9146_s12 = sand.u32 1, %s20973_s26  }
 0xaa1   : > { %p12370_p1 = pnand %p12373_p0, %p12659_p6  ;;  %s9147_s13 = scalar_lea.sflag [#allocation3], %s9146_s12 }
 0xaa3   : > { %p12371_p2 = pneg %p12370_p1 }
 0xaa5   : > { %12465 = dma.done.wait (%p12371_p2), %s9147_s13, 7168  }
 0xaa6   : > { %12467 = vsyncadd (%p12371_p2), %s9147_s13, 4294960128  ;;  %s20975_s30 = sld [smem:[#allocation9_spill]]  ;;  %s20978_s29 = smov %s12474_s2 }
 0xaa7   : > { %s20976_s11 = sld [smem:[#allocation6_spill]] }
 0xaa8   : > { %s20977_s6 = sld [smem:[#allocation10_spill]] }
 0xaac   : > { %p35_p3 = scmp.ge.s32.totalorder %s20975_s30, 4  }
 0xaad   : > { %s20979_s2 = smov %s20976_s11 }
 0xaae   :  { %37 = sbr.rel (!%p35_p3) target bundleno = 19 (0x13), region = 155 }
 0xab3   :  { %9153 = vsyncpa [#allocation3], 1 }
 0xab4   :  { %9155 = vsyncpa [#allocation3 + $0x1], 1 }

</bundles_post_ra>
